<compile_context>
chip_gen: v5e
topology: v5e:2x2
jax: 0.10.0
libtpu: 0.0.40
codegen_flags: <defaults>
</compile_context>

<pallas_src>
import functools

import numpy as np
import jax
import jax.numpy as jnp
from jax.experimental import pallas as pl
from jax.experimental.pallas import tpu as pltpu


def _round_up(x, m):
    return (x + m - 1) // m * m


# ----------------------------------------------------------------------------
# Pass-1 kernel: tiled matmul (bf16 -> f32 acc) + bias, epilogue is either
# LeakyReLU (no-BN layers) or per-tile column sum / sum-of-squares partials.
# ----------------------------------------------------------------------------
def _conv_mm_kernel(a_ref, b_ref, bias_ref, *rest, normalize, leaky, m_real, tm):
    if normalize:
        y_ref, stats_ref, acc_ref = rest
    else:
        y_ref, acc_ref = rest

    # Read every grid index ONCE, at the top of the body (never inside pl.when:
    # program_id inside a cond-branch jaxpr is not substitutable at lowering).
    i = pl.program_id(0)
    k = pl.program_id(2)
    last_k = pl.num_programs(2) - 1
    row_base = i * tm

    @pl.when(k == 0)
    def _():
        acc_ref[...] = jnp.zeros_like(acc_ref)

    acc_ref[...] += jnp.dot(a_ref[...], b_ref[...],
                            preferred_element_type=jnp.float32)

    @pl.when(k == last_k)
    def _():
        acc = acc_ref[...] + bias_ref[...]              # (TM, TN) f32
        if normalize:
            # Single-pass sum / sum-of-squares over the *valid* rows only
            # (zero-padded rows must not pollute the batch statistics).
            rows = (jax.lax.broadcasted_iota(jnp.int32, acc.shape, 0)
                    + row_base)
            masked = jnp.where(rows < m_real, acc, 0.0)
            s1 = jnp.sum(masked, axis=0, keepdims=True)            # (1, TN)
            s2 = jnp.sum(masked * masked, axis=0, keepdims=True)   # (1, TN)
            # Pack into an (8, TN) tile: row 0 = sum, row 1 = sumsq, rest = 0.
            rid = jax.lax.broadcasted_iota(jnp.int32, (8, s1.shape[1]), 0)
            stats_ref[...] = (jnp.where(rid == 0, s1, 0.0)
                              + jnp.where(rid == 1, s2, 0.0))
            y_ref[...] = acc.astype(y_ref.dtype)                   # pre-BN
        else:
            if leaky:
                acc = jnp.where(acc >= 0.0, acc, 0.2 * acc)        # LeakyReLU
            y_ref[...] = acc.astype(y_ref.dtype)


# ----------------------------------------------------------------------------
# Pass-2 kernel (BN layers): folded affine (scale/shift) + LeakyReLU(0.2).
# ----------------------------------------------------------------------------
def _bn_lrelu_kernel(y_ref, scale_ref, shift_ref, o_ref):
    y = y_ref[...].astype(jnp.float32)
    out = y * scale_ref[...] + shift_ref[...]
    out = jnp.where(out >= 0.0, out, 0.2 * out)
    o_ref[...] = out.astype(o_ref.dtype)


# ----------------------------------------------------------------------------
# Plain-JAX glue: im2col patch extraction (pure data rearrangement)
# ----------------------------------------------------------------------------
def _extract_patches(x_nhwc, ksize, stride, pad):
    n, h, w, c = x_nhwc.shape
    xp = jnp.pad(x_nhwc, ((0, 0), (pad, pad), (pad, pad), (0, 0)))
    oh = (h + 2 * pad - ksize) // stride + 1
    ow = (w + 2 * pad - ksize) // stride + 1
    cols = []
    for kh in range(ksize):
        for kw in range(ksize):
            cols.append(xp[:, kh:kh + stride * oh:stride,
                            kw:kw + stride * ow:stride, :])
    # (N, OH, OW, KH*KW, C) -> (N*OH*OW, KH*KW*C); feature order = (kh, kw, c)
    patches = jnp.stack(cols, axis=3)
    return patches.reshape(n * oh * ow, ksize * ksize * c), (n, oh, ow)


# ----------------------------------------------------------------------------
# One discriminator block: Conv2d(k=4) [+ BN(train)] [+ LeakyReLU(0.2)]
# ----------------------------------------------------------------------------
def _conv_block(x_nhwc, w, b, gamma=None, beta=None, *, stride, pad,
                normalize, leaky, eps=1e-5, out_dtype=jnp.bfloat16):
    cout, cin, kh, kw = w.shape
    a, (n, oh, ow) = _extract_patches(x_nhwc, kh, stride, pad)
    m, kdim = a.shape

    # ---- tile-size selection (chip-agnostic; resident VMEM stays << 32 MiB) ----
    tn = 256 if cout % 256 == 0 else 128
    cout_pad = _round_up(cout, tn)
    tk = 1024 if kdim >= 1024 else _round_up(kdim, 128)
    k_pad = _round_up(kdim, tk)
    tm = 512 if m >= 512 else _round_up(m, 16)
    m_pad = _round_up(m, tm)
    nm, nn, nk = m_pad // tm, cout_pad // tn, k_pad // tk

    # ---- operand prep: bf16 matmul operands, zero-padded to tile multiples ----
    a_p = jnp.pad(a.astype(jnp.bfloat16), ((0, m_pad - m), (0, k_pad - kdim)))
    # (Cout, Cin, KH, KW) -> (KH, KW, Cin, Cout) -> (KH*KW*Cin, Cout)
    bmat = jnp.transpose(w, (2, 3, 1, 0)).reshape(kh * kw * cin, cout)
    b_p = jnp.pad(bmat.astype(jnp.bfloat16),
                  ((0, k_pad - kdim), (0, cout_pad - cout)))
    bias_p = jnp.pad(b.astype(jnp.float32),
                     (0, cout_pad - cout)).reshape(1, cout_pad)

    kernel = functools.partial(_conv_mm_kernel, normalize=normalize,
                               leaky=leaky, m_real=m, tm=tm)

    if normalize:
        out_shape = (jax.ShapeDtypeStruct((m_pad, cout_pad), jnp.bfloat16),
                     jax.ShapeDtypeStruct((nm * 8, cout_pad), jnp.float32))
        out_specs = (pl.BlockSpec((tm, tn), lambda i, j, k: (i, j)),
                     pl.BlockSpec((8, tn), lambda i, j, k: (i, j)))
    else:
        out_shape = jax.ShapeDtypeStruct((m_pad, cout_pad), out_dtype)
        out_specs = pl.BlockSpec((tm, tn), lambda i, j, k: (i, j))

    res = pl.pallas_call(
        kernel,
        out_shape=out_shape,
        grid=(nm, nn, nk),
        in_specs=[
            pl.BlockSpec((tm, tk), lambda i, j, k: (i, k)),   # patch tile
            pl.BlockSpec((tk, tn), lambda i, j, k: (k, j)),   # weight tile
            pl.BlockSpec((1, tn), lambda i, j, k: (0, j)),    # bias
        ],
        out_specs=out_specs,
        scratch_shapes=[pltpu.VMEM((tm, tn), jnp.float32)],
        compiler_params=pltpu.CompilerParams(
            dimension_semantics=("parallel", "parallel", "arbitrary"),
            vmem_limit_bytes=32 * 1024 * 1024),
    )(a_p, b_p, bias_p)

    if normalize:
        y_pad, stats = res
        # Exact full-M (biased, train-mode) batch statistics from per-tile partials.
        st = stats.reshape(nm, 8, cout_pad)
        s1 = jnp.sum(st[:, 0, :], axis=0)
        s2 = jnp.sum(st[:, 1, :], axis=0)
        mean = s1 / m
        var = jnp.maximum(s2 / m - mean * mean, 0.0)
        g = jnp.pad(gamma.astype(jnp.float32), (0, cout_pad - cout))
        bt = jnp.pad(beta.astype(jnp.float32), (0, cout_pad - cout))
        scale = (g * jax.lax.rsqrt(var + eps)).reshape(1, cout_pad)
        shift = (bt - mean * scale[0]).reshape(1, cout_pad)

        y_pad = pl.pallas_call(
            _bn_lrelu_kernel,
            out_shape=jax.ShapeDtypeStruct((m_pad, cout_pad), out_dtype),
            grid=(nm, nn),
            in_specs=[
                pl.BlockSpec((tm, tn), lambda i, j: (i, j)),
                pl.BlockSpec((1, tn), lambda i, j: (0, j)),
                pl.BlockSpec((1, tn), lambda i, j: (0, j)),
            ],
            out_specs=pl.BlockSpec((tm, tn), lambda i, j: (i, j)),
            compiler_params=pltpu.CompilerParams(
                dimension_semantics=("parallel", "parallel"),
                vmem_limit_bytes=32 * 1024 * 1024),
        )(y_pad, scale, shift)
    else:
        y_pad = res

    return y_pad[:m, :cout].reshape(n, oh, ow, cout)


# ----------------------------------------------------------------------------
# Full Discriminator forward (matches the nn.Sequential in the PyTorch module)
# ----------------------------------------------------------------------------
def discriminator_forward(img_nchw, p):
    x = jnp.transpose(img_nchw, (0, 2, 3, 1)).astype(jnp.bfloat16)  # NCHW -> NHWC
    # block 1: Conv(3->64, s=2) + LeakyReLU          (no normalization)
    x = _conv_block(x, p["w1"], p["b1"], stride=2, pad=1,
                    normalize=False, leaky=True)
    # block 2: Conv(64->128, s=2) + BN + LeakyReLU
    x = _conv_block(x, p["w2"], p["b2"], p["g2"], p["beta2"], stride=2, pad=1,
                    normalize=True, leaky=True)
    # block 3: Conv(128->256, s=2) + BN + LeakyReLU
    x = _conv_block(x, p["w3"], p["b3"], p["g3"], p["beta3"], stride=2, pad=1,
                    normalize=True, leaky=True)
    # block 4: Conv(256->512, s=2) + BN + LeakyReLU
    x = _conv_block(x, p["w4"], p["b4"], p["g4"], p["beta4"], stride=2, pad=1,
                    normalize=True, leaky=True)
    # head: Conv(512->1, s=1, pad=1), no BN, no activation
    x = _conv_block(x, p["w5"], p["b5"], stride=1, pad=1,
                    normalize=False, leaky=False, out_dtype=jnp.float32)
    return jnp.transpose(x, (0, 3, 1, 2))  # NHWC -> NCHW


# ----------------------------------------------------------------------------
# Pure-JAX reference (lax.conv, f32) for a correctness sanity check
# ----------------------------------------------------------------------------
def reference_forward(img, p, eps=1e-5):
    def conv(x, w, b, stride, pad):
        y = jax.lax.conv_general_dilated(
            x, w, (stride, stride), [(pad, pad), (pad, pad)],
            dimension_numbers=("NCHW", "OIHW", "NCHW"))
        return y + b.reshape(1, -1, 1, 1)

    def bn(x, g, bt):
        mean = jnp.mean(x, axis=(0, 2, 3), keepdims=True)
        var = jnp.mean(jnp.square(x - mean), axis=(0, 2, 3), keepdims=True)
        return ((x - mean) * jax.lax.rsqrt(var + eps)
                * g.reshape(1, -1, 1, 1) + bt.reshape(1, -1, 1, 1))

    lrelu = lambda x: jnp.where(x >= 0, x, 0.2 * x)

    x = lrelu(conv(img, p["w1"], p["b1"], 2, 1))
    x = lrelu(bn(conv(x, p["w2"], p["b2"], 2, 1), p["g2"], p["beta2"]))
    x = lrelu(bn(conv(x, p["w3"], p["b3"], 2, 1), p["g3"], p["beta3"]))
    x = lrelu(bn(conv(x, p["w4"], p["b4"], 2, 1), p["g4"], p["beta4"]))
    x = conv(x, p["w5"], p["b5"], 1, 1)
    return x


# ----------------------------------------------------------------------------
# Deterministic parameter init (PyTorch-like uniform fan-in bounds; BN: 1 / 0)
# ----------------------------------------------------------------------------
def init_params(key):
    specs = [(64, 3), (128, 64), (256, 128), (512, 256), (1, 512)]
    p = {}
    keys = jax.random.split(key, 2 * len(specs))
    for idx, (cout, cin) in enumerate(specs):
        bound = 1.0 / np.sqrt(cin * 4 * 4)
        p[f"w{idx+1}"] = jax.random.uniform(
            keys[2 * idx], (cout, cin, 4, 4), jnp.float32, -bound, bound)
        p[f"b{idx+1}"] = jax.random.uniform(
            keys[2 * idx + 1], (cout,), jnp.float32, -bound, bound)
    for idx, c in [(2, 128), (3, 256), (4, 512)]:
        p[f"g{idx}"] = jnp.ones((c,), jnp.float32)      # BatchNorm weight
        p[f"beta{idx}"] = jnp.zeros((c,), jnp.float32)  # BatchNorm bias
    return p


if __name__ == "__main__":
    key = jax.random.PRNGKey(0)
    kp, kx = jax.random.split(key)
    params = init_params(kp)

    # Smallest spatial size that keeps the final 4x4 conv valid: 32x32.
    img = jax.random.normal(kx, (2, 3, 32, 32), jnp.float32)  # NCHW like PyTorch

    fwd = jax.jit(discriminator_forward)
    out = jax.block_until_ready(fwd(img, params))

    ref = jax.block_until_ready(reference_forward(img, params))

    assert out.shape == (2, 1, 1, 1), out.shape
    assert bool(jnp.all(jnp.isfinite(out)))
    # bf16 intermediates across 5 conv layers -> generous but meaningful bound.
    np.testing.assert_allclose(np.asarray(out), np.asarray(ref),
                               rtol=1e-1, atol=1e-1)
    print("KERNEL_OK")
</pallas_src>

<mosaic_0001>
module attributes {stable_mosaic.version = 11 : i64} {
  func.func @_conv_mm_kernel(%arg0: i32, %arg1: i32, %arg2: i32, %arg3: memref<512x128xbf16, #tpu.memory_space<vmem>>, %arg4: memref<128x128xbf16, #tpu.memory_space<vmem>>, %arg5: memref<1x128xf32, #tpu.memory_space<vmem>>, %arg6: memref<512x128xbf16, #tpu.memory_space<vmem>>, %arg7: memref<512x128xf32, #tpu.memory_space<vmem>>) attributes {dimension_semantics = [#tpu.dimension_semantics<parallel>, #tpu.dimension_semantics<parallel>, #tpu.dimension_semantics<arbitrary>], iteration_bounds = array<i64: 1, 1, 1>, scalar_prefetch = 0 : i64, scratch_operands = 1 : i64, tpu.core_type = #tpu.core_type<tc>, window_params = [{transform_indices = @transform_0, window_bounds = array<i64: 512, 128>}, {transform_indices = @transform_1, window_bounds = array<i64: 128, 128>}, {transform_indices = @transform_2, window_bounds = array<i64: 1, 128>}, {transform_indices = @transform_3, window_bounds = array<i64: 512, 128>}]} {
    %c0_i32 = arith.constant 0 : i32
    %0 = arith.cmpi eq, %arg2, %c0_i32 : i32
    %1 = arith.extui %0 : i1 to i32
    %c0_i32_0 = arith.constant 0 : i32
    %2 = arith.cmpi ne, %1, %c0_i32_0 : i32
    scf.if %2 {
      %cst_10 = arith.constant 0.000000e+00 : f32
      %12 = vector.broadcast %cst_10 : f32 to vector<512x128xf32>
      %c0_11 = arith.constant 0 : index
      %c0_12 = arith.constant 0 : index
      %13 = vector.load %arg7[%c0_11, %c0_12] : memref<512x128xf32, #tpu.memory_space<vmem>>, vector<512x128xf32>
      tpu.vector_store %arg7[%c0_11, %c0_12], %12 {strides = array<i32>} : memref<512x128xf32, #tpu.memory_space<vmem>>, vector<512x128xf32>,
    } else {
    }
    %c0 = arith.constant 0 : index
    %c0_1 = arith.constant 0 : index
    %3 = vector.load %arg7[%c0, %c0_1] : memref<512x128xf32, #tpu.memory_space<vmem>>, vector<512x128xf32>
    %c0_2 = arith.constant 0 : index
    %c0_3 = arith.constant 0 : index
    %4 = vector.load %arg3[%c0_2, %c0_3] : memref<512x128xbf16, #tpu.memory_space<vmem>>, vector<512x128xbf16>
    %c0_4 = arith.constant 0 : index
    %c0_5 = arith.constant 0 : index
    %5 = vector.load %arg4[%c0_4, %c0_5] : memref<128x128xbf16, #tpu.memory_space<vmem>>, vector<128x128xbf16>
    %cst = arith.constant dense<0.000000e+00> : vector<512x128xf32>
    %6 = tpu.matmul %4, %5, %cst {dimension_numbers = #tpu.dot_dimension_numbers<[1], [0], [0], [1], [0, 0, 1, 1], [], []>} : vector<512x128xbf16>, vector<128x128xbf16>, vector<512x128xf32> -> vector<512x128xf32>
    %7 = arith.addf %3, %6 : vector<512x128xf32>
    %c0_6 = arith.constant 0 : index
    %c0_7 = arith.constant 0 : index
    %8 = vector.load %arg7[%c0_6, %c0_7] : memref<512x128xf32, #tpu.memory_space<vmem>>, vector<512x128xf32>
    tpu.vector_store %arg7[%c0_6, %c0_7], %7 {strides = array<i32>} : memref<512x128xf32, #tpu.memory_space<vmem>>, vector<512x128xf32>,
    %c0_i32_8 = arith.constant 0 : i32
    %9 = arith.cmpi eq, %arg2, %c0_i32_8 : i32
    %10 = arith.extui %9 : i1 to i32
    %c0_i32_9 = arith.constant 0 : i32
    %11 = arith.cmpi ne, %10, %c0_i32_9 : i32
    scf.if %11 {
      %c0_10 = arith.constant 0 : index
      %c0_11 = arith.constant 0 : index
      %12 = vector.load %arg7[%c0_10, %c0_11] : memref<512x128xf32, #tpu.memory_space<vmem>>, vector<512x128xf32>
      %c0_12 = arith.constant 0 : index
      %c0_13 = arith.constant 0 : index
      %13 = vector.load %arg5[%c0_12, %c0_13] : memref<1x128xf32, #tpu.memory_space<vmem>>, vector<1x128xf32>
      %14 = vector.broadcast %13 : vector<1x128xf32> to vector<512x128xf32>
      %15 = arith.addf %12, %14 : vector<512x128xf32>
      %cst_14 = arith.constant 0.000000e+00 : f32
      %16 = vector.broadcast %cst_14 : f32 to vector<512x128xf32>
      %17 = arith.cmpf oge, %15, %16 : vector<512x128xf32>
      %cst_15 = arith.constant 2.000000e-01 : f32
      %18 = vector.broadcast %cst_15 : f32 to vector<512x128xf32>
      %19 = arith.mulf %18, %15 : vector<512x128xf32>
      %20 = arith.select %17, %15, %19 : vector<512x128xi1>, vector<512x128xf32>
      %21 = arith.truncf %20 : vector<512x128xf32> to vector<512x128xbf16>
      %c0_16 = arith.constant 0 : index
      %c0_17 = arith.constant 0 : index
      %22 = vector.load %arg6[%c0_16, %c0_17] : memref<512x128xbf16, #tpu.memory_space<vmem>>, vector<512x128xbf16>
      tpu.vector_store %arg6[%c0_16, %c0_17], %21 {strides = array<i32>} : memref<512x128xbf16, #tpu.memory_space<vmem>>, vector<512x128xbf16>,
    } else {
    }
    return
  }
  func.func @transform_0(%arg0: i32, %arg1: i32, %arg2: i32) -> (i32, i32) {
    %c0_i32 = arith.constant 0 : i32
    return %arg0, %arg2 : i32, i32
  }
  func.func @transform_1(%arg0: i32, %arg1: i32, %arg2: i32) -> (i32, i32) {
    %c0_i32 = arith.constant 0 : i32
    return %arg2, %arg1 : i32, i32
  }
  func.func @transform_2(%arg0: i32, %arg1: i32, %arg2: i32) -> (i32, i32) {
    %c0_i32 = arith.constant 0 : i32
    %c0_i32_0 = arith.constant 0 : i32
    return %c0_i32, %arg1 : i32, i32
  }
  func.func @transform_3(%arg0: i32, %arg1: i32, %arg2: i32) -> (i32, i32) {
    %c0_i32 = arith.constant 0 : i32
    return %arg0, %arg1 : i32, i32
  }
}

module attributes {stable_mosaic.version = 11 : i64} {
  func.func @_bn_lrelu_kernel(%arg0: i32, %arg1: i32, %arg2: memref<128x128xbf16, #tpu.memory_space<vmem>>, %arg3: memref<1x128xf32, #tpu.memory_space<vmem>>, %arg4: memref<1x128xf32, #tpu.memory_space<vmem>>, %arg5: memref<128x128xbf16, #tpu.memory_space<vmem>>) attributes {dimension_semantics = [#tpu.dimension_semantics<parallel>, #tpu.dimension_semantics<parallel>], iteration_bounds = array<i64: 1, 1>, scalar_prefetch = 0 : i64, scratch_operands = 0 : i64, tpu.core_type = #tpu.core_type<tc>, window_params = [{transform_indices = @transform_0, window_bounds = array<i64: 128, 128>}, {transform_indices = @transform_1, window_bounds = array<i64: 1, 128>}, {transform_indices = @transform_2, window_bounds = array<i64: 1, 128>}, {transform_indices = @transform_3, window_bounds = array<i64: 128, 128>}]} {
    %c0 = arith.constant 0 : index
    %c0_0 = arith.constant 0 : index
    %0 = vector.load %arg2[%c0, %c0_0] : memref<128x128xbf16, #tpu.memory_space<vmem>>, vector<128x128xbf16>
    %1 = arith.extf %0 : vector<128x128xbf16> to vector<128x128xf32>
    %c0_1 = arith.constant 0 : index
    %c0_2 = arith.constant 0 : index
    %2 = vector.load %arg3[%c0_1, %c0_2] : memref<1x128xf32, #tpu.memory_space<vmem>>, vector<1x128xf32>
    %3 = vector.broadcast %2 : vector<1x128xf32> to vector<128x128xf32>
    %4 = arith.mulf %1, %3 : vector<128x128xf32>
    %c0_3 = arith.constant 0 : index
    %c0_4 = arith.constant 0 : index
    %5 = vector.load %arg4[%c0_3, %c0_4] : memref<1x128xf32, #tpu.memory_space<vmem>>, vector<1x128xf32>
    %6 = vector.broadcast %5 : vector<1x128xf32> to vector<128x128xf32>
    %7 = arith.addf %4, %6 : vector<128x128xf32>
    %cst = arith.constant 0.000000e+00 : f32
    %8 = vector.broadcast %cst : f32 to vector<128x128xf32>
    %9 = arith.cmpf oge, %7, %8 : vector<128x128xf32>
    %cst_5 = arith.constant 2.000000e-01 : f32
    %10 = vector.broadcast %cst_5 : f32 to vector<128x128xf32>
    %11 = arith.mulf %10, %7 : vector<128x128xf32>
    %12 = arith.select %9, %7, %11 : vector<128x128xi1>, vector<128x128xf32>
    %13 = arith.truncf %12 : vector<128x128xf32> to vector<128x128xbf16>
    %c0_6 = arith.constant 0 : index
    %c0_7 = arith.constant 0 : index
    %14 = vector.load %arg5[%c0_6, %c0_7] : memref<128x128xbf16, #tpu.memory_space<vmem>>, vector<128x128xbf16>
    tpu.vector_store %arg5[%c0_6, %c0_7], %13 {strides = array<i32>} : memref<128x128xbf16, #tpu.memory_space<vmem>>, vector<128x128xbf16>,
    return
  }
  func.func @transform_0(%arg0: i32, %arg1: i32) -> (i32, i32) {
    %c0_i32 = arith.constant 0 : i32
    return %arg0, %arg1 : i32, i32
  }
  func.func @transform_1(%arg0: i32, %arg1: i32) -> (i32, i32) {
    %c0_i32 = arith.constant 0 : i32
    %c0_i32_0 = arith.constant 0 : i32
    return %c0_i32, %arg1 : i32, i32
  }
  func.func @transform_2(%arg0: i32, %arg1: i32) -> (i32, i32) {
    %c0_i32 = arith.constant 0 : i32
    %c0_i32_0 = arith.constant 0 : i32
    return %c0_i32, %arg1 : i32, i32
  }
  func.func @transform_3(%arg0: i32, %arg1: i32) -> (i32, i32) {
    %c0_i32 = arith.constant 0 : i32
    return %arg0, %arg1 : i32, i32
  }
}

module attributes {stable_mosaic.version = 11 : i64} {
  func.func @_conv_mm_kernel(%arg0: i32, %arg1: i32, %arg2: i32, %arg3: memref<128x1024xbf16, #tpu.memory_space<vmem>>, %arg4: memref<1024x128xbf16, #tpu.memory_space<vmem>>, %arg5: memref<1x128xf32, #tpu.memory_space<vmem>>, %arg6: memref<128x128xbf16, #tpu.memory_space<vmem>>, %arg7: memref<8x128xf32, #tpu.memory_space<vmem>>, %arg8: memref<128x128xf32, #tpu.memory_space<vmem>>) attributes {dimension_semantics = [#tpu.dimension_semantics<parallel>, #tpu.dimension_semantics<parallel>, #tpu.dimension_semantics<arbitrary>], iteration_bounds = array<i64: 1, 1, 1>, scalar_prefetch = 0 : i64, scratch_operands = 1 : i64, tpu.core_type = #tpu.core_type<tc>, window_params = [{transform_indices = @transform_0, window_bounds = array<i64: 128, 1024>}, {transform_indices = @transform_1, window_bounds = array<i64: 1024, 128>}, {transform_indices = @transform_2, window_bounds = array<i64: 1, 128>}, {transform_indices = @transform_3, window_bounds = array<i64: 128, 128>}, {transform_indices = @transform_4, window_bounds = array<i64: 8, 128>}]} {
    %c128_i32 = arith.constant 128 : i32
    %0 = arith.muli %arg0, %c128_i32 : i32
    %c0_i32 = arith.constant 0 : i32
    %1 = arith.cmpi eq, %arg2, %c0_i32 : i32
    %2 = arith.extui %1 : i1 to i32
    %c0_i32_0 = arith.constant 0 : i32
    %3 = arith.cmpi ne, %2, %c0_i32_0 : i32
    scf.if %3 {
      %cst_10 = arith.constant 0.000000e+00 : f32
      %13 = vector.broadcast %cst_10 : f32 to vector<128x128xf32>
      %c0_11 = arith.constant 0 : index
      %c0_12 = arith.constant 0 : index
      %14 = vector.load %arg8[%c0_11, %c0_12] : memref<128x128xf32, #tpu.memory_space<vmem>>, vector<128x128xf32>
      tpu.vector_store %arg8[%c0_11, %c0_12], %13 {strides = array<i32>} : memref<128x128xf32, #tpu.memory_space<vmem>>, vector<128x128xf32>,
    } else {
    }
    %c0 = arith.constant 0 : index
    %c0_1 = arith.constant 0 : index
    %4 = vector.load %arg8[%c0, %c0_1] : memref<128x128xf32, #tpu.memory_space<vmem>>, vector<128x128xf32>
    %c0_2 = arith.constant 0 : index
    %c0_3 = arith.constant 0 : index
    %5 = vector.load %arg3[%c0_2, %c0_3] : memref<128x1024xbf16, #tpu.memory_space<vmem>>, vector<128x1024xbf16>
    %c0_4 = arith.constant 0 : index
    %c0_5 = arith.constant 0 : index
    %6 = vector.load %arg4[%c0_4, %c0_5] : memref<1024x128xbf16, #tpu.memory_space<vmem>>, vector<1024x128xbf16>
    %cst = arith.constant dense<0.000000e+00> : vector<128x128xf32>
    %7 = tpu.matmul %5, %6, %cst {dimension_numbers = #tpu.dot_dimension_numbers<[1], [0], [0], [1], [0, 0, 1, 1], [], []>} : vector<128x1024xbf16>, vector<1024x128xbf16>, vector<128x128xf32> -> vector<128x128xf32>
    %8 = arith.addf %4, %7 : vector<128x128xf32>
    %c0_6 = arith.constant 0 : index
    %c0_7 = arith.constant 0 : index
    %9 = vector.load %arg8[%c0_6, %c0_7] : memref<128x128xf32, #tpu.memory_space<vmem>>, vector<128x128xf32>
    tpu.vector_store %arg8[%c0_6, %c0_7], %8 {strides = array<i32>} : memref<128x128xf32, #tpu.memory_space<vmem>>, vector<128x128xf32>,
    %c0_i32_8 = arith.constant 0 : i32
    %10 = arith.cmpi eq, %arg2, %c0_i32_8 : i32
    %11 = arith.extui %10 : i1 to i32
    %c0_i32_9 = arith.constant 0 : i32
    %12 = arith.cmpi ne, %11, %c0_i32_9 : i32
    scf.if %12 {
      %c0_10 = arith.constant 0 : index
      %c0_11 = arith.constant 0 : index
      %13 = vector.load %arg8[%c0_10, %c0_11] : memref<128x128xf32, #tpu.memory_space<vmem>>, vector<128x128xf32>
      %c0_12 = arith.constant 0 : index
      %c0_13 = arith.constant 0 : index
      %14 = vector.load %arg5[%c0_12, %c0_13] : memref<1x128xf32, #tpu.memory_space<vmem>>, vector<1x128xf32>
      %15 = vector.broadcast %14 : vector<1x128xf32> to vector<128x128xf32>
      %16 = arith.addf %13, %15 : vector<128x128xf32>
      %17 = tpu.iota {dimensions = array<i32: 0>} : vector<128x128xi32>
      %18 = vector.broadcast %0 : i32 to vector<128x128xi32>
      %19 = arith.addi %17, %18 : vector<128x128xi32>
      %c128_i32_14 = arith.constant 128 : i32
      %20 = vector.broadcast %c128_i32_14 : i32 to vector<128x128xi32>
      %21 = arith.cmpi slt, %19, %20 : vector<128x128xi32>
      %cst_15 = arith.constant 0.000000e+00 : f32
      %22 = vector.broadcast %cst_15 : f32 to vector<128x128xf32>
      %23 = arith.select %21, %16, %22 : vector<128x128xi1>, vector<128x128xf32>
      %cst_16 = arith.constant dense<0.000000e+00> : vector<128xf32>
      %24 = vector.multi_reduction <add>, %23, %cst_16 [0] : vector<128x128xf32> to vector<128xf32>
      %25 = vector.shape_cast %24 : vector<128xf32> to vector<1x128xf32>
      %26 = arith.mulf %23, %23 : vector<128x128xf32>
      %cst_17 = arith.constant dense<0.000000e+00> : vector<128xf32>
      %27 = vector.multi_reduction <add>, %26, %cst_17 [0] : vector<128x128xf32> to vector<128xf32>
      %28 = vector.shape_cast %27 : vector<128xf32> to vector<1x128xf32>
      %29 = tpu.iota {dimensions = array<i32: 0>} : vector<8x128xi32>
      %c0_i32_18 = arith.constant 0 : i32
      %30 = vector.broadcast %c0_i32_18 : i32 to vector<8x128xi32>
      %31 = arith.cmpi eq, %29, %30 : vector<8x128xi32>
      %cst_19 = arith.constant 0.000000e+00 : f32
      %32 = vector.shape_cast %25 : vector<1x128xf32> to vector<1x128xf32>
      %33 = vector.broadcast %32 : vector<1x128xf32> to vector<8x128xf32>
      %34 = vector.broadcast %cst_19 : f32 to vector<8x128xf32>
      %35 = arith.select %31, %33, %34 : vector<8x128xi1>, vector<8x128xf32>
      %c1_i32 = arith.constant 1 : i32
      %36 = vector.broadcast %c1_i32 : i32 to vector<8x128xi32>
      %37 = arith.cmpi eq, %29, %36 : vector<8x128xi32>
      %cst_20 = arith.constant 0.000000e+00 : f32
      %38 = vector.shape_cast %28 : vector<1x128xf32> to vector<1x128xf32>
      %39 = vector.broadcast %38 : vector<1x128xf32> to vector<8x128xf32>
      %40 = vector.broadcast %cst_20 : f32 to vector<8x128xf32>
      %41 = arith.select %37, %39, %40 : vector<8x128xi1>, vector<8x128xf32>
      %42 = arith.addf %35, %41 : vector<8x128xf32>
      %c0_21 = arith.constant 0 : index
      %c0_22 = arith.constant 0 : index
      %43 = vector.load %arg7[%c0_21, %c0_22] : memref<8x128xf32, #tpu.memory_space<vmem>>, vector<8x128xf32>
      tpu.vector_store %arg7[%c0_21, %c0_22], %42 {strides = array<i32>} : memref<8x128xf32, #tpu.memory_space<vmem>>, vector<8x128xf32>,
      %44 = arith.truncf %16 : vector<128x128xf32> to vector<128x128xbf16>
      %c0_23 = arith.constant 0 : index
      %c0_24 = arith.constant 0 : index
      %45 = vector.load %arg6[%c0_23, %c0_24] : memref<128x128xbf16, #tpu.memory_space<vmem>>, vector<128x128xbf16>
      tpu.vector_store %arg6[%c0_23, %c0_24], %44 {strides = array<i32>} : memref<128x128xbf16, #tpu.memory_space<vmem>>, vector<128x128xbf16>,
    } else {
    }
    return
  }
  func.func @transform_0(%arg0: i32, %arg1: i32, %arg2: i32) -> (i32, i32) {
    %c0_i32 = arith.constant 0 : i32
    return %arg0, %arg2 : i32, i32
  }
  func.func @transform_1(%arg0: i32, %arg1: i32, %arg2: i32) -> (i32, i32) {
    %c0_i32 = arith.constant 0 : i32
    return %arg2, %arg1 : i32, i32
  }
  func.func @transform_2(%arg0: i32, %arg1: i32, %arg2: i32) -> (i32, i32) {
    %c0_i32 = arith.constant 0 : i32
    %c0_i32_0 = arith.constant 0 : i32
    return %c0_i32, %arg1 : i32, i32
  }
  func.func @transform_3(%arg0: i32, %arg1: i32, %arg2: i32) -> (i32, i32) {
    %c0_i32 = arith.constant 0 : i32
    return %arg0, %arg1 : i32, i32
  }
  func.func @transform_4(%arg0: i32, %arg1: i32, %arg2: i32) -> (i32, i32) {
    %c0_i32 = arith.constant 0 : i32
    return %arg0, %arg1 : i32, i32
  }
}

module attributes {stable_mosaic.version = 11 : i64} {
  func.func @_conv_mm_kernel(%arg0: i32, %arg1: i32, %arg2: i32, %arg3: memref<32x1024xbf16, #tpu.memory_space<vmem>>, %arg4: memref<1024x256xbf16, #tpu.memory_space<vmem>>, %arg5: memref<1x256xf32, #tpu.memory_space<vmem>>, %arg6: memref<32x256xbf16, #tpu.memory_space<vmem>>, %arg7: memref<8x256xf32, #tpu.memory_space<vmem>>, %arg8: memref<32x256xf32, #tpu.memory_space<vmem>>) attributes {dimension_semantics = [#tpu.dimension_semantics<parallel>, #tpu.dimension_semantics<parallel>, #tpu.dimension_semantics<arbitrary>], iteration_bounds = array<i64: 1, 1, 2>, scalar_prefetch = 0 : i64, scratch_operands = 1 : i64, tpu.core_type = #tpu.core_type<tc>, window_params = [{transform_indices = @transform_0, window_bounds = array<i64: 32, 1024>}, {transform_indices = @transform_1, window_bounds = array<i64: 1024, 256>}, {transform_indices = @transform_2, window_bounds = array<i64: 1, 256>}, {transform_indices = @transform_3, window_bounds = array<i64: 32, 256>}, {transform_indices = @transform_4, window_bounds = array<i64: 8, 256>}]} {
    %c32_i32 = arith.constant 32 : i32
    %0 = arith.muli %arg0, %c32_i32 : i32
    %c0_i32 = arith.constant 0 : i32
    %1 = arith.cmpi eq, %arg2, %c0_i32 : i32
    %2 = arith.extui %1 : i1 to i32
    %c0_i32_0 = arith.constant 0 : i32
    %3 = arith.cmpi ne, %2, %c0_i32_0 : i32
    scf.if %3 {
      %cst_9 = arith.constant 0.000000e+00 : f32
      %13 = vector.broadcast %cst_9 : f32 to vector<32x256xf32>
      %c0_10 = arith.constant 0 : index
      %c0_11 = arith.constant 0 : index
      %14 = vector.load %arg8[%c0_10, %c0_11] : memref<32x256xf32, #tpu.memory_space<vmem>>, vector<32x256xf32>
      tpu.vector_store %arg8[%c0_10, %c0_11], %13 {strides = array<i32>} : memref<32x256xf32, #tpu.memory_space<vmem>>, vector<32x256xf32>,
    } else {
    }
    %c0 = arith.constant 0 : index
    %c0_1 = arith.constant 0 : index
    %4 = vector.load %arg8[%c0, %c0_1] : memref<32x256xf32, #tpu.memory_space<vmem>>, vector<32x256xf32>
    %c0_2 = arith.constant 0 : index
    %c0_3 = arith.constant 0 : index
    %5 = vector.load %arg3[%c0_2, %c0_3] : memref<32x1024xbf16, #tpu.memory_space<vmem>>, vector<32x1024xbf16>
    %c0_4 = arith.constant 0 : index
    %c0_5 = arith.constant 0 : index
    %6 = vector.load %arg4[%c0_4, %c0_5] : memref<1024x256xbf16, #tpu.memory_space<vmem>>, vector<1024x256xbf16>
    %cst = arith.constant dense<0.000000e+00> : vector<32x256xf32>
    %7 = tpu.matmul %5, %6, %cst {dimension_numbers = #tpu.dot_dimension_numbers<[1], [0], [0], [1], [0, 0, 1, 1], [], []>} : vector<32x1024xbf16>, vector<1024x256xbf16>, vector<32x256xf32> -> vector<32x256xf32>
    %8 = arith.addf %4, %7 : vector<32x256xf32>
    %c0_6 = arith.constant 0 : index
    %c0_7 = arith.constant 0 : index
    %9 = vector.load %arg8[%c0_6, %c0_7] : memref<32x256xf32, #tpu.memory_space<vmem>>, vector<32x256xf32>
    tpu.vector_store %arg8[%c0_6, %c0_7], %8 {strides = array<i32>} : memref<32x256xf32, #tpu.memory_space<vmem>>, vector<32x256xf32>,
    %c1_i32 = arith.constant 1 : i32
    %10 = arith.cmpi eq, %arg2, %c1_i32 : i32
    %11 = arith.extui %10 : i1 to i32
    %c0_i32_8 = arith.constant 0 : i32
    %12 = arith.cmpi ne, %11, %c0_i32_8 : i32
    scf.if %12 {
      %c0_9 = arith.constant 0 : index
      %c0_10 = arith.constant 0 : index
      %13 = vector.load %arg8[%c0_9, %c0_10] : memref<32x256xf32, #tpu.memory_space<vmem>>, vector<32x256xf32>
      %c0_11 = arith.constant 0 : index
      %c0_12 = arith.constant 0 : index
      %14 = vector.load %arg5[%c0_11, %c0_12] : memref<1x256xf32, #tpu.memory_space<vmem>>, vector<1x256xf32>
      %15 = vector.broadcast %14 : vector<1x256xf32> to vector<32x256xf32>
      %16 = arith.addf %13, %15 : vector<32x256xf32>
      %17 = tpu.iota {dimensions = array<i32: 0>} : vector<32x256xi32>
      %18 = vector.broadcast %0 : i32 to vector<32x256xi32>
      %19 = arith.addi %17, %18 : vector<32x256xi32>
      %c32_i32_13 = arith.constant 32 : i32
      %20 = vector.broadcast %c32_i32_13 : i32 to vector<32x256xi32>
      %21 = arith.cmpi slt, %19, %20 : vector<32x256xi32>
      %cst_14 = arith.constant 0.000000e+00 : f32
      %22 = vector.broadcast %cst_14 : f32 to vector<32x256xf32>
      %23 = arith.select %21, %16, %22 : vector<32x256xi1>, vector<32x256xf32>
      %cst_15 = arith.constant dense<0.000000e+00> : vector<256xf32>
      %24 = vector.multi_reduction <add>, %23, %cst_15 [0] : vector<32x256xf32> to vector<256xf32>
      %25 = vector.shape_cast %24 : vector<256xf32> to vector<1x256xf32>
      %26 = arith.mulf %23, %23 : vector<32x256xf32>
      %cst_16 = arith.constant dense<0.000000e+00> : vector<256xf32>
      %27 = vector.multi_reduction <add>, %26, %cst_16 [0] : vector<32x256xf32> to vector<256xf32>
      %28 = vector.shape_cast %27 : vector<256xf32> to vector<1x256xf32>
      %29 = tpu.iota {dimensions = array<i32: 0>} : vector<8x256xi32>
      %c0_i32_17 = arith.constant 0 : i32
      %30 = vector.broadcast %c0_i32_17 : i32 to vector<8x256xi32>
      %31 = arith.cmpi eq, %29, %30 : vector<8x256xi32>
      %cst_18 = arith.constant 0.000000e+00 : f32
      %32 = vector.shape_cast %25 : vector<1x256xf32> to vector<1x256xf32>
      %33 = vector.broadcast %32 : vector<1x256xf32> to vector<8x256xf32>
      %34 = vector.broadcast %cst_18 : f32 to vector<8x256xf32>
      %35 = arith.select %31, %33, %34 : vector<8x256xi1>, vector<8x256xf32>
      %c1_i32_19 = arith.constant 1 : i32
      %36 = vector.broadcast %c1_i32_19 : i32 to vector<8x256xi32>
      %37 = arith.cmpi eq, %29, %36 : vector<8x256xi32>
      %cst_20 = arith.constant 0.000000e+00 : f32
      %38 = vector.shape_cast %28 : vector<1x256xf32> to vector<1x256xf32>
      %39 = vector.broadcast %38 : vector<1x256xf32> to vector<8x256xf32>
      %40 = vector.broadcast %cst_20 : f32 to vector<8x256xf32>
      %41 = arith.select %37, %39, %40 : vector<8x256xi1>, vector<8x256xf32>
      %42 = arith.addf %35, %41 : vector<8x256xf32>
      %c0_21 = arith.constant 0 : index
      %c0_22 = arith.constant 0 : index
      %43 = vector.load %arg7[%c0_21, %c0_22] : memref<8x256xf32, #tpu.memory_space<vmem>>, vector<8x256xf32>
      tpu.vector_store %arg7[%c0_21, %c0_22], %42 {strides = array<i32>} : memref<8x256xf32, #tpu.memory_space<vmem>>, vector<8x256xf32>,
      %44 = arith.truncf %16 : vector<32x256xf32> to vector<32x256xbf16>
      %c0_23 = arith.constant 0 : index
      %c0_24 = arith.constant 0 : index
      %45 = vector.load %arg6[%c0_23, %c0_24] : memref<32x256xbf16, #tpu.memory_space<vmem>>, vector<32x256xbf16>
      tpu.vector_store %arg6[%c0_23, %c0_24], %44 {strides = array<i32>} : memref<32x256xbf16, #tpu.memory_space<vmem>>, vector<32x256xbf16>,
    } else {
    }
    return
  }
  func.func @transform_0(%arg0: i32, %arg1: i32, %arg2: i32) -> (i32, i32) {
    %c0_i32 = arith.constant 0 : i32
    return %arg0, %arg2 : i32, i32
  }
  func.func @transform_1(%arg0: i32, %arg1: i32, %arg2: i32) -> (i32, i32) {
    %c0_i32 = arith.constant 0 : i32
    return %arg2, %arg1 : i32, i32
  }
  func.func @transform_2(%arg0: i32, %arg1: i32, %arg2: i32) -> (i32, i32) {
    %c0_i32 = arith.constant 0 : i32
    %c0_i32_0 = arith.constant 0 : i32
    return %c0_i32, %arg1 : i32, i32
  }
  func.func @transform_3(%arg0: i32, %arg1: i32, %arg2: i32) -> (i32, i32) {
    %c0_i32 = arith.constant 0 : i32
    return %arg0, %arg1 : i32, i32
  }
  func.func @transform_4(%arg0: i32, %arg1: i32, %arg2: i32) -> (i32, i32) {
    %c0_i32 = arith.constant 0 : i32
    return %arg0, %arg1 : i32, i32
  }
}

module attributes {stable_mosaic.version = 11 : i64} {
  func.func @_bn_lrelu_kernel(%arg0: i32, %arg1: i32, %arg2: memref<32x256xbf16, #tpu.memory_space<vmem>>, %arg3: memref<1x256xf32, #tpu.memory_space<vmem>>, %arg4: memref<1x256xf32, #tpu.memory_space<vmem>>, %arg5: memref<32x256xbf16, #tpu.memory_space<vmem>>) attributes {dimension_semantics = [#tpu.dimension_semantics<parallel>, #tpu.dimension_semantics<parallel>], iteration_bounds = array<i64: 1, 1>, scalar_prefetch = 0 : i64, scratch_operands = 0 : i64, tpu.core_type = #tpu.core_type<tc>, window_params = [{transform_indices = @transform_0, window_bounds = array<i64: 32, 256>}, {transform_indices = @transform_1, window_bounds = array<i64: 1, 256>}, {transform_indices = @transform_2, window_bounds = array<i64: 1, 256>}, {transform_indices = @transform_3, window_bounds = array<i64: 32, 256>}]} {
    %c0 = arith.constant 0 : index
    %c0_0 = arith.constant 0 : index
    %0 = vector.load %arg2[%c0, %c0_0] : memref<32x256xbf16, #tpu.memory_space<vmem>>, vector<32x256xbf16>
    %1 = arith.extf %0 : vector<32x256xbf16> to vector<32x256xf32>
    %c0_1 = arith.constant 0 : index
    %c0_2 = arith.constant 0 : index
    %2 = vector.load %arg3[%c0_1, %c0_2] : memref<1x256xf32, #tpu.memory_space<vmem>>, vector<1x256xf32>
    %3 = vector.broadcast %2 : vector<1x256xf32> to vector<32x256xf32>
    %4 = arith.mulf %1, %3 : vector<32x256xf32>
    %c0_3 = arith.constant 0 : index
    %c0_4 = arith.constant 0 : index
    %5 = vector.load %arg4[%c0_3, %c0_4] : memref<1x256xf32, #tpu.memory_space<vmem>>, vector<1x256xf32>
    %6 = vector.broadcast %5 : vector<1x256xf32> to vector<32x256xf32>
    %7 = arith.addf %4, %6 : vector<32x256xf32>
    %cst = arith.constant 0.000000e+00 : f32
    %8 = vector.broadcast %cst : f32 to vector<32x256xf32>
    %9 = arith.cmpf oge, %7, %8 : vector<32x256xf32>
    %cst_5 = arith.constant 2.000000e-01 : f32
    %10 = vector.broadcast %cst_5 : f32 to vector<32x256xf32>
    %11 = arith.mulf %10, %7 : vector<32x256xf32>
    %12 = arith.select %9, %7, %11 : vector<32x256xi1>, vector<32x256xf32>
    %13 = arith.truncf %12 : vector<32x256xf32> to vector<32x256xbf16>
    %c0_6 = arith.constant 0 : index
    %c0_7 = arith.constant 0 : index
    %14 = vector.load %arg5[%c0_6, %c0_7] : memref<32x256xbf16, #tpu.memory_space<vmem>>, vector<32x256xbf16>
    tpu.vector_store %arg5[%c0_6, %c0_7], %13 {strides = array<i32>} : memref<32x256xbf16, #tpu.memory_space<vmem>>, vector<32x256xbf16>,
    return
  }
  func.func @transform_0(%arg0: i32, %arg1: i32) -> (i32, i32) {
    %c0_i32 = arith.constant 0 : i32
    return %arg0, %arg1 : i32, i32
  }
  func.func @transform_1(%arg0: i32, %arg1: i32) -> (i32, i32) {
    %c0_i32 = arith.constant 0 : i32
    %c0_i32_0 = arith.constant 0 : i32
    return %c0_i32, %arg1 : i32, i32
  }
  func.func @transform_2(%arg0: i32, %arg1: i32) -> (i32, i32) {
    %c0_i32 = arith.constant 0 : i32
    %c0_i32_0 = arith.constant 0 : i32
    return %c0_i32, %arg1 : i32, i32
  }
  func.func @transform_3(%arg0: i32, %arg1: i32) -> (i32, i32) {
    %c0_i32 = arith.constant 0 : i32
    return %arg0, %arg1 : i32, i32
  }
}

module attributes {stable_mosaic.version = 11 : i64} {
  func.func @_conv_mm_kernel(%arg0: i32, %arg1: i32, %arg2: i32, %arg3: memref<16x1024xbf16, #tpu.memory_space<vmem>>, %arg4: memref<1024x256xbf16, #tpu.memory_space<vmem>>, %arg5: memref<1x256xf32, #tpu.memory_space<vmem>>, %arg6: memref<16x256xbf16, #tpu.memory_space<vmem>>, %arg7: memref<8x256xf32, #tpu.memory_space<vmem>>, %arg8: memref<16x256xf32, #tpu.memory_space<vmem>>) attributes {dimension_semantics = [#tpu.dimension_semantics<parallel>, #tpu.dimension_semantics<parallel>, #tpu.dimension_semantics<arbitrary>], iteration_bounds = array<i64: 1, 2, 4>, scalar_prefetch = 0 : i64, scratch_operands = 1 : i64, tpu.core_type = #tpu.core_type<tc>, window_params = [{transform_indices = @transform_0, window_bounds = array<i64: 16, 1024>}, {transform_indices = @transform_1, window_bounds = array<i64: 1024, 256>}, {transform_indices = @transform_2, window_bounds = array<i64: 1, 256>}, {transform_indices = @transform_3, window_bounds = array<i64: 16, 256>}, {transform_indices = @transform_4, window_bounds = array<i64: 8, 256>}]} {
    %c16_i32 = arith.constant 16 : i32
    %0 = arith.muli %arg0, %c16_i32 : i32
    %c0_i32 = arith.constant 0 : i32
    %1 = arith.cmpi eq, %arg2, %c0_i32 : i32
    %2 = arith.extui %1 : i1 to i32
    %c0_i32_0 = arith.constant 0 : i32
    %3 = arith.cmpi ne, %2, %c0_i32_0 : i32
    scf.if %3 {
      %cst_9 = arith.constant 0.000000e+00 : f32
      %13 = vector.broadcast %cst_9 : f32 to vector<16x256xf32>
      %c0_10 = arith.constant 0 : index
      %c0_11 = arith.constant 0 : index
      %14 = vector.load %arg8[%c0_10, %c0_11] : memref<16x256xf32, #tpu.memory_space<vmem>>, vector<16x256xf32>
      tpu.vector_store %arg8[%c0_10, %c0_11], %13 {strides = array<i32>} : memref<16x256xf32, #tpu.memory_space<vmem>>, vector<16x256xf32>,
    } else {
    }
    %c0 = arith.constant 0 : index
    %c0_1 = arith.constant 0 : index
    %4 = vector.load %arg8[%c0, %c0_1] : memref<16x256xf32, #tpu.memory_space<vmem>>, vector<16x256xf32>
    %c0_2 = arith.constant 0 : index
    %c0_3 = arith.constant 0 : index
    %5 = vector.load %arg3[%c0_2, %c0_3] : memref<16x1024xbf16, #tpu.memory_space<vmem>>, vector<16x1024xbf16>
    %c0_4 = arith.constant 0 : index
    %c0_5 = arith.constant 0 : index
    %6 = vector.load %arg4[%c0_4, %c0_5] : memref<1024x256xbf16, #tpu.memory_space<vmem>>, vector<1024x256xbf16>
    %cst = arith.constant dense<0.000000e+00> : vector<16x256xf32>
    %7 = tpu.matmul %5, %6, %cst {dimension_numbers = #tpu.dot_dimension_numbers<[1], [0], [0], [1], [0, 0, 1, 1], [], []>} : vector<16x1024xbf16>, vector<1024x256xbf16>, vector<16x256xf32> -> vector<16x256xf32>
    %8 = arith.addf %4, %7 : vector<16x256xf32>
    %c0_6 = arith.constant 0 : index
    %c0_7 = arith.constant 0 : index
    %9 = vector.load %arg8[%c0_6, %c0_7] : memref<16x256xf32, #tpu.memory_space<vmem>>, vector<16x256xf32>
    tpu.vector_store %arg8[%c0_6, %c0_7], %8 {strides = array<i32>} : memref<16x256xf32, #tpu.memory_space<vmem>>, vector<16x256xf32>,
    %c3_i32 = arith.constant 3 : i32
    %10 = arith.cmpi eq, %arg2, %c3_i32 : i32
    %11 = arith.extui %10 : i1 to i32
    %c0_i32_8 = arith.constant 0 : i32
    %12 = arith.cmpi ne, %11, %c0_i32_8 : i32
    scf.if %12 {
      %c0_9 = arith.constant 0 : index
      %c0_10 = arith.constant 0 : index
      %13 = vector.load %arg8[%c0_9, %c0_10] : memref<16x256xf32, #tpu.memory_space<vmem>>, vector<16x256xf32>
      %c0_11 = arith.constant 0 : index
      %c0_12 = arith.constant 0 : index
      %14 = vector.load %arg5[%c0_11, %c0_12] : memref<1x256xf32, #tpu.memory_space<vmem>>, vector<1x256xf32>
      %15 = vector.broadcast %14 : vector<1x256xf32> to vector<16x256xf32>
      %16 = arith.addf %13, %15 : vector<16x256xf32>
      %17 = tpu.iota {dimensions = array<i32: 0>} : vector<16x256xi32>
      %18 = vector.broadcast %0 : i32 to vector<16x256xi32>
      %19 = arith.addi %17, %18 : vector<16x256xi32>
      %c8_i32 = arith.constant 8 : i32
      %20 = vector.broadcast %c8_i32 : i32 to vector<16x256xi32>
      %21 = arith.cmpi slt, %19, %20 : vector<16x256xi32>
      %cst_13 = arith.constant 0.000000e+00 : f32
      %22 = vector.broadcast %cst_13 : f32 to vector<16x256xf32>
      %23 = arith.select %21, %16, %22 : vector<16x256xi1>, vector<16x256xf32>
      %cst_14 = arith.constant dense<0.000000e+00> : vector<256xf32>
      %24 = vector.multi_reduction <add>, %23, %cst_14 [0] : vector<16x256xf32> to vector<256xf32>
      %25 = vector.shape_cast %24 : vector<256xf32> to vector<1x256xf32>
      %26 = arith.mulf %23, %23 : vector<16x256xf32>
      %cst_15 = arith.constant dense<0.000000e+00> : vector<256xf32>
      %27 = vector.multi_reduction <add>, %26, %cst_15 [0] : vector<16x256xf32> to vector<256xf32>
      %28 = vector.shape_cast %27 : vector<256xf32> to vector<1x256xf32>
      %29 = tpu.iota {dimensions = array<i32: 0>} : vector<8x256xi32>
      %c0_i32_16 = arith.constant 0 : i32
      %30 = vector.broadcast %c0_i32_16 : i32 to vector<8x256xi32>
      %31 = arith.cmpi eq, %29, %30 : vector<8x256xi32>
      %cst_17 = arith.constant 0.000000e+00 : f32
      %32 = vector.shape_cast %25 : vector<1x256xf32> to vector<1x256xf32>
      %33 = vector.broadcast %32 : vector<1x256xf32> to vector<8x256xf32>
      %34 = vector.broadcast %cst_17 : f32 to vector<8x256xf32>
      %35 = arith.select %31, %33, %34 : vector<8x256xi1>, vector<8x256xf32>
      %c1_i32 = arith.constant 1 : i32
      %36 = vector.broadcast %c1_i32 : i32 to vector<8x256xi32>
      %37 = arith.cmpi eq, %29, %36 : vector<8x256xi32>
      %cst_18 = arith.constant 0.000000e+00 : f32
      %38 = vector.shape_cast %28 : vector<1x256xf32> to vector<1x256xf32>
      %39 = vector.broadcast %38 : vector<1x256xf32> to vector<8x256xf32>
      %40 = vector.broadcast %cst_18 : f32 to vector<8x256xf32>
      %41 = arith.select %37, %39, %40 : vector<8x256xi1>, vector<8x256xf32>
      %42 = arith.addf %35, %41 : vector<8x256xf32>
      %c0_19 = arith.constant 0 : index
      %c0_20 = arith.constant 0 : index
      %43 = vector.load %arg7[%c0_19, %c0_20] : memref<8x256xf32, #tpu.memory_space<vmem>>, vector<8x256xf32>
      tpu.vector_store %arg7[%c0_19, %c0_20], %42 {strides = array<i32>} : memref<8x256xf32, #tpu.memory_space<vmem>>, vector<8x256xf32>,
      %44 = arith.truncf %16 : vector<16x256xf32> to vector<16x256xbf16>
      %c0_21 = arith.constant 0 : index
      %c0_22 = arith.constant 0 : index
      %45 = vector.load %arg6[%c0_21, %c0_22] : memref<16x256xbf16, #tpu.memory_space<vmem>>, vector<16x256xbf16>
      tpu.vector_store %arg6[%c0_21, %c0_22], %44 {strides = array<i32>} : memref<16x256xbf16, #tpu.memory_space<vmem>>, vector<16x256xbf16>,
    } else {
    }
    return
  }
  func.func @transform_0(%arg0: i32, %arg1: i32, %arg2: i32) -> (i32, i32) {
    %c0_i32 = arith.constant 0 : i32
    return %arg0, %arg2 : i32, i32
  }
  func.func @transform_1(%arg0: i32, %arg1: i32, %arg2: i32) -> (i32, i32) {
    %c0_i32 = arith.constant 0 : i32
    return %arg2, %arg1 : i32, i32
  }
  func.func @transform_2(%arg0: i32, %arg1: i32, %arg2: i32) -> (i32, i32) {
    %c0_i32 = arith.constant 0 : i32
    %c0_i32_0 = arith.constant 0 : i32
    return %c0_i32, %arg1 : i32, i32
  }
  func.func @transform_3(%arg0: i32, %arg1: i32, %arg2: i32) -> (i32, i32) {
    %c0_i32 = arith.constant 0 : i32
    return %arg0, %arg1 : i32, i32
  }
  func.func @transform_4(%arg0: i32, %arg1: i32, %arg2: i32) -> (i32, i32) {
    %c0_i32 = arith.constant 0 : i32
    return %arg0, %arg1 : i32, i32
  }
}

module attributes {stable_mosaic.version = 11 : i64} {
  func.func @_bn_lrelu_kernel(%arg0: i32, %arg1: i32, %arg2: memref<16x256xbf16, #tpu.memory_space<vmem>>, %arg3: memref<1x256xf32, #tpu.memory_space<vmem>>, %arg4: memref<1x256xf32, #tpu.memory_space<vmem>>, %arg5: memref<16x256xbf16, #tpu.memory_space<vmem>>) attributes {dimension_semantics = [#tpu.dimension_semantics<parallel>, #tpu.dimension_semantics<parallel>], iteration_bounds = array<i64: 1, 2>, scalar_prefetch = 0 : i64, scratch_operands = 0 : i64, tpu.core_type = #tpu.core_type<tc>, window_params = [{transform_indices = @transform_0, window_bounds = array<i64: 16, 256>}, {transform_indices = @transform_1, window_bounds = array<i64: 1, 256>}, {transform_indices = @transform_2, window_bounds = array<i64: 1, 256>}, {transform_indices = @transform_3, window_bounds = array<i64: 16, 256>}]} {
    %c0 = arith.constant 0 : index
    %c0_0 = arith.constant 0 : index
    %0 = vector.load %arg2[%c0, %c0_0] : memref<16x256xbf16, #tpu.memory_space<vmem>>, vector<16x256xbf16>
    %1 = arith.extf %0 : vector<16x256xbf16> to vector<16x256xf32>
    %c0_1 = arith.constant 0 : index
    %c0_2 = arith.constant 0 : index
    %2 = vector.load %arg3[%c0_1, %c0_2] : memref<1x256xf32, #tpu.memory_space<vmem>>, vector<1x256xf32>
    %3 = vector.broadcast %2 : vector<1x256xf32> to vector<16x256xf32>
    %4 = arith.mulf %1, %3 : vector<16x256xf32>
    %c0_3 = arith.constant 0 : index
    %c0_4 = arith.constant 0 : index
    %5 = vector.load %arg4[%c0_3, %c0_4] : memref<1x256xf32, #tpu.memory_space<vmem>>, vector<1x256xf32>
    %6 = vector.broadcast %5 : vector<1x256xf32> to vector<16x256xf32>
    %7 = arith.addf %4, %6 : vector<16x256xf32>
    %cst = arith.constant 0.000000e+00 : f32
    %8 = vector.broadcast %cst : f32 to vector<16x256xf32>
    %9 = arith.cmpf oge, %7, %8 : vector<16x256xf32>
    %cst_5 = arith.constant 2.000000e-01 : f32
    %10 = vector.broadcast %cst_5 : f32 to vector<16x256xf32>
    %11 = arith.mulf %10, %7 : vector<16x256xf32>
    %12 = arith.select %9, %7, %11 : vector<16x256xi1>, vector<16x256xf32>
    %13 = arith.truncf %12 : vector<16x256xf32> to vector<16x256xbf16>
    %c0_6 = arith.constant 0 : index
    %c0_7 = arith.constant 0 : index
    %14 = vector.load %arg5[%c0_6, %c0_7] : memref<16x256xbf16, #tpu.memory_space<vmem>>, vector<16x256xbf16>
    tpu.vector_store %arg5[%c0_6, %c0_7], %13 {strides = array<i32>} : memref<16x256xbf16, #tpu.memory_space<vmem>>, vector<16x256xbf16>,
    return
  }
  func.func @transform_0(%arg0: i32, %arg1: i32) -> (i32, i32) {
    %c0_i32 = arith.constant 0 : i32
    return %arg0, %arg1 : i32, i32
  }
  func.func @transform_1(%arg0: i32, %arg1: i32) -> (i32, i32) {
    %c0_i32 = arith.constant 0 : i32
    %c0_i32_0 = arith.constant 0 : i32
    return %c0_i32, %arg1 : i32, i32
  }
  func.func @transform_2(%arg0: i32, %arg1: i32) -> (i32, i32) {
    %c0_i32 = arith.constant 0 : i32
    %c0_i32_0 = arith.constant 0 : i32
    return %c0_i32, %arg1 : i32, i32
  }
  func.func @transform_3(%arg0: i32, %arg1: i32) -> (i32, i32) {
    %c0_i32 = arith.constant 0 : i32
    return %arg0, %arg1 : i32, i32
  }
}

module attributes {stable_mosaic.version = 11 : i64} {
  func.func @_conv_mm_kernel(%arg0: i32, %arg1: i32, %arg2: i32, %arg3: memref<16x1024xbf16, #tpu.memory_space<vmem>>, %arg4: memref<1024x128xbf16, #tpu.memory_space<vmem>>, %arg5: memref<1x128xf32, #tpu.memory_space<vmem>>, %arg6: memref<16x128xf32, #tpu.memory_space<vmem>>, %arg7: memref<16x128xf32, #tpu.memory_space<vmem>>) attributes {dimension_semantics = [#tpu.dimension_semantics<parallel>, #tpu.dimension_semantics<parallel>, #tpu.dimension_semantics<arbitrary>], iteration_bounds = array<i64: 1, 1, 8>, scalar_prefetch = 0 : i64, scratch_operands = 1 : i64, tpu.core_type = #tpu.core_type<tc>, window_params = [{transform_indices = @transform_0, window_bounds = array<i64: 16, 1024>}, {transform_indices = @transform_1, window_bounds = array<i64: 1024, 128>}, {transform_indices = @transform_2, window_bounds = array<i64: 1, 128>}, {transform_indices = @transform_3, window_bounds = array<i64: 16, 128>}]} {
    %c0_i32 = arith.constant 0 : i32
    %0 = arith.cmpi eq, %arg2, %c0_i32 : i32
    %1 = arith.extui %0 : i1 to i32
    %c0_i32_0 = arith.constant 0 : i32
    %2 = arith.cmpi ne, %1, %c0_i32_0 : i32
    scf.if %2 {
      %cst_9 = arith.constant 0.000000e+00 : f32
      %12 = vector.broadcast %cst_9 : f32 to vector<16x128xf32>
      %c0_10 = arith.constant 0 : index
      %c0_11 = arith.constant 0 : index
      %13 = vector.load %arg7[%c0_10, %c0_11] : memref<16x128xf32, #tpu.memory_space<vmem>>, vector<16x128xf32>
      tpu.vector_store %arg7[%c0_10, %c0_11], %12 {strides = array<i32>} : memref<16x128xf32, #tpu.memory_space<vmem>>, vector<16x128xf32>,
    } else {
    }
    %c0 = arith.constant 0 : index
    %c0_1 = arith.constant 0 : index
    %3 = vector.load %arg7[%c0, %c0_1] : memref<16x128xf32, #tpu.memory_space<vmem>>, vector<16x128xf32>
    %c0_2 = arith.constant 0 : index
    %c0_3 = arith.constant 0 : index
    %4 = vector.load %arg3[%c0_2, %c0_3] : memref<16x1024xbf16, #tpu.memory_space<vmem>>, vector<16x1024xbf16>
    %c0_4 = arith.constant 0 : index
    %c0_5 = arith.constant 0 : index
    %5 = vector.load %arg4[%c0_4, %c0_5] : memref<1024x128xbf16, #tpu.memory_space<vmem>>, vector<1024x128xbf16>
    %cst = arith.constant dense<0.000000e+00> : vector<16x128xf32>
    %6 = tpu.matmul %4, %5, %cst {dimension_numbers = #tpu.dot_dimension_numbers<[1], [0], [0], [1], [0, 0, 1, 1], [], []>} : vector<16x1024xbf16>, vector<1024x128xbf16>, vector<16x128xf32> -> vector<16x128xf32>
    %7 = arith.addf %3, %6 : vector<16x128xf32>
    %c0_6 = arith.constant 0 : index
    %c0_7 = arith.constant 0 : index
    %8 = vector.load %arg7[%c0_6, %c0_7] : memref<16x128xf32, #tpu.memory_space<vmem>>, vector<16x128xf32>
    tpu.vector_store %arg7[%c0_6, %c0_7], %7 {strides = array<i32>} : memref<16x128xf32, #tpu.memory_space<vmem>>, vector<16x128xf32>,
    %c7_i32 = arith.constant 7 : i32
    %9 = arith.cmpi eq, %arg2, %c7_i32 : i32
    %10 = arith.extui %9 : i1 to i32
    %c0_i32_8 = arith.constant 0 : i32
    %11 = arith.cmpi ne, %10, %c0_i32_8 : i32
    scf.if %11 {
      %c0_9 = arith.constant 0 : index
      %c0_10 = arith.constant 0 : index
      %12 = vector.load %arg7[%c0_9, %c0_10] : memref<16x128xf32, #tpu.memory_space<vmem>>, vector<16x128xf32>
      %c0_11 = arith.constant 0 : index
      %c0_12 = arith.constant 0 : index
      %13 = vector.load %arg5[%c0_11, %c0_12] : memref<1x128xf32, #tpu.memory_space<vmem>>, vector<1x128xf32>
      %14 = vector.broadcast %13 : vector<1x128xf32> to vector<16x128xf32>
      %15 = arith.addf %12, %14 : vector<16x128xf32>
      %c0_13 = arith.constant 0 : index
      %c0_14 = arith.constant 0 : index
      %16 = vector.load %arg6[%c0_13, %c0_14] : memref<16x128xf32, #tpu.memory_space<vmem>>, vector<16x128xf32>
      tpu.vector_store %arg6[%c0_13, %c0_14], %15 {strides = array<i32>} : memref<16x128xf32, #tpu.memory_space<vmem>>, vector<16x128xf32>,
    } else {
    }
    return
  }
  func.func @transform_0(%arg0: i32, %arg1: i32, %arg2: i32) -> (i32, i32) {
    %c0_i32 = arith.constant 0 : i32
    return %arg0, %arg2 : i32, i32
  }
  func.func @transform_1(%arg0: i32, %arg1: i32, %arg2: i32) -> (i32, i32) {
    %c0_i32 = arith.constant 0 : i32
    return %arg2, %arg1 : i32, i32
  }
  func.func @transform_2(%arg0: i32, %arg1: i32, %arg2: i32) -> (i32, i32) {
    %c0_i32 = arith.constant 0 : i32
    %c0_i32_0 = arith.constant 0 : i32
    return %c0_i32, %arg1 : i32, i32
  }
  func.func @transform_3(%arg0: i32, %arg1: i32, %arg2: i32) -> (i32, i32) {
    %c0_i32 = arith.constant 0 : i32
    return %arg0, %arg1 : i32, i32
  }
}

</mosaic_0001>

<bundles_post_ra>
// kernel: discriminator_forward.8
= control target key start
LH: loop header
LB: loop body
LE: loop exit
PB: predicated region body
PF: predicated region fallthrough
CT: control target
= control target key end

     0   :  { %s1943_s1 = inlined_call_operand.vmem [shape: bf16[128,128], index: 1, kind: input, shape index: {}]   ;;  %s1944_s2 = inlined_call_operand.vmem [shape: f32[1,128], index: 2, kind: input, shape index: {}]   ;;  %s1945_s0 = inlined_call_operand.vmem [shape: bf16[512,128], index: 0, kind: input, shape index: {}]   ;;  %s1946_s3 = inlined_call_operand.vmem [shape: bf16[512,128], index: 3, kind: output, shape index: {}]  }
   0x1   :  { %v1421_v0 = vld [vmem:[%s1943_s1 + $0x38] sm:$0xff]  ;;  %v1420_v1 = vld [vmem:[%s1943_s1 + $0x30] sm:$0xff]  ;;  %v1419_v2 = vld [vmem:[%s1943_s1 + $0x28] sm:$0xff] }
   0x2   :  { %466 = vmatpush.bf16.msra.mxu0 %v1421_v0  ;;  %1613 = vmatpush.bf16.msra.mxu1 %v1421_v0  ;;  %v1418_v3 = vld [vmem:[%s1943_s1 + $0x20] sm:$0xff]  ;;  %v1417_v4 = vld [vmem:[%s1943_s1 + $0x18] sm:$0xff]  ;;  %v1416_v5 = vld [vmem:[%s1943_s1 + $0x10] sm:$0xff] }
   0x3   :  { %1614 = vmatpush.bf16.msra.mxu2 %v1421_v0  ;;  %1615 = vmatpush.bf16.msra.mxu3 %v1421_v0  ;;  %v1415_v6 = vld [vmem:[%s1943_s1 + $0x8] sm:$0xff]  ;;  %v1414_v7 = vld [vmem:[%s1943_s1] sm:$0xff]  ;;  %v1384_v16 = vld [vmem:[%s1945_s0 + $0x10] sm:$0xff] }
   0x4   :  { %v1382_v8 = vld [vmem:[%s1945_s0] sm:$0xff]  ;;  %v1383_v12 = vld [vmem:[%s1945_s0 + $0x8] sm:$0xff]  ;;  %v1392_v17 = vld [vmem:[%s1945_s0 + $0x50] sm:$0xff] }
   0x5   :  { %v1390_v9 = vld [vmem:[%s1945_s0 + $0x40] sm:$0xff]  ;;  %v1391_v13 = vld [vmem:[%s1945_s0 + $0x48] sm:$0xff]  ;;  %v1400_v18 = vld [vmem:[%s1945_s0 + $0x90] sm:$0xff] }
   0x6   :  { %467 = vmatpush.bf16.msra.mxu0 %v1420_v1  ;;  %1616 = vmatpush.bf16.msra.mxu1 %v1420_v1  ;;  %v1398_v10 = vld [vmem:[%s1945_s0 + $0x80] sm:$0xff]  ;;  %v1399_v14 = vld [vmem:[%s1945_s0 + $0x88] sm:$0xff]  ;;  %v1408_v19 = vld [vmem:[%s1945_s0 + $0xd0] sm:$0xff] }
   0x7   :  { %1617 = vmatpush.bf16.msra.mxu2 %v1420_v1  ;;  %1618 = vmatpush.bf16.msra.mxu3 %v1420_v1  ;;  %v1406_v11 = vld [vmem:[%s1945_s0 + $0xc0] sm:$0xff]  ;;  %v1407_v15 = vld [vmem:[%s1945_s0 + $0xc8] sm:$0xff]  ;;  %v1385_v20 = vld [vmem:[%s1945_s0 + $0x18] sm:$0xff] }
   0x8   :  { %v1393_v21 = vld [vmem:[%s1945_s0 + $0x58] sm:$0xff]  ;;  %v1386_v24 = vld [vmem:[%s1945_s0 + $0x20] sm:$0xff]  ;;  %v1387_v28 = vld [vmem:[%s1945_s0 + $0x28] sm:$0xff] }
   0x9   :  { %v1401_v22 = vld [vmem:[%s1945_s0 + $0x98] sm:$0xff]  ;;  %v1394_v25 = vld [vmem:[%s1945_s0 + $0x60] sm:$0xff]  ;;  %v1395_v29 = vld [vmem:[%s1945_s0 + $0x68] sm:$0xff] }
   0xa   :  { %468 = vmatpush.bf16.msra.mxu0 %v1419_v2  ;;  %1619 = vmatpush.bf16.msra.mxu1 %v1419_v2  ;;  %v1409_v23 = vld [vmem:[%s1945_s0 + $0xd8] sm:$0xff]  ;;  %v1402_v26 = vld [vmem:[%s1945_s0 + $0xa0] sm:$0xff]  ;;  %v1403_v30 = vld [vmem:[%s1945_s0 + $0xa8] sm:$0xff] }
   0xb   :  { %1620 = vmatpush.bf16.msra.mxu2 %v1419_v2  ;;  %1621 = vmatpush.bf16.msra.mxu3 %v1419_v2  ;;  %v1410_v27 = vld [vmem:[%s1945_s0 + $0xe0] sm:$0xff]  ;;  %v1411_v31 = vld [vmem:[%s1945_s0 + $0xe8] sm:$0xff]  ;;  %v1388_v32 = vld [vmem:[%s1945_s0 + $0x30] sm:$0xff] }
   0xc   :  { %v1396_v33 = vld [vmem:[%s1945_s0 + $0x70] sm:$0xff]  ;;  %v1389_v36 = vld [vmem:[%s1945_s0 + $0x38] sm:$0xff]  ;;  %v1781_v42 = vld [vmem:[%s1944_s2] ss:$0 sm:$0xff] }
   0xd   :  { %v1404_v34 = vld [vmem:[%s1945_s0 + $0xb0] sm:$0xff]  ;;  %v1397_v37 = vld [vmem:[%s1945_s0 + $0x78] sm:$0xff] }
   0xe   :  { %469 = vmatpush.bf16.msra.mxu0 %v1418_v3  ;;  %1622 = vmatpush.bf16.msra.mxu1 %v1418_v3  ;;  %v1412_v35 = vld [vmem:[%s1945_s0 + $0xf0] sm:$0xff]  ;;  %v1405_v38 = vld [vmem:[%s1945_s0 + $0xb8] sm:$0xff] }
   0xf   :  { %1623 = vmatpush.bf16.msra.mxu2 %v1418_v3  ;;  %1624 = vmatpush.bf16.msra.mxu3 %v1418_v3  ;;  %v1413_v39 = vld [vmem:[%s1945_s0 + $0xf8] sm:$0xff] }
  0x12   :  { %470 = vmatpush.bf16.msra.mxu0 %v1417_v4  ;;  %1625 = vmatpush.bf16.msra.mxu1 %v1417_v4 }
  0x13   :  { %1626 = vmatpush.bf16.msra.mxu2 %v1417_v4  ;;  %1627 = vmatpush.bf16.msra.mxu3 %v1417_v4 }
  0x16   :  { %471 = vmatpush.bf16.msra.mxu0 %v1416_v5  ;;  %1628 = vmatpush.bf16.msra.mxu1 %v1416_v5 }
  0x17   :  { %1629 = vmatpush.bf16.msra.mxu2 %v1416_v5  ;;  %1630 = vmatpush.bf16.msra.mxu3 %v1416_v5 }
  0x1a   :  { %472 = vmatpush.bf16.msra.mxu0 %v1415_v6  ;;  %1631 = vmatpush.bf16.msra.mxu1 %v1415_v6 }
  0x1b   :  { %1632 = vmatpush.bf16.msra.mxu2 %v1415_v6  ;;  %1633 = vmatpush.bf16.msra.mxu3 %v1415_v6 }
  0x1e   :  { %473 = vmatpush.bf16.msra.mxu0 %v1414_v7  ;;  %1634 = vmatpush.bf16.msra.mxu1 %v1414_v7 }
  0x1f   :  { %1635 = vmatpush.bf16.msra.mxu2 %v1414_v7  ;;  %1636 = vmatpush.bf16.msra.mxu3 %v1414_v7 }
  0x21   :  { %474 = vmatmul.bf16.vlgmr.msra.gmra.mxu0 %v1382_v8  ;;  %514 = vmatmul.bf16.vlgmr.msra.gmra.mxu1 %v1390_v9 }
  0x22   :  { %554 = vmatmul.bf16.vlgmr.msra.gmra.mxu2 %v1398_v10  ;;  %594 = vmatmul.bf16.vlgmr.msra.gmra.mxu3 %v1406_v11 }
  0x31   :  { %479 = vmatmul.bf16.gmra.mxu0 %v1383_v12  ;;  %519 = vmatmul.bf16.gmra.mxu1 %v1391_v13 }
  0x32   :  { %559 = vmatmul.bf16.gmra.mxu2 %v1399_v14  ;;  %599 = vmatmul.bf16.gmra.mxu3 %v1407_v15 }
  0x41   :  { %484 = vmatmul.bf16.gmra.mxu0 %v1384_v16  ;;  %524 = vmatmul.bf16.gmra.mxu1 %v1392_v17 }
  0x42   :  { %564 = vmatmul.bf16.gmra.mxu2 %v1400_v18  ;;  %604 = vmatmul.bf16.gmra.mxu3 %v1408_v19 }
  0x51   :  { %489 = vmatmul.bf16.gmra.mxu0 %v1385_v20  ;;  %529 = vmatmul.bf16.gmra.mxu1 %v1393_v21 }
  0x52   :  { %569 = vmatmul.bf16.gmra.mxu2 %v1401_v22  ;;  %609 = vmatmul.bf16.gmra.mxu3 %v1409_v23 }
  0x61   :  { %494 = vmatmul.bf16.gmra.mxu0 %v1386_v24  ;;  %534 = vmatmul.bf16.gmra.mxu1 %v1394_v25 }
  0x62   :  { %574 = vmatmul.bf16.gmra.mxu2 %v1402_v26  ;;  %614 = vmatmul.bf16.gmra.mxu3 %v1410_v27 }
  0x71   :  { %499 = vmatmul.bf16.gmra.mxu0 %v1387_v28  ;;  %539 = vmatmul.bf16.gmra.mxu1 %v1395_v29 }
  0x72   :  { %579 = vmatmul.bf16.gmra.mxu2 %v1403_v30  ;;  %619 = vmatmul.bf16.gmra.mxu3 %v1411_v31 }
  0x81   :  { %504 = vmatmul.bf16.gmra.mxu0 %v1388_v32  ;;  %544 = vmatmul.bf16.gmra.mxu1 %v1396_v33 }
  0x82   :  { %584 = vmatmul.bf16.gmra.mxu2 %v1404_v34  ;;  %624 = vmatmul.bf16.gmra.mxu3 %v1412_v35 }
  0x91   :  { %509 = vmatmul.bf16.gmra.mxu0 %v1389_v36  ;;  %549 = vmatmul.bf16.gmra.mxu1 %v1397_v37 }
  0x92   :  { %589 = vmatmul.bf16.gmra.mxu2 %v1405_v38  ;;  %629 = vmatmul.bf16.gmra.mxu3 %v1413_v39 }
  0x9e   :  { %v475_v40 = vpop.f32.mrf.mxu0  ;;  %v515_v41 = vpop.f32.mrf.mxu1 }
  0x9f   :  { %v834_v43 = vadd.f32 %v1781_v42, %v475_v40  ;;  %v850_v44 = vadd.f32 %v1781_v42, %v515_v41 }
  0xa1   :  { %v962_v49 = vmul.f32 0.2, %v834_v43  ;;  %v978_v50 = vmul.f32 0.2, %v850_v44  ;;  %vm898_vm0 = vcmp.ge.f32.partialorder %v834_v43, 0.0  ;;  %vm914_vm1 = vcmp.ge.f32.partialorder %v850_v44, 0.0 }
  0xa3   :  { %v1026_v57 = vsel %vm898_vm0, %v834_v43, %v962_v49  ;;  %v1042_v58 = vsel %vm914_vm1, %v850_v44, %v978_v50 }
  0xa5   :  { %v555_v45 = vpop.f32.mrf.mxu2  ;;  %v595_v46 = vpop.f32.mrf.mxu3 }
  0xa6   :  { %v477_v47 = vpop.f32.mrf.mxu0  ;;  %v517_v48 = vpop.f32.mrf.mxu1  ;;  %v866_v55 = vadd.f32 %v1781_v42, %v555_v45  ;;  %v882_v56 = vadd.f32 %v1781_v42, %v595_v46 }
  0xa7   :  { %v835_v51 = vadd.f32 %v1781_v42, %v477_v47  ;;  %v851_v52 = vadd.f32 %v1781_v42, %v517_v48 }
  0xa8   :  { %v994_v1 = vmul.f32 0.2, %v866_v55  ;;  %v1010_v2 = vmul.f32 0.2, %v882_v56  ;;  %vm930_vm4 = vcmp.ge.f32.partialorder %v866_v55, 0.0  ;;  %vm946_vm5 = vcmp.ge.f32.partialorder %v882_v56, 0.0 }
  0xa9   :  { %vm899_vm2 = vcmp.ge.f32.partialorder %v835_v51, 0.0  ;;  %v963_v53 = vmul.f32 0.2, %v835_v51  ;;  %vm915_vm3 = vcmp.ge.f32.partialorder %v851_v52, 0.0  ;;  %v979_v54 = vmul.f32 0.2, %v851_v52 }
  0xaa   :  { %v1058_v9 = vsel %vm930_vm4, %v866_v55, %v994_v1  ;;  %v1074_v10 = vsel %vm946_vm5, %v882_v56, %v1010_v2 }
  0xab   :  { %v1027_v59 = vsel %vm899_vm2, %v835_v51, %v963_v53  ;;  %v1043_v60 = vsel %vm915_vm3, %v851_v52, %v979_v54 }
  0xac   :  { %v1425_v61 = vpack.c.bf16 %v1027_v59, %v1026_v57  ;;  %v1465_v62 = vpack.c.bf16 %v1043_v60, %v1042_v58 }
  0xad   :  { %v557_v63 = vpop.f32.mrf.mxu2  ;;  %v597_v0 = vpop.f32.mrf.mxu3 }
  0xae   :  { %1426 = vst [vmem:[%s1946_s3] sm:$0xff] %v1425_v61   ;;  %v867_v3 = vadd.f32 %v1781_v42, %v557_v63  ;;  %v883_v4 = vadd.f32 %v1781_v42, %v597_v0  ;;  %v480_v5 = vpop.f32.mrf.mxu0  ;;  %v520_v6 = vpop.f32.mrf.mxu1 }
  0xaf   :  { %1589 = vst [vmem:[%s1946_s3 + $0x40] sm:$0xff] %v1465_v62   ;;  %v836_v15 = vadd.f32 %v1781_v42, %v480_v5  ;;  %v852_v16 = vadd.f32 %v1781_v42, %v520_v6 }
  0xb0   :  { %vm931_vm6 = vcmp.ge.f32.partialorder %v867_v3, 0.0  ;;  %v995_v7 = vmul.f32 0.2, %v867_v3  ;;  %vm947_vm7 = vcmp.ge.f32.partialorder %v883_v4, 0.0  ;;  %v1011_v8 = vmul.f32 0.2, %v883_v4 }
  0xb1   :  { %v964_v21 = vmul.f32 0.2, %v836_v15  ;;  %v980_v22 = vmul.f32 0.2, %v852_v16  ;;  %vm900_vm8 = vcmp.ge.f32.partialorder %v836_v15, 0.0  ;;  %vm916_vm9 = vcmp.ge.f32.partialorder %v852_v16, 0.0 }
  0xb2   :  { %v1059_v11 = vsel %vm931_vm6, %v867_v3, %v995_v7  ;;  %v1075_v12 = vsel %vm947_vm7, %v883_v4, %v1011_v8 }
  0xb3   :  { %v1505_v13 = vpack.c.bf16 %v1059_v11, %v1058_v9  ;;  %v1545_v14 = vpack.c.bf16 %v1075_v12, %v1074_v10  ;;  %v1028_v29 = vsel %vm900_vm8, %v836_v15, %v964_v21  ;;  %v1044_v30 = vsel %vm916_vm9, %v852_v16, %v980_v22 }
  0xb5   :  { %1597 = vst [vmem:[%s1946_s3 + $0x80] sm:$0xff] %v1505_v13   ;;  %v560_v17 = vpop.f32.mrf.mxu2  ;;  %v600_v18 = vpop.f32.mrf.mxu3 }
  0xb6   :  { %1605 = vst [vmem:[%s1946_s3 + $0xc0] sm:$0xff] %v1545_v14   ;;  %v482_v19 = vpop.f32.mrf.mxu0  ;;  %v522_v20 = vpop.f32.mrf.mxu1  ;;  %v868_v27 = vadd.f32 %v1781_v42, %v560_v17  ;;  %v884_v28 = vadd.f32 %v1781_v42, %v600_v18 }
  0xb7   :  { %v837_v23 = vadd.f32 %v1781_v42, %v482_v19  ;;  %v853_v24 = vadd.f32 %v1781_v42, %v522_v20 }
  0xb8   :  { %v996_v37 = vmul.f32 0.2, %v868_v27  ;;  %v1012_v38 = vmul.f32 0.2, %v884_v28  ;;  %vm932_vm12 = vcmp.ge.f32.partialorder %v868_v27, 0.0  ;;  %vm948_vm13 = vcmp.ge.f32.partialorder %v884_v28, 0.0 }
  0xb9   :  { %vm901_vm10 = vcmp.ge.f32.partialorder %v837_v23, 0.0  ;;  %v965_v25 = vmul.f32 0.2, %v837_v23  ;;  %vm917_vm11 = vcmp.ge.f32.partialorder %v853_v24, 0.0  ;;  %v981_v26 = vmul.f32 0.2, %v853_v24 }
  0xba   :  { %v1060_v46 = vsel %vm932_vm12, %v868_v27, %v996_v37  ;;  %v1076_v47 = vsel %vm948_vm13, %v884_v28, %v1012_v38 }
  0xbb   :  { %v1029_v31 = vsel %vm901_vm10, %v837_v23, %v965_v25  ;;  %v1045_v32 = vsel %vm917_vm11, %v853_v24, %v981_v26 }
  0xbc   :  { %v1430_v33 = vpack.c.bf16 %v1029_v31, %v1028_v29  ;;  %v1470_v34 = vpack.c.bf16 %v1045_v32, %v1044_v30 }
  0xbd   :  { %v562_v35 = vpop.f32.mrf.mxu2  ;;  %v602_v36 = vpop.f32.mrf.mxu3 }
  0xbe   :  { %1582 = vst [vmem:[%s1946_s3 + $0x8] sm:$0xff] %v1430_v33   ;;  %v869_v39 = vadd.f32 %v1781_v42, %v562_v35  ;;  %v885_v40 = vadd.f32 %v1781_v42, %v602_v36  ;;  %v485_v41 = vpop.f32.mrf.mxu0  ;;  %v525_v43 = vpop.f32.mrf.mxu1 }
  0xbf   :  { %1590 = vst [vmem:[%s1946_s3 + $0x48] sm:$0xff] %v1470_v34   ;;  %v838_v52 = vadd.f32 %v1781_v42, %v485_v41  ;;  %v854_v53 = vadd.f32 %v1781_v42, %v525_v43 }
  0xc0   :  { %vm933_vm14 = vcmp.ge.f32.partialorder %v869_v39, 0.0  ;;  %v997_v44 = vmul.f32 0.2, %v869_v39  ;;  %vm949_vm15 = vcmp.ge.f32.partialorder %v885_v40, 0.0  ;;  %v1013_v45 = vmul.f32 0.2, %v885_v40 }
  0xc1   :  { %v966_v58 = vmul.f32 0.2, %v838_v52  ;;  %v982_v59 = vmul.f32 0.2, %v854_v53  ;;  %vm902_vm0 = vcmp.ge.f32.partialorder %v838_v52, 0.0  ;;  %vm918_vm1 = vcmp.ge.f32.partialorder %v854_v53, 0.0 }
  0xc2   :  { %v1061_v48 = vsel %vm933_vm14, %v869_v39, %v997_v44  ;;  %v1077_v49 = vsel %vm949_vm15, %v885_v40, %v1013_v45 }
  0xc3   :  { %v1510_v50 = vpack.c.bf16 %v1061_v48, %v1060_v46  ;;  %v1550_v51 = vpack.c.bf16 %v1077_v49, %v1076_v47  ;;  %v1030_v2 = vsel %vm902_vm0, %v838_v52, %v966_v58  ;;  %v1046_v3 = vsel %vm918_vm1, %v854_v53, %v982_v59 }
  0xc5   :  { %1598 = vst [vmem:[%s1946_s3 + $0x88] sm:$0xff] %v1510_v50   ;;  %v565_v54 = vpop.f32.mrf.mxu2  ;;  %v605_v55 = vpop.f32.mrf.mxu3 }
  0xc6   :  { %1606 = vst [vmem:[%s1946_s3 + $0xc8] sm:$0xff] %v1550_v51   ;;  %v487_v56 = vpop.f32.mrf.mxu0  ;;  %v527_v57 = vpop.f32.mrf.mxu1  ;;  %v870_v0 = vadd.f32 %v1781_v42, %v565_v54  ;;  %v886_v1 = vadd.f32 %v1781_v42, %v605_v55 }
  0xc7   :  { %v839_v60 = vadd.f32 %v1781_v42, %v487_v56  ;;  %v855_v61 = vadd.f32 %v1781_v42, %v527_v57 }
  0xc8   :  { %v998_v10 = vmul.f32 0.2, %v870_v0  ;;  %v1014_v11 = vmul.f32 0.2, %v886_v1  ;;  %vm934_vm4 = vcmp.ge.f32.partialorder %v870_v0, 0.0  ;;  %vm950_vm5 = vcmp.ge.f32.partialorder %v886_v1, 0.0 }
  0xc9   :  { %vm903_vm2 = vcmp.ge.f32.partialorder %v839_v60, 0.0  ;;  %v967_v62 = vmul.f32 0.2, %v839_v60  ;;  %vm919_vm3 = vcmp.ge.f32.partialorder %v855_v61, 0.0  ;;  %v983_v63 = vmul.f32 0.2, %v855_v61 }
  0xca   :  { %v1062_v18 = vsel %vm934_vm4, %v870_v0, %v998_v10  ;;  %v1078_v19 = vsel %vm950_vm5, %v886_v1, %v1014_v11 }
  0xcb   :  { %v1031_v4 = vsel %vm903_vm2, %v839_v60, %v967_v62  ;;  %v1047_v5 = vsel %vm919_vm3, %v855_v61, %v983_v63 }
  0xcc   :  { %v1435_v6 = vpack.c.bf16 %v1031_v4, %v1030_v2  ;;  %v1475_v7 = vpack.c.bf16 %v1047_v5, %v1046_v3 }
  0xcd   :  { %v567_v8 = vpop.f32.mrf.mxu2  ;;  %v607_v9 = vpop.f32.mrf.mxu3 }
  0xce   :  { %1583 = vst [vmem:[%s1946_s3 + $0x10] sm:$0xff] %v1435_v6   ;;  %v871_v12 = vadd.f32 %v1781_v42, %v567_v8  ;;  %v887_v13 = vadd.f32 %v1781_v42, %v607_v9  ;;  %v490_v14 = vpop.f32.mrf.mxu0  ;;  %v530_v15 = vpop.f32.mrf.mxu1 }
  0xcf   :  { %1591 = vst [vmem:[%s1946_s3 + $0x50] sm:$0xff] %v1475_v7   ;;  %v840_v24 = vadd.f32 %v1781_v42, %v490_v14  ;;  %v856_v25 = vadd.f32 %v1781_v42, %v530_v15 }
  0xd0   :  { %vm935_vm6 = vcmp.ge.f32.partialorder %v871_v12, 0.0  ;;  %v999_v16 = vmul.f32 0.2, %v871_v12  ;;  %vm951_vm7 = vcmp.ge.f32.partialorder %v887_v13, 0.0  ;;  %v1015_v17 = vmul.f32 0.2, %v887_v13 }
  0xd1   :  { %v968_v30 = vmul.f32 0.2, %v840_v24  ;;  %v984_v31 = vmul.f32 0.2, %v856_v25  ;;  %vm904_vm8 = vcmp.ge.f32.partialorder %v840_v24, 0.0  ;;  %vm920_vm9 = vcmp.ge.f32.partialorder %v856_v25, 0.0 }
  0xd2   :  { %v1063_v20 = vsel %vm935_vm6, %v871_v12, %v999_v16  ;;  %v1079_v21 = vsel %vm951_vm7, %v887_v13, %v1015_v17 }
  0xd3   :  { %v1515_v22 = vpack.c.bf16 %v1063_v20, %v1062_v18  ;;  %v1555_v23 = vpack.c.bf16 %v1079_v21, %v1078_v19  ;;  %v1032_v38 = vsel %vm904_vm8, %v840_v24, %v968_v30  ;;  %v1048_v39 = vsel %vm920_vm9, %v856_v25, %v984_v31 }
  0xd5   :  { %1599 = vst [vmem:[%s1946_s3 + $0x90] sm:$0xff] %v1515_v22   ;;  %v570_v26 = vpop.f32.mrf.mxu2  ;;  %v610_v27 = vpop.f32.mrf.mxu3 }
  0xd6   :  { %1607 = vst [vmem:[%s1946_s3 + $0xd0] sm:$0xff] %v1555_v23   ;;  %v492_v28 = vpop.f32.mrf.mxu0  ;;  %v532_v29 = vpop.f32.mrf.mxu1  ;;  %v872_v36 = vadd.f32 %v1781_v42, %v570_v26  ;;  %v888_v37 = vadd.f32 %v1781_v42, %v610_v27 }
  0xd7   :  { %v841_v32 = vadd.f32 %v1781_v42, %v492_v28  ;;  %v857_v33 = vadd.f32 %v1781_v42, %v532_v29 }
  0xd8   :  { %v1000_v47 = vmul.f32 0.2, %v872_v36  ;;  %v1016_v48 = vmul.f32 0.2, %v888_v37  ;;  %vm936_vm12 = vcmp.ge.f32.partialorder %v872_v36, 0.0  ;;  %vm952_vm13 = vcmp.ge.f32.partialorder %v888_v37, 0.0 }
  0xd9   :  { %vm905_vm10 = vcmp.ge.f32.partialorder %v841_v32, 0.0  ;;  %v969_v34 = vmul.f32 0.2, %v841_v32  ;;  %vm921_vm11 = vcmp.ge.f32.partialorder %v857_v33, 0.0  ;;  %v985_v35 = vmul.f32 0.2, %v857_v33 }
  0xda   :  { %v1064_v55 = vsel %vm936_vm12, %v872_v36, %v1000_v47  ;;  %v1080_v56 = vsel %vm952_vm13, %v888_v37, %v1016_v48 }
  0xdb   :  { %v1033_v40 = vsel %vm905_vm10, %v841_v32, %v969_v34  ;;  %v1049_v41 = vsel %vm921_vm11, %v857_v33, %v985_v35 }
  0xdc   :  { %v1440_v43 = vpack.c.bf16 %v1033_v40, %v1032_v38  ;;  %v1480_v44 = vpack.c.bf16 %v1049_v41, %v1048_v39 }
  0xdd   :  { %v572_v45 = vpop.f32.mrf.mxu2  ;;  %v612_v46 = vpop.f32.mrf.mxu3 }
  0xde   :  { %1584 = vst [vmem:[%s1946_s3 + $0x18] sm:$0xff] %v1440_v43   ;;  %v873_v49 = vadd.f32 %v1781_v42, %v572_v45  ;;  %v889_v50 = vadd.f32 %v1781_v42, %v612_v46  ;;  %v495_v51 = vpop.f32.mrf.mxu0  ;;  %v535_v52 = vpop.f32.mrf.mxu1 }
  0xdf   :  { %1592 = vst [vmem:[%s1946_s3 + $0x58] sm:$0xff] %v1480_v44   ;;  %v842_v61 = vadd.f32 %v1781_v42, %v495_v51  ;;  %v858_v62 = vadd.f32 %v1781_v42, %v535_v52 }
  0xe0   :  { %vm937_vm14 = vcmp.ge.f32.partialorder %v873_v49, 0.0  ;;  %v1001_v53 = vmul.f32 0.2, %v873_v49  ;;  %vm953_vm15 = vcmp.ge.f32.partialorder %v889_v50, 0.0  ;;  %v1017_v54 = vmul.f32 0.2, %v889_v50 }
  0xe1   :  { %v970_v3 = vmul.f32 0.2, %v842_v61  ;;  %v986_v4 = vmul.f32 0.2, %v858_v62  ;;  %vm906_vm0 = vcmp.ge.f32.partialorder %v842_v61, 0.0  ;;  %vm922_vm1 = vcmp.ge.f32.partialorder %v858_v62, 0.0 }
  0xe2   :  { %v1065_v57 = vsel %vm937_vm14, %v873_v49, %v1001_v53  ;;  %v1081_v58 = vsel %vm953_vm15, %v889_v50, %v1017_v54 }
  0xe3   :  { %v1520_v59 = vpack.c.bf16 %v1065_v57, %v1064_v55  ;;  %v1560_v60 = vpack.c.bf16 %v1081_v58, %v1080_v56  ;;  %v1034_v11 = vsel %vm906_vm0, %v842_v61, %v970_v3  ;;  %v1050_v12 = vsel %vm922_vm1, %v858_v62, %v986_v4 }
  0xe5   :  { %1600 = vst [vmem:[%s1946_s3 + $0x98] sm:$0xff] %v1520_v59   ;;  %v575_v63 = vpop.f32.mrf.mxu2  ;;  %v615_v0 = vpop.f32.mrf.mxu3 }
  0xe6   :  { %1608 = vst [vmem:[%s1946_s3 + $0xd8] sm:$0xff] %v1560_v60   ;;  %v497_v1 = vpop.f32.mrf.mxu0  ;;  %v537_v2 = vpop.f32.mrf.mxu1  ;;  %v874_v9 = vadd.f32 %v1781_v42, %v575_v63  ;;  %v890_v10 = vadd.f32 %v1781_v42, %v615_v0 }
  0xe7   :  { %v843_v5 = vadd.f32 %v1781_v42, %v497_v1  ;;  %v859_v6 = vadd.f32 %v1781_v42, %v537_v2 }
  0xe8   :  { %v1002_v19 = vmul.f32 0.2, %v874_v9  ;;  %v1018_v20 = vmul.f32 0.2, %v890_v10  ;;  %vm938_vm4 = vcmp.ge.f32.partialorder %v874_v9, 0.0  ;;  %vm954_vm5 = vcmp.ge.f32.partialorder %v890_v10, 0.0 }
  0xe9   :  { %vm907_vm2 = vcmp.ge.f32.partialorder %v843_v5, 0.0  ;;  %v971_v7 = vmul.f32 0.2, %v843_v5  ;;  %vm923_vm3 = vcmp.ge.f32.partialorder %v859_v6, 0.0  ;;  %v987_v8 = vmul.f32 0.2, %v859_v6 }
  0xea   :  { %v1066_v27 = vsel %vm938_vm4, %v874_v9, %v1002_v19  ;;  %v1082_v28 = vsel %vm954_vm5, %v890_v10, %v1018_v20 }
  0xeb   :  { %v1035_v13 = vsel %vm907_vm2, %v843_v5, %v971_v7  ;;  %v1051_v14 = vsel %vm923_vm3, %v859_v6, %v987_v8 }
  0xec   :  { %v1445_v15 = vpack.c.bf16 %v1035_v13, %v1034_v11  ;;  %v1485_v16 = vpack.c.bf16 %v1051_v14, %v1050_v12 }
  0xed   :  { %v577_v17 = vpop.f32.mrf.mxu2  ;;  %v617_v18 = vpop.f32.mrf.mxu3 }
  0xee   :  { %1585 = vst [vmem:[%s1946_s3 + $0x20] sm:$0xff] %v1445_v15   ;;  %v875_v21 = vadd.f32 %v1781_v42, %v577_v17  ;;  %v891_v22 = vadd.f32 %v1781_v42, %v617_v18  ;;  %v500_v23 = vpop.f32.mrf.mxu0  ;;  %v540_v24 = vpop.f32.mrf.mxu1 }
  0xef   :  { %1593 = vst [vmem:[%s1946_s3 + $0x60] sm:$0xff] %v1485_v16   ;;  %v844_v33 = vadd.f32 %v1781_v42, %v500_v23  ;;  %v860_v34 = vadd.f32 %v1781_v42, %v540_v24 }
  0xf0   :  { %vm939_vm6 = vcmp.ge.f32.partialorder %v875_v21, 0.0  ;;  %v1003_v25 = vmul.f32 0.2, %v875_v21  ;;  %vm955_vm7 = vcmp.ge.f32.partialorder %v891_v22, 0.0  ;;  %v1019_v26 = vmul.f32 0.2, %v891_v22 }
  0xf1   :  { %v972_v39 = vmul.f32 0.2, %v844_v33  ;;  %v988_v40 = vmul.f32 0.2, %v860_v34  ;;  %vm908_vm8 = vcmp.ge.f32.partialorder %v844_v33, 0.0  ;;  %vm924_vm9 = vcmp.ge.f32.partialorder %v860_v34, 0.0 }
  0xf2   :  { %v1067_v29 = vsel %vm939_vm6, %v875_v21, %v1003_v25  ;;  %v1083_v30 = vsel %vm955_vm7, %v891_v22, %v1019_v26 }
  0xf3   :  { %v1525_v31 = vpack.c.bf16 %v1067_v29, %v1066_v27  ;;  %v1565_v32 = vpack.c.bf16 %v1083_v30, %v1082_v28  ;;  %v1036_v48 = vsel %vm908_vm8, %v844_v33, %v972_v39  ;;  %v1052_v49 = vsel %vm924_vm9, %v860_v34, %v988_v40 }
  0xf5   :  { %1601 = vst [vmem:[%s1946_s3 + $0xa0] sm:$0xff] %v1525_v31   ;;  %v580_v35 = vpop.f32.mrf.mxu2  ;;  %v620_v36 = vpop.f32.mrf.mxu3 }
  0xf6   :  { %1609 = vst [vmem:[%s1946_s3 + $0xe0] sm:$0xff] %v1565_v32   ;;  %v502_v37 = vpop.f32.mrf.mxu0  ;;  %v542_v38 = vpop.f32.mrf.mxu1  ;;  %v876_v46 = vadd.f32 %v1781_v42, %v580_v35  ;;  %v892_v47 = vadd.f32 %v1781_v42, %v620_v36 }
  0xf7   :  { %v845_v41 = vadd.f32 %v1781_v42, %v502_v37  ;;  %v861_v43 = vadd.f32 %v1781_v42, %v542_v38 }
  0xf8   :  { %v1004_v56 = vmul.f32 0.2, %v876_v46  ;;  %v1020_v57 = vmul.f32 0.2, %v892_v47  ;;  %vm940_vm12 = vcmp.ge.f32.partialorder %v876_v46, 0.0  ;;  %vm956_vm13 = vcmp.ge.f32.partialorder %v892_v47, 0.0 }
  0xf9   :  { %vm909_vm10 = vcmp.ge.f32.partialorder %v845_v41, 0.0  ;;  %v973_v44 = vmul.f32 0.2, %v845_v41  ;;  %vm925_vm11 = vcmp.ge.f32.partialorder %v861_v43, 0.0  ;;  %v989_v45 = vmul.f32 0.2, %v861_v43 }
  0xfa   :  { %v1068_v0 = vsel %vm940_vm12, %v876_v46, %v1004_v56  ;;  %v1084_v1 = vsel %vm956_vm13, %v892_v47, %v1020_v57 }
  0xfb   :  { %v1037_v50 = vsel %vm909_vm10, %v845_v41, %v973_v44  ;;  %v1053_v51 = vsel %vm925_vm11, %v861_v43, %v989_v45 }
  0xfc   :  { %v1450_v52 = vpack.c.bf16 %v1037_v50, %v1036_v48  ;;  %v1490_v53 = vpack.c.bf16 %v1053_v51, %v1052_v49 }
  0xfd   :  { %v582_v54 = vpop.f32.mrf.mxu2  ;;  %v622_v55 = vpop.f32.mrf.mxu3 }
  0xfe   :  { %1586 = vst [vmem:[%s1946_s3 + $0x28] sm:$0xff] %v1450_v52   ;;  %v877_v58 = vadd.f32 %v1781_v42, %v582_v54  ;;  %v893_v59 = vadd.f32 %v1781_v42, %v622_v55  ;;  %v505_v60 = vpop.f32.mrf.mxu0  ;;  %v545_v61 = vpop.f32.mrf.mxu1 }
  0xff   :  { %1594 = vst [vmem:[%s1946_s3 + $0x68] sm:$0xff] %v1490_v53   ;;  %v846_v6 = vadd.f32 %v1781_v42, %v505_v60  ;;  %v862_v7 = vadd.f32 %v1781_v42, %v545_v61 }
 0x100   :  { %vm941_vm14 = vcmp.ge.f32.partialorder %v877_v58, 0.0  ;;  %v1005_v62 = vmul.f32 0.2, %v877_v58  ;;  %vm957_vm15 = vcmp.ge.f32.partialorder %v893_v59, 0.0  ;;  %v1021_v63 = vmul.f32 0.2, %v893_v59 }
 0x101   :  { %v974_v12 = vmul.f32 0.2, %v846_v6  ;;  %v990_v13 = vmul.f32 0.2, %v862_v7  ;;  %vm910_vm0 = vcmp.ge.f32.partialorder %v846_v6, 0.0  ;;  %vm926_vm1 = vcmp.ge.f32.partialorder %v862_v7, 0.0 }
 0x102   :  { %v1069_v2 = vsel %vm941_vm14, %v877_v58, %v1005_v62  ;;  %v1085_v3 = vsel %vm957_vm15, %v893_v59, %v1021_v63 }
 0x103   :  { %v1530_v4 = vpack.c.bf16 %v1069_v2, %v1068_v0  ;;  %v1570_v5 = vpack.c.bf16 %v1085_v3, %v1084_v1  ;;  %v1038_v20 = vsel %vm910_vm0, %v846_v6, %v974_v12  ;;  %v1054_v21 = vsel %vm926_vm1, %v862_v7, %v990_v13 }
 0x105   :  { %1602 = vst [vmem:[%s1946_s3 + $0xa8] sm:$0xff] %v1530_v4   ;;  %v585_v8 = vpop.f32.mrf.mxu2  ;;  %v625_v9 = vpop.f32.mrf.mxu3 }
 0x106   :  { %1610 = vst [vmem:[%s1946_s3 + $0xe8] sm:$0xff] %v1570_v5   ;;  %v507_v10 = vpop.f32.mrf.mxu0  ;;  %v547_v11 = vpop.f32.mrf.mxu1  ;;  %v878_v18 = vadd.f32 %v1781_v42, %v585_v8  ;;  %v894_v19 = vadd.f32 %v1781_v42, %v625_v9 }
 0x107   :  { %v847_v14 = vadd.f32 %v1781_v42, %v507_v10  ;;  %v863_v15 = vadd.f32 %v1781_v42, %v547_v11 }
 0x108   :  { %v1006_v28 = vmul.f32 0.2, %v878_v18  ;;  %v1022_v29 = vmul.f32 0.2, %v894_v19  ;;  %vm942_vm4 = vcmp.ge.f32.partialorder %v878_v18, 0.0  ;;  %vm958_vm5 = vcmp.ge.f32.partialorder %v894_v19, 0.0 }
 0x109   :  { %vm911_vm2 = vcmp.ge.f32.partialorder %v847_v14, 0.0  ;;  %v975_v16 = vmul.f32 0.2, %v847_v14  ;;  %vm927_vm3 = vcmp.ge.f32.partialorder %v863_v15, 0.0  ;;  %v991_v17 = vmul.f32 0.2, %v863_v15 }
 0x10a   :  { %v1070_v36 = vsel %vm942_vm4, %v878_v18, %v1006_v28  ;;  %v1086_v37 = vsel %vm958_vm5, %v894_v19, %v1022_v29 }
 0x10b   :  { %v1039_v22 = vsel %vm911_vm2, %v847_v14, %v975_v16  ;;  %v1055_v23 = vsel %vm927_vm3, %v863_v15, %v991_v17 }
 0x10c   :  { %v1455_v24 = vpack.c.bf16 %v1039_v22, %v1038_v20  ;;  %v1495_v25 = vpack.c.bf16 %v1055_v23, %v1054_v21 }
 0x10d   :  { %v587_v26 = vpop.f32.mrf.mxu2  ;;  %v627_v27 = vpop.f32.mrf.mxu3 }
 0x10e   :  { %1587 = vst [vmem:[%s1946_s3 + $0x30] sm:$0xff] %v1455_v24   ;;  %v879_v30 = vadd.f32 %v1781_v42, %v587_v26  ;;  %v895_v31 = vadd.f32 %v1781_v42, %v627_v27  ;;  %v510_v32 = vpop.f32.mrf.mxu0  ;;  %v550_v33 = vpop.f32.mrf.mxu1 }
 0x10f   :  { %1595 = vst [vmem:[%s1946_s3 + $0x70] sm:$0xff] %v1495_v25   ;;  %v848_v43 = vadd.f32 %v1781_v42, %v510_v32  ;;  %v864_v44 = vadd.f32 %v1781_v42, %v550_v33 }
 0x110   :  { %vm943_vm6 = vcmp.ge.f32.partialorder %v879_v30, 0.0  ;;  %v1007_v34 = vmul.f32 0.2, %v879_v30  ;;  %vm959_vm7 = vcmp.ge.f32.partialorder %v895_v31, 0.0  ;;  %v1023_v35 = vmul.f32 0.2, %v895_v31 }
 0x111   :  { %v976_v49 = vmul.f32 0.2, %v848_v43  ;;  %v992_v50 = vmul.f32 0.2, %v864_v44  ;;  %vm912_vm8 = vcmp.ge.f32.partialorder %v848_v43, 0.0  ;;  %vm928_vm9 = vcmp.ge.f32.partialorder %v864_v44, 0.0 }
 0x112   :  { %v1071_v38 = vsel %vm943_vm6, %v879_v30, %v1007_v34  ;;  %v1087_v39 = vsel %vm959_vm7, %v895_v31, %v1023_v35 }
 0x113   :  { %v1535_v40 = vpack.c.bf16 %v1071_v38, %v1070_v36  ;;  %v1575_v41 = vpack.c.bf16 %v1087_v39, %v1086_v37  ;;  %v1040_v57 = vsel %vm912_vm8, %v848_v43, %v976_v49  ;;  %v1056_v58 = vsel %vm928_vm9, %v864_v44, %v992_v50 }
 0x115   :  { %1603 = vst [vmem:[%s1946_s3 + $0xb0] sm:$0xff] %v1535_v40   ;;  %v590_v45 = vpop.f32.mrf.mxu2  ;;  %v630_v46 = vpop.f32.mrf.mxu3 }
 0x116   :  { %1611 = vst [vmem:[%s1946_s3 + $0xf0] sm:$0xff] %v1575_v41   ;;  %v512_v47 = vpop.f32.mrf.mxu0  ;;  %v552_v48 = vpop.f32.mrf.mxu1  ;;  %v880_v55 = vadd.f32 %v1781_v42, %v590_v45  ;;  %v896_v56 = vadd.f32 %v1781_v42, %v630_v46 }
 0x117   :  { %v849_v51 = vadd.f32 %v1781_v42, %v512_v47  ;;  %v865_v52 = vadd.f32 %v1781_v42, %v552_v48 }
 0x118   :  { %v1008_v1 = vmul.f32 0.2, %v880_v55  ;;  %v1024_v2 = vmul.f32 0.2, %v896_v56  ;;  %vm944_vm12 = vcmp.ge.f32.partialorder %v880_v55, 0.0  ;;  %vm960_vm13 = vcmp.ge.f32.partialorder %v896_v56, 0.0 }
 0x119   :  { %vm913_vm10 = vcmp.ge.f32.partialorder %v849_v51, 0.0  ;;  %v977_v53 = vmul.f32 0.2, %v849_v51  ;;  %vm929_vm11 = vcmp.ge.f32.partialorder %v865_v52, 0.0  ;;  %v993_v54 = vmul.f32 0.2, %v865_v52 }
 0x11a   :  { %v1072_v7 = vsel %vm944_vm12, %v880_v55, %v1008_v1  ;;  %v1088_v8 = vsel %vm960_vm13, %v896_v56, %v1024_v2 }
 0x11b   :  { %v1041_v59 = vsel %vm913_vm10, %v849_v51, %v977_v53  ;;  %v1057_v60 = vsel %vm929_vm11, %v865_v52, %v993_v54 }
 0x11c   :  { %v1460_v61 = vpack.c.bf16 %v1041_v59, %v1040_v57  ;;  %v1500_v62 = vpack.c.bf16 %v1057_v60, %v1056_v58 }
 0x11d   :  { %v592_v63 = vpop.f32.mrf.mxu2  ;;  %v632_v0 = vpop.f32.mrf.mxu3 }
 0x11e   :  { %1588 = vst [vmem:[%s1946_s3 + $0x38] sm:$0xff] %v1460_v61   ;;  %v881_v3 = vadd.f32 %v1781_v42, %v592_v63  ;;  %v897_v4 = vadd.f32 %v1781_v42, %v632_v0 }
 0x11f   :  { %1596 = vst [vmem:[%s1946_s3 + $0x78] sm:$0xff] %v1500_v62  }
 0x120   :  { %vm945_vm14 = vcmp.ge.f32.partialorder %v881_v3, 0.0  ;;  %v1009_v5 = vmul.f32 0.2, %v881_v3  ;;  %vm961_vm15 = vcmp.ge.f32.partialorder %v897_v4, 0.0  ;;  %v1025_v6 = vmul.f32 0.2, %v897_v4 }
 0x122   :  { %v1073_v9 = vsel %vm945_vm14, %v881_v3, %v1009_v5  ;;  %v1089_v10 = vsel %vm961_vm15, %v897_v4, %v1025_v6 }
 0x123   :  { %v1540_v11 = vpack.c.bf16 %v1073_v9, %v1072_v7  ;;  %v1580_v12 = vpack.c.bf16 %v1089_v10, %v1088_v8 }
 0x125   :  { %1604 = vst [vmem:[%s1946_s3 + $0xb8] sm:$0xff] %v1540_v11  }
 0x126   :  { %1612 = vst [vmem:[%s1946_s3 + $0xf8] sm:$0xff] %v1580_v12  }

// kernel: discriminator_forward.10
= control target key start
LH: loop header
LB: loop body
LE: loop exit
PB: predicated region body
PF: predicated region fallthrough
CT: control target
= control target key end

     0   :  { %s368_s0 = inlined_call_operand.vmem [shape: bf16[128,128], index: 0, kind: input, shape index: {}]   ;;  %s369_s1 = inlined_call_operand.vmem [shape: f32[1,128], index: 1, kind: input, shape index: {}]   ;;  %s370_s2 = inlined_call_operand.vmem [shape: f32[1,128], index: 2, kind: input, shape index: {}]   ;;  %s371_s3 = inlined_call_operand.vmem [shape: bf16[128,128], index: 3, kind: output, shape index: {}]  }
   0x1   :  { %v171_v0 = vld [vmem:[%s368_s0] sm:$0xff]   ;;  %v242_v5 = vld [vmem:[%s368_s0 + $0x8] sm:$0xff]   ;;  %v243_v8 = vld [vmem:[%s368_s0 + $0x10] sm:$0xff]  }
   0x2   :  { %v284_v1 = vld [vmem:[%s369_s1] ss:$0 sm:$0xff]  ;;  %v172_v2 = vunpack.c.l.bf16 %v171_v0  ;;  %v173_v3 = vunpack.c.h.bf16 %v171_v0  ;;  %v176_v6 = vunpack.c.l.bf16 %v242_v5  ;;  %v177_v7 = vunpack.c.h.bf16 %v242_v5  ;;  %v244_v9 = vld [vmem:[%s368_s0 + $0x18] sm:$0xff]   ;;  %v246_v39 = vld [vmem:[%s368_s0 + $0x28] sm:$0xff]  }
   0x3   :  { %v289_v4 = vld [vmem:[%s370_s2] ss:$0 sm:$0xff]  ;;  %v180_v12 = vunpack.c.l.bf16 %v243_v8  ;;  %v181_v13 = vunpack.c.h.bf16 %v243_v8  ;;  %v184_v16 = vunpack.c.l.bf16 %v244_v9  ;;  %v185_v17 = vunpack.c.h.bf16 %v244_v9  ;;  %v247_v49 = vld [vmem:[%s368_s0 + $0x30] sm:$0xff]   ;;  %v248_v57 = vld [vmem:[%s368_s0 + $0x38] sm:$0xff]  }
   0x4   :  { %v50_v10 = vmul.f32 %v284_v1, %v172_v2  ;;  %v51_v11 = vmul.f32 %v284_v1, %v173_v3  ;;  %v52_v14 = vmul.f32 %v284_v1, %v176_v6  ;;  %v53_v15 = vmul.f32 %v284_v1, %v177_v7  ;;  %v245_v38 = vld [vmem:[%s368_s0 + $0x20] sm:$0xff]  }
   0x5   :  { %v54_v20 = vmul.f32 %v284_v1, %v180_v12  ;;  %v55_v21 = vmul.f32 %v284_v1, %v181_v13  ;;  %v56_v24 = vmul.f32 %v284_v1, %v184_v16  ;;  %v57_v25 = vmul.f32 %v284_v1, %v185_v17 }
   0x6   :  { %v70_v18 = vadd.f32 %v289_v4, %v50_v10  ;;  %v71_v19 = vadd.f32 %v289_v4, %v51_v11  ;;  %v72_v22 = vadd.f32 %v289_v4, %v52_v14  ;;  %v73_v23 = vadd.f32 %v289_v4, %v53_v15 }
   0x7   :  { %v74_v32 = vadd.f32 %v289_v4, %v54_v20  ;;  %v75_v33 = vadd.f32 %v289_v4, %v55_v21  ;;  %v76_v37 = vadd.f32 %v289_v4, %v56_v24  ;;  %v77_v43 = vadd.f32 %v289_v4, %v57_v25 }
   0x8   :  { %vm86_vm0 = vcmp.ge.f32.partialorder %v70_v18, 0.0  ;;  %vm87_vm1 = vcmp.ge.f32.partialorder %v71_v19, 0.0  ;;  %v102_v26 = vmul.f32 0.2, %v70_v18  ;;  %v103_v27 = vmul.f32 0.2, %v71_v19 }
   0x9   :  { %vm88_vm2 = vcmp.ge.f32.partialorder %v72_v22, 0.0  ;;  %vm89_vm3 = vcmp.ge.f32.partialorder %v73_v23, 0.0  ;;  %v104_v28 = vmul.f32 0.2, %v72_v22  ;;  %v105_v29 = vmul.f32 0.2, %v73_v23 }
   0xa   :  { %v118_v30 = vsel %vm86_vm0, %v70_v18, %v102_v26  ;;  %v119_v31 = vsel %vm87_vm1, %v71_v19, %v103_v27  ;;  %vm90_vm4 = vcmp.ge.f32.partialorder %v74_v32, 0.0  ;;  %vm91_vm5 = vcmp.ge.f32.partialorder %v75_v33, 0.0 }
   0xb   :  { %v205_v34 = vpack.c.bf16 %v119_v31, %v118_v30  ;;  %v120_v35 = vsel %vm88_vm2, %v72_v22, %v104_v28  ;;  %v121_v36 = vsel %vm89_vm3, %v73_v23, %v105_v29  ;;  %v106_v41 = vmul.f32 0.2, %v74_v32 }
   0xc   :  { %v210_v40 = vpack.c.bf16 %v121_v36, %v120_v35  ;;  %v107_v42 = vmul.f32 0.2, %v75_v33  ;;  %vm92_vm6 = vcmp.ge.f32.partialorder %v76_v37, 0.0  ;;  %v108_v44 = vmul.f32 0.2, %v76_v37 }
   0xd   :  { %206 = vst [vmem:[%s371_s3] sm:$0xff] %v205_v34   ;;  %v122_v45 = vsel %vm90_vm4, %v74_v32, %v106_v41  ;;  %v188_v46 = vunpack.c.l.bf16 %v245_v38  ;;  %v189_v47 = vunpack.c.h.bf16 %v245_v38  ;;  %v192_v48 = vunpack.c.l.bf16 %v246_v39 }
   0xe   :  { %249 = vst [vmem:[%s371_s3 + $0x8] sm:$0xff] %v210_v40   ;;  %v123_v50 = vsel %vm91_vm5, %v75_v33, %v107_v42  ;;  %vm93_vm7 = vcmp.ge.f32.partialorder %v77_v43, 0.0  ;;  %v109_v51 = vmul.f32 0.2, %v77_v43  ;;  %v124_v52 = vsel %vm92_vm6, %v76_v37, %v108_v44 }
   0xf   :  { %v215_v53 = vpack.c.bf16 %v123_v50, %v122_v45  ;;  %v58_v54 = vmul.f32 %v284_v1, %v188_v46  ;;  %v59_v55 = vmul.f32 %v284_v1, %v189_v47  ;;  %v193_v56 = vunpack.c.h.bf16 %v246_v39 }
  0x10   :  { %v125_v58 = vsel %vm93_vm7, %v77_v43, %v109_v51  ;;  %v60_v59 = vmul.f32 %v284_v1, %v192_v48  ;;  %v196_v60 = vunpack.c.l.bf16 %v247_v49  ;;  %v197_v61 = vunpack.c.h.bf16 %v247_v49 }
  0x11   :  { %250 = vst [vmem:[%s371_s3 + $0x10] sm:$0xff] %v215_v53   ;;  %v220_v62 = vpack.c.bf16 %v125_v58, %v124_v52  ;;  %v78_v63 = vadd.f32 %v289_v4, %v58_v54  ;;  %v79_v0 = vadd.f32 %v289_v4, %v59_v55  ;;  %v61_v2 = vmul.f32 %v284_v1, %v193_v56 }
  0x12   :  { %v80_v3 = vadd.f32 %v289_v4, %v60_v59  ;;  %v62_v5 = vmul.f32 %v284_v1, %v196_v60  ;;  %v63_v6 = vmul.f32 %v284_v1, %v197_v61  ;;  %v200_v7 = vunpack.c.l.bf16 %v248_v57 }
  0x13   :  { %251 = vst [vmem:[%s371_s3 + $0x18] sm:$0xff] %v220_v62   ;;  %vm94_vm8 = vcmp.ge.f32.partialorder %v78_v63, 0.0  ;;  %vm95_vm9 = vcmp.ge.f32.partialorder %v79_v0, 0.0  ;;  %v110_v8 = vmul.f32 0.2, %v78_v63  ;;  %v81_v9 = vadd.f32 %v289_v4, %v61_v2 }
  0x14   :  { %v111_v10 = vmul.f32 0.2, %v79_v0  ;;  %vm96_vm10 = vcmp.ge.f32.partialorder %v80_v3, 0.0  ;;  %v112_v11 = vmul.f32 0.2, %v80_v3  ;;  %v82_v12 = vadd.f32 %v289_v4, %v62_v5 }
  0x15   :  { %v126_v13 = vsel %vm94_vm8, %v78_v63, %v110_v8  ;;  %vm97_vm11 = vcmp.ge.f32.partialorder %v81_v9, 0.0  ;;  %v113_v14 = vmul.f32 0.2, %v81_v9  ;;  %v83_v15 = vadd.f32 %v289_v4, %v63_v6 }
  0x16   :  { %v127_v16 = vsel %vm95_vm9, %v79_v0, %v111_v10  ;;  %v128_v17 = vsel %vm96_vm10, %v80_v3, %v112_v11  ;;  %vm98_vm12 = vcmp.ge.f32.partialorder %v82_v12, 0.0  ;;  %v114_v18 = vmul.f32 0.2, %v82_v12 }
  0x17   :  { %v225_v19 = vpack.c.bf16 %v127_v16, %v126_v13  ;;  %v129_v20 = vsel %vm97_vm11, %v81_v9, %v113_v14  ;;  %vm99_vm13 = vcmp.ge.f32.partialorder %v83_v15, 0.0  ;;  %v115_v21 = vmul.f32 0.2, %v83_v15 }
  0x18   :  { %v230_v22 = vpack.c.bf16 %v129_v20, %v128_v17  ;;  %v130_v23 = vsel %vm98_vm12, %v82_v12, %v114_v18  ;;  %v201_v24 = vunpack.c.h.bf16 %v248_v57  ;;  %v64_v25 = vmul.f32 %v284_v1, %v200_v7 }
  0x19   :  { %252 = vst [vmem:[%s371_s3 + $0x20] sm:$0xff] %v225_v19   ;;  %v131_v26 = vsel %vm99_vm13, %v83_v15, %v115_v21 }
  0x1a   :  { %253 = vst [vmem:[%s371_s3 + $0x28] sm:$0xff] %v230_v22   ;;  %v235_v27 = vpack.c.bf16 %v131_v26, %v130_v23  ;;  %v65_v28 = vmul.f32 %v284_v1, %v201_v24  ;;  %v84_v29 = vadd.f32 %v289_v4, %v64_v25 }
  0x1c   :  { %254 = vst [vmem:[%s371_s3 + $0x30] sm:$0xff] %v235_v27   ;;  %v85_v30 = vadd.f32 %v289_v4, %v65_v28  ;;  %vm100_vm14 = vcmp.ge.f32.partialorder %v84_v29, 0.0  ;;  %v116_v31 = vmul.f32 0.2, %v84_v29 }
  0x1e   :  { %vm101_vm15 = vcmp.ge.f32.partialorder %v85_v30, 0.0  ;;  %v117_v32 = vmul.f32 0.2, %v85_v30  ;;  %v132_v33 = vsel %vm100_vm14, %v84_v29, %v116_v31 }
  0x20   :  { %v133_v34 = vsel %vm101_vm15, %v85_v30, %v117_v32 }
  0x21   :  { %v240_v35 = vpack.c.bf16 %v133_v34, %v132_v33 }
  0x23   :  { %255 = vst [vmem:[%s371_s3 + $0x38] sm:$0xff] %v240_v35  }

// kernel: discriminator_forward.9
= control target key start
LH: loop header
LB: loop body
LE: loop exit
PB: predicated region body
PF: predicated region fallthrough
CT: control target
= control target key end

     0   :  { %s2967_s1 = inlined_call_operand.vmem [shape: bf16[1024,128], index: 1, kind: input, shape index: {}]   ;;  %s2968_s0 = inlined_call_operand.vmem [shape: bf16[128,1024], index: 0, kind: input, shape index: {}]   ;;  %s2969_s2 = inlined_call_operand.vmem [shape: f32[1,128], index: 2, kind: input, shape index: {}]   ;;  %s2970_s3 = inlined_call_operand.vmem [shape: bf16[128,128], index: 3, kind: output, shape index: {0}]   ;;  %s2971_s4 = inlined_call_operand.vmem [shape: f32[8,128], index: 4, kind: output, shape index: {1}]  }
   0x1   :  { %v2165_v0 = vld [vmem:[%s2967_s1 + $0x38] sm:$0xff]  ;;  %v2164_v4 = vld [vmem:[%s2967_s1 + $0x30] sm:$0xff]  ;;  %v2163_v8 = vld [vmem:[%s2967_s1 + $0x28] sm:$0xff] }
   0x2   :  { %v2173_v1 = vld [vmem:[%s2967_s1 + $0x78] sm:$0xff]  ;;  %949 = vmatpush.bf16.msra.mxu0 %v2165_v0  ;;  %v2172_v5 = vld [vmem:[%s2967_s1 + $0x70] sm:$0xff]  ;;  %v2171_v9 = vld [vmem:[%s2967_s1 + $0x68] sm:$0xff] }
   0x3   :  { %v2181_v2 = vld [vmem:[%s2967_s1 + $0xb8] sm:$0xff]  ;;  %998 = vmatpush.bf16.msra.mxu1 %v2173_v1  ;;  %v2180_v6 = vld [vmem:[%s2967_s1 + $0xb0] sm:$0xff]  ;;  %v2179_v10 = vld [vmem:[%s2967_s1 + $0xa8] sm:$0xff] }
   0x4   :  { %v2189_v3 = vld [vmem:[%s2967_s1 + $0xf8] sm:$0xff]  ;;  %1047 = vmatpush.bf16.msra.mxu2 %v2181_v2  ;;  %v2188_v7 = vld [vmem:[%s2967_s1 + $0xf0] sm:$0xff]  ;;  %v2187_v11 = vld [vmem:[%s2967_s1 + $0xe8] sm:$0xff] }
   0x5   :  { %1096 = vmatpush.bf16.msra.mxu3 %v2189_v3  ;;  %v2162_v12 = vld [vmem:[%s2967_s1 + $0x20] sm:$0xff]  ;;  %v2161_v16 = vld [vmem:[%s2967_s1 + $0x18] sm:$0xff]  ;;  %v2160_v20 = vld [vmem:[%s2967_s1 + $0x10] sm:$0xff] }
   0x6   :  { %950 = vmatpush.bf16.msra.mxu0 %v2164_v4  ;;  %v2170_v13 = vld [vmem:[%s2967_s1 + $0x60] sm:$0xff]  ;;  %v2169_v17 = vld [vmem:[%s2967_s1 + $0x58] sm:$0xff]  ;;  %v2168_v21 = vld [vmem:[%s2967_s1 + $0x50] sm:$0xff] }
   0x7   :  { %999 = vmatpush.bf16.msra.mxu1 %v2172_v5  ;;  %v2178_v14 = vld [vmem:[%s2967_s1 + $0xa0] sm:$0xff]  ;;  %v2177_v18 = vld [vmem:[%s2967_s1 + $0x98] sm:$0xff]  ;;  %v2176_v22 = vld [vmem:[%s2967_s1 + $0x90] sm:$0xff] }
   0x8   :  { %1048 = vmatpush.bf16.msra.mxu2 %v2180_v6  ;;  %v2186_v15 = vld [vmem:[%s2967_s1 + $0xe0] sm:$0xff]  ;;  %v2185_v19 = vld [vmem:[%s2967_s1 + $0xd8] sm:$0xff]  ;;  %v2184_v23 = vld [vmem:[%s2967_s1 + $0xd0] sm:$0xff] }
   0x9   :  { %1097 = vmatpush.bf16.msra.mxu3 %v2188_v7  ;;  %v2159_v24 = vld [vmem:[%s2967_s1 + $0x8] sm:$0xff]  ;;  %v2158_v28 = vld [vmem:[%s2967_s1] sm:$0xff]  ;;  %v2213_v40 = vld [vmem:[%s2967_s1 + $0x1b8] sm:$0xff] }
   0xa   :  { %951 = vmatpush.bf16.msra.mxu0 %v2163_v8  ;;  %v2167_v25 = vld [vmem:[%s2967_s1 + $0x48] sm:$0xff]  ;;  %v2166_v29 = vld [vmem:[%s2967_s1 + $0x40] sm:$0xff]  ;;  %v2197_v41 = vld [vmem:[%s2967_s1 + $0x138] sm:$0xff] }
   0xb   :  { %1000 = vmatpush.bf16.msra.mxu1 %v2171_v9  ;;  %v2175_v26 = vld [vmem:[%s2967_s1 + $0x88] sm:$0xff]  ;;  %v2174_v30 = vld [vmem:[%s2967_s1 + $0x80] sm:$0xff]  ;;  %v2221_v46 = vld [vmem:[%s2967_s1 + $0x1f8] sm:$0xff] }
   0xc   :  { %1049 = vmatpush.bf16.msra.mxu2 %v2179_v10  ;;  %v2183_v27 = vld [vmem:[%s2967_s1 + $0xc8] sm:$0xff]  ;;  %v2182_v31 = vld [vmem:[%s2967_s1 + $0xc0] sm:$0xff]  ;;  %v2205_v47 = vld [vmem:[%s2967_s1 + $0x178] sm:$0xff] }
   0xd   :  { %1098 = vmatpush.bf16.msra.mxu3 %v2187_v11  ;;  %v1584_v32 = vld [vmem:[%s2968_s0] sm:$0xf]  ;;  %v2094_v34 = vld [vmem:[%s2968_s0 + $0x4] sm:$0xf]  ;;  %v1592_v36 = vld [vmem:[%s2968_s0 + $0x8] sm:$0xf] }
   0xe   :  { %952 = vmatpush.bf16.msra.mxu0 %v2162_v12  ;;  %v2098_v33 = vld [vmem:[%s2968_s0 + $0x1c] sm:$0xf0]  ;;  %v1586_v35 = vld [vmem:[%s2968_s0 + $0x20] sm:$0xf0]  ;;  %v2099_v37 = vld [vmem:[%s2968_s0 + $0x24] sm:$0xf0] }
   0xf   :  { %1001 = vmatpush.bf16.msra.mxu1 %v2170_v13  ;;  %v2095_v38 = vld [vmem:[%s2968_s0 + $0xc] sm:$0xf]  ;;  %v1585_v42 = vor.u32 %v2098_v33, %v1584_v32  ;;  %v1589_v43 = vor.u32 %v2094_v34, %v1586_v35  ;;  %v1593_v44 = vor.u32 %v2099_v37, %v1592_v36  ;;  %v2212_v48 = vld [vmem:[%s2967_s1 + $0x1b0] sm:$0xff]  ;;  %v1616_v56 = vld [vmem:[%s2968_s0 + $0x40] sm:$0xf] }
  0x10   :  { %1050 = vmatpush.bf16.msra.mxu2 %v2178_v14  ;;  %v1594_v39 = vld [vmem:[%s2968_s0 + $0x28] sm:$0xf0]  ;;  %v2196_v49 = vld [vmem:[%s2967_s1 + $0x130] sm:$0xff]  ;;  %v2106_v57 = vld [vmem:[%s2968_s0 + $0x5c] sm:$0xf0] }
  0x11   :  { %1099 = vmatpush.bf16.msra.mxu3 %v2186_v15  ;;  %v1597_v45 = vor.u32 %v2095_v38, %v1594_v39  ;;  %v2220_v50 = vld [vmem:[%s2967_s1 + $0x1f0] sm:$0xff]  ;;  %v2211_v52 = vld [vmem:[%s2967_s1 + $0x1a8] sm:$0xff]  ;;  %v2102_v58 = vld [vmem:[%s2968_s0 + $0x44] sm:$0xf]  ;;  %v1617_v0 = vor.u32 %v2106_v57, %v1616_v56 }
  0x12   :  { %953 = vmatpush.bf16.msra.mxu0 %v2161_v16  ;;  %v2204_v51 = vld [vmem:[%s2967_s1 + $0x170] sm:$0xff]  ;;  %v2195_v53 = vld [vmem:[%s2967_s1 + $0x128] sm:$0xff]  ;;  %v1618_v59 = vld [vmem:[%s2968_s0 + $0x60] sm:$0xf0] }
  0x13   :  { %1002 = vmatpush.bf16.msra.mxu1 %v2169_v17  ;;  %v2219_v54 = vld [vmem:[%s2967_s1 + $0x1e8] sm:$0xff]  ;;  %v1621_v1 = vor.u32 %v2102_v58, %v1618_v59  ;;  %v2210_v4 = vld [vmem:[%s2967_s1 + $0x1a0] sm:$0xff]  ;;  %v2208_v36 = vld [vmem:[%s2967_s1 + $0x190] sm:$0xff] }
  0x14   :  { %1051 = vmatpush.bf16.msra.mxu2 %v2177_v18  ;;  %v2203_v55 = vld [vmem:[%s2967_s1 + $0x168] sm:$0xff]  ;;  %v2194_v5 = vld [vmem:[%s2967_s1 + $0x120] sm:$0xff]  ;;  %v2192_v37 = vld [vmem:[%s2967_s1 + $0x110] sm:$0xff] }
  0x15   :  { %1100 = vmatpush.bf16.msra.mxu3 %v2185_v19  ;;  %v1624_v60 = vld [vmem:[%s2968_s0 + $0x48] sm:$0xf]  ;;  %v2103_v62 = vld [vmem:[%s2968_s0 + $0x4c] sm:$0xf]  ;;  %v2218_v6 = vld [vmem:[%s2967_s1 + $0x1e0] sm:$0xff] }
  0x16   :  { %954 = vmatpush.bf16.msra.mxu0 %v2160_v20  ;;  %v2107_v61 = vld [vmem:[%s2968_s0 + $0x64] sm:$0xf0]  ;;  %v1626_v63 = vld [vmem:[%s2968_s0 + $0x68] sm:$0xf0]  ;;  %v2202_v7 = vld [vmem:[%s2967_s1 + $0x160] sm:$0xff] }
  0x17   :  { %1003 = vmatpush.bf16.msra.mxu1 %v2168_v21  ;;  %v1625_v2 = vor.u32 %v2107_v61, %v1624_v60  ;;  %v1629_v3 = vor.u32 %v2103_v62, %v1626_v63  ;;  %v1648_v8 = vld [vmem:[%s2968_s0 + $0x80] sm:$0xf]  ;;  %v2110_v10 = vld [vmem:[%s2968_s0 + $0x84] sm:$0xf]  ;;  %v1656_v12 = vld [vmem:[%s2968_s0 + $0x88] sm:$0xf] }
  0x18   :  { %1052 = vmatpush.bf16.msra.mxu2 %v2176_v22  ;;  %v2114_v9 = vld [vmem:[%s2968_s0 + $0x9c] sm:$0xf0]  ;;  %v1650_v11 = vld [vmem:[%s2968_s0 + $0xa0] sm:$0xf0]  ;;  %v2115_v13 = vld [vmem:[%s2968_s0 + $0xa4] sm:$0xf0] }
  0x19   :  { %1101 = vmatpush.bf16.msra.mxu3 %v2184_v23  ;;  %v2111_v14 = vld [vmem:[%s2968_s0 + $0x8c] sm:$0xf]  ;;  %v1649_v16 = vor.u32 %v2114_v9, %v1648_v8  ;;  %v1653_v17 = vor.u32 %v2110_v10, %v1650_v11  ;;  %v1657_v18 = vor.u32 %v2115_v13, %v1656_v12  ;;  %v2209_v20 = vld [vmem:[%s2967_s1 + $0x198] sm:$0xff]  ;;  %v2216_v38 = vld [vmem:[%s2967_s1 + $0x1d0] sm:$0xff] }
  0x1a   :  { %955 = vmatpush.bf16.msra.mxu0 %v2159_v24  ;;  %v1658_v15 = vld [vmem:[%s2968_s0 + $0xa8] sm:$0xf0]  ;;  %v2193_v21 = vld [vmem:[%s2967_s1 + $0x118] sm:$0xff]  ;;  %v1680_v24 = vld [vmem:[%s2968_s0 + $0xc0] sm:$0xf] }
  0x1b   :  { %1004 = vmatpush.bf16.msra.mxu1 %v2167_v25  ;;  %v1661_v19 = vor.u32 %v2111_v14, %v1658_v15  ;;  %v2217_v22 = vld [vmem:[%s2967_s1 + $0x1d8] sm:$0xff]  ;;  %v2122_v25 = vld [vmem:[%s2968_s0 + $0xdc] sm:$0xf0]  ;;  %v2200_v39 = vld [vmem:[%s2967_s1 + $0x150] sm:$0xff] }
  0x1c   :  { %1053 = vmatpush.bf16.msra.mxu2 %v2175_v26  ;;  %v2201_v23 = vld [vmem:[%s2967_s1 + $0x158] sm:$0xff]  ;;  %v2118_v26 = vld [vmem:[%s2968_s0 + $0xc4] sm:$0xf]  ;;  %v1681_v32 = vor.u32 %v2122_v25, %v1680_v24  ;;  %v1744_v56 = vld [vmem:[%s2968_s0 + $0x140] sm:$0xf] }
  0x1d   :  { %1102 = vmatpush.bf16.msra.mxu3 %v2183_v27  ;;  %v1682_v27 = vld [vmem:[%s2968_s0 + $0xe0] sm:$0xf0]  ;;  %v2138_v57 = vld [vmem:[%s2968_s0 + $0x15c] sm:$0xf0]  ;;  %v1752_v60 = vld [vmem:[%s2968_s0 + $0x148] sm:$0xf] }
  0x1e   :  { %956 = vmatpush.bf16.msra.mxu0 %v2158_v28  ;;  %v1688_v28 = vld [vmem:[%s2968_s0 + $0xc8] sm:$0xf]  ;;  %v1685_v33 = vor.u32 %v2118_v26, %v1682_v27  ;;  %v2134_v58 = vld [vmem:[%s2968_s0 + $0x144] sm:$0xf]  ;;  %v2135_v62 = vld [vmem:[%s2968_s0 + $0x14c] sm:$0xf] }
  0x1f   :  { %1005 = vmatpush.bf16.msra.mxu1 %v2166_v29  ;;  %v2123_v29 = vld [vmem:[%s2968_s0 + $0xe4] sm:$0xf0]  ;;  %v1746_v59 = vld [vmem:[%s2968_s0 + $0x160] sm:$0xf0]  ;;  %v1754_v63 = vld [vmem:[%s2968_s0 + $0x168] sm:$0xf0] }
  0x20   :  { %1054 = vmatpush.bf16.msra.mxu2 %v2174_v30  ;;  %v2119_v30 = vld [vmem:[%s2968_s0 + $0xcc] sm:$0xf]  ;;  %v1689_v34 = vor.u32 %v2123_v29, %v1688_v28  ;;  %v2139_v61 = vld [vmem:[%s2968_s0 + $0x164] sm:$0xf0]  ;;  %v1776_v8 = vld [vmem:[%s2968_s0 + $0x180] sm:$0xf] }
  0x21   :  { %1103 = vmatpush.bf16.msra.mxu3 %v2182_v31  ;;  %957 = vmatmul.bf16.vlgmr.msra.gmra.mxu0 %v1585_v42  ;;  %v1690_v31 = vld [vmem:[%s2968_s0 + $0xe8] sm:$0xf0]  ;;  %v2126_v42 = vld [vmem:[%s2968_s0 + $0x104] sm:$0xf]  ;;  %v2146_v9 = vld [vmem:[%s2968_s0 + $0x19c] sm:$0xf0] }
  0x22   :  { %1145 = vmatpush.bf16.msrb.mxu0 %v2197_v41  ;;  %1006 = vmatmul.bf16.vlgmr.msra.gmra.mxu1 %v1589_v43  ;;  %v1693_v35 = vor.u32 %v2119_v30, %v1690_v31  ;;  %v2130_v41 = vld [vmem:[%s2968_s0 + $0x11c] sm:$0xf0]  ;;  %v1714_v43 = vld [vmem:[%s2968_s0 + $0x120] sm:$0xf0]  ;;  %v1784_v12 = vld [vmem:[%s2968_s0 + $0x188] sm:$0xf] }
  0x23   :  { %1055 = vmatmul.bf16.vlgmr.msra.gmra.mxu2 %v1593_v44  ;;  %1194 = vmatpush.bf16.msrb.mxu1 %v2205_v47  ;;  %v1720_v44 = vld [vmem:[%s2968_s0 + $0x108] sm:$0xf]  ;;  %v1722_v47 = vld [vmem:[%s2968_s0 + $0x128] sm:$0xf0]  ;;  %v2142_v10 = vld [vmem:[%s2968_s0 + $0x184] sm:$0xf] }
  0x24   :  { %1243 = vmatpush.bf16.msrb.mxu2 %v2213_v40  ;;  %1104 = vmatmul.bf16.vlgmr.msra.gmra.mxu3 %v1597_v45  ;;  %v1712_v40 = vld [vmem:[%s2968_s0 + $0x100] sm:$0xf]  ;;  %v2131_v45 = vld [vmem:[%s2968_s0 + $0x124] sm:$0xf0]  ;;  %v1778_v11 = vld [vmem:[%s2968_s0 + $0x1a0] sm:$0xf0] }
  0x25   :  { %1292 = vmatpush.bf16.msrb.mxu3 %v2221_v46  ;;  %v2127_v46 = vld [vmem:[%s2968_s0 + $0x10c] sm:$0xf]  ;;  %v2147_v13 = vld [vmem:[%s2968_s0 + $0x1a4] sm:$0xf0] }
  0x26   :  { %1146 = vmatpush.bf16.msrb.mxu0 %v2196_v49  ;;  %v1717_v49 = vor.u32 %v2126_v42, %v1714_v43  ;;  %v2143_v14 = vld [vmem:[%s2968_s0 + $0x18c] sm:$0xf]  ;;  %v1816_v24 = vld [vmem:[%s2968_s0 + $0x1c8] sm:$0xf] }
  0x27   :  { %1195 = vmatpush.bf16.msrb.mxu1 %v2204_v51  ;;  %v1725_v51 = vor.u32 %v2127_v46, %v1722_v47  ;;  %v1786_v15 = vld [vmem:[%s2968_s0 + $0x1a8] sm:$0xf0]  ;;  %v2155_v25 = vld [vmem:[%s2968_s0 + $0x1e4] sm:$0xf0] }
  0x28   :  { %1244 = vmatpush.bf16.msrb.mxu2 %v2212_v48  ;;  %v1713_v48 = vor.u32 %v2130_v41, %v1712_v40  ;;  %v2151_v26 = vld [vmem:[%s2968_s0 + $0x1cc] sm:$0xf]  ;;  %v1817_v30 = vor.u32 %v2155_v25, %v1816_v24 }
  0x29   :  { %1293 = vmatpush.bf16.msrb.mxu3 %v2220_v50  ;;  %v1721_v50 = vor.u32 %v2131_v45, %v1720_v44  ;;  %v1818_v27 = vld [vmem:[%s2968_s0 + $0x1e8] sm:$0xf0] }
  0x2a   :  { %1147 = vmatpush.bf16.msrb.mxu0 %v2195_v53  ;;  %v2191_v53 = vld [vmem:[%s2967_s1 + $0x108] sm:$0xff]  ;;  %v1821_v31 = vor.u32 %v2151_v26, %v1818_v27 }
  0x2b   :  { %1196 = vmatpush.bf16.msrb.mxu1 %v2203_v55  ;;  %v2199_v55 = vld [vmem:[%s2967_s1 + $0x148] sm:$0xff] }
  0x2c   :  { %1245 = vmatpush.bf16.msrb.mxu2 %v2211_v52  ;;  %v2207_v52 = vld [vmem:[%s2967_s1 + $0x188] sm:$0xff] }
  0x2d   :  { %1294 = vmatpush.bf16.msrb.mxu3 %v2219_v54  ;;  %v2215_v54 = vld [vmem:[%s2967_s1 + $0x1c8] sm:$0xff] }
  0x2e   :  { %1148 = vmatpush.bf16.msrb.mxu0 %v2194_v5  ;;  %v2190_v5 = vld [vmem:[%s2967_s1 + $0x100] sm:$0xff] }
  0x2f   :  { %1197 = vmatpush.bf16.msrb.mxu1 %v2202_v7  ;;  %v2198_v7 = vld [vmem:[%s2967_s1 + $0x140] sm:$0xff] }
  0x30   :  { %1246 = vmatpush.bf16.msrb.mxu2 %v2210_v4  ;;  %v2206_v4 = vld [vmem:[%s2967_s1 + $0x180] sm:$0xff] }
  0x31   :  { %962 = vmatmul.bf16.gmra.mxu0 %v1617_v0  ;;  %1295 = vmatpush.bf16.msrb.mxu3 %v2218_v6  ;;  %v1745_v0 = vor.u32 %v2138_v57, %v1744_v56  ;;  %v2214_v6 = vld [vmem:[%s2967_s1 + $0x1c0] sm:$0xff]  ;;  %v2104_v56 = vld [vmem:[%s2968_s0 + $0x54] sm:$0xf] }
  0x32   :  { %1011 = vmatmul.bf16.gmra.mxu1 %v1621_v1  ;;  %1149 = vmatpush.bf16.msrb.mxu0 %v2193_v21  ;;  %v1749_v1 = vor.u32 %v2134_v58, %v1746_v59  ;;  %v2154_v21 = vld [vmem:[%s2968_s0 + $0x1dc] sm:$0xf0]  ;;  %v1634_v57 = vld [vmem:[%s2968_s0 + $0x70] sm:$0xf0]  ;;  %v1640_v58 = vld [vmem:[%s2968_s0 + $0x58] sm:$0xf] }
  0x33   :  { %1060 = vmatmul.bf16.gmra.mxu2 %v1625_v2  ;;  %1198 = vmatpush.bf16.msrb.mxu1 %v2201_v23  ;;  %v1753_v2 = vor.u32 %v2139_v61, %v1752_v60  ;;  %v1810_v23 = vld [vmem:[%s2968_s0 + $0x1e0] sm:$0xf0]  ;;  %v2109_v59 = vld [vmem:[%s2968_s0 + $0x74] sm:$0xf0]  ;;  %v2105_v60 = vld [vmem:[%s2968_s0 + $0x5c] sm:$0xf] }
  0x34   :  { %1109 = vmatmul.bf16.gmra.mxu3 %v1629_v3  ;;  %1247 = vmatpush.bf16.msrb.mxu2 %v2209_v20  ;;  %v1757_v3 = vor.u32 %v2135_v62, %v1754_v63  ;;  %v1808_v20 = vld [vmem:[%s2968_s0 + $0x1c0] sm:$0xf]  ;;  %v1642_v61 = vld [vmem:[%s2968_s0 + $0x78] sm:$0xf0] }
  0x35   :  { %1296 = vmatpush.bf16.msrb.mxu3 %v2217_v22  ;;  %v2150_v22 = vld [vmem:[%s2968_s0 + $0x1c4] sm:$0xf]  ;;  %v1809_v28 = vor.u32 %v2154_v21, %v1808_v20  ;;  %v1672_v20 = vld [vmem:[%s2968_s0 + $0x98] sm:$0xf] }
  0x36   :  { %1150 = vmatpush.bf16.msrb.mxu0 %v2192_v37  ;;  %v1813_v29 = vor.u32 %v2150_v22, %v1810_v23  ;;  %v2101_v37 = vld [vmem:[%s2968_s0 + $0x34] sm:$0xf0]  ;;  %v2113_v22 = vld [vmem:[%s2968_s0 + $0x9c] sm:$0xf] }
  0x37   :  { %1199 = vmatpush.bf16.msrb.mxu1 %v2200_v39  ;;  %v1610_v39 = vld [vmem:[%s2968_s0 + $0x38] sm:$0xf0]  ;;  %v2117_v21 = vld [vmem:[%s2968_s0 + $0xb4] sm:$0xf0] }
  0x38   :  { %1248 = vmatpush.bf16.msrb.mxu2 %v2208_v36  ;;  %v1608_v36 = vld [vmem:[%s2968_s0 + $0x18] sm:$0xf]  ;;  %v1674_v23 = vld [vmem:[%s2968_s0 + $0xb8] sm:$0xf0] }
  0x39   :  { %1297 = vmatpush.bf16.msrb.mxu3 %v2216_v38  ;;  %v2097_v38 = vld [vmem:[%s2968_s0 + $0x1c] sm:$0xf]  ;;  %v1609_v44 = vor.u32 %v2101_v37, %v1608_v36 }
  0x3a   :  { %1151 = vmatpush.bf16.msrb.mxu0 %v2191_v53  ;;  %v1613_v45 = vor.u32 %v2097_v38, %v1610_v39 }
  0x3b   :  { %1200 = vmatpush.bf16.msrb.mxu1 %v2199_v55  ;;  %v2108_v55 = vld [vmem:[%s2968_s0 + $0x6c] sm:$0xf0] }
  0x3c   :  { %1249 = vmatpush.bf16.msrb.mxu2 %v2207_v52 }
  0x3d   :  { %1298 = vmatpush.bf16.msrb.mxu3 %v2215_v54  ;;  %v1632_v54 = vld [vmem:[%s2968_s0 + $0x50] sm:$0xf] }
  0x3e   :  { %1152 = vmatpush.bf16.msrb.mxu0 %v2190_v5  ;;  %v1641_v5 = vor.u32 %v2109_v59, %v1640_v58 }
  0x3f   :  { %1201 = vmatpush.bf16.msrb.mxu1 %v2198_v7 }
  0x40   :  { %1250 = vmatpush.bf16.msrb.mxu2 %v2206_v4 }
  0x41   :  { %967 = vmatmul.bf16.gmra.mxu0 %v1649_v16  ;;  %1299 = vmatpush.bf16.msrb.mxu3 %v2214_v6  ;;  %v1777_v16 = vor.u32 %v2146_v9, %v1776_v8  ;;  %v1645_v6 = vor.u32 %v2105_v60, %v1642_v61 }
  0x42   :  { %1016 = vmatmul.bf16.gmra.mxu1 %v1653_v17  ;;  %v1781_v17 = vor.u32 %v2142_v10, %v1778_v11 }
  0x43   :  { %1065 = vmatmul.bf16.gmra.mxu2 %v1657_v18  ;;  %v1785_v18 = vor.u32 %v2147_v13, %v1784_v12 }
  0x44   :  { %1114 = vmatmul.bf16.gmra.mxu3 %v1661_v19  ;;  %v1789_v19 = vor.u32 %v2143_v14, %v1786_v15 }
  0x51   :  { %972 = vmatmul.bf16.gmra.mxu0 %v1681_v32  ;;  %v1600_v32 = vld [vmem:[%s2968_s0 + $0x10] sm:$0xf] }
  0x52   :  { %1021 = vmatmul.bf16.gmra.mxu1 %v1685_v33  ;;  %v2100_v33 = vld [vmem:[%s2968_s0 + $0x2c] sm:$0xf0] }
  0x53   :  { %1070 = vmatmul.bf16.gmra.mxu2 %v1689_v34  ;;  %v2096_v34 = vld [vmem:[%s2968_s0 + $0x14] sm:$0xf]  ;;  %v1601_v40 = vor.u32 %v2100_v33, %v1600_v32  ;;  %v1677_v32 = vor.u32 %v2113_v22, %v1674_v23 }
  0x54   :  { %1119 = vmatmul.bf16.gmra.mxu3 %v1693_v35  ;;  %v1602_v35 = vld [vmem:[%s2968_s0 + $0x30] sm:$0xf0] }
  0x55   :  { %v1605_v41 = vor.u32 %v2096_v34, %v1602_v35 }
  0x61   :  { %977 = vmatmul.bf16.gmra.mxu0 %v1713_v48 }
  0x62   :  { %1026 = vmatmul.bf16.gmra.mxu1 %v1717_v49 }
  0x63   :  { %1075 = vmatmul.bf16.gmra.mxu2 %v1721_v50 }
  0x64   :  { %1124 = vmatmul.bf16.gmra.mxu3 %v1725_v51 }
  0x71   :  { %982 = vmatmul.bf16.gmra.mxu0 %v1745_v0  ;;  %v1633_v0 = vor.u32 %v2108_v55, %v1632_v54 }
  0x72   :  { %1031 = vmatmul.bf16.gmra.mxu1 %v1749_v1  ;;  %v1637_v1 = vor.u32 %v2104_v56, %v1634_v57 }
  0x73   :  { %1080 = vmatmul.bf16.gmra.mxu2 %v1753_v2 }
  0x74   :  { %1129 = vmatmul.bf16.gmra.mxu3 %v1757_v3 }
  0x81   :  { %987 = vmatmul.bf16.gmra.mxu0 %v1777_v16  ;;  %v1664_v16 = vld [vmem:[%s2968_s0 + $0x90] sm:$0xf] }
  0x82   :  { %1036 = vmatmul.bf16.gmra.mxu1 %v1781_v17  ;;  %v2116_v17 = vld [vmem:[%s2968_s0 + $0xac] sm:$0xf0] }
  0x83   :  { %1085 = vmatmul.bf16.gmra.mxu2 %v1785_v18  ;;  %v2112_v18 = vld [vmem:[%s2968_s0 + $0x94] sm:$0xf]  ;;  %v1665_v26 = vor.u32 %v2116_v17, %v1664_v16 }
  0x84   :  { %1134 = vmatmul.bf16.gmra.mxu3 %v1789_v19  ;;  %v1666_v19 = vld [vmem:[%s2968_s0 + $0xb0] sm:$0xf0] }
  0x85   :  { %v1669_v27 = vor.u32 %v2112_v18, %v1666_v19 }
  0x91   :  { %992 = vmatmul.bf16.gmra.mxu0 %v1809_v28 }
  0x92   :  { %1041 = vmatmul.bf16.gmra.mxu1 %v1813_v29 }
  0x93   :  { %1090 = vmatmul.bf16.gmra.mxu2 %v1817_v30 }
  0x94   :  { %1139 = vmatmul.bf16.gmra.mxu3 %v1821_v31  ;;  %v1673_v31 = vor.u32 %v2117_v21, %v1672_v20 }
  0x9e   :  { %v958_v42 = vpop.f32.mrf.mxu0 }
  0x9f   :  { %v1007_v43 = vpop.f32.mrf.mxu1 }
  0xa0   :  { %v1008_v46 = vadd.f32 %v1007_v43, %v958_v42  ;;  %v1696_v42 = vld [vmem:[%s2968_s0 + $0xd0] sm:$0xf] }
  0xa1   :  { %1153 = vmatmul.bf16.vlgmr.msrb.gmra.mxu0 %v1601_v40  ;;  %v2124_v43 = vld [vmem:[%s2968_s0 + $0xec] sm:$0xf0] }
  0xa2   :  { %1202 = vmatmul.bf16.vlgmr.msrb.gmra.mxu1 %v1605_v41 }
  0xa3   :  { %1251 = vmatmul.bf16.vlgmr.msrb.gmra.mxu2 %v1609_v44  ;;  %v2120_v44 = vld [vmem:[%s2968_s0 + $0xd4] sm:$0xf] }
  0xa4   :  { %1300 = vmatmul.bf16.vlgmr.msrb.gmra.mxu3 %v1613_v45  ;;  %v1698_v45 = vld [vmem:[%s2968_s0 + $0xf0] sm:$0xf0] }
  0xa5   :  { %v1701_v54 = vor.u32 %v2120_v44, %v1698_v45 }
  0xa6   :  { %v1056_v47 = vpop.f32.mrf.mxu2  ;;  %v960_v50 = vpop.f32.mrf.mxu0 }
  0xa7   :  { %v1105_v48 = vpop.f32.mrf.mxu3  ;;  %v1057_v49 = vadd.f32 %v1056_v47, %v1008_v46  ;;  %v1009_v51 = vpop.f32.mrf.mxu1  ;;  %v1704_v46 = vld [vmem:[%s2968_s0 + $0xd8] sm:$0xf] }
  0xa8   :  { %v1010_v52 = vadd.f32 %v1009_v51, %v960_v50  ;;  %v2125_v47 = vld [vmem:[%s2968_s0 + $0xf4] sm:$0xf0] }
  0xa9   :  { %v2703_v53 = vadd.f32 %v1105_v48, %v1057_v49  ;;  %v2121_v48 = vld [vmem:[%s2968_s0 + $0xdc] sm:$0xf]  ;;  %v1705_v58 = vor.u32 %v2125_v47, %v1704_v46 }
  0xaa   :  { %v1706_v49 = vld [vmem:[%s2968_s0 + $0xf8] sm:$0xf0] }
  0xab   :  { %v1709_v59 = vor.u32 %v2121_v48, %v1706_v49 }
  0xae   :  { %v1058_v62 = vpop.f32.mrf.mxu2  ;;  %v963_v3 = vpop.f32.mrf.mxu0 }
  0xaf   :  { %v1107_v63 = vpop.f32.mrf.mxu3  ;;  %v1059_v2 = vadd.f32 %v1058_v62, %v1010_v52  ;;  %v1012_v4 = vpop.f32.mrf.mxu1  ;;  %v1697_v52 = vor.u32 %v2124_v43, %v1696_v42  ;;  %v1770_v42 = vld [vmem:[%s2968_s0 + $0x178] sm:$0xf0] }
  0xb0   :  { %v1013_v7 = vadd.f32 %v1012_v4, %v963_v3 }
  0xb1   :  { %v2729_v8 = vadd.f32 %v1107_v63, %v1059_v2  ;;  %1158 = vmatmul.bf16.gmra.mxu0 %v1633_v0 }
  0xb2   :  { %1207 = vmatmul.bf16.gmra.mxu1 %v1637_v1 }
  0xb3   :  { %1256 = vmatmul.bf16.gmra.mxu2 %v1641_v5  ;;  %v1728_v5 = vld [vmem:[%s2968_s0 + $0x110] sm:$0xf] }
  0xb4   :  { %1305 = vmatmul.bf16.gmra.mxu3 %v1645_v6  ;;  %v2132_v6 = vld [vmem:[%s2968_s0 + $0x12c] sm:$0xf0] }
  0xb5   :  { %v1729_v17 = vor.u32 %v2132_v6, %v1728_v5  ;;  %v2149_v5 = vld [vmem:[%s2968_s0 + $0x1b4] sm:$0xf0]  ;;  %v2145_v6 = vld [vmem:[%s2968_s0 + $0x19c] sm:$0xf] }
  0xb6   :  { %v1061_v9 = vpop.f32.mrf.mxu2  ;;  %v965_v12 = vpop.f32.mrf.mxu0 }
  0xb7   :  { %v1110_v10 = vpop.f32.mrf.mxu3  ;;  %v1062_v11 = vadd.f32 %v1061_v9, %v1013_v7  ;;  %v1014_v13 = vpop.f32.mrf.mxu1  ;;  %v2128_v7 = vld [vmem:[%s2968_s0 + $0x114] sm:$0xf] }
  0xb8   :  { %v1015_v14 = vadd.f32 %v1014_v13, %v965_v12  ;;  %v1730_v9 = vld [vmem:[%s2968_s0 + $0x130] sm:$0xf0]  ;;  %v2129_v12 = vld [vmem:[%s2968_s0 + $0x11c] sm:$0xf] }
  0xb9   :  { %v2731_v15 = vadd.f32 %v1110_v10, %v1062_v11  ;;  %v1736_v10 = vld [vmem:[%s2968_s0 + $0x118] sm:$0xf]  ;;  %v1738_v13 = vld [vmem:[%s2968_s0 + $0x138] sm:$0xf0]  ;;  %v1733_v18 = vor.u32 %v2128_v7, %v1730_v9 }
  0xba   :  { %v2133_v11 = vld [vmem:[%s2968_s0 + $0x134] sm:$0xf0]  ;;  %v1741_v23 = vor.u32 %v2129_v12, %v1738_v13  ;;  %v1802_v7 = vld [vmem:[%s2968_s0 + $0x1b8] sm:$0xf0] }
  0xbb   :  { %v1737_v22 = vor.u32 %v2133_v11, %v1736_v10 }
  0xbe   :  { %v1063_v24 = vpop.f32.mrf.mxu2  ;;  %v968_v29 = vpop.f32.mrf.mxu0 }
  0xbf   :  { %v1112_v25 = vpop.f32.mrf.mxu3  ;;  %v1064_v28 = vadd.f32 %v1063_v24, %v1015_v14  ;;  %v1017_v30 = vpop.f32.mrf.mxu1 }
  0xc0   :  { %v1018_v33 = vadd.f32 %v1017_v30, %v968_v29 }
  0xc1   :  { %v2757_v34 = vadd.f32 %v1112_v25, %v1064_v28  ;;  %1163 = vmatmul.bf16.gmra.mxu0 %v1665_v26 }
  0xc2   :  { %1212 = vmatmul.bf16.gmra.mxu1 %v1669_v27 }
  0xc3   :  { %1261 = vmatmul.bf16.gmra.mxu2 %v1673_v31 }
  0xc4   :  { %1310 = vmatmul.bf16.gmra.mxu3 %v1677_v32 }
  0xc6   :  { %v1066_v35 = vpop.f32.mrf.mxu2  ;;  %v970_v38 = vpop.f32.mrf.mxu0 }
  0xc7   :  { %v1115_v36 = vpop.f32.mrf.mxu3  ;;  %v1067_v37 = vadd.f32 %v1066_v35, %v1018_v33  ;;  %v1019_v39 = vpop.f32.mrf.mxu1  ;;  %v1760_v33 = vld [vmem:[%s2968_s0 + $0x150] sm:$0xf] }
  0xc8   :  { %v1020_v40 = vadd.f32 %v1019_v39, %v970_v38  ;;  %v2140_v35 = vld [vmem:[%s2968_s0 + $0x16c] sm:$0xf0]  ;;  %v1768_v38 = vld [vmem:[%s2968_s0 + $0x158] sm:$0xf] }
  0xc9   :  { %v2759_v41 = vadd.f32 %v1115_v36, %v1067_v37  ;;  %v2136_v36 = vld [vmem:[%s2968_s0 + $0x154] sm:$0xf]  ;;  %v2141_v39 = vld [vmem:[%s2968_s0 + $0x174] sm:$0xf0]  ;;  %v1761_v45 = vor.u32 %v2140_v35, %v1760_v33 }
  0xca   :  { %v1762_v37 = vld [vmem:[%s2968_s0 + $0x170] sm:$0xf0]  ;;  %v1832_v35 = vld [vmem:[%s2968_s0 + $0x1d8] sm:$0xf] }
  0xcb   :  { %v1765_v46 = vor.u32 %v2136_v36, %v1762_v37  ;;  %v1826_v33 = vld [vmem:[%s2968_s0 + $0x1f0] sm:$0xf0]  ;;  %v2157_v36 = vld [vmem:[%s2968_s0 + $0x1f4] sm:$0xf0]  ;;  %v2153_v37 = vld [vmem:[%s2968_s0 + $0x1dc] sm:$0xf] }
  0xce   :  { %v1068_v50 = vpop.f32.mrf.mxu2  ;;  %v973_v56 = vpop.f32.mrf.mxu0 }
  0xcf   :  { %v1117_v51 = vpop.f32.mrf.mxu3  ;;  %v1069_v55 = vadd.f32 %v1068_v50, %v1020_v40  ;;  %v1022_v57 = vpop.f32.mrf.mxu1  ;;  %v2137_v40 = vld [vmem:[%s2968_s0 + $0x15c] sm:$0xf]  ;;  %v1769_v50 = vor.u32 %v2141_v39, %v1768_v38 }
  0xd0   :  { %v1023_v60 = vadd.f32 %v1022_v57, %v973_v56  ;;  %v1834_v38 = vld [vmem:[%s2968_s0 + $0x1f8] sm:$0xf0] }
  0xd1   :  { %v2785_v61 = vadd.f32 %v1117_v51, %v1069_v55  ;;  %1168 = vmatmul.bf16.gmra.mxu0 %v1697_v52  ;;  %v1773_v51 = vor.u32 %v2137_v40, %v1770_v42 }
  0xd2   :  { %1217 = vmatmul.bf16.gmra.mxu1 %v1701_v54 }
  0xd3   :  { %1266 = vmatmul.bf16.gmra.mxu2 %v1705_v58 }
  0xd4   :  { %1315 = vmatmul.bf16.gmra.mxu3 %v1709_v59 }
  0xd6   :  { %v1071_v62 = vpop.f32.mrf.mxu2  ;;  %v975_v1 = vpop.f32.mrf.mxu0 }
  0xd7   :  { %v1120_v63 = vpop.f32.mrf.mxu3  ;;  %v1072_v0 = vadd.f32 %v1071_v62, %v1023_v60  ;;  %v1024_v2 = vpop.f32.mrf.mxu1 }
  0xd8   :  { %v1025_v3 = vadd.f32 %v1024_v2, %v975_v1  ;;  %v2144_v1 = vld [vmem:[%s2968_s0 + $0x194] sm:$0xf] }
  0xd9   :  { %v2787_v4 = vadd.f32 %v1120_v63, %v1072_v0  ;;  %v1792_v63 = vld [vmem:[%s2968_s0 + $0x190] sm:$0xf]  ;;  %v1794_v2 = vld [vmem:[%s2968_s0 + $0x1b0] sm:$0xf0] }
  0xda   :  { %v2148_v0 = vld [vmem:[%s2968_s0 + $0x1ac] sm:$0xf0]  ;;  %v1797_v12 = vor.u32 %v2144_v1, %v1794_v2 }
  0xdb   :  { %v1793_v11 = vor.u32 %v2148_v0, %v1792_v63 }
  0xde   :  { %v1073_v14 = vpop.f32.mrf.mxu2  ;;  %v978_v20 = vpop.f32.mrf.mxu0 }
  0xdf   :  { %v1122_v16 = vpop.f32.mrf.mxu3  ;;  %v1074_v19 = vadd.f32 %v1073_v14, %v1025_v3  ;;  %v1027_v21 = vpop.f32.mrf.mxu1  ;;  %v1800_v3 = vld [vmem:[%s2968_s0 + $0x198] sm:$0xf] }
  0xe0   :  { %v1028_v24 = vadd.f32 %v1027_v21, %v978_v20 }
  0xe1   :  { %v2813_v25 = vadd.f32 %v1122_v16, %v1074_v19  ;;  %1173 = vmatmul.bf16.gmra.mxu0 %v1729_v17  ;;  %v1801_v17 = vor.u32 %v2149_v5, %v1800_v3 }
  0xe2   :  { %1222 = vmatmul.bf16.gmra.mxu1 %v1733_v18  ;;  %v1805_v18 = vor.u32 %v2145_v6, %v1802_v7 }
  0xe3   :  { %1271 = vmatmul.bf16.gmra.mxu2 %v1737_v22 }
  0xe4   :  { %1320 = vmatmul.bf16.gmra.mxu3 %v1741_v23 }
  0xe6   :  { %v1076_v26 = vpop.f32.mrf.mxu2  ;;  %v980_v29 = vpop.f32.mrf.mxu0 }
  0xe7   :  { %v1125_v27 = vpop.f32.mrf.mxu3  ;;  %v1077_v28 = vadd.f32 %v1076_v26, %v1028_v24  ;;  %v1029_v30 = vpop.f32.mrf.mxu1 }
  0xe8   :  { %v1030_v31 = vadd.f32 %v1029_v30, %v980_v29  ;;  %v1824_v29 = vld [vmem:[%s2968_s0 + $0x1d0] sm:$0xf] }
  0xe9   :  { %v2815_v32 = vadd.f32 %v1125_v27, %v1077_v28  ;;  %v2156_v30 = vld [vmem:[%s2968_s0 + $0x1ec] sm:$0xf0] }
  0xea   :  { %v1825_v42 = vor.u32 %v2156_v30, %v1824_v29 }
  0xee   :  { %v1078_v43 = vpop.f32.mrf.mxu2  ;;  %v983_v48 = vpop.f32.mrf.mxu0 }
  0xef   :  { %v1127_v44 = vpop.f32.mrf.mxu3  ;;  %v1079_v47 = vadd.f32 %v1078_v43, %v1030_v31  ;;  %v1032_v49 = vpop.f32.mrf.mxu1  ;;  %v2152_v31 = vld [vmem:[%s2968_s0 + $0x1d4] sm:$0xf] }
  0xf0   :  { %v1033_v52 = vadd.f32 %v1032_v49, %v983_v48  ;;  %v1829_v43 = vor.u32 %v2152_v31, %v1826_v33  ;;  %v1837_v48 = vor.u32 %v2153_v37, %v1834_v38 }
  0xf1   :  { %v2841_v54 = vadd.f32 %v1127_v44, %v1079_v47  ;;  %1178 = vmatmul.bf16.gmra.mxu0 %v1761_v45  ;;  %v1833_v47 = vor.u32 %v2157_v36, %v1832_v35 }
  0xf2   :  { %1227 = vmatmul.bf16.gmra.mxu1 %v1765_v46 }
  0xf3   :  { %1276 = vmatmul.bf16.gmra.mxu2 %v1769_v50 }
  0xf4   :  { %1325 = vmatmul.bf16.gmra.mxu3 %v1773_v51 }
  0xf6   :  { %v1081_v55 = vpop.f32.mrf.mxu2  ;;  %v985_v58 = vpop.f32.mrf.mxu0 }
  0xf7   :  { %v1130_v56 = vpop.f32.mrf.mxu3  ;;  %v1082_v57 = vadd.f32 %v1081_v55, %v1033_v52  ;;  %v1034_v59 = vpop.f32.mrf.mxu1 }
  0xf8   :  { %v1035_v60 = vadd.f32 %v1034_v59, %v985_v58 }
  0xf9   :  { %v2843_v62 = vadd.f32 %v1130_v56, %v1082_v57 }
  0xfe   :  { %v1083_v9 = vpop.f32.mrf.mxu2  ;;  %v988_v14 = vpop.f32.mrf.mxu0 }
  0xff   :  { %v1132_v10 = vpop.f32.mrf.mxu3  ;;  %v1084_v13 = vadd.f32 %v1083_v9, %v1035_v60  ;;  %v1037_v16 = vpop.f32.mrf.mxu1 }
 0x100   :  { %v1038_v19 = vadd.f32 %v1037_v16, %v988_v14  ;;  %v2908_v16 = vld [vmem:[%s2969_s2] ss:$0 sm:$0xff] }
 0x101   :  { %v2869_v20 = vadd.f32 %v1132_v10, %v1084_v13  ;;  %1183 = vmatmul.bf16.gmra.mxu0 %v1793_v11 }
 0x102   :  { %1232 = vmatmul.bf16.gmra.mxu1 %v1797_v12 }
 0x103   :  { %1281 = vmatmul.bf16.gmra.mxu2 %v1801_v17 }
 0x104   :  { %1330 = vmatmul.bf16.gmra.mxu3 %v1805_v18 }
 0x106   :  { %v1086_v21 = vpop.f32.mrf.mxu2  ;;  %v990_v24 = vpop.f32.mrf.mxu0 }
 0x107   :  { %v1135_v22 = vpop.f32.mrf.mxu3  ;;  %v1087_v23 = vadd.f32 %v1086_v21, %v1038_v19  ;;  %v1039_v26 = vpop.f32.mrf.mxu1 }
 0x108   :  { %v1040_v27 = vadd.f32 %v1039_v26, %v990_v24 }
 0x109   :  { %v2871_v28 = vadd.f32 %v1135_v22, %v1087_v23 }
 0x10e   :  { %v1088_v39 = vpop.f32.mrf.mxu2  ;;  %v993_v45 = vpop.f32.mrf.mxu0 }
 0x10f   :  { %v1137_v40 = vpop.f32.mrf.mxu3  ;;  %v1089_v44 = vadd.f32 %v1088_v39, %v1040_v27  ;;  %v1042_v46 = vpop.f32.mrf.mxu1 }
 0x110   :  { %v1043_v49 = vadd.f32 %v1042_v46, %v993_v45 }
 0x111   :  { %v2897_v50 = vadd.f32 %v1137_v40, %v1089_v44  ;;  %1188 = vmatmul.bf16.gmra.mxu0 %v1825_v42 }
 0x112   :  { %1237 = vmatmul.bf16.gmra.mxu1 %v1829_v43 }
 0x113   :  { %1286 = vmatmul.bf16.gmra.mxu2 %v1833_v47 }
 0x114   :  { %1335 = vmatmul.bf16.gmra.mxu3 %v1837_v48 }
 0x116   :  { %v1091_v51 = vpop.f32.mrf.mxu2  ;;  %v995_v56 = vpop.f32.mrf.mxu0 }
 0x117   :  { %v1140_v52 = vpop.f32.mrf.mxu3  ;;  %v1092_v55 = vadd.f32 %v1091_v51, %v1043_v49  ;;  %v1044_v57 = vpop.f32.mrf.mxu1 }
 0x118   :  { %v1045_v58 = vadd.f32 %v1044_v57, %v995_v56 }
 0x119   :  { %v2899_v59 = vadd.f32 %v1140_v52, %v1092_v55 }
 0x11e   :  { %v1093_v60 = vpop.f32.mrf.mxu2  ;;  %v1154_v1 = vpop.f32.mrf.mxu0 }
 0x11f   :  { %v1142_v63 = vpop.f32.mrf.mxu3  ;;  %v1094_v0 = vadd.f32 %v1093_v60, %v1045_v58  ;;  %v1203_v2 = vpop.f32.mrf.mxu1  ;;  %v1155_v5 = vadd.f32 %v1154_v1, %v2703_v53 }
 0x121   :  { %v2901_v3 = vadd.f32 %v1142_v63, %v1094_v0  ;;  %v1204_v6 = vadd.f32 %v1203_v2, %v1155_v5 }
 0x126   :  { %v1252_v7 = vpop.f32.mrf.mxu2  ;;  %v1156_v10 = vpop.f32.mrf.mxu0 }
 0x127   :  { %v1301_v9 = vpop.f32.mrf.mxu3  ;;  %v1205_v11 = vpop.f32.mrf.mxu1  ;;  %v1253_v12 = vadd.f32 %v1252_v7, %v1204_v6  ;;  %v1157_v13 = vadd.f32 %v1156_v10, %v2729_v8 }
 0x129   :  { %v1302_v14 = vadd.f32 %v1301_v9, %v1253_v12  ;;  %v1206_v17 = vadd.f32 %v1205_v11, %v1157_v13 }
 0x12b   :  { %v1396_v23 = vadd.f32 %v2908_v16, %v1302_v14 }
 0x12d   :  { %v1499_v8 = vmul.f32 %v1396_v23, %v1396_v23 }
 0x12e   :  { %v1254_v18 = vpop.f32.mrf.mxu2  ;;  %v1159_v22 = vpop.f32.mrf.mxu0 }
 0x12f   :  { %v1303_v19 = vpop.f32.mrf.mxu3  ;;  %v1255_v21 = vadd.f32 %v1254_v18, %v1206_v17  ;;  %v1208_v53 = vpop.f32.mrf.mxu1  ;;  %v1160_v26 = vadd.f32 %v1159_v22, %v2731_v15 }
 0x131   :  { %v1304_v24 = vadd.f32 %v1303_v19, %v1255_v21  ;;  %v1209_v33 = vadd.f32 %v1208_v53, %v1160_v26 }
 0x133   :  { %v1397_v27 = vadd.f32 %v2908_v16, %v1304_v24 }
 0x135   :  { %v1478_v29 = vadd.f32 %v1397_v27, %v1396_v23  ;;  %v1500_v30 = vmul.f32 %v1397_v27, %v1397_v27  ;;  %v2225_v31 = vpack.c.bf16 %v1397_v27, %v1396_v23 }
 0x136   :  { %v1257_v35 = vpop.f32.mrf.mxu2  ;;  %v1161_v39 = vpop.f32.mrf.mxu0 }
 0x137   :  { %v1306_v36 = vpop.f32.mrf.mxu3  ;;  %v1515_v37 = vadd.f32 %v1500_v30, %v1499_v8  ;;  %2226 = vst [vmem:[%s2970_s3] sm:$0xff] %v2225_v31   ;;  %v1258_v38 = vadd.f32 %v1257_v35, %v1209_v33  ;;  %v1210_v40 = vpop.f32.mrf.mxu1  ;;  %v1162_v15 = vadd.f32 %v1161_v39, %v2757_v34 }
 0x139   :  { %v1307_v42 = vadd.f32 %v1306_v36, %v1258_v38  ;;  %v1211_v46 = vadd.f32 %v1210_v40, %v1162_v15 }
 0x13b   :  { %v1398_v43 = vadd.f32 %v2908_v16, %v1307_v42 }
 0x13d   :  { %v1479_v44 = vadd.f32 %v1478_v29, %v1398_v43  ;;  %v1501_v45 = vmul.f32 %v1398_v43, %v1398_v43 }
 0x13e   :  { %v1259_v47 = vpop.f32.mrf.mxu2  ;;  %v1164_v52 = vpop.f32.mrf.mxu0 }
 0x13f   :  { %v1308_v48 = vpop.f32.mrf.mxu3  ;;  %v1516_v49 = vadd.f32 %v1515_v37, %v1501_v45  ;;  %v1260_v51 = vadd.f32 %v1259_v47, %v1211_v46  ;;  %v1213_v55 = vpop.f32.mrf.mxu1  ;;  %v1165_v57 = vadd.f32 %v1164_v52, %v2759_v41 }
 0x141   :  { %v1309_v56 = vadd.f32 %v1308_v48, %v1260_v51  ;;  %v1214_v34 = vadd.f32 %v1213_v55, %v1165_v57 }
 0x143   :  { %v1399_v58 = vadd.f32 %v2908_v16, %v1309_v56 }
 0x145   :  { %v1480_v60 = vadd.f32 %v1479_v44, %v1399_v58  ;;  %v1502_v63 = vmul.f32 %v1399_v58, %v1399_v58  ;;  %v2230_v0 = vpack.c.bf16 %v1399_v58, %v1398_v43 }
 0x146   :  { %v1262_v1 = vpop.f32.mrf.mxu2  ;;  %v1166_v7 = vpop.f32.mrf.mxu0 }
 0x147   :  { %v1311_v2 = vpop.f32.mrf.mxu3  ;;  %v1517_v5 = vadd.f32 %v1516_v49, %v1502_v63  ;;  %2262 = vst [vmem:[%s2970_s3 + $0x8] sm:$0xff] %v2230_v0   ;;  %v1263_v6 = vadd.f32 %v1262_v1, %v1214_v34  ;;  %v1215_v9 = vpop.f32.mrf.mxu1  ;;  %v1167_v11 = vadd.f32 %v1166_v7, %v2785_v61 }
 0x149   :  { %v1312_v10 = vadd.f32 %v1311_v2, %v1263_v6  ;;  %v1216_v14 = vadd.f32 %v1215_v9, %v1167_v11 }
 0x14b   :  { %v1400_v41 = vadd.f32 %v2908_v16, %v1312_v10 }
 0x14d   :  { %v1481_v12 = vadd.f32 %v1480_v60, %v1400_v41  ;;  %v1503_v13 = vmul.f32 %v1400_v41, %v1400_v41 }
 0x14e   :  { %v1264_v17 = vpop.f32.mrf.mxu2  ;;  %v1169_v22 = vpop.f32.mrf.mxu0 }
 0x14f   :  { %v1313_v18 = vpop.f32.mrf.mxu3  ;;  %v1518_v19 = vadd.f32 %v1517_v5, %v1503_v13  ;;  %v1265_v21 = vadd.f32 %v1264_v17, %v1216_v14  ;;  %v1218_v53 = vpop.f32.mrf.mxu1  ;;  %v1170_v24 = vadd.f32 %v1169_v22, %v2787_v4 }
 0x151   :  { %v1314_v23 = vadd.f32 %v1313_v18, %v1265_v21  ;;  %v1219_v61 = vadd.f32 %v1218_v53, %v1170_v24 }
 0x153   :  { %v1401_v26 = vadd.f32 %v2908_v16, %v1314_v23 }
 0x155   :  { %v1482_v27 = vadd.f32 %v1481_v12, %v1401_v26  ;;  %v1504_v8 = vmul.f32 %v1401_v26, %v1401_v26  ;;  %v2235_v29 = vpack.c.bf16 %v1401_v26, %v1400_v41 }
 0x156   :  { %v1267_v30 = vpop.f32.mrf.mxu2  ;;  %v1171_v36 = vpop.f32.mrf.mxu0 }
 0x157   :  { %v1316_v31 = vpop.f32.mrf.mxu3  ;;  %v1519_v33 = vadd.f32 %v1518_v19, %v1504_v8  ;;  %2263 = vst [vmem:[%s2970_s3 + $0x10] sm:$0xff] %v2235_v29   ;;  %v1268_v35 = vadd.f32 %v1267_v30, %v1219_v61  ;;  %v1220_v37 = vpop.f32.mrf.mxu1  ;;  %v1172_v39 = vadd.f32 %v1171_v36, %v2813_v25 }
 0x159   :  { %v1317_v38 = vadd.f32 %v1316_v31, %v1268_v35  ;;  %v1221_v15 = vadd.f32 %v1220_v37, %v1172_v39 }
 0x15b   :  { %v1402_v4 = vadd.f32 %v2908_v16, %v1317_v38 }
 0x15d   :  { %v1483_v40 = vadd.f32 %v1482_v27, %v1402_v4  ;;  %v1505_v42 = vmul.f32 %v1402_v4, %v1402_v4 }
 0x15e   :  { %v1269_v43 = vpop.f32.mrf.mxu2  ;;  %v1174_v47 = vpop.f32.mrf.mxu0 }
 0x15f   :  { %v1318_v44 = vpop.f32.mrf.mxu3  ;;  %v1520_v45 = vadd.f32 %v1519_v33, %v1505_v42  ;;  %v1270_v46 = vadd.f32 %v1269_v43, %v1221_v15  ;;  %v1223_v48 = vpop.f32.mrf.mxu1  ;;  %v1175_v51 = vadd.f32 %v1174_v47, %v2815_v32 }
 0x161   :  { %v1319_v49 = vadd.f32 %v1318_v44, %v1270_v46  ;;  %v1224_v25 = vadd.f32 %v1223_v48, %v1175_v51 }
 0x163   :  { %v1403_v52 = vadd.f32 %v2908_v16, %v1319_v49 }
 0x165   :  { %v1484_v55 = vadd.f32 %v1483_v40, %v1403_v52  ;;  %v1506_v56 = vmul.f32 %v1403_v52, %v1403_v52  ;;  %v2240_v57 = vpack.c.bf16 %v1403_v52, %v1402_v4 }
 0x166   :  { %v1272_v58 = vpop.f32.mrf.mxu2  ;;  %v1176_v34 = vpop.f32.mrf.mxu0 }
 0x167   :  { %v1321_v60 = vpop.f32.mrf.mxu3  ;;  %v1521_v63 = vadd.f32 %v1520_v45, %v1506_v56  ;;  %2264 = vst [vmem:[%s2970_s3 + $0x18] sm:$0xff] %v2240_v57   ;;  %v1273_v0 = vadd.f32 %v1272_v58, %v1224_v25  ;;  %v1225_v1 = vpop.f32.mrf.mxu1  ;;  %v1177_v5 = vadd.f32 %v1176_v34, %v2841_v54 }
 0x169   :  { %v1322_v2 = vadd.f32 %v1321_v60, %v1273_v0  ;;  %v1226_v9 = vadd.f32 %v1225_v1, %v1177_v5 }
 0x16b   :  { %v1404_v32 = vadd.f32 %v2908_v16, %v1322_v2 }
 0x16d   :  { %v1485_v6 = vadd.f32 %v1484_v55, %v1404_v32  ;;  %v1507_v7 = vmul.f32 %v1404_v32, %v1404_v32 }
 0x16e   :  { %v1274_v10 = vpop.f32.mrf.mxu2  ;;  %v1179_v13 = vpop.f32.mrf.mxu0 }
 0x16f   :  { %v1323_v11 = vpop.f32.mrf.mxu3  ;;  %v1522_v41 = vadd.f32 %v1521_v63, %v1507_v7  ;;  %v1275_v12 = vadd.f32 %v1274_v10, %v1226_v9  ;;  %v1228_v14 = vpop.f32.mrf.mxu1  ;;  %v1180_v18 = vadd.f32 %v1179_v13, %v2843_v62 }
 0x171   :  { %v1324_v17 = vadd.f32 %v1323_v11, %v1275_v12  ;;  %v1229_v54 = vadd.f32 %v1228_v14, %v1180_v18 }
 0x173   :  { %v1405_v19 = vadd.f32 %v2908_v16, %v1324_v17 }
 0x175   :  { %v1486_v21 = vadd.f32 %v1485_v6, %v1405_v19  ;;  %v1508_v22 = vmul.f32 %v1405_v19, %v1405_v19  ;;  %v2245_v53 = vpack.c.bf16 %v1405_v19, %v1404_v32 }
 0x176   :  { %v1277_v23 = vpop.f32.mrf.mxu2  ;;  %v1181_v8 = vpop.f32.mrf.mxu0 }
 0x177   :  { %v1326_v24 = vpop.f32.mrf.mxu3  ;;  %v1523_v26 = vadd.f32 %v1522_v41, %v1508_v22  ;;  %2265 = vst [vmem:[%s2970_s3 + $0x20] sm:$0xff] %v2245_v53   ;;  %v1278_v27 = vadd.f32 %v1277_v23, %v1229_v54  ;;  %v1230_v29 = vpop.f32.mrf.mxu1  ;;  %v1182_v30 = vadd.f32 %v1181_v8, %v2869_v20 }
 0x179   :  { %v1327_v61 = vadd.f32 %v1326_v24, %v1278_v27  ;;  %v1231_v35 = vadd.f32 %v1230_v29, %v1182_v30 }
 0x17b   :  { %v1406_v62 = vadd.f32 %v2908_v16, %v1327_v61 }
 0x17d   :  { %v1487_v31 = vadd.f32 %v1486_v21, %v1406_v62  ;;  %v1509_v33 = vmul.f32 %v1406_v62, %v1406_v62 }
 0x17e   :  { %v1279_v36 = vpop.f32.mrf.mxu2  ;;  %v1184_v4 = vpop.f32.mrf.mxu0 }
 0x17f   :  { %v1328_v37 = vpop.f32.mrf.mxu3  ;;  %v1524_v38 = vadd.f32 %v1523_v26, %v1509_v33  ;;  %v1280_v39 = vadd.f32 %v1279_v36, %v1231_v35  ;;  %v1233_v40 = vpop.f32.mrf.mxu1  ;;  %v1185_v15 = vadd.f32 %v1184_v4, %v2871_v28  ;;  %v1412_v36 = vlaneseq }
 0x181   :  { %v1329_v42 = vadd.f32 %v1328_v37, %v1280_v39  ;;  %v1234_v20 = vadd.f32 %v1233_v40, %v1185_v15  ;;  %v1413_v40 = vshrl.u32 %v1412_v36, 7 }
 0x183   :  { %v1407_v43 = vadd.f32 %v2908_v16, %v1329_v42  ;;  %vm1536_vm0 = vcmp.eq.s32.totalorder %v1413_v40, 0  ;;  %vm1538_vm1 = vcmp.eq.s32.totalorder %v1413_v40, 1 }
 0x185   :  { %v1488_v44 = vadd.f32 %v1487_v31, %v1407_v43  ;;  %v1510_v45 = vmul.f32 %v1407_v43, %v1407_v43  ;;  %v2250_v46 = vpack.c.bf16 %v1407_v43, %v1406_v62 }
 0x186   :  { %v1282_v47 = vpop.f32.mrf.mxu2  ;;  %v1186_v52 = vpop.f32.mrf.mxu0 }
 0x187   :  { %v1331_v48 = vpop.f32.mrf.mxu3  ;;  %v1525_v49 = vadd.f32 %v1524_v38, %v1510_v45  ;;  %2266 = vst [vmem:[%s2970_s3 + $0x28] sm:$0xff] %v2250_v46   ;;  %v1283_v51 = vadd.f32 %v1282_v47, %v1234_v20  ;;  %v1235_v55 = vpop.f32.mrf.mxu1  ;;  %v1187_v57 = vadd.f32 %v1186_v52, %v2897_v50 }
 0x189   :  { %v1332_v56 = vadd.f32 %v1331_v48, %v1283_v51  ;;  %v1236_v60 = vadd.f32 %v1235_v55, %v1187_v57 }
 0x18b   :  { %v1408_v28 = vadd.f32 %v2908_v16, %v1332_v56 }
 0x18d   :  { %v1489_v25 = vadd.f32 %v1488_v44, %v1408_v28  ;;  %v1511_v58 = vmul.f32 %v1408_v28, %v1408_v28 }
 0x18e   :  { %v1284_v63 = vpop.f32.mrf.mxu2  ;;  %v1189_v2 = vpop.f32.mrf.mxu0 }
 0x18f   :  { %v1333_v0 = vpop.f32.mrf.mxu3  ;;  %v1526_v34 = vadd.f32 %v1525_v49, %v1511_v58  ;;  %v1285_v1 = vadd.f32 %v1284_v63, %v1236_v60  ;;  %v1190_v32 = vadd.f32 %v1189_v2, %v2899_v59  ;;  %v1238_v6 = vpop.f32.mrf.mxu1 }
 0x191   :  { %v1334_v5 = vadd.f32 %v1333_v0, %v1285_v1  ;;  %v1239_v50 = vadd.f32 %v1238_v6, %v1190_v32 }
 0x193   :  { %v1409_v7 = vadd.f32 %v2908_v16, %v1334_v5 }
 0x195   :  { %v1490_v9 = vadd.f32 %v1489_v25, %v1409_v7  ;;  %v1512_v10 = vmul.f32 %v1409_v7, %v1409_v7  ;;  %v2255_v11 = vpack.c.bf16 %v1409_v7, %v1408_v28 }
 0x196   :  { %v1287_v41 = vpop.f32.mrf.mxu2  ;;  %v1191_v17 = vpop.f32.mrf.mxu0 }
 0x197   :  { %v1336_v12 = vpop.f32.mrf.mxu3  ;;  %v1527_v13 = vadd.f32 %v1526_v34, %v1512_v10  ;;  %2267 = vst [vmem:[%s2970_s3 + $0x30] sm:$0xff] %v2255_v11   ;;  %v1288_v14 = vadd.f32 %v1287_v41, %v1239_v50  ;;  %v1192_v19 = vadd.f32 %v1191_v17, %v2901_v3  ;;  %v1240_v21 = vpop.f32.mrf.mxu1 }
 0x199   :  { %v1337_v18 = vadd.f32 %v1336_v12, %v1288_v14  ;;  %v1241_v54 = vadd.f32 %v1240_v21, %v1192_v19 }
 0x19b   :  { %v1410_v59 = vadd.f32 %v2908_v16, %v1337_v18 }
 0x19d   :  { %v1491_v22 = vadd.f32 %v1490_v9, %v1410_v59  ;;  %v1513_v53 = vmul.f32 %v1410_v59, %v1410_v59 }
 0x19e   :  { %v1289_v23 = vpop.f32.mrf.mxu2 }
 0x19f   :  { %v1528_v24 = vadd.f32 %v1527_v13, %v1513_v53  ;;  %v1290_v26 = vadd.f32 %v1289_v23, %v1241_v54  ;;  %v1338_v27 = vpop.f32.mrf.mxu3 }
 0x1a1   :  { %v1339_v8 = vadd.f32 %v1338_v27, %v1290_v26 }
 0x1a3   :  { %v1411_v29 = vadd.f32 %v2908_v16, %v1339_v8 }
 0x1a5   :  { %v1492_v61 = vadd.f32 %v1491_v22, %v1411_v29  ;;  %v1514_v30 = vmul.f32 %v1411_v29, %v1411_v29  ;;  %v2260_v62 = vpack.c.bf16 %v1411_v29, %v1410_v59 }
 0x1a7   :  { %v1493_v31 = vrot.slane %v1492_v61, 4  ;;  %v1529_v33 = vadd.f32 %v1528_v24, %v1514_v30  ;;  %2268 = vst [vmem:[%s2970_s3 + $0x38] sm:$0xff] %v2260_v62  }
 0x1a9   :  { %v1494_v3 = vadd.f32 %v1493_v31, %v1492_v61  ;;  %v1530_v35 = vrot.slane %v1529_v33, 4 }
 0x1ab   :  { %v1495_v37 = vrot.slane %v1494_v3, 2  ;;  %v1531_v38 = vadd.f32 %v1530_v35, %v1529_v33 }
 0x1ad   :  { %v1496_v39 = vadd.f32 %v1495_v37, %v1494_v3  ;;  %v1532_v4 = vrot.slane %v1531_v38, 2 }
 0x1af   :  { %v1497_v42 = vrot.slane %v1496_v39, 1  ;;  %v1533_v15 = vadd.f32 %v1532_v4, %v1531_v38 }
 0x1b1   :  { %v1498_v16 = vadd.f32 %v1497_v42, %v1496_v39  ;;  %v1534_v43 = vrot.slane %v1533_v15, 1 }
 0x1b3   :  { %v1535_v44 = vadd.f32 %v1534_v43, %v1533_v15  ;;  %v1537_v45 = vsel %vm1536_vm0, %v1498_v16, 0.0 }
 0x1b5   :  { %v1539_v46 = vsel %vm1538_vm1, %v1535_v44, 0.0 }
 0x1b6   :  { %v1540_v20 = vadd.f32 %v1539_v46, %v1537_v45 }
 0x1b8   :  { %1541 = vst [vmem:[%s2971_s4] sm:$0xff] %v1540_v20 }

// kernel: discriminator_forward.12
= control target key start
LH: loop header
LB: loop body
LE: loop exit
PB: predicated region body
PF: predicated region fallthrough
CT: control target
= control target key end

     0   :  { %s140_s0 = inlined_call_operand.vmem [shape: bf16[32,256], index: 0, kind: input, shape index: {}]   ;;  %s141_s1 = inlined_call_operand.vmem [shape: f32[1,256], index: 1, kind: input, shape index: {}]   ;;  %s142_s2 = inlined_call_operand.vmem [shape: f32[1,256], index: 2, kind: input, shape index: {}]   ;;  %s143_s3 = inlined_call_operand.vmem [shape: bf16[32,256], index: 3, kind: output, shape index: {}]  }
   0x1   :  { %v14_v0 = vld [vmem:[%s140_s0] sm:$0xff]  ;;  %v15_v7 = vld [vmem:[%s140_s0 + $0x8] sm:$0xff]  ;;  %v16_v8 = vld [vmem:[%s140_s0 + $0x10] sm:$0xff] }
   0x2   :  { %v26_v1 = vld [vmem:[%s141_s1] sm:$0x3]  ;;  %v18_v3 = vunpack.c.l.bf16 %v14_v0  ;;  %v19_v4 = vunpack.c.h.bf16 %v14_v0  ;;  %v17_v9 = vld [vmem:[%s140_s0 + $0x18] sm:$0xff]  ;;  %v20_v12 = vunpack.c.l.bf16 %v15_v7  ;;  %v21_v13 = vunpack.c.h.bf16 %v15_v7 }
   0x3   :  { %v40_v2 = vld [vmem:[%s142_s2] sm:$0x3]  ;;  %v28_v5 = vperm.slane %v26_v1, 0  ;;  %v29_v6 = vperm.slane %v26_v1, 1  ;;  %v22_v16 = vunpack.c.l.bf16 %v16_v8  ;;  %v23_v17 = vunpack.c.h.bf16 %v16_v8 }
   0x4   :  { %v42_v10 = vperm.slane %v40_v2, 0  ;;  %v43_v11 = vperm.slane %v40_v2, 1  ;;  %v24_v20 = vunpack.c.l.bf16 %v17_v9  ;;  %v25_v21 = vunpack.c.h.bf16 %v17_v9 }
   0x5   :  { %v32_v14 = vmul.f32 %v28_v5, %v18_v3  ;;  %v33_v15 = vmul.f32 %v29_v6, %v19_v4  ;;  %v34_v18 = vmul.f32 %v28_v5, %v20_v12  ;;  %v35_v19 = vmul.f32 %v29_v6, %v21_v13 }
   0x6   :  { %v36_v24 = vmul.f32 %v28_v5, %v22_v16  ;;  %v37_v25 = vmul.f32 %v29_v6, %v23_v17  ;;  %v38_v28 = vmul.f32 %v28_v5, %v24_v20  ;;  %v39_v29 = vmul.f32 %v29_v6, %v25_v21 }
   0x7   :  { %v46_v22 = vadd.f32 %v42_v10, %v32_v14  ;;  %v47_v23 = vadd.f32 %v43_v11, %v33_v15  ;;  %v48_v26 = vadd.f32 %v42_v10, %v34_v18  ;;  %v49_v27 = vadd.f32 %v43_v11, %v35_v19 }
   0x8   :  { %v50_v36 = vadd.f32 %v42_v10, %v36_v24  ;;  %v51_v37 = vadd.f32 %v43_v11, %v37_v25  ;;  %v52_v41 = vadd.f32 %v42_v10, %v38_v28  ;;  %v53_v45 = vadd.f32 %v43_v11, %v39_v29 }
   0x9   :  { %vm54_vm0 = vcmp.ge.f32.partialorder %v46_v22, 0.0  ;;  %vm55_vm1 = vcmp.ge.f32.partialorder %v47_v23, 0.0  ;;  %v62_v30 = vmul.f32 0.2, %v46_v22  ;;  %v63_v31 = vmul.f32 0.2, %v47_v23 }
   0xa   :  { %vm56_vm2 = vcmp.ge.f32.partialorder %v48_v26, 0.0  ;;  %vm57_vm3 = vcmp.ge.f32.partialorder %v49_v27, 0.0  ;;  %v64_v32 = vmul.f32 0.2, %v48_v26  ;;  %v65_v33 = vmul.f32 0.2, %v49_v27 }
   0xb   :  { %v70_v34 = vsel %vm54_vm0, %v46_v22, %v62_v30  ;;  %v71_v35 = vsel %vm55_vm1, %v47_v23, %v63_v31  ;;  %vm58_vm4 = vcmp.ge.f32.partialorder %v50_v36, 0.0  ;;  %vm59_vm5 = vcmp.ge.f32.partialorder %v51_v37, 0.0 }
   0xc   :  { %v78_v38 = vpack.c.bf16 %v71_v35, %v70_v34  ;;  %v72_v39 = vsel %vm56_vm2, %v48_v26, %v64_v32  ;;  %v73_v40 = vsel %vm57_vm3, %v49_v27, %v65_v33  ;;  %v66_v43 = vmul.f32 0.2, %v50_v36 }
   0xd   :  { %v79_v42 = vpack.c.bf16 %v73_v40, %v72_v39  ;;  %v67_v44 = vmul.f32 0.2, %v51_v37  ;;  %vm60_vm6 = vcmp.ge.f32.partialorder %v52_v41, 0.0  ;;  %v68_v46 = vmul.f32 0.2, %v52_v41 }
   0xe   :  { %82 = vst [vmem:[%s143_s3] sm:$0xff] %v78_v38  ;;  %v74_v47 = vsel %vm58_vm4, %v50_v36, %v66_v43  ;;  %vm61_vm7 = vcmp.ge.f32.partialorder %v53_v45, 0.0  ;;  %v69_v49 = vmul.f32 0.2, %v53_v45 }
   0xf   :  { %83 = vst [vmem:[%s143_s3 + $0x8] sm:$0xff] %v79_v42  ;;  %v75_v48 = vsel %vm59_vm5, %v51_v37, %v67_v44  ;;  %v76_v50 = vsel %vm60_vm6, %v52_v41, %v68_v46 }
  0x10   :  { %v80_v51 = vpack.c.bf16 %v75_v48, %v74_v47  ;;  %v77_v52 = vsel %vm61_vm7, %v53_v45, %v69_v49 }
  0x11   :  { %v81_v53 = vpack.c.bf16 %v77_v52, %v76_v50 }
  0x12   :  { %84 = vst [vmem:[%s143_s3 + $0x10] sm:$0xff] %v80_v51 }
  0x13   :  { %85 = vst [vmem:[%s143_s3 + $0x18] sm:$0xff] %v81_v53 }

// kernel: discriminator_forward.11
= control target key start
LH: loop header
LB: loop body
LE: loop exit
PB: predicated region body
PF: predicated region fallthrough
CT: control target
= control target key end

     0   :  { %s2706_s15 = smov 0   ;;  %s2708_s16 = smov 0   ;;  %s3168_s0 = inlined_call_operand.vmem [shape: bf16[32,2048], index: 0, kind: input, shape index: {}]   ;;  %s3169_s1 = inlined_call_operand.vmem [shape: bf16[2048,256], index: 1, kind: input, shape index: {}]   ;;  %s3170_s2 = inlined_call_operand.vmem [shape: f32[1,256], index: 2, kind: input, shape index: {}]   ;;  %s3171_s3 = inlined_call_operand.vmem [shape: bf16[32,256], index: 3, kind: output, shape index: {0}]   ;;  %s3172_s4 = inlined_call_operand.vmem [shape: f32[8,256], index: 4, kind: output, shape index: {1}]  }
   0x1   :  { %s2710_s17 = smov 0   ;;  %s2712_s18 = smov 0  }
   0x2   :  { %s2714_s19 = smov 0  }
   0x3 LB: > { %s27_s20 = sadd.s32 1, %s2674_s18  ;;  %p50_p1 = scmp.ne.s32.totalorder %s2666_s16, %s2662_s15  ;;  %s2678_s19 = sphi %s2714_s19, %s15_s19   ;;  %s2674_s18 = sphi %s2712_s18, %s3176_s18   ;;  %s2670_s17 = sphi %s2710_s17, %s3175_s17   ;;  %s2666_s16 = sphi %s2708_s16, %s3174_s16   ;;  %s2662_s15 = sphi %s2706_s15, %s3173_s15  }
   0x4   : > { %p28_p0 = scmp.ge.s32.totalorder %s27_s20, 2  ;;  %p51_p2 = scmp.eq.s32.totalorder %s2678_s19, 0 }
   0x5   : > { %s43_s22 = sadd.s32 1, %s2666_s16  ;;  %p1860_p5 = scmp.ge.s32.totalorder %s2678_s19, 2 }
   0x6   : > { %s3178_s20 = smov (%p28_p0, %s27_s20), 0  ;;  %p52_p3 = por %p51_p2, %p50_p1 }
   0x7   : > { %s39_s21 = ssub.s32 %s2674_s18, %s3178_s20  ;;  %194 = sbr.rel (%p1860_p5) target bundleno = 32 (0x20), region = 20 }
   0x8   : > { %p41_p4 = scmp.eq.s32.totalorder %s39_s21, 0 }
   0xa   : > { %s2741_s23 = scalar_select %p41_p4, %s2666_s16, %s43_s22  }
   0xc   : > { %197 = sbr.rel (!%p52_p3) target bundleno = 32 (0x20), region = 24  ;;  %s199_s24 = sand.u32 (%p52_p3), 1, %s2666_s16  }
   0xd   : > { %s2453_s25 = sshll.u32 (%p52_p3), %s2674_s18, 5  ;;  %s1861_s26 = sshll.u32 (%p52_p3), %s199_s24, 7 }
   0xe   : > { %s2749_s29 = scalar_lea.vmem (%p52_p3), %s3168_s0, %s2453_s25  ;;  %s201_s30 = scalar_lea.vmem (%p52_p3), [#allocation3], %s1861_s26 }
   0xf   : > { %v220_v0 = vld [vmem:[%s2749_s29] sm:$0xff] (%p52_p3)  ;;  %v222_v1 = vld [vmem:[%s2749_s29 + $0x8] sm:$0xff] (%p52_p3)  ;;  %v224_v2 = vld [vmem:[%s2749_s29 + $0x10] sm:$0xff] (%p52_p3) }
  0x10   : > { %221 = vst [vmem:[%s201_s30] sm:$0xff] (%p52_p3), %v220_v0  ;;  %v226_v3 = vld [vmem:[%s2749_s29 + $0x18] sm:$0xff] (%p52_p3)  ;;  %v228_v4 = vld [vmem:[%s2749_s29 + $0x40] sm:$0xff] (%p52_p3)  ;;  %v230_v5 = vld [vmem:[%s2749_s29 + $0x48] sm:$0xff] (%p52_p3) }
  0x11   : > { %223 = vst [vmem:[%s201_s30 + $0x8] sm:$0xff] %v222_v1  ;;  %v232_v6 = vld [vmem:[%s2749_s29 + $0x50] sm:$0xff]  ;;  %v234_v7 = vld [vmem:[%s2749_s29 + $0x58] sm:$0xff]  ;;  %v236_v8 = vld [vmem:[%s2749_s29 + $0x80] sm:$0xff] }
  0x12   : > { %225 = vst [vmem:[%s201_s30 + $0x10] sm:$0xff] %v224_v2  ;;  %v238_v9 = vld [vmem:[%s2749_s29 + $0x88] sm:$0xff]  ;;  %v240_v10 = vld [vmem:[%s2749_s29 + $0x90] sm:$0xff]  ;;  %v242_v11 = vld [vmem:[%s2749_s29 + $0x98] sm:$0xff] }
  0x13   : > { %227 = vst [vmem:[%s201_s30 + $0x18] sm:$0xff] %v226_v3  ;;  %v244_v12 = vld [vmem:[%s2749_s29 + $0xc0] sm:$0xff]  ;;  %v246_v13 = vld [vmem:[%s2749_s29 + $0xc8] sm:$0xff]  ;;  %v248_v14 = vld [vmem:[%s2749_s29 + $0xd0] sm:$0xff] }
  0x14   : > { %229 = vst [vmem:[%s201_s30 + $0x20] sm:$0xff] %v228_v4  ;;  %v250_v15 = vld [vmem:[%s2749_s29 + $0xd8] sm:$0xff] }
  0x15   : > { %231 = vst [vmem:[%s201_s30 + $0x28] sm:$0xff] %v230_v5 }
  0x16   : > { %233 = vst [vmem:[%s201_s30 + $0x30] sm:$0xff] %v232_v6 }
  0x17   : > { %235 = vst [vmem:[%s201_s30 + $0x38] sm:$0xff] %v234_v7 }
  0x18   : > { %237 = vst [vmem:[%s201_s30 + $0x40] sm:$0xff] %v236_v8 }
  0x19   : > { %239 = vst [vmem:[%s201_s30 + $0x48] sm:$0xff] %v238_v9 }
  0x1a   : > { %241 = vst [vmem:[%s201_s30 + $0x50] sm:$0xff] %v240_v10 }
  0x1b   : > { %243 = vst [vmem:[%s201_s30 + $0x58] sm:$0xff] %v242_v11 }
  0x1c   : > { %245 = vst [vmem:[%s201_s30 + $0x60] sm:$0xff] %v244_v12 }
  0x1d   : > { %247 = vst [vmem:[%s201_s30 + $0x68] sm:$0xff] %v246_v13 }
  0x1e   : > { %249 = vst [vmem:[%s201_s30 + $0x70] sm:$0xff] %v248_v14 }
  0x1f   : > { %251 = vst [vmem:[%s201_s30 + $0x78] sm:$0xff] %v250_v15 }
  0x20 PF: > { %p1864_p6 = scmp.ge.s32.totalorder %s2678_s19, 1  ;;  %p271_p7 = scmp.lt.s32.totalorder %s2678_s19, 3 }
  0x22   : > { %p272_p8 = pnand %p1864_p6, %p271_p7 }
  0x23   : > { %s278_s5 = sand.u32 (!%p272_p8), 1, %s2662_s15   ;;  %s1866_s6 = sshll.u32 (!%p272_p8), %s2670_s17, 7 }
  0x24   : > { %275 = sbr.rel (%p272_p8) target bundleno = 382 (0x17e), region = 51  ;;  %s1865_s7 = sshll.u32 (!%p272_p8), %s278_s5, 7 }
  0x25   : > { %p335_p9 = scmp.lt.s32.totalorder (!%p272_p8), %s1866_s6, 255  ;;  %s2776_s12 = scalar_lea.vmem (!%p272_p8), [#allocation3], %s1865_s7 }
  0x26   : > { %p1869_p10 = scmp.ne.s32.totalorder (!%p272_p8), %s2670_s17, 0 }
  0x29   : > { %s3180_s6 = smov (!%p335_p9, %s1866_s6), 255  ;;  %376 = sbr.rel (%p1869_p10) target bundleno = 55 (0x37), region = 59 }
  0x2a   : > { %s2454_s8 = sshll.u32 %s3180_s6, 3 }
  0x2b   : > { %s2774_s11 = scalar_lea.vmem %s3169_s1, %s2454_s8 }
  0x2e   : > { %v2680_v16 = vmov 0.0  }
  0x2f   : > { %377 = vst [vmem:[#allocation2 + $0x30] sm:$0xff] %v2680_v16 }
  0x30   : > { %378 = vst [vmem:[#allocation2] sm:$0xff] %v2680_v16 }
  0x31   : > { %379 = vst [vmem:[#allocation2 + $0x18] sm:$0xff] %v2680_v16 }
  0x32   : > { %380 = vst [vmem:[#allocation2 + $0x10] sm:$0xff] %v2680_v16 }
  0x33   : > { %381 = vst [vmem:[#allocation2 + $0x8] sm:$0xff] %v2680_v16 }
  0x34   : > { %382 = vst [vmem:[#allocation2 + $0x20] sm:$0xff] %v2680_v16 }
  0x35   : > { %383 = vst [vmem:[#allocation2 + $0x28] sm:$0xff] %v2680_v16 }
  0x36   : > { %384 = vst [vmem:[#allocation2 + $0x38] sm:$0xff] %v2680_v16 }
  0x37 PF: > { %v1992_v17 = vld [vmem:[%s2774_s11 + $0x70] sm:$0xf]  ;;  %v2486_v18 = vld [vmem:[%s2774_s11 + $0x74] sm:$0xf0]  ;;  %v1984_v28 = vld [vmem:[%s2774_s11 + $0x60] sm:$0xf] }
  0x38   : > { %v2056_v19 = vld [vmem:[%s2774_s11 + $0xf0] sm:$0xf]  ;;  %v1993_v20 = vor.u32 %v2486_v18, %v1992_v17  ;;  %v2502_v21 = vld [vmem:[%s2774_s11 + $0xf4] sm:$0xf0]  ;;  %v2484_v30 = vld [vmem:[%s2774_s11 + $0x64] sm:$0xf0] }
  0x39   : > { %v2120_v22 = vld [vmem:[%s2774_s11 + $0x170] sm:$0xf]  ;;  %v2518_v23 = vld [vmem:[%s2774_s11 + $0x174] sm:$0xf0]  ;;  %v2057_v24 = vor.u32 %v2502_v21, %v2056_v19  ;;  %v2048_v31 = vld [vmem:[%s2774_s11 + $0xe0] sm:$0xf]  ;;  %v1985_v33 = vor.u32 %v2484_v30, %v1984_v28 }
  0x3a   : > { %v2121_v25 = vor.u32 %v2518_v23, %v2120_v22  ;;  %v2184_v26 = vld [vmem:[%s2774_s11 + $0x1f0] sm:$0xf]  ;;  %v2534_v27 = vld [vmem:[%s2774_s11 + $0x1f4] sm:$0xf0]  ;;  %1257 = vmatpush.bf16.msra.mxu0 %v1993_v20  ;;  %v2500_v32 = vld [vmem:[%s2774_s11 + $0xe4] sm:$0xf0] }
  0x3b   : > { %v2185_v29 = vor.u32 %v2534_v27, %v2184_v26  ;;  %1276 = vmatpush.bf16.msra.mxu1 %v2057_v24  ;;  %v2049_v34 = vor.u32 %v2500_v32, %v2048_v31  ;;  %v2112_v35 = vld [vmem:[%s2774_s11 + $0x160] sm:$0xf]  ;;  %v2516_v36 = vld [vmem:[%s2774_s11 + $0x164] sm:$0xf0]  ;;  %v1976_v40 = vld [vmem:[%s2774_s11 + $0x50] sm:$0xf] }
  0x3c   : > { %1295 = vmatpush.bf16.msra.mxu2 %v2121_v25  ;;  %v2176_v37 = vld [vmem:[%s2774_s11 + $0x1e0] sm:$0xf]  ;;  %v2113_v38 = vor.u32 %v2516_v36, %v2112_v35  ;;  %v2532_v39 = vld [vmem:[%s2774_s11 + $0x1e4] sm:$0xf0]  ;;  %v2482_v41 = vld [vmem:[%s2774_s11 + $0x54] sm:$0xf0] }
  0x3d   : > { %1314 = vmatpush.bf16.msra.mxu3 %v2185_v29  ;;  %v2177_v42 = vor.u32 %v2532_v39, %v2176_v37  ;;  %v2040_v43 = vld [vmem:[%s2774_s11 + $0xd0] sm:$0xf]  ;;  %v2498_v44 = vld [vmem:[%s2774_s11 + $0xd4] sm:$0xf0]  ;;  %v1977_v46 = vor.u32 %v2482_v41, %v1976_v40  ;;  %v1968_v52 = vld [vmem:[%s2774_s11 + $0x40] sm:$0xf] }
  0x3e   : > { %v2104_v45 = vld [vmem:[%s2774_s11 + $0x150] sm:$0xf]  ;;  %1258 = vmatpush.bf16.msra.mxu0 %v1985_v33  ;;  %v2514_v47 = vld [vmem:[%s2774_s11 + $0x154] sm:$0xf0]  ;;  %v2041_v50 = vor.u32 %v2498_v44, %v2040_v43  ;;  %v2480_v53 = vld [vmem:[%s2774_s11 + $0x44] sm:$0xf0] }
  0x3f   : > { %v2168_v48 = vld [vmem:[%s2774_s11 + $0x1d0] sm:$0xf]  ;;  %v2530_v49 = vld [vmem:[%s2774_s11 + $0x1d4] sm:$0xf0]  ;;  %1277 = vmatpush.bf16.msra.mxu1 %v2049_v34  ;;  %v2105_v51 = vor.u32 %v2514_v47, %v2104_v45  ;;  %v2032_v54 = vld [vmem:[%s2774_s11 + $0xc0] sm:$0xf]  ;;  %v1969_v61 = vor.u32 %v2480_v53, %v1968_v52 }
  0x40   : > { %1296 = vmatpush.bf16.msra.mxu2 %v2113_v38  ;;  %v2169_v55 = vor.u32 %v2530_v49, %v2168_v48  ;;  %v2496_v56 = vld [vmem:[%s2774_s11 + $0xc4] sm:$0xf0]  ;;  %v2096_v57 = vld [vmem:[%s2774_s11 + $0x140] sm:$0xf]  ;;  %v1960_v0 = vld [vmem:[%s2774_s11 + $0x30] sm:$0xf] }
  0x41   : > { %1315 = vmatpush.bf16.msra.mxu3 %v2177_v42  ;;  %v2512_v58 = vld [vmem:[%s2774_s11 + $0x144] sm:$0xf0]  ;;  %v2160_v59 = vld [vmem:[%s2774_s11 + $0x1c0] sm:$0xf]  ;;  %v2033_v62 = vor.u32 %v2496_v56, %v2032_v54  ;;  %v2478_v1 = vld [vmem:[%s2774_s11 + $0x34] sm:$0xf0] }
  0x42   : > { %v2528_v60 = vld [vmem:[%s2774_s11 + $0x1c4] sm:$0xf0]  ;;  %1259 = vmatpush.bf16.msra.mxu0 %v1977_v46  ;;  %v2097_v63 = vor.u32 %v2512_v58, %v2096_v57  ;;  %v2024_v2 = vld [vmem:[%s2774_s11 + $0xb0] sm:$0xf]  ;;  %v2494_v4 = vld [vmem:[%s2774_s11 + $0xb4] sm:$0xf0]  ;;  %v1961_v9 = vor.u32 %v2478_v1, %v1960_v0 }
  0x43   : > { %1278 = vmatpush.bf16.msra.mxu1 %v2041_v50  ;;  %v2161_v3 = vor.u32 %v2528_v60, %v2160_v59  ;;  %v2088_v5 = vld [vmem:[%s2774_s11 + $0x130] sm:$0xf]  ;;  %v2510_v6 = vld [vmem:[%s2774_s11 + $0x134] sm:$0xf0]  ;;  %v2025_v10 = vor.u32 %v2494_v4, %v2024_v2  ;;  %v1952_v12 = vld [vmem:[%s2774_s11 + $0x20] sm:$0xf] }
  0x44   : > { %1297 = vmatpush.bf16.msra.mxu2 %v2105_v51  ;;  %v2152_v7 = vld [vmem:[%s2774_s11 + $0x1b0] sm:$0xf]  ;;  %v2526_v8 = vld [vmem:[%s2774_s11 + $0x1b4] sm:$0xf0]  ;;  %v2089_v11 = vor.u32 %v2510_v6, %v2088_v5  ;;  %v2476_v13 = vld [vmem:[%s2774_s11 + $0x24] sm:$0xf0] }
  0x45   : > { %1316 = vmatpush.bf16.msra.mxu3 %v2169_v55  ;;  %v2016_v14 = vld [vmem:[%s2774_s11 + $0xa0] sm:$0xf]  ;;  %v2153_v15 = vor.u32 %v2526_v8, %v2152_v7  ;;  %v2492_v16 = vld [vmem:[%s2774_s11 + $0xa4] sm:$0xf0]  ;;  %v1953_v21 = vor.u32 %v2476_v13, %v1952_v12  ;;  %v1944_v24 = vld [vmem:[%s2774_s11 + $0x10] sm:$0xf] }
  0x46   : > { %1260 = vmatpush.bf16.msra.mxu0 %v1969_v61  ;;  %v2080_v17 = vld [vmem:[%s2774_s11 + $0x120] sm:$0xf]  ;;  %v2508_v18 = vld [vmem:[%s2774_s11 + $0x124] sm:$0xf0]  ;;  %v2017_v22 = vor.u32 %v2492_v16, %v2016_v14  ;;  %v2474_v25 = vld [vmem:[%s2774_s11 + $0x14] sm:$0xf0] }
  0x47   : > { %1279 = vmatpush.bf16.msra.mxu1 %v2033_v62  ;;  %v2144_v19 = vld [vmem:[%s2774_s11 + $0x1a0] sm:$0xf]  ;;  %v2524_v20 = vld [vmem:[%s2774_s11 + $0x1a4] sm:$0xf0]  ;;  %v2081_v23 = vor.u32 %v2508_v18, %v2080_v17  ;;  %v2008_v26 = vld [vmem:[%s2774_s11 + $0x90] sm:$0xf]  ;;  %v1945_v34 = vor.u32 %v2474_v25, %v1944_v24 }
  0x48   : > { %1298 = vmatpush.bf16.msra.mxu2 %v2097_v63  ;;  %v2145_v27 = vor.u32 %v2524_v20, %v2144_v19  ;;  %v2490_v28 = vld [vmem:[%s2774_s11 + $0x94] sm:$0xf0]  ;;  %v2072_v29 = vld [vmem:[%s2774_s11 + $0x110] sm:$0xf]  ;;  %v1936_v33 = vld [vmem:[%s2774_s11] sm:$0xf] }
  0x49   : > { %1317 = vmatpush.bf16.msra.mxu3 %v2161_v3  ;;  %v2506_v30 = vld [vmem:[%s2774_s11 + $0x114] sm:$0xf0]  ;;  %v2136_v31 = vld [vmem:[%s2774_s11 + $0x190] sm:$0xf]  ;;  %v2472_v35 = vld [vmem:[%s2774_s11 + $0x4] sm:$0xf0]  ;;  %v2009_v38 = vor.u32 %v2490_v28, %v2008_v26 }
  0x4a   : > { %1261 = vmatpush.bf16.msra.mxu0 %v1961_v9  ;;  %v2522_v32 = vld [vmem:[%s2774_s11 + $0x194] sm:$0xf0]  ;;  %v2000_v36 = vld [vmem:[%s2774_s11 + $0x80] sm:$0xf]  ;;  %v2488_v37 = vld [vmem:[%s2774_s11 + $0x84] sm:$0xf0]  ;;  %v2073_v39 = vor.u32 %v2506_v30, %v2072_v29  ;;  %v1937_v51 = vor.u32 %v2472_v35, %v1936_v33 }
  0x4b   : > { %1280 = vmatpush.bf16.msra.mxu1 %v2025_v10  ;;  %v2064_v40 = vld [vmem:[%s2774_s11 + $0x100] sm:$0xf]  ;;  %v2504_v41 = vld [vmem:[%s2774_s11 + $0x104] sm:$0xf0]  ;;  %v2137_v43 = vor.u32 %v2522_v32, %v2136_v31  ;;  %v2455_v47 = vld [vmem:[%s2776_s12 + $0x4] sm:$0xf]  ;;  %v2001_v55 = vor.u32 %v2488_v37, %v2000_v36 }
  0x4c   : > { %1299 = vmatpush.bf16.msra.mxu2 %v2089_v11  ;;  %v2128_v42 = vld [vmem:[%s2774_s11 + $0x180] sm:$0xf]  ;;  %v2520_v44 = vld [vmem:[%s2774_s11 + $0x184] sm:$0xf0]  ;;  %v1874_v48 = vld [vmem:[%s2776_s12 + $0x20] sm:$0xf0]  ;;  %v2065_v56 = vor.u32 %v2504_v41, %v2064_v40 }
  0x4d   : > { %1318 = vmatpush.bf16.msra.mxu3 %v2153_v15  ;;  %v1872_v45 = vld [vmem:[%s2776_s12] sm:$0xf]  ;;  %v2376_v49 = vld [vmem:[%s2774_s11 + $0x370] sm:$0xf]  ;;  %v2582_v50 = vld [vmem:[%s2774_s11 + $0x374] sm:$0xf0]  ;;  %v2129_v60 = vor.u32 %v2520_v44, %v2128_v42  ;;  %v2863_v6 = vor.u32 %v2455_v47, %v1874_v48 }
  0x4e   : > { %1262 = vmatpush.bf16.msra.mxu0 %v1953_v21  ;;  %v2459_v46 = vld [vmem:[%s2776_s12 + $0x1c] sm:$0xf0]  ;;  %v1880_v52 = vld [vmem:[%s2776_s12 + $0x8] sm:$0xf]  ;;  %v2312_v53 = vld [vmem:[%s2774_s11 + $0x2f0] sm:$0xf]  ;;  %v2377_v61 = vor.u32 %v2582_v50, %v2376_v49 }
  0x4f   : > { %1281 = vmatpush.bf16.msra.mxu1 %v2017_v22  ;;  %v2566_v54 = vld [vmem:[%s2774_s11 + $0x2f4] sm:$0xf0]  ;;  %v2460_v57 = vld [vmem:[%s2776_s12 + $0x24] sm:$0xf0]  ;;  %v2456_v58 = vld [vmem:[%s2776_s12 + $0xc] sm:$0xf]  ;;  %v2858_v1 = vor.u32 %v2459_v46, %v1872_v45 }
  0x50   : > { %1300 = vmatpush.bf16.msra.mxu2 %v2081_v23  ;;  %v1882_v59 = vld [vmem:[%s2776_s12 + $0x28] sm:$0xf0]  ;;  %v2248_v62 = vld [vmem:[%s2774_s11 + $0x270] sm:$0xf]  ;;  %v2550_v63 = vld [vmem:[%s2774_s11 + $0x274] sm:$0xf0]  ;;  %v2313_v2 = vor.u32 %v2566_v54, %v2312_v53  ;;  %v2865_v7 = vor.u32 %v2460_v57, %v1880_v52 }
  0x51   : > { %1319 = vmatpush.bf16.msra.mxu3 %v2145_v27  ;;  %v2440_v0 = vld [vmem:[%s2774_s11 + $0x3f0] sm:$0xf]  ;;  %v2598_v3 = vld [vmem:[%s2774_s11 + $0x3f4] sm:$0xf0]  ;;  %v2368_v4 = vld [vmem:[%s2774_s11 + $0x360] sm:$0xf]  ;;  %v2869_v10 = vor.u32 %v2456_v58, %v1882_v59  ;;  %v2249_v11 = vor.u32 %v2550_v63, %v2248_v62 }
  0x52   : > { %1263 = vmatpush.bf16.msra.mxu0 %v1945_v34  ;;  %v2580_v5 = vld [vmem:[%s2774_s11 + $0x364] sm:$0xf0]  ;;  %v2304_v8 = vld [vmem:[%s2774_s11 + $0x2e0] sm:$0xf]  ;;  %v2441_v12 = vor.u32 %v2598_v3, %v2440_v0  ;;  %v2360_v19 = vld [vmem:[%s2774_s11 + $0x350] sm:$0xf] }
  0x53   : > { %1282 = vmatpush.bf16.msra.mxu1 %v2009_v38  ;;  %v2564_v9 = vld [vmem:[%s2774_s11 + $0x2e4] sm:$0xf0]  ;;  %v2369_v13 = vor.u32 %v2580_v5, %v2368_v4  ;;  %v2240_v14 = vld [vmem:[%s2774_s11 + $0x260] sm:$0xf]  ;;  %v2578_v20 = vld [vmem:[%s2774_s11 + $0x354] sm:$0xf0] }
  0x54   : > { %1301 = vmatpush.bf16.msra.mxu2 %v2073_v39  ;;  %v2548_v15 = vld [vmem:[%s2774_s11 + $0x264] sm:$0xf0]  ;;  %v2432_v16 = vld [vmem:[%s2774_s11 + $0x3e0] sm:$0xf]  ;;  %v2305_v17 = vor.u32 %v2564_v9, %v2304_v8  ;;  %v2296_v21 = vld [vmem:[%s2774_s11 + $0x2d0] sm:$0xf]  ;;  %v2361_v25 = vor.u32 %v2578_v20, %v2360_v19 }
  0x55   : > { %1320 = vmatpush.bf16.msra.mxu3 %v2137_v43  ;;  %v2596_v18 = vld [vmem:[%s2774_s11 + $0x3e4] sm:$0xf0]  ;;  %v2562_v22 = vld [vmem:[%s2774_s11 + $0x2d4] sm:$0xf0]  ;;  %v2241_v23 = vor.u32 %v2548_v15, %v2240_v14  ;;  %v2232_v26 = vld [vmem:[%s2774_s11 + $0x250] sm:$0xf] }
  0x56   : > { %1264 = vmatpush.bf16.msra.mxu0 %v1937_v51  ;;  %v2433_v24 = vor.u32 %v2596_v18, %v2432_v16  ;;  %v2546_v27 = vld [vmem:[%s2774_s11 + $0x254] sm:$0xf0]  ;;  %v2424_v28 = vld [vmem:[%s2774_s11 + $0x3d0] sm:$0xf]  ;;  %v2297_v29 = vor.u32 %v2562_v22, %v2296_v21  ;;  %v2352_v31 = vld [vmem:[%s2774_s11 + $0x340] sm:$0xf] }
  0x57   : > { %1283 = vmatpush.bf16.msra.mxu1 %v2001_v55  ;;  %v2594_v30 = vld [vmem:[%s2774_s11 + $0x3d4] sm:$0xf0]  ;;  %v2576_v32 = vld [vmem:[%s2774_s11 + $0x344] sm:$0xf0]  ;;  %v2288_v33 = vld [vmem:[%s2774_s11 + $0x2c0] sm:$0xf]  ;;  %v2233_v35 = vor.u32 %v2546_v27, %v2232_v26 }
  0x58   : > { %1302 = vmatpush.bf16.msra.mxu2 %v2065_v56  ;;  %v2560_v34 = vld [vmem:[%s2774_s11 + $0x2c4] sm:$0xf0]  ;;  %v2224_v36 = vld [vmem:[%s2774_s11 + $0x240] sm:$0xf]  ;;  %v2425_v39 = vor.u32 %v2594_v30, %v2424_v28  ;;  %v2353_v40 = vor.u32 %v2576_v32, %v2352_v31  ;;  %v2463_v45 = vld [vmem:[%s2776_s12 + $0x44] sm:$0xf] }
  0x59   : > { %1321 = vmatpush.bf16.msra.mxu3 %v2129_v60  ;;  %1265 = vmatmul.bf16.vlgmr.msra.gmra.mxu0 %v2858_v1  ;;  %v2544_v37 = vld [vmem:[%s2774_s11 + $0x244] sm:$0xf0]  ;;  %v2416_v38 = vld [vmem:[%s2774_s11 + $0x3c0] sm:$0xf]  ;;  %v2289_v44 = vor.u32 %v2560_v34, %v2288_v33  ;;  %v1906_v46 = vld [vmem:[%s2776_s12 + $0x60] sm:$0xf0] }
  0x5a   : > { %1284 = vmatmul.bf16.vlgmr.msra.gmra.mxu1 %v2863_v6  ;;  %1333 = vmatpush.bf16.msrb.mxu0 %v2249_v11  ;;  %v2592_v41 = vld [vmem:[%s2774_s11 + $0x3c4] sm:$0xf0]  ;;  %v1904_v42 = vld [vmem:[%s2776_s12 + $0x40] sm:$0xf]  ;;  %v2344_v47 = vld [vmem:[%s2774_s11 + $0x330] sm:$0xf]  ;;  %v2225_v52 = vor.u32 %v2544_v37, %v2224_v36  ;;  %v2915_v3 = vor.u32 %v2463_v45, %v1906_v46 }
  0x5b   : > { %1352 = vmatpush.bf16.msrb.mxu1 %v2313_v2  ;;  %1303 = vmatmul.bf16.vlgmr.msra.gmra.mxu2 %v2865_v7  ;;  %v2467_v43 = vld [vmem:[%s2776_s12 + $0x5c] sm:$0xf0]  ;;  %v2574_v48 = vld [vmem:[%s2774_s11 + $0x334] sm:$0xf0]  ;;  %v1912_v49 = vld [vmem:[%s2776_s12 + $0x48] sm:$0xf]  ;;  %v2417_v56 = vor.u32 %v2592_v41, %v2416_v38 }
  0x5c   : > { %1371 = vmatpush.bf16.msrb.mxu2 %v2377_v61  ;;  %1322 = vmatmul.bf16.vlgmr.msra.gmra.mxu3 %v2869_v10  ;;  %v2280_v50 = vld [vmem:[%s2774_s11 + $0x2b0] sm:$0xf]  ;;  %v2558_v51 = vld [vmem:[%s2774_s11 + $0x2b4] sm:$0xf0]  ;;  %v2468_v53 = vld [vmem:[%s2776_s12 + $0x64] sm:$0xf0]  ;;  %v2345_v57 = vor.u32 %v2574_v48, %v2344_v47  ;;  %v2910_v61 = vor.u32 %v2467_v43, %v1904_v42 }
  0x5d   : > { %1390 = vmatpush.bf16.msrb.mxu3 %v2441_v12  ;;  %v2464_v54 = vld [vmem:[%s2776_s12 + $0x4c] sm:$0xf]  ;;  %v2216_v58 = vld [vmem:[%s2774_s11 + $0x230] sm:$0xf]  ;;  %v2542_v59 = vld [vmem:[%s2774_s11 + $0x234] sm:$0xf0]  ;;  %v2281_v62 = vor.u32 %v2558_v51, %v2280_v50  ;;  %v2917_v4 = vor.u32 %v2468_v53, %v1912_v49 }
  0x5e   : > { %1334 = vmatpush.bf16.msrb.mxu0 %v2241_v23  ;;  %v1914_v55 = vld [vmem:[%s2776_s12 + $0x68] sm:$0xf0]  ;;  %v2408_v60 = vld [vmem:[%s2774_s11 + $0x3b0] sm:$0xf]  ;;  %v2590_v63 = vld [vmem:[%s2774_s11 + $0x3b4] sm:$0xf0]  ;;  %v2217_v11 = vor.u32 %v2542_v59, %v2216_v58 }
  0x5f   : > { %1353 = vmatpush.bf16.msrb.mxu1 %v2305_v17  ;;  %v2336_v0 = vld [vmem:[%s2774_s11 + $0x320] sm:$0xf]  ;;  %v2572_v2 = vld [vmem:[%s2774_s11 + $0x324] sm:$0xf0]  ;;  %v2921_v9 = vor.u32 %v2464_v54, %v1914_v55  ;;  %v2409_v12 = vor.u32 %v2590_v63, %v2408_v60  ;;  %v2328_v19 = vld [vmem:[%s2774_s11 + $0x310] sm:$0xf] }
  0x60   : > { %1372 = vmatpush.bf16.msrb.mxu2 %v2369_v13  ;;  %v2272_v5 = vld [vmem:[%s2774_s11 + $0x2a0] sm:$0xf]  ;;  %v2556_v8 = vld [vmem:[%s2774_s11 + $0x2a4] sm:$0xf0]  ;;  %v2337_v13 = vor.u32 %v2572_v2, %v2336_v0  ;;  %v2570_v20 = vld [vmem:[%s2774_s11 + $0x314] sm:$0xf0] }
  0x61   : > { %1391 = vmatpush.bf16.msrb.mxu3 %v2433_v24  ;;  %v2208_v14 = vld [vmem:[%s2774_s11 + $0x220] sm:$0xf]  ;;  %v2540_v15 = vld [vmem:[%s2774_s11 + $0x224] sm:$0xf0]  ;;  %v2273_v17 = vor.u32 %v2556_v8, %v2272_v5  ;;  %v2264_v21 = vld [vmem:[%s2774_s11 + $0x290] sm:$0xf]  ;;  %v2329_v26 = vor.u32 %v2570_v20, %v2328_v19 }
  0x62   : > { %1335 = vmatpush.bf16.msrb.mxu0 %v2233_v35  ;;  %v2400_v16 = vld [vmem:[%s2774_s11 + $0x3a0] sm:$0xf]  ;;  %v2588_v18 = vld [vmem:[%s2774_s11 + $0x3a4] sm:$0xf0]  ;;  %v2554_v22 = vld [vmem:[%s2774_s11 + $0x294] sm:$0xf0]  ;;  %v2209_v23 = vor.u32 %v2540_v15, %v2208_v14 }
  0x63   : > { %1354 = vmatpush.bf16.msrb.mxu1 %v2297_v29  ;;  %v2200_v24 = vld [vmem:[%s2774_s11 + $0x210] sm:$0xf]  ;;  %v2538_v27 = vld [vmem:[%s2774_s11 + $0x214] sm:$0xf0]  ;;  %v2265_v30 = vor.u32 %v2554_v22, %v2264_v21  ;;  %v2320_v31 = vld [vmem:[%s2774_s11 + $0x300] sm:$0xf] }
  0x64   : > { %1373 = vmatpush.bf16.msrb.mxu2 %v2361_v25  ;;  %v2401_v25 = vor.u32 %v2588_v18, %v2400_v16  ;;  %v2392_v28 = vld [vmem:[%s2774_s11 + $0x390] sm:$0xf]  ;;  %v2586_v29 = vld [vmem:[%s2774_s11 + $0x394] sm:$0xf0]  ;;  %v2568_v32 = vld [vmem:[%s2774_s11 + $0x304] sm:$0xf0]  ;;  %v2201_v37 = vor.u32 %v2538_v27, %v2200_v24 }
  0x65   : > { %1392 = vmatpush.bf16.msrb.mxu3 %v2425_v39  ;;  %v2256_v33 = vld [vmem:[%s2774_s11 + $0x280] sm:$0xf]  ;;  %v2552_v34 = vld [vmem:[%s2774_s11 + $0x284] sm:$0xf0]  ;;  %v2517_v35 = vld [vmem:[%s2774_s11 + $0x174] sm:$0xf]  ;;  %v2393_v41 = vor.u32 %v2586_v29, %v2392_v28  ;;  %v2321_v42 = vor.u32 %v2568_v32, %v2320_v31 }
  0x66   : > { %1336 = vmatpush.bf16.msrb.mxu0 %v2225_v52  ;;  %v2122_v36 = vld [vmem:[%s2774_s11 + $0x178] sm:$0xf0]  ;;  %v2192_v38 = vld [vmem:[%s2774_s11 + $0x200] sm:$0xf]  ;;  %v2501_v39 = vld [vmem:[%s2774_s11 + $0xf4] sm:$0xf]  ;;  %v2257_v46 = vor.u32 %v2552_v34, %v2256_v33 }
  0x67   : > { %1355 = vmatpush.bf16.msrb.mxu1 %v2289_v44  ;;  %v2536_v43 = vld [vmem:[%s2774_s11 + $0x204] sm:$0xf0]  ;;  %v2384_v44 = vld [vmem:[%s2774_s11 + $0x380] sm:$0xf]  ;;  %v1888_v47 = vld [vmem:[%s2776_s12 + $0x10] sm:$0xf]  ;;  %v2125_v51 = vor.u32 %v2517_v35, %v2122_v36 }
  0x68   : > { %1374 = vmatpush.bf16.msrb.mxu2 %v2353_v40  ;;  %v2058_v40 = vld [vmem:[%s2774_s11 + $0xf8] sm:$0xf0]  ;;  %v2584_v45 = vld [vmem:[%s2774_s11 + $0x384] sm:$0xf0]  ;;  %v2461_v48 = vld [vmem:[%s2776_s12 + $0x2c] sm:$0xf0]  ;;  %v2193_v59 = vor.u32 %v2536_v43, %v2192_v38 }
  0x69   : > { %1393 = vmatpush.bf16.msrb.mxu3 %v2417_v56  ;;  %1270 = vmatmul.bf16.gmra.mxu0 %v2910_v61  ;;  %v2457_v49 = vld [vmem:[%s2776_s12 + $0x14] sm:$0xf]  ;;  %v1994_v53 = vld [vmem:[%s2774_s11 + $0x78] sm:$0xf0]  ;;  %v2061_v55 = vor.u32 %v2501_v39, %v2058_v40  ;;  %v2114_v58 = vld [vmem:[%s2774_s11 + $0x168] sm:$0xf0]  ;;  %v2385_v0 = vor.u32 %v2584_v45, %v2384_v44 }
  0x6a   : > { %1289 = vmatmul.bf16.gmra.mxu1 %v2915_v3  ;;  %1337 = vmatpush.bf16.msrb.mxu0 %v2217_v11  ;;  %v1890_v50 = vld [vmem:[%s2776_s12 + $0x30] sm:$0xf0]  ;;  %v2186_v56 = vld [vmem:[%s2774_s11 + $0x1f8] sm:$0xf0]  ;;  %v1896_v60 = vld [vmem:[%s2776_s12 + $0x18] sm:$0xf] }
  0x6b   : > { %1356 = vmatpush.bf16.msrb.mxu1 %v2281_v62  ;;  %1308 = vmatmul.bf16.gmra.mxu2 %v2917_v4  ;;  %v2485_v52 = vld [vmem:[%s2774_s11 + $0x74] sm:$0xf]  ;;  %v2462_v62 = vld [vmem:[%s2776_s12 + $0x34] sm:$0xf0]  ;;  %v2458_v63 = vld [vmem:[%s2776_s12 + $0x1c] sm:$0xf]  ;;  %v2972_v18 = vor.u32 %v2457_v49, %v1890_v50 }
  0x6c   : > { %1375 = vmatpush.bf16.msrb.mxu2 %v2345_v57  ;;  %1327 = vmatmul.bf16.gmra.mxu3 %v2921_v9  ;;  %v2533_v54 = vld [vmem:[%s2774_s11 + $0x1f4] sm:$0xf]  ;;  %v2515_v57 = vld [vmem:[%s2774_s11 + $0x164] sm:$0xf]  ;;  %v1898_v2 = vld [vmem:[%s2776_s12 + $0x38] sm:$0xf0]  ;;  %v1997_v5 = vor.u32 %v2485_v52, %v1994_v53  ;;  %v2977_v22 = vor.u32 %v2462_v62, %v1896_v60 }
  0x6d   : > { %1394 = vmatpush.bf16.msrb.mxu3 %v2409_v12  ;;  %v2483_v8 = vld [vmem:[%s2774_s11 + $0x64] sm:$0xf]  ;;  %v1986_v11 = vld [vmem:[%s2774_s11 + $0x68] sm:$0xf0]  ;;  %v2189_v12 = vor.u32 %v2533_v54, %v2186_v56  ;;  %v2513_v20 = vld [vmem:[%s2774_s11 + $0x154] sm:$0xf] }
  0x6e   : > { %1338 = vmatpush.bf16.msrb.mxu0 %v2209_v23  ;;  %v2499_v14 = vld [vmem:[%s2774_s11 + $0xe4] sm:$0xf]  ;;  %v2050_v15 = vld [vmem:[%s2774_s11 + $0xe8] sm:$0xf0]  ;;  %v2106_v21 = vld [vmem:[%s2774_s11 + $0x158] sm:$0xf0]  ;;  %v2979_v23 = vor.u32 %v2458_v63, %v1898_v2  ;;  %v1989_v24 = vor.u32 %v2483_v8, %v1986_v11 }
  0x6f   : > { %1357 = vmatpush.bf16.msrb.mxu1 %v2273_v17  ;;  %v2531_v16 = vld [vmem:[%s2774_s11 + $0x1e4] sm:$0xf]  ;;  %v2970_v17 = vor.u32 %v2461_v48, %v1888_v47  ;;  %v2178_v19 = vld [vmem:[%s2774_s11 + $0x1e8] sm:$0xf0]  ;;  %v1978_v27 = vld [vmem:[%s2774_s11 + $0x58] sm:$0xf0]  ;;  %v2109_v29 = vor.u32 %v2513_v20, %v2106_v21 }
  0x70   : > { %1376 = vmatpush.bf16.msrb.mxu2 %v2337_v13  ;;  %v2117_v13 = vor.u32 %v2515_v57, %v2114_v58  ;;  %v2181_v28 = vor.u32 %v2531_v16, %v2178_v19  ;;  %v2042_v31 = vld [vmem:[%s2774_s11 + $0xd8] sm:$0xf0]  ;;  %v2529_v32 = vld [vmem:[%s2774_s11 + $0x1d4] sm:$0xf]  ;;  %v2511_v34 = vld [vmem:[%s2774_s11 + $0x144] sm:$0xf] }
  0x71   : > { %1395 = vmatpush.bf16.msrb.mxu3 %v2401_v25  ;;  %v2053_v25 = vor.u32 %v2499_v14, %v2050_v15  ;;  %v2170_v33 = vld [vmem:[%s2774_s11 + $0x1d8] sm:$0xf0]  ;;  %v2098_v35 = vld [vmem:[%s2774_s11 + $0x148] sm:$0xf0]  ;;  %v2479_v38 = vld [vmem:[%s2774_s11 + $0x44] sm:$0xf] }
  0x72   : > { %1339 = vmatpush.bf16.msrb.mxu0 %v2201_v37  ;;  %v1970_v39 = vld [vmem:[%s2774_s11 + $0x48] sm:$0xf0]  ;;  %v2173_v40 = vor.u32 %v2529_v32, %v2170_v33  ;;  %v2527_v44 = vld [vmem:[%s2774_s11 + $0x1c4] sm:$0xf]  ;;  %v2090_v47 = vld [vmem:[%s2774_s11 + $0x138] sm:$0xf0] }
  0x73   : > { %1358 = vmatpush.bf16.msrb.mxu1 %v2265_v30  ;;  %v2497_v30 = vld [vmem:[%s2774_s11 + $0xd4] sm:$0xf]  ;;  %v2034_v43 = vld [vmem:[%s2774_s11 + $0xc8] sm:$0xf0]  ;;  %v1973_v48 = vor.u32 %v2479_v38, %v1970_v39  ;;  %v1920_v53 = vld [vmem:[%s2776_s12 + $0x50] sm:$0xf] }
  0x74   : > { %1377 = vmatpush.bf16.msrb.mxu2 %v2329_v26  ;;  %v2481_v26 = vld [vmem:[%s2774_s11 + $0x54] sm:$0xf]  ;;  %v2045_v37 = vor.u32 %v2497_v30, %v2042_v31  ;;  %v2162_v45 = vld [vmem:[%s2774_s11 + $0x1c8] sm:$0xf0]  ;;  %v2469_v54 = vld [vmem:[%s2776_s12 + $0x6c] sm:$0xf0] }
  0x75   : > { %1396 = vmatpush.bf16.msrb.mxu3 %v2393_v41  ;;  %v1981_v36 = vor.u32 %v2481_v26, %v1978_v27  ;;  %v2101_v41 = vor.u32 %v2511_v34, %v2098_v35  ;;  %v2477_v50 = vld [vmem:[%s2774_s11 + $0x34] sm:$0xf]  ;;  %v2165_v52 = vor.u32 %v2527_v44, %v2162_v45  ;;  %v2154_v62 = vld [vmem:[%s2774_s11 + $0x1b8] sm:$0xf0]  ;;  %v2507_v63 = vld [vmem:[%s2774_s11 + $0x124] sm:$0xf] }
  0x76   : > { %1340 = vmatpush.bf16.msrb.mxu0 %v2193_v59  ;;  %v1922_v56 = vld [vmem:[%s2776_s12 + $0x70] sm:$0xf0]  ;;  %v2026_v59 = vld [vmem:[%s2774_s11 + $0xb8] sm:$0xf0]  ;;  %v1928_v2 = vld [vmem:[%s2776_s12 + $0x58] sm:$0xf] }
  0x77   : > { %1359 = vmatpush.bf16.msrb.mxu1 %v2257_v46  ;;  %v2509_v46 = vld [vmem:[%s2774_s11 + $0x134] sm:$0xf]  ;;  %v2466_v8 = vld [vmem:[%s2776_s12 + $0x5c] sm:$0xf]  ;;  %v2475_v14 = vld [vmem:[%s2774_s11 + $0x24] sm:$0xf] }
  0x78   : > { %1378 = vmatpush.bf16.msrb.mxu2 %v2321_v42  ;;  %v2495_v42 = vld [vmem:[%s2774_s11 + $0xc4] sm:$0xf]  ;;  %v2093_v57 = vor.u32 %v2509_v46, %v2090_v47  ;;  %v2493_v58 = vld [vmem:[%s2774_s11 + $0xb4] sm:$0xf]  ;;  %v1930_v11 = vld [vmem:[%s2776_s12 + $0x78] sm:$0xf0] }
  0x79   : > { %1397 = vmatpush.bf16.msrb.mxu3 %v2385_v0  ;;  %1341 = vmatmul.bf16.vlgmr.msrb.gmra.mxu0 %v2970_v17  ;;  %v2037_v49 = vor.u32 %v2495_v42, %v2034_v43  ;;  %v2525_v60 = vld [vmem:[%s2774_s11 + $0x1b4] sm:$0xf]  ;;  %v2082_v0 = vld [vmem:[%s2774_s11 + $0x128] sm:$0xf0]  ;;  %v2491_v20 = vld [vmem:[%s2774_s11 + $0xa4] sm:$0xf]  ;;  %v3031_v31 = vor.u32 %v2466_v8, %v1930_v11 }
  0x7a   : > { %1409 = vmatpush.bf16.msra.mxu0 %v1997_v5  ;;  %1360 = vmatmul.bf16.vlgmr.msrb.gmra.mxu1 %v2972_v18  ;;  %v2470_v5 = vld [vmem:[%s2776_s12 + $0x74] sm:$0xf0]  ;;  %v1954_v15 = vld [vmem:[%s2774_s11 + $0x28] sm:$0xf0]  ;;  %v2157_v16 = vor.u32 %v2525_v60, %v2154_v62  ;;  %v2085_v19 = vor.u32 %v2507_v63, %v2082_v0  ;;  %v2473_v34 = vld [vmem:[%s2774_s11 + $0x14] sm:$0xf] }
  0x7b   : > { %1428 = vmatpush.bf16.msra.mxu1 %v2061_v55  ;;  %1379 = vmatmul.bf16.vlgmr.msrb.gmra.mxu2 %v2977_v22  ;;  %v2465_v55 = vld [vmem:[%s2776_s12 + $0x54] sm:$0xf]  ;;  %v2018_v21 = vld [vmem:[%s2774_s11 + $0xa8] sm:$0xf0]  ;;  %v3029_v30 = vor.u32 %v2470_v5, %v1928_v2  ;;  %v1957_v32 = vor.u32 %v2475_v14, %v1954_v15  ;;  %v1946_v35 = vld [vmem:[%s2774_s11 + $0x18] sm:$0xf0] }
  0x7c   : > { %1447 = vmatpush.bf16.msra.mxu2 %v2125_v51  ;;  %1398 = vmatmul.bf16.vlgmr.msrb.gmra.mxu3 %v2979_v23  ;;  %v1962_v51 = vld [vmem:[%s2774_s11 + $0x38] sm:$0xf0]  ;;  %v3024_v26 = vor.u32 %v2465_v55, %v1922_v56  ;;  %v2146_v27 = vld [vmem:[%s2774_s11 + $0x1a8] sm:$0xf0]  ;;  %v2021_v33 = vor.u32 %v2491_v20, %v2018_v21  ;;  %v2489_v38 = vld [vmem:[%s2774_s11 + $0x94] sm:$0xf]  ;;  %v1949_v46 = vor.u32 %v2473_v34, %v1946_v35 }
  0x7d   : > { %1466 = vmatpush.bf16.msra.mxu3 %v2189_v12  ;;  %v1965_v12 = vor.u32 %v2477_v50, %v1962_v51  ;;  %v2010_v39 = vld [vmem:[%s2774_s11 + $0x98] sm:$0xf0]  ;;  %v2503_v42 = vld [vmem:[%s2774_s11 + $0x104] sm:$0xf]  ;;  %v2066_v43 = vld [vmem:[%s2774_s11 + $0x108] sm:$0xf0] }
  0x7e   : > { %1410 = vmatpush.bf16.msra.mxu0 %v1989_v24  ;;  %v2523_v24 = vld [vmem:[%s2774_s11 + $0x1a4] sm:$0xf]  ;;  %v2581_v44 = vld [vmem:[%s2774_s11 + $0x374] sm:$0xf]  ;;  %v2378_v45 = vld [vmem:[%s2774_s11 + $0x378] sm:$0xf0]  ;;  %v2013_v47 = vor.u32 %v2489_v38, %v2010_v39 }
  0x7f   : > { %1429 = vmatpush.bf16.msra.mxu1 %v2053_v25  ;;  %v3022_v25 = vor.u32 %v2469_v54, %v1920_v53  ;;  %v2487_v50 = vld [vmem:[%s2774_s11 + $0x84] sm:$0xf]  ;;  %v2002_v53 = vld [vmem:[%s2774_s11 + $0x88] sm:$0xf0]  ;;  %v2381_v56 = vor.u32 %v2581_v44, %v2378_v45  ;;  %v2314_v60 = vld [vmem:[%s2774_s11 + $0x2f8] sm:$0xf0] }
  0x80   : > { %1448 = vmatpush.bf16.msra.mxu2 %v2117_v13  ;;  %v2029_v13 = vor.u32 %v2493_v58, %v2026_v59  ;;  %v2519_v54 = vld [vmem:[%s2774_s11 + $0x184] sm:$0xf]  ;;  %v2130_v55 = vld [vmem:[%s2774_s11 + $0x188] sm:$0xf0]  ;;  %v2250_v58 = vld [vmem:[%s2774_s11 + $0x278] sm:$0xf0]  ;;  %v2005_v2 = vor.u32 %v2487_v50, %v2002_v53 }
  0x81   : > { %1467 = vmatpush.bf16.msra.mxu3 %v2181_v28  ;;  %v2505_v28 = vld [vmem:[%s2774_s11 + $0x114] sm:$0xf]  ;;  %v2442_v63 = vld [vmem:[%s2774_s11 + $0x3f8] sm:$0xf0]  ;;  %v2579_v5 = vld [vmem:[%s2774_s11 + $0x364] sm:$0xf]  ;;  %v2133_v11 = vor.u32 %v2519_v54, %v2130_v55 }
  0x82   : > { %1411 = vmatpush.bf16.msra.mxu0 %v1981_v36  ;;  %v2149_v36 = vor.u32 %v2523_v24, %v2146_v27  ;;  %v2565_v59 = vld [vmem:[%s2774_s11 + $0x2f4] sm:$0xf]  ;;  %v2370_v8 = vld [vmem:[%s2774_s11 + $0x368] sm:$0xf0]  ;;  %v2547_v15 = vld [vmem:[%s2774_s11 + $0x264] sm:$0xf] }
  0x83   : > { %1430 = vmatpush.bf16.msra.mxu1 %v2045_v37  ;;  %v2597_v62 = vld [vmem:[%s2774_s11 + $0x3f4] sm:$0xf]  ;;  %v2563_v20 = vld [vmem:[%s2774_s11 + $0x2e4] sm:$0xf]  ;;  %v2306_v21 = vld [vmem:[%s2774_s11 + $0x2e8] sm:$0xf0] }
  0x84   : > { %1449 = vmatpush.bf16.msra.mxu2 %v2109_v29  ;;  %v2074_v29 = vld [vmem:[%s2774_s11 + $0x118] sm:$0xf0]  ;;  %v2445_v14 = vor.u32 %v2597_v62, %v2442_v63  ;;  %v2595_v27 = vld [vmem:[%s2774_s11 + $0x3e4] sm:$0xf]  ;;  %v2309_v35 = vor.u32 %v2563_v20, %v2306_v21  ;;  %v2354_v44 = vld [vmem:[%s2774_s11 + $0x348] sm:$0xf0] }
  0x85   : > { %1468 = vmatpush.bf16.msra.mxu3 %v2173_v40  ;;  %v2077_v37 = vor.u32 %v2505_v28, %v2074_v29  ;;  %v2521_v40 = vld [vmem:[%s2774_s11 + $0x194] sm:$0xf]  ;;  %v2434_v28 = vld [vmem:[%s2774_s11 + $0x3e8] sm:$0xf0]  ;;  %v2234_v34 = vld [vmem:[%s2774_s11 + $0x258] sm:$0xf0] }
  0x86   : > { %1412 = vmatpush.bf16.msra.mxu0 %v1973_v48  ;;  %v2471_v48 = vld [vmem:[%s2774_s11 + $0x4] sm:$0xf]  ;;  %v2577_v29 = vld [vmem:[%s2774_s11 + $0x354] sm:$0xf]  ;;  %v2298_v38 = vld [vmem:[%s2774_s11 + $0x2d8] sm:$0xf0] }
  0x87   : > { %1431 = vmatpush.bf16.msra.mxu1 %v2037_v49  ;;  %v1938_v49 = vld [vmem:[%s2774_s11 + $0x8] sm:$0xf0]  ;;  %v2543_v45 = vld [vmem:[%s2774_s11 + $0x244] sm:$0xf]  ;;  %v2541_v53 = vld [vmem:[%s2774_s11 + $0x234] sm:$0xf] }
  0x88   : > { %1450 = vmatpush.bf16.msra.mxu2 %v2101_v41  ;;  %v2138_v41 = vld [vmem:[%s2774_s11 + $0x198] sm:$0xf0]  ;;  %v1941_v0 = vor.u32 %v2471_v48, %v1938_v49  ;;  %v2589_v62 = vld [vmem:[%s2774_s11 + $0x3b4] sm:$0xf]  ;;  %v2402_v20 = vld [vmem:[%s2774_s11 + $0x3a8] sm:$0xf0] }
  0x89   : > { %1469 = vmatpush.bf16.msra.mxu3 %v2165_v52  ;;  %1346 = vmatmul.bf16.gmra.mxu0 %v3022_v25  ;;  %v2141_v51 = vor.u32 %v2521_v40, %v2138_v41  ;;  %v2069_v52 = vor.u32 %v2503_v42, %v2066_v43  ;;  %v2593_v41 = vld [vmem:[%s2774_s11 + $0x3d4] sm:$0xf]  ;;  %v2426_v42 = vld [vmem:[%s2774_s11 + $0x3d8] sm:$0xf0]  ;;  %v2575_v43 = vld [vmem:[%s2774_s11 + $0x344] sm:$0xf] }
  0x8a   : > { %1413 = vmatpush.bf16.msra.mxu0 %v1965_v12  ;;  %1365 = vmatmul.bf16.gmra.mxu1 %v3024_v26  ;;  %v2429_v48 = vor.u32 %v2593_v41, %v2426_v42  ;;  %v2357_v49 = vor.u32 %v2575_v43, %v2354_v44  ;;  %v2218_v54 = vld [vmem:[%s2774_s11 + $0x238] sm:$0xf0]  ;;  %v2569_v21 = vld [vmem:[%s2774_s11 + $0x314] sm:$0xf]  ;;  %v2535_v41 = vld [vmem:[%s2774_s11 + $0x204] sm:$0xf] }
  0x8b   : > { %1432 = vmatpush.bf16.msra.mxu1 %v2029_v13  ;;  %1384 = vmatmul.bf16.gmra.mxu2 %v3029_v30  ;;  %v2317_v13 = vor.u32 %v2565_v59, %v2314_v60  ;;  %v2221_v60 = vor.u32 %v2541_v53, %v2218_v54  ;;  %v2410_v63 = vld [vmem:[%s2774_s11 + $0x3b8] sm:$0xf0]  ;;  %v2194_v42 = vld [vmem:[%s2774_s11 + $0x208] sm:$0xf0]  ;;  %p2446_p11 = scmp.ne.s32.totalorder %s2670_s17, 1 }
  0x8c   : > { %1451 = vmatpush.bf16.msra.mxu2 %v2093_v57  ;;  %1403 = vmatmul.bf16.gmra.mxu3 %v3031_v31  ;;  %v2549_v57 = vld [vmem:[%s2774_s11 + $0x274] sm:$0xf] }
  0x8d   : > { %1470 = vmatpush.bf16.msra.mxu3 %v2157_v16  ;;  %v2253_v12 = vor.u32 %v2549_v57, %v2250_v58  ;;  %v2242_v16 = vld [vmem:[%s2774_s11 + $0x268] sm:$0xf0]  ;;  %v2557_v57 = vld [vmem:[%s2774_s11 + $0x2b4] sm:$0xf]  ;;  %v2282_v58 = vld [vmem:[%s2774_s11 + $0x2b8] sm:$0xf0] }
  0x8e   : > { %1414 = vmatpush.bf16.msra.mxu0 %v1957_v32  ;;  %v2245_v24 = vor.u32 %v2547_v15, %v2242_v16  ;;  %v2362_v32 = vld [vmem:[%s2774_s11 + $0x358] sm:$0xf0] }
  0x8f   : > { %1433 = vmatpush.bf16.msra.mxu1 %v2021_v33  ;;  %v2545_v33 = vld [vmem:[%s2774_s11 + $0x254] sm:$0xf]  ;;  %v2365_v39 = vor.u32 %v2577_v29, %v2362_v32 }
  0x90   : > { %1452 = vmatpush.bf16.msra.mxu2 %v2085_v19  ;;  %v2373_v19 = vor.u32 %v2579_v5, %v2370_v8  ;;  %v2237_v40 = vor.u32 %v2545_v33, %v2234_v34  ;;  %v2539_v5 = vld [vmem:[%s2774_s11 + $0x224] sm:$0xf]  ;;  %v2210_v8 = vld [vmem:[%s2774_s11 + $0x228] sm:$0xf0]  ;;  %v2553_v33 = vld [vmem:[%s2774_s11 + $0x294] sm:$0xf] }
  0x91   : > { %1471 = vmatpush.bf16.msra.mxu3 %v2149_v36  ;;  %v2437_v36 = vor.u32 %v2595_v27, %v2434_v28  ;;  %v2213_v16 = vor.u32 %v2539_v5, %v2210_v8  ;;  %v2537_v27 = vld [vmem:[%s2774_s11 + $0x214] sm:$0xf]  ;;  %v2202_v28 = vld [vmem:[%s2774_s11 + $0x218] sm:$0xf0] }
  0x92   : > { %1415 = vmatpush.bf16.msra.mxu0 %v1949_v46  ;;  %v2226_v46 = vld [vmem:[%s2774_s11 + $0x248] sm:$0xf0]  ;;  %v2266_v34 = vld [vmem:[%s2774_s11 + $0x298] sm:$0xf0] }
  0x93   : > { %1434 = vmatpush.bf16.msra.mxu1 %v2013_v47  ;;  %v2229_v50 = vor.u32 %v2543_v45, %v2226_v46  ;;  %v2269_v43 = vor.u32 %v2553_v33, %v2266_v34  ;;  %v2551_v45 = vld [vmem:[%s2774_s11 + $0x284] sm:$0xf]  ;;  %v2197_v46 = vor.u32 %v2535_v41, %v2194_v42  ;;  %v387_v33 = vld [vmem:[#allocation2 + $0x18] sm:$0xff] }
  0x94   : > { %1453 = vmatpush.bf16.msra.mxu2 %v2077_v37  ;;  %v2561_v37 = vld [vmem:[%s2774_s11 + $0x2d4] sm:$0xf] }
  0x95   : > { %1472 = vmatpush.bf16.msra.mxu3 %v2141_v51  ;;  %v2301_v47 = vor.u32 %v2561_v37, %v2298_v38  ;;  %v2591_v51 = vld [vmem:[%s2774_s11 + $0x3c4] sm:$0xf]  ;;  %v2585_v37 = vld [vmem:[%s2774_s11 + $0x394] sm:$0xf]  ;;  %v2394_v38 = vld [vmem:[%s2774_s11 + $0x398] sm:$0xf0] }
  0x96   : > { %1416 = vmatpush.bf16.msra.mxu0 %v1941_v0  ;;  %v2571_v0 = vld [vmem:[%s2774_s11 + $0x324] sm:$0xf]  ;;  %v2397_v44 = vor.u32 %v2585_v37, %v2394_v38 }
  0x97   : > { %1435 = vmatpush.bf16.msra.mxu1 %v2005_v2  ;;  %v2338_v2 = vld [vmem:[%s2774_s11 + $0x328] sm:$0xf0] }
  0x98   : > { %1454 = vmatpush.bf16.msra.mxu2 %v2069_v52  ;;  %v2418_v52 = vld [vmem:[%s2774_s11 + $0x3c8] sm:$0xf0]  ;;  %v2341_v15 = vor.u32 %v2571_v0, %v2338_v2 }
  0x99   : > { %1473 = vmatpush.bf16.msra.mxu3 %v2133_v11  ;;  %1417 = vmatmul.bf16.vlgmr.msra.gmra.mxu0 %v2858_v1  ;;  %v2559_v1 = vld [vmem:[%s2774_s11 + $0x2c4] sm:$0xf]  ;;  %v2285_v11 = vor.u32 %v2557_v57, %v2282_v58 }
  0x9a   : > { %1485 = vmatpush.bf16.msrb.mxu0 %v2253_v12  ;;  %1436 = vmatmul.bf16.vlgmr.msra.gmra.mxu1 %v2863_v6  ;;  %v2290_v6 = vld [vmem:[%s2774_s11 + $0x2c8] sm:$0xf0]  ;;  %v2413_v12 = vor.u32 %v2589_v62, %v2410_v63 }
  0x9b   : > { %1504 = vmatpush.bf16.msrb.mxu1 %v2317_v13  ;;  %1455 = vmatmul.bf16.vlgmr.msra.gmra.mxu2 %v2865_v7  ;;  %v2573_v7 = vld [vmem:[%s2774_s11 + $0x334] sm:$0xf]  ;;  %v2293_v55 = vor.u32 %v2559_v1, %v2290_v6  ;;  %v2555_v13 = vld [vmem:[%s2774_s11 + $0x2a4] sm:$0xf] }
  0x9c   : > { %1523 = vmatpush.bf16.msrb.mxu2 %v2381_v56  ;;  %1474 = vmatmul.bf16.vlgmr.msra.gmra.mxu3 %v2869_v10  ;;  %v2346_v10 = vld [vmem:[%s2774_s11 + $0x338] sm:$0xf0]  ;;  %v2421_v56 = vor.u32 %v2591_v51, %v2418_v52 }
  0x9d   : > { %1542 = vmatpush.bf16.msrb.mxu3 %v2445_v14  ;;  %v2349_v59 = vor.u32 %v2573_v7, %v2346_v10  ;;  %v2274_v14 = vld [vmem:[%s2774_s11 + $0x2a8] sm:$0xf0] }
  0x9e   : > { %1486 = vmatpush.bf16.msrb.mxu0 %v2245_v24  ;;  %v2330_v24 = vld [vmem:[%s2774_s11 + $0x318] sm:$0xf0]  ;;  %v2277_v29 = vor.u32 %v2555_v13, %v2274_v14 }
  0x9f   : > { %1505 = vmatpush.bf16.msrb.mxu1 %v2309_v35  ;;  %v2333_v35 = vor.u32 %v2569_v21, %v2330_v24 }
  0xa0   : > { %1524 = vmatpush.bf16.msrb.mxu2 %v2373_v19  ;;  %v2587_v19 = vld [vmem:[%s2774_s11 + $0x3a4] sm:$0xf] }
  0xa1   : > { %1543 = vmatpush.bf16.msrb.mxu3 %v2437_v36  ;;  %v2405_v32 = vor.u32 %v2587_v19, %v2402_v20  ;;  %v2205_v36 = vor.u32 %v2537_v27, %v2202_v28 }
  0xa2   : > { %1487 = vmatpush.bf16.msrb.mxu0 %v2237_v40  ;;  %v2322_v40 = vld [vmem:[%s2774_s11 + $0x308] sm:$0xf0] }
  0xa3   : > { %1506 = vmatpush.bf16.msrb.mxu1 %v2301_v47  ;;  %v2258_v47 = vld [vmem:[%s2774_s11 + $0x288] sm:$0xf0] }
  0xa4   : > { %1525 = vmatpush.bf16.msrb.mxu2 %v2365_v39  ;;  %v2567_v39 = vld [vmem:[%s2774_s11 + $0x304] sm:$0xf]  ;;  %v2261_v1 = vor.u32 %v2551_v45, %v2258_v47 }
  0xa5   : > { %1544 = vmatpush.bf16.msrb.mxu3 %v2429_v48  ;;  %v2386_v48 = vld [vmem:[%s2774_s11 + $0x388] sm:$0xf0] }
  0xa6   : > { %1488 = vmatpush.bf16.msrb.mxu0 %v2229_v50 }
  0xa7   : > { %1507 = vmatpush.bf16.msrb.mxu1 %v2293_v55 }
  0xa8   : > { %1526 = vmatpush.bf16.msrb.mxu2 %v2357_v49 }
  0xa9   : > { %1545 = vmatpush.bf16.msrb.mxu3 %v2421_v56  ;;  %1422 = vmatmul.bf16.gmra.mxu0 %v2910_v61  ;;  %v2325_v61 = vor.u32 %v2567_v39, %v2322_v40 }
  0xaa   : > { %1489 = vmatpush.bf16.msrb.mxu0 %v2221_v60  ;;  %1441 = vmatmul.bf16.gmra.mxu1 %v2915_v3  ;;  %v2583_v3 = vld [vmem:[%s2774_s11 + $0x384] sm:$0xf] }
  0xab   : > { %1508 = vmatpush.bf16.msrb.mxu1 %v2285_v11  ;;  %1460 = vmatmul.bf16.gmra.mxu2 %v2917_v4  ;;  %v2389_v6 = vor.u32 %v2583_v3, %v2386_v48 }
  0xac   : > { %1527 = vmatpush.bf16.msrb.mxu2 %v2349_v59  ;;  %1479 = vmatmul.bf16.gmra.mxu3 %v2921_v9 }
  0xad   : > { %1546 = vmatpush.bf16.msrb.mxu3 %v2413_v12  ;;  %v385_v12 = vld [vmem:[#allocation2 + $0x30] sm:$0xff] }
  0xae   : > { %1490 = vmatpush.bf16.msrb.mxu0 %v2213_v16 }
  0xaf   : > { %1509 = vmatpush.bf16.msrb.mxu1 %v2277_v29 }
  0xb0   : > { %1528 = vmatpush.bf16.msrb.mxu2 %v2341_v15 }
  0xb1   : > { %1547 = vmatpush.bf16.msrb.mxu3 %v2405_v32 }
  0xb2   : > { %1491 = vmatpush.bf16.msrb.mxu0 %v2205_v36 }
  0xb3   : > { %1510 = vmatpush.bf16.msrb.mxu1 %v2269_v43 }
  0xb4   : > { %1529 = vmatpush.bf16.msrb.mxu2 %v2333_v35 }
  0xb5   : > { %1548 = vmatpush.bf16.msrb.mxu3 %v2397_v44 }
  0xb6   : > { %1492 = vmatpush.bf16.msrb.mxu0 %v2197_v46 }
  0xb7   : > { %1511 = vmatpush.bf16.msrb.mxu1 %v2261_v1 }
  0xb8   : > { %1530 = vmatpush.bf16.msrb.mxu2 %v2325_v61  ;;  %v389_v61 = vld [vmem:[#allocation2 + $0x8] sm:$0xff] }
  0xb9   : > { %1549 = vmatpush.bf16.msrb.mxu3 %v2389_v6  ;;  %1493 = vmatmul.bf16.vlgmr.msrb.gmra.mxu0 %v2970_v17 }
  0xba   : > { %1512 = vmatmul.bf16.vlgmr.msrb.gmra.mxu1 %v2972_v18 }
  0xbb   : > { %1531 = vmatmul.bf16.vlgmr.msrb.gmra.mxu2 %v2977_v22 }
  0xbc   : > { %1550 = vmatmul.bf16.vlgmr.msrb.gmra.mxu3 %v2979_v23 }
  0xc9   : > { %1498 = vmatmul.bf16.gmra.mxu0 %v3022_v25 }
  0xca   : > { %1517 = vmatmul.bf16.gmra.mxu1 %v3024_v26 }
  0xcb   : > { %1536 = vmatmul.bf16.gmra.mxu2 %v3029_v30 }
  0xcc   : > { %1555 = vmatmul.bf16.gmra.mxu3 %v3031_v31 }
  0xd6   : > { %v1266_v4 = vpop.f32.mrf.mxu0 }
  0xd7   : > { %v1285_v9 = vpop.f32.mrf.mxu1 }
  0xd8   : > { %v1286_v54 = vadd.f32 %v1285_v9, %v1266_v4 }
  0xde   : > { %v1304_v49 = vpop.f32.mrf.mxu2  ;;  %v1268_v51 = vpop.f32.mrf.mxu0 }
  0xdf   : > { %v1323_v50 = vpop.f32.mrf.mxu3  ;;  %v1287_v17 = vpop.f32.mrf.mxu1  ;;  %v1305_v26 = vadd.f32 %v1304_v49, %v1286_v54 }
  0xe0   : > { %v1288_v58 = vadd.f32 %v1287_v17, %v1268_v51 }
  0xe1   : > { %v1324_v56 = vadd.f32 %v1323_v50, %v1305_v26  ;;  %v391_v50 = vld [vmem:[#allocation2 + $0x28] sm:$0xff] }
  0xe6   : > { %v1306_v52 = vpop.f32.mrf.mxu2  ;;  %v1271_v7 = vpop.f32.mrf.mxu0 }
  0xe7   : > { %v1325_v18 = vpop.f32.mrf.mxu3  ;;  %v1290_v22 = vpop.f32.mrf.mxu1  ;;  %v1307_v60 = vadd.f32 %v1306_v52, %v1288_v58 }
  0xe8   : > { %v1291_v13 = vadd.f32 %v1290_v22, %v1271_v7 }
  0xe9   : > { %v1326_v2 = vadd.f32 %v1325_v18, %v1307_v60 }
  0xee   : > { %v1309_v10 = vpop.f32.mrf.mxu2  ;;  %v1273_v53 = vpop.f32.mrf.mxu0 }
  0xef   : > { %v1328_v23 = vpop.f32.mrf.mxu3  ;;  %v1292_v25 = vpop.f32.mrf.mxu1  ;;  %v1310_v16 = vadd.f32 %v1309_v10, %v1291_v13 }
  0xf0   : > { %v1293_v34 = vadd.f32 %v1292_v25, %v1273_v53 }
  0xf1   : > { %v1329_v27 = vadd.f32 %v1328_v23, %v1310_v16 }
  0xf6   : > { %v1311_v55 = vpop.f32.mrf.mxu2  ;;  %v1342_v31 = vpop.f32.mrf.mxu0 }
  0xf7   : > { %v1330_v30 = vpop.f32.mrf.mxu3  ;;  %v1361_v57 = vpop.f32.mrf.mxu1  ;;  %v1343_v59 = vadd.f32 %v1342_v31, %v1324_v56  ;;  %v1312_v37 = vadd.f32 %v1311_v55, %v1293_v34 }
  0xf9   : > { %v1362_v62 = vadd.f32 %v1361_v57, %v1343_v59  ;;  %v1331_v42 = vadd.f32 %v1330_v30, %v1312_v37 }
  0xfe   : > { %v1380_v63 = vpop.f32.mrf.mxu2  ;;  %v1344_v8 = vpop.f32.mrf.mxu0 }
  0xff   : > { %v1399_v0 = vpop.f32.mrf.mxu3  ;;  %v1381_v5 = vadd.f32 %v1380_v63, %v1362_v62  ;;  %v1363_v11 = vpop.f32.mrf.mxu1  ;;  %v1345_v15 = vadd.f32 %v1344_v8, %v1326_v2 }
 0x101   : > { %v1400_v14 = vadd.f32 %v1399_v0, %v1381_v5  ;;  %v1364_v20 = vadd.f32 %v1363_v11, %v1345_v15  ;;  %v386_v15 = vld [vmem:[#allocation2] sm:$0xff] }
 0x103   : > { %v1561_v19 = vadd.f32 %v1400_v14, %v385_v12 }
 0x105   : > { %1569 = vst [vmem:[#allocation2 + $0x30] sm:$0xff] %v1561_v19 }
 0x106   : > { %v1382_v21 = vpop.f32.mrf.mxu2  ;;  %v1347_v29 = vpop.f32.mrf.mxu0 }
 0x107   : > { %v1401_v24 = vpop.f32.mrf.mxu3  ;;  %v1383_v28 = vadd.f32 %v1382_v21, %v1364_v20  ;;  %v1366_v32 = vpop.f32.mrf.mxu1  ;;  %v1348_v36 = vadd.f32 %v1347_v29, %v1329_v27 }
 0x109   : > { %v1402_v35 = vadd.f32 %v1401_v24, %v1383_v28  ;;  %v1367_v39 = vadd.f32 %v1366_v32, %v1348_v36  ;;  %v388_v36 = vld [vmem:[#allocation2 + $0x10] sm:$0xff] }
 0x10b   : > { %v1563_v38 = vadd.f32 %v1402_v35, %v387_v33 }
 0x10d   : > { %1571 = vst [vmem:[#allocation2 + $0x18] sm:$0xff] %v1563_v38 }
 0x10e   : > { %v1385_v40 = vpop.f32.mrf.mxu2  ;;  %v1349_v44 = vpop.f32.mrf.mxu0 }
 0x10f   : > { %v1404_v41 = vpop.f32.mrf.mxu3  ;;  %v1386_v43 = vadd.f32 %v1385_v40, %v1367_v39  ;;  %v1368_v45 = vpop.f32.mrf.mxu1  ;;  %v1350_v47 = vadd.f32 %v1349_v44, %v1331_v42 }
 0x111   : > { %v1405_v46 = vadd.f32 %v1404_v41, %v1386_v43  ;;  %v1369_v48 = vadd.f32 %v1368_v45, %v1350_v47 }
 0x113   : > { %v1565_v3 = vadd.f32 %v1405_v46, %v389_v61 }
 0x115   : > { %1573 = vst [vmem:[#allocation2 + $0x8] sm:$0xff] %v1565_v3  ;;  %v390_v3 = vld [vmem:[#allocation2 + $0x20] sm:$0xff] }
 0x116   : > { %v1387_v1 = vpop.f32.mrf.mxu2  ;;  %v1418_v9 = vpop.f32.mrf.mxu0 }
 0x117   : > { %v1406_v6 = vpop.f32.mrf.mxu3  ;;  %v1388_v4 = vadd.f32 %v1387_v1, %v1369_v48  ;;  %v1437_v49 = vpop.f32.mrf.mxu1 }
 0x118   : > { %v1438_v56 = vadd.f32 %v1437_v49, %v1418_v9 }
 0x119   : > { %v1407_v51 = vadd.f32 %v1406_v6, %v1388_v4 }
 0x11b   : > { %v1567_v17 = vadd.f32 %v1407_v51, %v391_v50  ;;  %v392_v51 = vld [vmem:[#allocation2 + $0x38] sm:$0xff] }
 0x11d   : > { %1575 = vst [vmem:[#allocation2 + $0x28] sm:$0xff] %v1567_v17 }
 0x11e   : > { %v1456_v52 = vpop.f32.mrf.mxu2  ;;  %v1420_v7 = vpop.f32.mrf.mxu0 }
 0x11f   : > { %v1475_v18 = vpop.f32.mrf.mxu3  ;;  %v1439_v22 = vpop.f32.mrf.mxu1  ;;  %v1457_v31 = vadd.f32 %v1456_v52, %v1438_v56 }
 0x120   : > { %v1440_v63 = vadd.f32 %v1439_v22, %v1420_v7 }
 0x121   : > { %v1476_v59 = vadd.f32 %v1475_v18, %v1457_v31 }
 0x126   : > { %v1458_v10 = vpop.f32.mrf.mxu2  ;;  %v1423_v53 = vpop.f32.mrf.mxu0 }
 0x127   : > { %v1477_v23 = vpop.f32.mrf.mxu3  ;;  %v1442_v25 = vpop.f32.mrf.mxu1  ;;  %v1459_v2 = vadd.f32 %v1458_v10, %v1440_v63 }
 0x128   : > { %v1443_v19 = vadd.f32 %v1442_v25, %v1423_v53 }
 0x129   : > { %v1478_v12 = vadd.f32 %v1477_v23, %v1459_v2 }
 0x12e   : > { %v1461_v54 = vpop.f32.mrf.mxu2  ;;  %v1425_v55 = vpop.f32.mrf.mxu0 }
 0x12f   : > { %v1480_v26 = vpop.f32.mrf.mxu3  ;;  %v1444_v30 = vpop.f32.mrf.mxu1  ;;  %v1462_v24 = vadd.f32 %v1461_v54, %v1443_v19 }
 0x130   : > { %v1445_v37 = vadd.f32 %v1444_v30, %v1425_v55 }
 0x131   : > { %v1481_v33 = vadd.f32 %v1480_v26, %v1462_v24 }
 0x136   : > { %v1463_v57 = vpop.f32.mrf.mxu2  ;;  %v1494_v60 = vpop.f32.mrf.mxu0 }
 0x137   : > { %v1482_v58 = vpop.f32.mrf.mxu3  ;;  %v1513_v62 = vpop.f32.mrf.mxu1  ;;  %v1495_v0 = vadd.f32 %v1494_v60, %v1476_v59  ;;  %v1464_v41 = vadd.f32 %v1463_v57, %v1445_v37 }
 0x139   : > { %v1514_v5 = vadd.f32 %v1513_v62, %v1495_v0  ;;  %v1483_v61 = vadd.f32 %v1482_v58, %v1464_v41 }
 0x13e   : > { %v1532_v8 = vpop.f32.mrf.mxu2  ;;  %v1496_v14 = vpop.f32.mrf.mxu0 }
 0x13f   : > { %v1551_v11 = vpop.f32.mrf.mxu3  ;;  %v1533_v13 = vadd.f32 %v1532_v8, %v1514_v5  ;;  %v1515_v16 = vpop.f32.mrf.mxu1  ;;  %v1497_v21 = vadd.f32 %v1496_v14, %v1478_v12 }
 0x141   : > { %v1552_v20 = vadd.f32 %v1551_v11, %v1533_v13  ;;  %v1516_v28 = vadd.f32 %v1515_v16, %v1497_v21 }
 0x143   : > { %v1562_v27 = vadd.f32 %v1552_v20, %v386_v15 }
 0x145   : > { %1570 = vst [vmem:[#allocation2] sm:$0xff] %v1562_v27 }
 0x146   : > { %v1534_v29 = vpop.f32.mrf.mxu2  ;;  %v1499_v35 = vpop.f32.mrf.mxu0 }
 0x147   : > { %v1553_v32 = vpop.f32.mrf.mxu3  ;;  %v1535_v34 = vadd.f32 %v1534_v29, %v1516_v28  ;;  %v1500_v39 = vadd.f32 %v1499_v35, %v1481_v33  ;;  %v1518_v40 = vpop.f32.mrf.mxu1 }
 0x149   : > { %v1554_v38 = vadd.f32 %v1553_v32, %v1535_v34  ;;  %v1519_v43 = vadd.f32 %v1518_v40, %v1500_v39 }
 0x14b   : > { %v1564_v42 = vadd.f32 %v1554_v38, %v388_v36 }
 0x14d   : > { %1572 = vst [vmem:[#allocation2 + $0x10] sm:$0xff] %v1564_v42 }
 0x14e   : > { %v1537_v44 = vpop.f32.mrf.mxu2  ;;  %v1501_v47 = vpop.f32.mrf.mxu0 }
 0x14f   : > { %v1556_v45 = vpop.f32.mrf.mxu3  ;;  %v1538_v46 = vadd.f32 %v1537_v44, %v1519_v43  ;;  %v1502_v1 = vadd.f32 %v1501_v47, %v1483_v61  ;;  %v1520_v4 = vpop.f32.mrf.mxu1 }
 0x151   : > { %v1557_v48 = vadd.f32 %v1556_v45, %v1538_v46  ;;  %v1521_v9 = vadd.f32 %v1520_v4, %v1502_v1 }
 0x153   : > { %v1566_v6 = vadd.f32 %v1557_v48, %v390_v3 }
 0x155   : > { %1574 = vst [vmem:[#allocation2 + $0x20] sm:$0xff] %v1566_v6 }
 0x156   : > { %v1539_v49 = vpop.f32.mrf.mxu2 }
 0x157   : > { %v1540_v50 = vadd.f32 %v1539_v49, %v1521_v9  ;;  %v1558_v17 = vpop.f32.mrf.mxu3 }
 0x159   : > { %v1559_v52 = vadd.f32 %v1558_v17, %v1540_v50  ;;  %1580 = sbr.rel (%p2446_p11) target bundleno = 382 (0x17e), region = 63 }
 0x15b   : > { %v1568_v18 = vadd.f32 %v1559_v52, %v392_v51 }
 0x15d   : > { %1576 = vst [vmem:[#allocation2 + $0x38] sm:$0xff] %v1568_v18 }
 0x15e   : > { %v1581_v7 = vld [vmem:[#allocation2 + $0x30] sm:$0xff]  ;;  %v1583_v22 = vld [vmem:[#allocation2 + $0x18] sm:$0xff]  ;;  %v1585_v10 = vld [vmem:[#allocation2 + $0x8] sm:$0xff]  ;;  %v1603_v40 = vlaneseq }
 0x15f   : > { %v1587_v23 = vld [vmem:[#allocation2 + $0x28] sm:$0xff]  ;;  %v1589_v53 = vld [vmem:[%s3170_s2] sm:$0x3]  ;;  %v1584_v26 = vld [vmem:[#allocation2 + $0x10] sm:$0xff] }
 0x160   : > { %v1591_v25 = vperm.slane %v1589_v53, 0  ;;  %v1582_v54 = vld [vmem:[#allocation2] sm:$0xff]  ;;  %v1592_v55 = vperm.slane %v1589_v53, 1  ;;  %v1604_v3 = vshrl.u32 %v1603_v40, 7 }
 0x161   : > { %v1586_v58 = vld [vmem:[#allocation2 + $0x20] sm:$0xff] }
 0x162   : > { %v1595_v30 = vadd.f32 %v1591_v25, %v1581_v7  ;;  %v1597_v56 = vadd.f32 %v1591_v25, %v1583_v22  ;;  %v1599_v31 = vadd.f32 %v1591_v25, %v1585_v10  ;;  %v1601_v57 = vadd.f32 %v1591_v25, %v1587_v23 }
 0x163   : > { %v1596_v60 = vadd.f32 %v1592_v55, %v1582_v54  ;;  %v1598_v62 = vadd.f32 %v1592_v55, %v1584_v26  ;;  %v1600_v11 = vadd.f32 %v1592_v55, %v1586_v58  ;;  %vm1669_vm0 = vcmp.eq.s32.totalorder %v1604_v3, 0 }
 0x164   : > { %v1588_v59 = vld [vmem:[#allocation2 + $0x38] sm:$0xff]  ;;  %v1625_v63 = vadd.f32 %v1597_v56, %v1595_v30  ;;  %v1643_v0 = vmul.f32 %v1595_v30, %v1595_v30  ;;  %v1645_v2 = vmul.f32 %v1597_v56, %v1597_v56  ;;  %v1647_v5 = vmul.f32 %v1599_v31, %v1599_v31 }
 0x165   : > { %v1649_v8 = vmul.f32 %v1601_v57, %v1601_v57  ;;  %v1602_v12 = vadd.f32 %v1592_v55, %v1588_v59  ;;  %v1634_v13 = vadd.f32 %v1598_v62, %v1596_v60  ;;  %v1644_v16 = vmul.f32 %v1596_v60, %v1596_v60 }
 0x166   : > { %v1626_v14 = vadd.f32 %v1625_v63, %v1599_v31  ;;  %v1651_v15 = vadd.f32 %v1645_v2, %v1643_v0  ;;  %v1646_v19 = vmul.f32 %v1598_v62, %v1598_v62  ;;  %v1648_v21 = vmul.f32 %v1600_v11, %v1600_v11 }
 0x167   : > { %v1635_v20 = vadd.f32 %v1634_v13, %v1600_v11  ;;  %v1650_v24 = vmul.f32 %v1602_v12, %v1602_v12  ;;  %v1679_v27 = vpack.c.bf16 %v1596_v60, %v1595_v30  ;;  %v1680_v33 = vpack.c.bf16 %v1598_v62, %v1597_v56 }
 0x168   : > { %v1627_v28 = vadd.f32 %v1626_v14, %v1601_v57  ;;  %v1652_v29 = vadd.f32 %v1651_v15, %v1647_v5  ;;  %v1660_v32 = vadd.f32 %v1646_v19, %v1644_v16  ;;  %v1681_v35 = vpack.c.bf16 %v1600_v11, %v1599_v31 }
 0x169   : > { %v1636_v34 = vadd.f32 %v1635_v20, %v1602_v12  ;;  %1683 = vst [vmem:[%s3171_s3] sm:$0xff] %v1679_v27  ;;  %v1682_v36 = vpack.c.bf16 %v1602_v12, %v1601_v57  ;;  %vm1672_vm1 = vcmp.eq.s32.totalorder %v1604_v3, 1 }
 0x16a   : > { %v1628_v37 = vrot.slane %v1627_v28, 4  ;;  %v1653_v38 = vadd.f32 %v1652_v29, %v1649_v8  ;;  %v1661_v39 = vadd.f32 %v1660_v32, %v1648_v21  ;;  %1684 = vst [vmem:[%s3171_s3 + $0x8] sm:$0xff] %v1680_v33 }
 0x16b   : > { %v1637_v41 = vrot.slane %v1636_v34, 4  ;;  %1685 = vst [vmem:[%s3171_s3 + $0x10] sm:$0xff] %v1681_v35 }
 0x16c   : > { %v1629_v42 = vadd.f32 %v1628_v37, %v1627_v28  ;;  %v1654_v43 = vrot.slane %v1653_v38, 4  ;;  %v1662_v44 = vadd.f32 %v1661_v39, %v1650_v24  ;;  %1686 = vst [vmem:[%s3171_s3 + $0x18] sm:$0xff] %v1682_v36 }
 0x16d   : > { %v1638_v45 = vadd.f32 %v1637_v41, %v1636_v34 }
 0x16e   : > { %v1630_v61 = vrot.slane %v1629_v42, 2  ;;  %v1655_v46 = vadd.f32 %v1654_v43, %v1653_v38  ;;  %v1663_v47 = vrot.slane %v1662_v44, 4 }
 0x16f   : > { %v1639_v48 = vrot.slane %v1638_v45, 2 }
 0x170   : > { %v1631_v1 = vadd.f32 %v1630_v61, %v1629_v42  ;;  %v1656_v6 = vrot.slane %v1655_v46, 2  ;;  %v1664_v4 = vadd.f32 %v1663_v47, %v1662_v44 }
 0x171   : > { %v1640_v9 = vadd.f32 %v1639_v48, %v1638_v45 }
 0x172   : > { %v1632_v49 = vrot.slane %v1631_v1, 1  ;;  %v1657_v50 = vadd.f32 %v1656_v6, %v1655_v46  ;;  %v1665_v51 = vrot.slane %v1664_v4, 2 }
 0x173   : > { %v1641_v17 = vrot.slane %v1640_v9, 1 }
 0x174   : > { %v1633_v52 = vadd.f32 %v1632_v49, %v1631_v1  ;;  %v1658_v18 = vrot.slane %v1657_v50, 1  ;;  %v1666_v7 = vadd.f32 %v1665_v51, %v1664_v4 }
 0x175   : > { %v1642_v22 = vadd.f32 %v1641_v17, %v1640_v9 }
 0x176   : > { %v1659_v10 = vadd.f32 %v1658_v18, %v1657_v50  ;;  %v1670_v23 = vsel %vm1669_vm0, %v1633_v52, 0.0  ;;  %v1667_v53 = vrot.slane %v1666_v7, 1 }
 0x177   : > { %v1671_v26 = vsel %vm1669_vm0, %v1642_v22, 0.0 }
 0x178   : > { %v1673_v25 = vsel %vm1672_vm1, %v1659_v10, 0.0  ;;  %v1668_v54 = vadd.f32 %v1667_v53, %v1666_v7 }
 0x179   : > { %v1675_v55 = vadd.f32 %v1673_v25, %v1670_v23 }
 0x17a   : > { %v1674_v30 = vsel %vm1672_vm1, %v1668_v54, 0.0 }
 0x17b   : > { %1677 = vst [vmem:[%s3172_s4] sm:$0xff] %v1675_v55  ;;  %v1676_v56 = vadd.f32 %v1674_v30, %v1671_v26 }
 0x17d   : > { %1678 = vst [vmem:[%s3172_s4 + $0x8] sm:$0xff] %v1676_v56 }
 0x17e PF: > { %s15_s19 = sadd.s32 1, %s2678_s19   ;;  %s3173_s15 = smov %s2666_s16 }
 0x17f   : > { %p12_p12 = scmp.ge.s32.totalorder %s15_s19, 4   ;;  %s3174_s16 = smov %s2741_s23 }
 0x180   : > { %s3175_s17 = smov %s2674_s18  ;;  %s3176_s18 = smov %s3178_s20 }
 0x181   :  { %14 = sbr.rel (!%p12_p12) target bundleno = 3 (0x3), region = 116 }

// kernel: discriminator_forward.14
= control target key start
LH: loop header
LB: loop body
LE: loop exit
PB: predicated region body
PF: predicated region fallthrough
CT: control target
= control target key end

     0   :  { %s566_s12 = smov 0   ;;  %s568_s13 = smov 0   ;;  %s649_s0 = inlined_call_operand.vmem [shape: bf16[16,512], index: 0, kind: input, shape index: {}]   ;;  %s650_s1 = inlined_call_operand.vmem [shape: f32[1,512], index: 1, kind: input, shape index: {}]   ;;  %s651_s2 = inlined_call_operand.vmem [shape: f32[1,512], index: 2, kind: input, shape index: {}]   ;;  %s652_s3 = inlined_call_operand.vmem [shape: bf16[16,512], index: 3, kind: output, shape index: {}]  }
   0x1   :  { %s570_s14 = smov 0   ;;  %s572_s15 = smov 0  }
   0x2   :  { %s574_s16 = smov 0  }
   0x3 LB: > { %s22_s17 = sadd.s32 1, %s540_s15  ;;  %s447_s18 = sadd.s32 4294967295, %s544_s16   ;;  %s544_s16 = sphi %s574_s16, %s13_s16   ;;  %s540_s15 = sphi %s572_s15, %s657_s15   ;;  %s536_s14 = sphi %s570_s14, %s656_s14   ;;  %s532_s13 = sphi %s568_s13, %s655_s13   ;;  %s528_s12 = sphi %s566_s12, %s654_s12  }
   0x4   : > { %p23_p0 = scmp.ge.s32.totalorder %s22_s17, 2  ;;  %p41_p1 = scmp.ne.s32.totalorder %s532_s13, %s528_s12 }
   0x5   : > { %p42_p2 = scmp.eq.s32.totalorder %s544_s16, 0  ;;  %p125_p4 = scmp.eq.s32.totalorder %s447_s18, 1 }
   0x6   : > { %s659_s17 = smov (%p23_p0, %s22_s17), 0  ;;  %s34_s20 = sadd.s32 1, %s532_s13 }
   0x7   : > { %p43_p3 = por %p42_p2, %p41_p1  ;;  %s30_s19 = ssub.s32 %s540_s15, %s659_s17 }
   0x8   : > { %p32_p5 = scmp.eq.s32.totalorder %s30_s19, 0  ;;  %p601_p6 = por %p125_p4, %p41_p1 }
   0x9   : > { %p450_p7 = scmp.ge.s32.totalorder %s544_s16, 2 }
   0xa   : > { %s606_s22 = scalar_select %p32_p5, %s532_s13, %s34_s20  }
   0xb   : > { %147 = sbr.rel (%p450_p7) target bundleno = 22 (0x16), region = 16 }
  0x10   : > { %150 = sbr.rel (!%p43_p3) target bundleno = 22 (0x16), region = 20  ;;  %s152_s23 = sand.u32 (%p43_p3), 1, %s532_s13  }
  0x11   : > { %s464_s24 = sshll.u32 (%p43_p3), %s540_s15, 3  ;;  %s451_s25 = sshll.u32 (%p43_p3), %s152_s23, 4 }
  0x12   : > { %s160_s28 = scalar_lea.vmem (%p43_p3), %s649_s0, %s464_s24  ;;  %s154_s29 = scalar_lea.vmem (%p43_p3), [#allocation2], %s451_s25 }
  0x13   : > { %v191_v0 = vld [vmem:[%s160_s28] sm:$0xff] (%p43_p3)  ;;  %v193_v1 = vld [vmem:[%s160_s28 + $0x10] sm:$0xff] (%p43_p3) }
  0x14   : > { %192 = vst [vmem:[%s154_s29] sm:$0xff] (%p43_p3), %v191_v0 }
  0x15   : > { %194 = vst [vmem:[%s154_s29 + $0x8] sm:$0xff] %v193_v1 }
  0x16 PF: > { %p454_p8 = scmp.ge.s32.totalorder %s544_s16, 1  ;;  %p215_p9 = scmp.lt.s32.totalorder %s544_s16, 3 }
  0x18   : > { %p216_p10 = pnand %p454_p8, %p215_p9 }
  0x19   : > { %s222_s30 = sand.u32 (!%p216_p10), 1, %s528_s12   ;;  %s457_s4 = sshll.u32 (!%p216_p10), %s536_s14, 1 }
  0x1a   : > { %219 = sbr.rel (%p216_p10) target bundleno = 55 (0x37), region = 66  ;;  %s618_s5 = sshll.u32 (!%p216_p10), %s222_s30, 4 }
  0x1b   : > { %p255_p11 = scmp.lt.s32.totalorder (!%p216_p10), %s457_s4, 3  ;;  %s224_s6 = scalar_lea.vmem (!%p216_p10), [#allocation2], %s618_s5 }
  0x1c   : > { %s251_s12 = scalar_lea.vmem (!%p216_p10), [#allocation3], %s618_s5 }
  0x1f   : > { %s661_s4 = smov (!%p255_p11, %s457_s4), 3  ;;  %v266_v2 = vld [vmem:[%s224_s6] sm:$0xff]  ;;  %v267_v3 = vld [vmem:[%s224_s6 + $0x8] sm:$0xff]  ;;  %s465_s19 = sshll.u32 (%p601_p6), %s536_s14, 3 }
  0x20   : > { %s257_s9 = scalar_lea.vmem %s650_s1, %s661_s4  ;;  %s262_s18 = scalar_lea.vmem %s651_s2, %s661_s4  ;;  %v268_v4 = vunpack.c.l.bf16 %v266_v2  ;;  %v269_v5 = vunpack.c.h.bf16 %v266_v2  ;;  %v270_v6 = vunpack.c.l.bf16 %v267_v3  ;;  %v271_v7 = vunpack.c.h.bf16 %v267_v3 }
  0x21   : > { %v272_v8 = vld [vmem:[%s257_s9] sm:$0x3]  ;;  %s320_s24 = scalar_lea.vmem (%p601_p6), %s652_s3, %s465_s19 }
  0x22   : > { %v282_v9 = vld [vmem:[%s262_s18] sm:$0x3]  ;;  %v274_v10 = vperm.slane %v272_v8, 0  ;;  %v275_v11 = vperm.slane %v272_v8, 1 }
  0x23   : > { %v284_v12 = vperm.slane %v282_v9, 0  ;;  %v285_v13 = vperm.slane %v282_v9, 1 }
  0x24   : > { %v278_v14 = vmul.f32 %v274_v10, %v268_v4  ;;  %v279_v15 = vmul.f32 %v275_v11, %v269_v5  ;;  %v280_v16 = vmul.f32 %v274_v10, %v270_v6  ;;  %v281_v17 = vmul.f32 %v275_v11, %v271_v7 }
  0x26   : > { %v288_v18 = vadd.f32 %v284_v12, %v278_v14  ;;  %v289_v19 = vadd.f32 %v285_v13, %v279_v15  ;;  %v290_v20 = vadd.f32 %v284_v12, %v280_v16  ;;  %v291_v21 = vadd.f32 %v285_v13, %v281_v17 }
  0x28   : > { %vm292_vm0 = vcmp.ge.f32.partialorder %v288_v18, 0.0  ;;  %vm293_vm1 = vcmp.ge.f32.partialorder %v289_v19, 0.0  ;;  %v296_v22 = vmul.f32 0.2, %v288_v18  ;;  %v297_v23 = vmul.f32 0.2, %v289_v19 }
  0x29   : > { %vm294_vm2 = vcmp.ge.f32.partialorder %v290_v20, 0.0  ;;  %vm295_vm3 = vcmp.ge.f32.partialorder %v291_v21, 0.0  ;;  %v298_v24 = vmul.f32 0.2, %v290_v20  ;;  %v299_v25 = vmul.f32 0.2, %v291_v21 }
  0x2a   : > { %v300_v26 = vsel %vm292_vm0, %v288_v18, %v296_v22  ;;  %v301_v27 = vsel %vm293_vm1, %v289_v19, %v297_v23  ;;  %314 = sbr.rel (!%p601_p6) target bundleno = 55 (0x37), region = 74 }
  0x2b   : > { %v304_v28 = vpack.c.bf16 %v301_v27, %v300_v26  ;;  %v302_v29 = vsel %vm294_vm2, %v290_v20, %v298_v24  ;;  %v303_v30 = vsel %vm295_vm3, %v291_v21, %v299_v25 }
  0x2c   : > { %v305_v31 = vpack.c.bf16 %v303_v30, %v302_v29 }
  0x2d   : > { %306 = vst [vmem:[%s251_s12] sm:$0xff] %v304_v28 }
  0x2e   : > { %307 = vst [vmem:[%s251_s12 + $0x8] sm:$0xff] %v305_v31 }
  0x34   : > { %v351_v32 = vld [vmem:[%s251_s12] sm:$0xff] }
  0x35   : > { %v353_v33 = vld [vmem:[%s251_s12 + $0x8] sm:$0xff]  ;;  %352 = vst [vmem:[%s320_s24] sm:$0xff] %v351_v32 }
  0x36   : > { %354 = vst [vmem:[%s320_s24 + $0x10] sm:$0xff] %v353_v33 }
  0x37 PF: > { %s13_s16 = sadd.s32 1, %s544_s16   ;;  %s654_s12 = smov %s532_s13 }
  0x38   : > { %p10_p12 = scmp.ge.s32.totalorder %s13_s16, 4   ;;  %s655_s13 = smov %s606_s22 }
  0x39   : > { %s656_s14 = smov %s540_s15  ;;  %s657_s15 = smov %s659_s17 }
  0x3a   :  { %12 = sbr.rel (!%p10_p12) target bundleno = 3 (0x3), region = 149 }

// kernel: discriminator_forward.13
= control target key start
LH: loop header
LB: loop body
LE: loop exit
PB: predicated region body
PF: predicated region fallthrough
CT: control target
= control target key end

     0   :  { %s3880_s0 = inlined_call_operand.vmem [shape: bf16[16,4096], index: 0, kind: input, shape index: {}]   ;;  %s3881_s1 = inlined_call_operand.vmem [shape: bf16[4096,512], index: 1, kind: input, shape index: {}]   ;;  %s3882_s2 = inlined_call_operand.vmem [shape: f32[1,512], index: 2, kind: input, shape index: {}]   ;;  %s3883_s3 = inlined_call_operand.vmem [shape: bf16[16,512], index: 3, kind: output, shape index: {0}]   ;;  %s3884_s4 = inlined_call_operand.vmem [shape: f32[8,512], index: 4, kind: output, shape index: {1}]  }
   0x1   :  { %3887 = sst [smem:[#allocation8_spill]] %s3880_s0 }
   0x2   :  { %3888 = sst [smem:[#allocation9_spill]] %s3881_s1 }
   0x3   :  { %s3126_s15 = smov 0   ;;  %s3128_s16 = smov 0  }
   0x4   :  { %s3130_s17 = smov 0   ;;  %s3132_s18 = smov 0  }
   0x5   :  { %s3134_s19 = smov 0   ;;  %s3136_s20 = smov 0  }
   0x6   :  { %s3138_s21 = smov 0   ;;  %s3140_s22 = smov 0  }
   0x7   :  { %s3142_s23 = smov 0   ;;  %s3144_s24 = smov 0  }
   0x8   :  { %s3146_s25 = smov 0  }
   0x9 LB: > { %s2214_s26 = sadd.s32 4294967295, %s3098_s25   ;;  %s27_s27 = sadd.s32 1, %s3090_s23  ;;  %s3098_s25 = sphi %s3146_s25, %s15_s25   ;;  %s3094_s24 = sphi %s3144_s24, %s3907_s24   ;;  %s3090_s23 = sphi %s3142_s23, %s3906_s23   ;;  %s3086_s22 = sphi %s3140_s22, %s3905_s22   ;;  %s3082_s21 = sphi %s3138_s21, %s3904_s21   ;;  %s3078_s20 = sphi %s3136_s20, %s3903_s20   ;;  %s3074_s19 = sphi %s3134_s19, %s3902_s19   ;;  %s3070_s18 = sphi %s3132_s18, %s3901_s18   ;;  %s3066_s17 = sphi %s3130_s17, %s3900_s17   ;;  %s3062_s16 = sphi %s3128_s16, %s3899_s16   ;;  %s3058_s15 = sphi %s3126_s15, %s3898_s15  }
   0xa   : > { %p28_p0 = scmp.ge.s32.totalorder %s27_s27, 4  ;;  %s30_s28 = sadd.s32 1, %s3094_s24 }
   0xb   : > { %s43_s29 = sadd.s32 1, %s3078_s20  ;;  %p50_p1 = scmp.ne.s32.totalorder %s3078_s20, %s3074_s19 }
   0xc   : > { %s3909_s27 = smov (%p28_p0, %s27_s27), 0  ;;  %s3911_s28 = smov (!%p28_p0, %s30_s28), %s3094_s24 }
   0xd   : > { %3889 = sst [smem:[#allocation6_spill]] %s3909_s27  ;;  %s39_s30 = ssub.s32 %s3090_s23, %s3909_s27 }
   0xe   : > { %p51_p2 = scmp.eq.s32.totalorder %s3098_s25, 0  ;;  %p32_p3 = scmp.ge.s32.totalorder %s3911_s28, 2 }
   0xf   : > { %p41_p4 = scmp.eq.s32.totalorder %s39_s30, 0  ;;  %s71_s6 = sadd.s32 1, %s3070_s18 }
  0x10   : > { %p3193_p5 = por %p51_p2, %p50_p1  ;;  %s3913_s28 = smov (%p32_p3, %s3911_s28), 0 }
  0x11   : > { %3891 = sst [smem:[#allocation7_spill]] %s3913_s28  ;;  %s67_s8 = ssub.s32 %s3094_s24, %s3913_s28 }
  0x12   : > { %s3201_s7 = scalar_select %p41_p4, %s3078_s20, %s43_s29  }
  0x13   : > { %p78_p6 = scmp.ne.s32.totalorder %s3070_s18, %s3066_s17  ;;  %s68_s9 = sor.u32 %s67_s8, %s39_s30 }
  0x14   : > { %p123_p7 = scmp.eq.s32.totalorder %s67_s8, 0  ;;  %p69_p8 = scmp.eq.s32.totalorder %s68_s9, 0 }
  0x15   : > { %p3207_p9 = por %p78_p6, %p51_p2  ;;  %s125_s11 = sadd.s32 1, %s3062_s16 }
  0x16   : > { %p135_p10 = scmp.ne.s32.totalorder %s3062_s16, %s3058_s15  ;;  %p136_p11 = scmp.eq.s32.totalorder %s2214_s26, 7 }
  0x17   : > { %s3215_s12 = scalar_select %p69_p8, %s3070_s18, %s71_s6  }
  0x18   : > { %s3218_s13 = scalar_select %p123_p7, %s3062_s16, %s125_s11  }
  0x19   : > { %p3220_p12 = por %p136_p11, %p135_p10  ;;  %p2217_p13 = scmp.ge.s32.totalorder %s3098_s25, 8 }
  0x1b   : > { %186 = sbr.rel (%p2217_p13) target bundleno = 188 (0xbc), region = 16 }
  0x20   : > { %189 = sbr.rel (!%p3193_p5) target bundleno = 50 (0x32), region = 20  ;;  %s191_s29 = sand.u32 (%p3193_p5), 1, %s3078_s20  }
  0x21   : > { %s2784_s30 = sshll.u32 (%p3193_p5), %s3090_s23, 5  ;;  %s2218_s8 = sshll.u32 (%p3193_p5), %s191_s29, 6 }
  0x22   : > { %s3894_s0 = sld [smem:[#allocation8_spill]] (%p3193_p5)  ;;  %s193_s26 = scalar_lea.vmem (%p3193_p5), [#allocation3], %s2218_s8 }
  0x28   : > { %s199_s11 = scalar_lea.vmem %s3894_s0, %s2784_s30 }
  0x29   : > { %v212_v0 = vld [vmem:[%s199_s11] sm:$0xff]  ;;  %v214_v1 = vld [vmem:[%s199_s11 + $0x8] sm:$0xff]  ;;  %v216_v2 = vld [vmem:[%s199_s11 + $0x10] sm:$0xff] }
  0x2a   : > { %213 = vst [vmem:[%s193_s26] sm:$0xff] %v212_v0  ;;  %v218_v3 = vld [vmem:[%s199_s11 + $0x18] sm:$0xff]  ;;  %v220_v4 = vld [vmem:[%s199_s11 + $0x80] sm:$0xff]  ;;  %v222_v5 = vld [vmem:[%s199_s11 + $0x88] sm:$0xff] }
  0x2b   : > { %215 = vst [vmem:[%s193_s26 + $0x8] sm:$0xff] %v214_v1  ;;  %v224_v6 = vld [vmem:[%s199_s11 + $0x90] sm:$0xff]  ;;  %v226_v7 = vld [vmem:[%s199_s11 + $0x98] sm:$0xff] }
  0x2c   : > { %217 = vst [vmem:[%s193_s26 + $0x10] sm:$0xff] %v216_v2 }
  0x2d   : > { %219 = vst [vmem:[%s193_s26 + $0x18] sm:$0xff] %v218_v3 }
  0x2e   : > { %221 = vst [vmem:[%s193_s26 + $0x20] sm:$0xff] %v220_v4 }
  0x2f   : > { %223 = vst [vmem:[%s193_s26 + $0x28] sm:$0xff] %v222_v5 }
  0x30   : > { %225 = vst [vmem:[%s193_s26 + $0x30] sm:$0xff] %v224_v6 }
  0x31   : > { %227 = vst [vmem:[%s193_s26 + $0x38] sm:$0xff] %v226_v7 }
  0x32 PF: > { %233 = sbr.rel (!%p3207_p9) target bundleno = 188 (0xbc), region = 43  ;;  %s235_s5 = sand.u32 (%p3207_p9), 1, %s3070_s18  }
  0x33   : > { %s2223_s29 = sshll.u32 (%p3207_p9), %s3094_s24, 1  ;;  %s2221_s30 = sshll.u32 (%p3207_p9), %s235_s5, 10 }
  0x34   : > { %s2785_s8 = sshll.u32 (%p3207_p9), %s3090_s23, 9  ;;  %s3895_s1 = sld [smem:[#allocation9_spill]] (%p3207_p9) }
  0x35   : > { %s241_s6 = sadd.s32 (%p3207_p9), %s2785_s8, %s2223_s29  ;;  %s3245_s10 = scalar_lea.vmem (%p3207_p9), [#allocation4], %s2221_s30 }
  0x36   : > { %s2225_s9 = sshll.u32 (%p3207_p9), %s241_s6, 2 }
  0x3a   : > { %s3240_s11 = scalar_lea.vmem %s3895_s1, %s2225_s9 }
  0x3b   : > { %v526_v8 = vld [vmem:[%s3240_s11] sm:$0xff]  ;;  %v528_v9 = vld [vmem:[%s3240_s11 + $0x10] sm:$0xff] }
  0x3c   : > { %v530_v10 = vld [vmem:[%s3240_s11 + $0x20] sm:$0xff]  ;;  %527 = vst [vmem:[%s3245_s10] sm:$0xff] %v526_v8  ;;  %v532_v11 = vld [vmem:[%s3240_s11 + $0x30] sm:$0xff] }
  0x3d   : > { %529 = vst [vmem:[%s3245_s10 + $0x8] sm:$0xff] %v528_v9  ;;  %v534_v12 = vld [vmem:[%s3240_s11 + $0x40] sm:$0xff]  ;;  %v536_v13 = vld [vmem:[%s3240_s11 + $0x50] sm:$0xff] }
  0x3e   : > { %531 = vst [vmem:[%s3245_s10 + $0x10] sm:$0xff] %v530_v10  ;;  %v538_v14 = vld [vmem:[%s3240_s11 + $0x60] sm:$0xff]  ;;  %v540_v15 = vld [vmem:[%s3240_s11 + $0x70] sm:$0xff] }
  0x3f   : > { %533 = vst [vmem:[%s3245_s10 + $0x18] sm:$0xff] %v532_v11  ;;  %v542_v16 = vld [vmem:[%s3240_s11 + $0x80] sm:$0xff]  ;;  %v544_v17 = vld [vmem:[%s3240_s11 + $0x90] sm:$0xff] }
  0x40   : > { %535 = vst [vmem:[%s3245_s10 + $0x20] sm:$0xff] %v534_v12  ;;  %v546_v18 = vld [vmem:[%s3240_s11 + $0xa0] sm:$0xff]  ;;  %v548_v19 = vld [vmem:[%s3240_s11 + $0xb0] sm:$0xff] }
  0x41   : > { %537 = vst [vmem:[%s3245_s10 + $0x28] sm:$0xff] %v536_v13  ;;  %v550_v20 = vld [vmem:[%s3240_s11 + $0xc0] sm:$0xff]  ;;  %v552_v21 = vld [vmem:[%s3240_s11 + $0xd0] sm:$0xff] }
  0x42   : > { %539 = vst [vmem:[%s3245_s10 + $0x30] sm:$0xff] %v538_v14  ;;  %v554_v22 = vld [vmem:[%s3240_s11 + $0xe0] sm:$0xff]  ;;  %v556_v23 = vld [vmem:[%s3240_s11 + $0xf0] sm:$0xff] }
  0x43   : > { %541 = vst [vmem:[%s3245_s10 + $0x38] sm:$0xff] %v540_v15  ;;  %v558_v24 = vld [vmem:[%s3240_s11 + $0x100] sm:$0xff]  ;;  %v560_v25 = vld [vmem:[%s3240_s11 + $0x110] sm:$0xff] }
  0x44   : > { %543 = vst [vmem:[%s3245_s10 + $0x40] sm:$0xff] %v542_v16  ;;  %v562_v26 = vld [vmem:[%s3240_s11 + $0x120] sm:$0xff]  ;;  %v564_v27 = vld [vmem:[%s3240_s11 + $0x130] sm:$0xff] }
  0x45   : > { %545 = vst [vmem:[%s3245_s10 + $0x48] sm:$0xff] %v544_v17  ;;  %v566_v28 = vld [vmem:[%s3240_s11 + $0x140] sm:$0xff]  ;;  %v568_v29 = vld [vmem:[%s3240_s11 + $0x150] sm:$0xff] }
  0x46   : > { %547 = vst [vmem:[%s3245_s10 + $0x50] sm:$0xff] %v546_v18  ;;  %v570_v30 = vld [vmem:[%s3240_s11 + $0x160] sm:$0xff]  ;;  %v572_v31 = vld [vmem:[%s3240_s11 + $0x170] sm:$0xff] }
  0x47   : > { %549 = vst [vmem:[%s3245_s10 + $0x58] sm:$0xff] %v548_v19  ;;  %v574_v32 = vld [vmem:[%s3240_s11 + $0x180] sm:$0xff]  ;;  %v576_v33 = vld [vmem:[%s3240_s11 + $0x190] sm:$0xff] }
  0x48   : > { %551 = vst [vmem:[%s3245_s10 + $0x60] sm:$0xff] %v550_v20  ;;  %v578_v34 = vld [vmem:[%s3240_s11 + $0x1a0] sm:$0xff]  ;;  %v580_v35 = vld [vmem:[%s3240_s11 + $0x1b0] sm:$0xff] }
  0x49   : > { %553 = vst [vmem:[%s3245_s10 + $0x68] sm:$0xff] %v552_v21  ;;  %v582_v36 = vld [vmem:[%s3240_s11 + $0x1c0] sm:$0xff]  ;;  %v584_v37 = vld [vmem:[%s3240_s11 + $0x1d0] sm:$0xff] }
  0x4a   : > { %555 = vst [vmem:[%s3245_s10 + $0x70] sm:$0xff] %v554_v22  ;;  %v586_v38 = vld [vmem:[%s3240_s11 + $0x1e0] sm:$0xff]  ;;  %v588_v39 = vld [vmem:[%s3240_s11 + $0x1f0] sm:$0xff] }
  0x4b   : > { %557 = vst [vmem:[%s3245_s10 + $0x78] sm:$0xff] %v556_v23  ;;  %v590_v40 = vld [vmem:[%s3240_s11 + $0x200] sm:$0xff]  ;;  %v592_v41 = vld [vmem:[%s3240_s11 + $0x210] sm:$0xff] }
  0x4c   : > { %559 = vst [vmem:[%s3245_s10 + $0x80] sm:$0xff] %v558_v24  ;;  %v594_v42 = vld [vmem:[%s3240_s11 + $0x220] sm:$0xff]  ;;  %v596_v43 = vld [vmem:[%s3240_s11 + $0x230] sm:$0xff] }
  0x4d   : > { %561 = vst [vmem:[%s3245_s10 + $0x88] sm:$0xff] %v560_v25  ;;  %v598_v44 = vld [vmem:[%s3240_s11 + $0x240] sm:$0xff]  ;;  %v600_v45 = vld [vmem:[%s3240_s11 + $0x250] sm:$0xff] }
  0x4e   : > { %563 = vst [vmem:[%s3245_s10 + $0x90] sm:$0xff] %v562_v26  ;;  %v602_v46 = vld [vmem:[%s3240_s11 + $0x260] sm:$0xff]  ;;  %v604_v47 = vld [vmem:[%s3240_s11 + $0x270] sm:$0xff] }
  0x4f   : > { %565 = vst [vmem:[%s3245_s10 + $0x98] sm:$0xff] %v564_v27  ;;  %v606_v48 = vld [vmem:[%s3240_s11 + $0x280] sm:$0xff]  ;;  %v608_v49 = vld [vmem:[%s3240_s11 + $0x290] sm:$0xff] }
  0x50   : > { %567 = vst [vmem:[%s3245_s10 + $0xa0] sm:$0xff] %v566_v28  ;;  %v610_v50 = vld [vmem:[%s3240_s11 + $0x2a0] sm:$0xff]  ;;  %v612_v51 = vld [vmem:[%s3240_s11 + $0x2b0] sm:$0xff] }
  0x51   : > { %569 = vst [vmem:[%s3245_s10 + $0xa8] sm:$0xff] %v568_v29  ;;  %v614_v52 = vld [vmem:[%s3240_s11 + $0x2c0] sm:$0xff]  ;;  %v616_v53 = vld [vmem:[%s3240_s11 + $0x2d0] sm:$0xff] }
  0x52   : > { %571 = vst [vmem:[%s3245_s10 + $0xb0] sm:$0xff] %v570_v30  ;;  %v618_v54 = vld [vmem:[%s3240_s11 + $0x2e0] sm:$0xff]  ;;  %v620_v55 = vld [vmem:[%s3240_s11 + $0x2f0] sm:$0xff] }
  0x53   : > { %573 = vst [vmem:[%s3245_s10 + $0xb8] sm:$0xff] %v572_v31  ;;  %v622_v56 = vld [vmem:[%s3240_s11 + $0x300] sm:$0xff]  ;;  %v624_v57 = vld [vmem:[%s3240_s11 + $0x310] sm:$0xff] }
  0x54   : > { %575 = vst [vmem:[%s3245_s10 + $0xc0] sm:$0xff] %v574_v32  ;;  %v626_v58 = vld [vmem:[%s3240_s11 + $0x320] sm:$0xff]  ;;  %v628_v59 = vld [vmem:[%s3240_s11 + $0x330] sm:$0xff] }
  0x55   : > { %577 = vst [vmem:[%s3245_s10 + $0xc8] sm:$0xff] %v576_v33  ;;  %v630_v60 = vld [vmem:[%s3240_s11 + $0x340] sm:$0xff]  ;;  %v632_v61 = vld [vmem:[%s3240_s11 + $0x350] sm:$0xff] }
  0x56   : > { %579 = vst [vmem:[%s3245_s10 + $0xd0] sm:$0xff] %v578_v34  ;;  %v634_v62 = vld [vmem:[%s3240_s11 + $0x360] sm:$0xff]  ;;  %v636_v63 = vld [vmem:[%s3240_s11 + $0x370] sm:$0xff] }
  0x57   : > { %581 = vst [vmem:[%s3245_s10 + $0xd8] sm:$0xff] %v580_v35  ;;  %v638_v0 = vld [vmem:[%s3240_s11 + $0x380] sm:$0xff]  ;;  %v640_v1 = vld [vmem:[%s3240_s11 + $0x390] sm:$0xff] }
  0x58   : > { %583 = vst [vmem:[%s3245_s10 + $0xe0] sm:$0xff] %v582_v36  ;;  %v642_v2 = vld [vmem:[%s3240_s11 + $0x3a0] sm:$0xff]  ;;  %v644_v3 = vld [vmem:[%s3240_s11 + $0x3b0] sm:$0xff] }
  0x59   : > { %585 = vst [vmem:[%s3245_s10 + $0xe8] sm:$0xff] %v584_v37  ;;  %v646_v4 = vld [vmem:[%s3240_s11 + $0x3c0] sm:$0xff]  ;;  %v648_v5 = vld [vmem:[%s3240_s11 + $0x3d0] sm:$0xff] }
  0x5a   : > { %587 = vst [vmem:[%s3245_s10 + $0xf0] sm:$0xff] %v586_v38  ;;  %v650_v6 = vld [vmem:[%s3240_s11 + $0x3e0] sm:$0xff]  ;;  %v652_v7 = vld [vmem:[%s3240_s11 + $0x3f0] sm:$0xff] }
  0x5b   : > { %589 = vst [vmem:[%s3245_s10 + $0xf8] sm:$0xff] %v588_v39  ;;  %v654_v8 = vld [vmem:[%s3240_s11 + $0x400] sm:$0xff]  ;;  %v656_v9 = vld [vmem:[%s3240_s11 + $0x410] sm:$0xff] }
  0x5c   : > { %591 = vst [vmem:[%s3245_s10 + $0x100] sm:$0xff] %v590_v40  ;;  %v658_v10 = vld [vmem:[%s3240_s11 + $0x420] sm:$0xff]  ;;  %v660_v11 = vld [vmem:[%s3240_s11 + $0x430] sm:$0xff] }
  0x5d   : > { %593 = vst [vmem:[%s3245_s10 + $0x108] sm:$0xff] %v592_v41  ;;  %v662_v12 = vld [vmem:[%s3240_s11 + $0x440] sm:$0xff]  ;;  %v664_v13 = vld [vmem:[%s3240_s11 + $0x450] sm:$0xff] }
  0x5e   : > { %595 = vst [vmem:[%s3245_s10 + $0x110] sm:$0xff] %v594_v42  ;;  %v666_v14 = vld [vmem:[%s3240_s11 + $0x460] sm:$0xff]  ;;  %v668_v15 = vld [vmem:[%s3240_s11 + $0x470] sm:$0xff] }
  0x5f   : > { %597 = vst [vmem:[%s3245_s10 + $0x118] sm:$0xff] %v596_v43  ;;  %v670_v16 = vld [vmem:[%s3240_s11 + $0x480] sm:$0xff]  ;;  %v672_v17 = vld [vmem:[%s3240_s11 + $0x490] sm:$0xff] }
  0x60   : > { %599 = vst [vmem:[%s3245_s10 + $0x120] sm:$0xff] %v598_v44  ;;  %v674_v18 = vld [vmem:[%s3240_s11 + $0x4a0] sm:$0xff]  ;;  %v676_v19 = vld [vmem:[%s3240_s11 + $0x4b0] sm:$0xff] }
  0x61   : > { %601 = vst [vmem:[%s3245_s10 + $0x128] sm:$0xff] %v600_v45  ;;  %v678_v20 = vld [vmem:[%s3240_s11 + $0x4c0] sm:$0xff]  ;;  %v680_v21 = vld [vmem:[%s3240_s11 + $0x4d0] sm:$0xff] }
  0x62   : > { %603 = vst [vmem:[%s3245_s10 + $0x130] sm:$0xff] %v602_v46  ;;  %v682_v22 = vld [vmem:[%s3240_s11 + $0x4e0] sm:$0xff]  ;;  %v684_v23 = vld [vmem:[%s3240_s11 + $0x4f0] sm:$0xff] }
  0x63   : > { %605 = vst [vmem:[%s3245_s10 + $0x138] sm:$0xff] %v604_v47  ;;  %v686_v24 = vld [vmem:[%s3240_s11 + $0x500] sm:$0xff]  ;;  %v688_v25 = vld [vmem:[%s3240_s11 + $0x510] sm:$0xff] }
  0x64   : > { %607 = vst [vmem:[%s3245_s10 + $0x140] sm:$0xff] %v606_v48  ;;  %v690_v26 = vld [vmem:[%s3240_s11 + $0x520] sm:$0xff]  ;;  %v692_v27 = vld [vmem:[%s3240_s11 + $0x530] sm:$0xff] }
  0x65   : > { %609 = vst [vmem:[%s3245_s10 + $0x148] sm:$0xff] %v608_v49  ;;  %v694_v28 = vld [vmem:[%s3240_s11 + $0x540] sm:$0xff]  ;;  %v696_v29 = vld [vmem:[%s3240_s11 + $0x550] sm:$0xff] }
  0x66   : > { %611 = vst [vmem:[%s3245_s10 + $0x150] sm:$0xff] %v610_v50  ;;  %v698_v30 = vld [vmem:[%s3240_s11 + $0x560] sm:$0xff]  ;;  %v700_v31 = vld [vmem:[%s3240_s11 + $0x570] sm:$0xff] }
  0x67   : > { %613 = vst [vmem:[%s3245_s10 + $0x158] sm:$0xff] %v612_v51  ;;  %v702_v32 = vld [vmem:[%s3240_s11 + $0x580] sm:$0xff]  ;;  %v704_v33 = vld [vmem:[%s3240_s11 + $0x590] sm:$0xff] }
  0x68   : > { %615 = vst [vmem:[%s3245_s10 + $0x160] sm:$0xff] %v614_v52  ;;  %v706_v34 = vld [vmem:[%s3240_s11 + $0x5a0] sm:$0xff]  ;;  %v708_v35 = vld [vmem:[%s3240_s11 + $0x5b0] sm:$0xff] }
  0x69   : > { %617 = vst [vmem:[%s3245_s10 + $0x168] sm:$0xff] %v616_v53  ;;  %v710_v36 = vld [vmem:[%s3240_s11 + $0x5c0] sm:$0xff]  ;;  %v712_v37 = vld [vmem:[%s3240_s11 + $0x5d0] sm:$0xff] }
  0x6a   : > { %619 = vst [vmem:[%s3245_s10 + $0x170] sm:$0xff] %v618_v54  ;;  %v714_v38 = vld [vmem:[%s3240_s11 + $0x5e0] sm:$0xff]  ;;  %v716_v39 = vld [vmem:[%s3240_s11 + $0x5f0] sm:$0xff] }
  0x6b   : > { %621 = vst [vmem:[%s3245_s10 + $0x178] sm:$0xff] %v620_v55  ;;  %v718_v40 = vld [vmem:[%s3240_s11 + $0x600] sm:$0xff]  ;;  %v720_v41 = vld [vmem:[%s3240_s11 + $0x610] sm:$0xff] }
  0x6c   : > { %623 = vst [vmem:[%s3245_s10 + $0x180] sm:$0xff] %v622_v56  ;;  %v722_v42 = vld [vmem:[%s3240_s11 + $0x620] sm:$0xff]  ;;  %v724_v43 = vld [vmem:[%s3240_s11 + $0x630] sm:$0xff] }
  0x6d   : > { %625 = vst [vmem:[%s3245_s10 + $0x188] sm:$0xff] %v624_v57  ;;  %v726_v44 = vld [vmem:[%s3240_s11 + $0x640] sm:$0xff]  ;;  %v728_v45 = vld [vmem:[%s3240_s11 + $0x650] sm:$0xff] }
  0x6e   : > { %627 = vst [vmem:[%s3245_s10 + $0x190] sm:$0xff] %v626_v58  ;;  %v730_v46 = vld [vmem:[%s3240_s11 + $0x660] sm:$0xff]  ;;  %v732_v47 = vld [vmem:[%s3240_s11 + $0x670] sm:$0xff] }
  0x6f   : > { %629 = vst [vmem:[%s3245_s10 + $0x198] sm:$0xff] %v628_v59  ;;  %v734_v48 = vld [vmem:[%s3240_s11 + $0x680] sm:$0xff]  ;;  %v736_v49 = vld [vmem:[%s3240_s11 + $0x690] sm:$0xff] }
  0x70   : > { %631 = vst [vmem:[%s3245_s10 + $0x1a0] sm:$0xff] %v630_v60  ;;  %v738_v50 = vld [vmem:[%s3240_s11 + $0x6a0] sm:$0xff]  ;;  %v740_v51 = vld [vmem:[%s3240_s11 + $0x6b0] sm:$0xff] }
  0x71   : > { %633 = vst [vmem:[%s3245_s10 + $0x1a8] sm:$0xff] %v632_v61  ;;  %v742_v52 = vld [vmem:[%s3240_s11 + $0x6c0] sm:$0xff]  ;;  %v744_v53 = vld [vmem:[%s3240_s11 + $0x6d0] sm:$0xff] }
  0x72   : > { %635 = vst [vmem:[%s3245_s10 + $0x1b0] sm:$0xff] %v634_v62  ;;  %v746_v54 = vld [vmem:[%s3240_s11 + $0x6e0] sm:$0xff]  ;;  %v748_v55 = vld [vmem:[%s3240_s11 + $0x6f0] sm:$0xff] }
  0x73   : > { %637 = vst [vmem:[%s3245_s10 + $0x1b8] sm:$0xff] %v636_v63  ;;  %v750_v56 = vld [vmem:[%s3240_s11 + $0x700] sm:$0xff]  ;;  %v752_v57 = vld [vmem:[%s3240_s11 + $0x710] sm:$0xff] }
  0x74   : > { %639 = vst [vmem:[%s3245_s10 + $0x1c0] sm:$0xff] %v638_v0  ;;  %v754_v58 = vld [vmem:[%s3240_s11 + $0x720] sm:$0xff]  ;;  %v756_v59 = vld [vmem:[%s3240_s11 + $0x730] sm:$0xff] }
  0x75   : > { %641 = vst [vmem:[%s3245_s10 + $0x1c8] sm:$0xff] %v640_v1  ;;  %v758_v60 = vld [vmem:[%s3240_s11 + $0x740] sm:$0xff]  ;;  %v760_v61 = vld [vmem:[%s3240_s11 + $0x750] sm:$0xff] }
  0x76   : > { %643 = vst [vmem:[%s3245_s10 + $0x1d0] sm:$0xff] %v642_v2  ;;  %v762_v62 = vld [vmem:[%s3240_s11 + $0x760] sm:$0xff]  ;;  %v764_v63 = vld [vmem:[%s3240_s11 + $0x770] sm:$0xff] }
  0x77   : > { %645 = vst [vmem:[%s3245_s10 + $0x1d8] sm:$0xff] %v644_v3  ;;  %v766_v0 = vld [vmem:[%s3240_s11 + $0x780] sm:$0xff]  ;;  %v768_v1 = vld [vmem:[%s3240_s11 + $0x790] sm:$0xff] }
  0x78   : > { %647 = vst [vmem:[%s3245_s10 + $0x1e0] sm:$0xff] %v646_v4  ;;  %v770_v2 = vld [vmem:[%s3240_s11 + $0x7a0] sm:$0xff]  ;;  %v772_v3 = vld [vmem:[%s3240_s11 + $0x7b0] sm:$0xff] }
  0x79   : > { %649 = vst [vmem:[%s3245_s10 + $0x1e8] sm:$0xff] %v648_v5  ;;  %v774_v4 = vld [vmem:[%s3240_s11 + $0x7c0] sm:$0xff]  ;;  %v776_v5 = vld [vmem:[%s3240_s11 + $0x7d0] sm:$0xff] }
  0x7a   : > { %651 = vst [vmem:[%s3245_s10 + $0x1f0] sm:$0xff] %v650_v6  ;;  %v778_v6 = vld [vmem:[%s3240_s11 + $0x7e0] sm:$0xff] }
  0x7b   : > { %653 = vst [vmem:[%s3245_s10 + $0x1f8] sm:$0xff] %v652_v7  ;;  %v780_v7 = vld [vmem:[%s3240_s11 + $0x7f0] sm:$0xff] }
  0x7c   : > { %655 = vst [vmem:[%s3245_s10 + $0x200] sm:$0xff] %v654_v8 }
  0x7d   : > { %657 = vst [vmem:[%s3245_s10 + $0x208] sm:$0xff] %v656_v9 }
  0x7e   : > { %659 = vst [vmem:[%s3245_s10 + $0x210] sm:$0xff] %v658_v10 }
  0x7f   : > { %661 = vst [vmem:[%s3245_s10 + $0x218] sm:$0xff] %v660_v11 }
  0x80   : > { %663 = vst [vmem:[%s3245_s10 + $0x220] sm:$0xff] %v662_v12 }
  0x81   : > { %665 = vst [vmem:[%s3245_s10 + $0x228] sm:$0xff] %v664_v13 }
  0x82   : > { %667 = vst [vmem:[%s3245_s10 + $0x230] sm:$0xff] %v666_v14 }
  0x83   : > { %669 = vst [vmem:[%s3245_s10 + $0x238] sm:$0xff] %v668_v15 }
  0x84   : > { %671 = vst [vmem:[%s3245_s10 + $0x240] sm:$0xff] %v670_v16 }
  0x85   : > { %673 = vst [vmem:[%s3245_s10 + $0x248] sm:$0xff] %v672_v17 }
  0x86   : > { %675 = vst [vmem:[%s3245_s10 + $0x250] sm:$0xff] %v674_v18 }
  0x87   : > { %677 = vst [vmem:[%s3245_s10 + $0x258] sm:$0xff] %v676_v19 }
  0x88   : > { %679 = vst [vmem:[%s3245_s10 + $0x260] sm:$0xff] %v678_v20 }
  0x89   : > { %681 = vst [vmem:[%s3245_s10 + $0x268] sm:$0xff] %v680_v21 }
  0x8a   : > { %683 = vst [vmem:[%s3245_s10 + $0x270] sm:$0xff] %v682_v22 }
  0x8b   : > { %685 = vst [vmem:[%s3245_s10 + $0x278] sm:$0xff] %v684_v23 }
  0x8c   : > { %687 = vst [vmem:[%s3245_s10 + $0x280] sm:$0xff] %v686_v24 }
  0x8d   : > { %689 = vst [vmem:[%s3245_s10 + $0x288] sm:$0xff] %v688_v25 }
  0x8e   : > { %691 = vst [vmem:[%s3245_s10 + $0x290] sm:$0xff] %v690_v26 }
  0x8f   : > { %693 = vst [vmem:[%s3245_s10 + $0x298] sm:$0xff] %v692_v27 }
  0x90   : > { %695 = vst [vmem:[%s3245_s10 + $0x2a0] sm:$0xff] %v694_v28 }
  0x91   : > { %697 = vst [vmem:[%s3245_s10 + $0x2a8] sm:$0xff] %v696_v29 }
  0x92   : > { %699 = vst [vmem:[%s3245_s10 + $0x2b0] sm:$0xff] %v698_v30 }
  0x93   : > { %701 = vst [vmem:[%s3245_s10 + $0x2b8] sm:$0xff] %v700_v31 }
  0x94   : > { %703 = vst [vmem:[%s3245_s10 + $0x2c0] sm:$0xff] %v702_v32 }
  0x95   : > { %705 = vst [vmem:[%s3245_s10 + $0x2c8] sm:$0xff] %v704_v33 }
  0x96   : > { %707 = vst [vmem:[%s3245_s10 + $0x2d0] sm:$0xff] %v706_v34 }
  0x97   : > { %709 = vst [vmem:[%s3245_s10 + $0x2d8] sm:$0xff] %v708_v35 }
  0x98   : > { %711 = vst [vmem:[%s3245_s10 + $0x2e0] sm:$0xff] %v710_v36 }
  0x99   : > { %713 = vst [vmem:[%s3245_s10 + $0x2e8] sm:$0xff] %v712_v37 }
  0x9a   : > { %715 = vst [vmem:[%s3245_s10 + $0x2f0] sm:$0xff] %v714_v38 }
  0x9b   : > { %717 = vst [vmem:[%s3245_s10 + $0x2f8] sm:$0xff] %v716_v39 }
  0x9c   : > { %719 = vst [vmem:[%s3245_s10 + $0x300] sm:$0xff] %v718_v40 }
  0x9d   : > { %721 = vst [vmem:[%s3245_s10 + $0x308] sm:$0xff] %v720_v41 }
  0x9e   : > { %723 = vst [vmem:[%s3245_s10 + $0x310] sm:$0xff] %v722_v42 }
  0x9f   : > { %725 = vst [vmem:[%s3245_s10 + $0x318] sm:$0xff] %v724_v43 }
  0xa0   : > { %727 = vst [vmem:[%s3245_s10 + $0x320] sm:$0xff] %v726_v44 }
  0xa1   : > { %729 = vst [vmem:[%s3245_s10 + $0x328] sm:$0xff] %v728_v45 }
  0xa2   : > { %731 = vst [vmem:[%s3245_s10 + $0x330] sm:$0xff] %v730_v46 }
  0xa3   : > { %733 = vst [vmem:[%s3245_s10 + $0x338] sm:$0xff] %v732_v47 }
  0xa4   : > { %735 = vst [vmem:[%s3245_s10 + $0x340] sm:$0xff] %v734_v48 }
  0xa5   : > { %737 = vst [vmem:[%s3245_s10 + $0x348] sm:$0xff] %v736_v49 }
  0xa6   : > { %739 = vst [vmem:[%s3245_s10 + $0x350] sm:$0xff] %v738_v50 }
  0xa7   : > { %741 = vst [vmem:[%s3245_s10 + $0x358] sm:$0xff] %v740_v51 }
  0xa8   : > { %743 = vst [vmem:[%s3245_s10 + $0x360] sm:$0xff] %v742_v52 }
  0xa9   : > { %745 = vst [vmem:[%s3245_s10 + $0x368] sm:$0xff] %v744_v53 }
  0xaa   : > { %747 = vst [vmem:[%s3245_s10 + $0x370] sm:$0xff] %v746_v54 }
  0xab   : > { %749 = vst [vmem:[%s3245_s10 + $0x378] sm:$0xff] %v748_v55 }
  0xac   : > { %751 = vst [vmem:[%s3245_s10 + $0x380] sm:$0xff] %v750_v56 }
  0xad   : > { %753 = vst [vmem:[%s3245_s10 + $0x388] sm:$0xff] %v752_v57 }
  0xae   : > { %755 = vst [vmem:[%s3245_s10 + $0x390] sm:$0xff] %v754_v58 }
  0xaf   : > { %757 = vst [vmem:[%s3245_s10 + $0x398] sm:$0xff] %v756_v59 }
  0xb0   : > { %759 = vst [vmem:[%s3245_s10 + $0x3a0] sm:$0xff] %v758_v60 }
  0xb1   : > { %761 = vst [vmem:[%s3245_s10 + $0x3a8] sm:$0xff] %v760_v61 }
  0xb2   : > { %763 = vst [vmem:[%s3245_s10 + $0x3b0] sm:$0xff] %v762_v62 }
  0xb3   : > { %765 = vst [vmem:[%s3245_s10 + $0x3b8] sm:$0xff] %v764_v63 }
  0xb4   : > { %767 = vst [vmem:[%s3245_s10 + $0x3c0] sm:$0xff] %v766_v0 }
  0xb5   : > { %769 = vst [vmem:[%s3245_s10 + $0x3c8] sm:$0xff] %v768_v1 }
  0xb6   : > { %771 = vst [vmem:[%s3245_s10 + $0x3d0] sm:$0xff] %v770_v2 }
  0xb7   : > { %773 = vst [vmem:[%s3245_s10 + $0x3d8] sm:$0xff] %v772_v3 }
  0xb8   : > { %775 = vst [vmem:[%s3245_s10 + $0x3e0] sm:$0xff] %v774_v4 }
  0xb9   : > { %777 = vst [vmem:[%s3245_s10 + $0x3e8] sm:$0xff] %v776_v5 }
  0xba   : > { %779 = vst [vmem:[%s3245_s10 + $0x3f0] sm:$0xff] %v778_v6 }
  0xbb   : > { %781 = vst [vmem:[%s3245_s10 + $0x3f8] sm:$0xff] %v780_v7 }
  0xbc PF: > { %p2226_p0 = scmp.ge.s32.totalorder %s3098_s25, 1  ;;  %p794_p1 = scmp.lt.s32.totalorder %s3098_s25, 9 }
  0xbe   : > { %p795_p2 = pnand %p2226_p0, %p794_p1 }
  0xbf   : > { %s801_s0 = sand.u32 (!%p795_p2), 1, %s3074_s19   ;;  %s808_s28 = sand.u32 (!%p795_p2), 1, %s3066_s17  }
  0xc0   : > { %798 = sbr.rel (%p795_p2) target bundleno = 517 (0x205), region = 85  ;;  %s2227_s26 = sshll.u32 (!%p795_p2), %s801_s0, 6 }
  0xc1   : > { %s2228_s5 = sshll.u32 (!%p795_p2), %s808_s28, 10  ;;  %s835_s29 = sand.u32 (!%p795_p2), 1, %s3058_s15  }
  0xc2   : > { %s2230_s30 = sshll.u32 (!%p795_p2), %s3086_s22, 1  ;;  %s2229_s8 = sshll.u32 (!%p795_p2), %s835_s29, 4 }
  0xc3   : > { %p854_p3 = scmp.lt.s32.totalorder (!%p795_p2), %s2230_s30, 3  ;;  %s3518_s17 = scalar_lea.vmem (!%p795_p2), [#allocation3], %s2227_s26 }
  0xc4   : > { %s3520_s15 = scalar_lea.vmem (!%p795_p2), [#allocation4], %s2228_s5  ;;  %s3522_s0 = scalar_lea.vmem (!%p795_p2), [#allocation5], %s2229_s8 }
  0xc5   : > { %s3915_s30 = smov (!%p854_p3, %s2230_s30), 3  ;;  %p2233_p4 = scmp.ne.s32.totalorder %s3082_s21, 0 }
  0xc6   : > { %s856_s11 = scalar_lea.vmem %s3882_s2, %s3915_s30  ;;  %s2232_s10 = sshll.u32 %s3915_s30, 3 }
  0xc7   : > { %s3516_s19 = scalar_lea.vmem %s3884_s4, %s2232_s10  ;;  %874 = sbr.rel (%p2233_p4) target bundleno = 209 (0xd1), region = 97 }
  0xcc   : > { %v3100_v8 = vmov 0.0  }
  0xcd   : > { %875 = vst [vmem:[#allocation2 + $0x10] sm:$0xff] %v3100_v8 }
  0xce   : > { %876 = vst [vmem:[#allocation2] sm:$0xff] %v3100_v8 }
  0xcf   : > { %877 = vst [vmem:[#allocation2 + $0x18] sm:$0xff] %v3100_v8 }
  0xd0   : > { %878 = vst [vmem:[#allocation2 + $0x8] sm:$0xff] %v3100_v8 }
  0xd1 PF: > { %v2324_v9 = vld [vmem:[%s3520_s15 + $0x70] sm:$0xf]  ;;  %v2809_v10 = vld [vmem:[%s3520_s15 + $0x74] sm:$0xf0]  ;;  %v2316_v20 = vld [vmem:[%s3520_s15 + $0x60] sm:$0xf] }
  0xd2   : > { %v2388_v11 = vld [vmem:[%s3520_s15 + $0xf0] sm:$0xf]  ;;  %v2325_v12 = vor.u32 %v2809_v10, %v2324_v9  ;;  %v2825_v13 = vld [vmem:[%s3520_s15 + $0xf4] sm:$0xf0]  ;;  %v2807_v22 = vld [vmem:[%s3520_s15 + $0x64] sm:$0xf0] }
  0xd3   : > { %v2452_v14 = vld [vmem:[%s3520_s15 + $0x170] sm:$0xf]  ;;  %v2841_v15 = vld [vmem:[%s3520_s15 + $0x174] sm:$0xf0]  ;;  %v2389_v16 = vor.u32 %v2825_v13, %v2388_v11  ;;  %v2380_v23 = vld [vmem:[%s3520_s15 + $0xe0] sm:$0xf]  ;;  %v2317_v25 = vor.u32 %v2807_v22, %v2316_v20 }
  0xd4   : > { %v2453_v17 = vor.u32 %v2841_v15, %v2452_v14  ;;  %v2516_v18 = vld [vmem:[%s3520_s15 + $0x1f0] sm:$0xf]  ;;  %v2857_v19 = vld [vmem:[%s3520_s15 + $0x1f4] sm:$0xf0]  ;;  %1699 = vmatpush.bf16.msra.mxu0 %v2325_v12  ;;  %v2823_v24 = vld [vmem:[%s3520_s15 + $0xe4] sm:$0xf0] }
  0xd5   : > { %v2517_v21 = vor.u32 %v2857_v19, %v2516_v18  ;;  %1713 = vmatpush.bf16.msra.mxu1 %v2389_v16  ;;  %v2381_v26 = vor.u32 %v2823_v24, %v2380_v23  ;;  %v2444_v27 = vld [vmem:[%s3520_s15 + $0x160] sm:$0xf]  ;;  %v2839_v28 = vld [vmem:[%s3520_s15 + $0x164] sm:$0xf0]  ;;  %v2308_v32 = vld [vmem:[%s3520_s15 + $0x50] sm:$0xf] }
  0xd6   : > { %1727 = vmatpush.bf16.msra.mxu2 %v2453_v17  ;;  %v2508_v29 = vld [vmem:[%s3520_s15 + $0x1e0] sm:$0xf]  ;;  %v2445_v30 = vor.u32 %v2839_v28, %v2444_v27  ;;  %v2855_v31 = vld [vmem:[%s3520_s15 + $0x1e4] sm:$0xf0]  ;;  %v2805_v33 = vld [vmem:[%s3520_s15 + $0x54] sm:$0xf0] }
  0xd7   : > { %1741 = vmatpush.bf16.msra.mxu3 %v2517_v21  ;;  %v2509_v34 = vor.u32 %v2855_v31, %v2508_v29  ;;  %v2372_v35 = vld [vmem:[%s3520_s15 + $0xd0] sm:$0xf]  ;;  %v2821_v36 = vld [vmem:[%s3520_s15 + $0xd4] sm:$0xf0]  ;;  %v2309_v38 = vor.u32 %v2805_v33, %v2308_v32  ;;  %v2300_v44 = vld [vmem:[%s3520_s15 + $0x40] sm:$0xf] }
  0xd8   : > { %v2436_v37 = vld [vmem:[%s3520_s15 + $0x150] sm:$0xf]  ;;  %1700 = vmatpush.bf16.msra.mxu0 %v2317_v25  ;;  %v2837_v39 = vld [vmem:[%s3520_s15 + $0x154] sm:$0xf0]  ;;  %v2373_v42 = vor.u32 %v2821_v36, %v2372_v35  ;;  %v2803_v45 = vld [vmem:[%s3520_s15 + $0x44] sm:$0xf0] }
  0xd9   : > { %v2500_v40 = vld [vmem:[%s3520_s15 + $0x1d0] sm:$0xf]  ;;  %v2853_v41 = vld [vmem:[%s3520_s15 + $0x1d4] sm:$0xf0]  ;;  %1714 = vmatpush.bf16.msra.mxu1 %v2381_v26  ;;  %v2437_v43 = vor.u32 %v2837_v39, %v2436_v37  ;;  %v2364_v46 = vld [vmem:[%s3520_s15 + $0xc0] sm:$0xf]  ;;  %v2301_v53 = vor.u32 %v2803_v45, %v2300_v44 }
  0xda   : > { %1728 = vmatpush.bf16.msra.mxu2 %v2445_v30  ;;  %v2501_v47 = vor.u32 %v2853_v41, %v2500_v40  ;;  %v2819_v48 = vld [vmem:[%s3520_s15 + $0xc4] sm:$0xf0]  ;;  %v2428_v49 = vld [vmem:[%s3520_s15 + $0x140] sm:$0xf]  ;;  %v2292_v56 = vld [vmem:[%s3520_s15 + $0x30] sm:$0xf] }
  0xdb   : > { %1742 = vmatpush.bf16.msra.mxu3 %v2509_v34  ;;  %v2835_v50 = vld [vmem:[%s3520_s15 + $0x144] sm:$0xf0]  ;;  %v2492_v51 = vld [vmem:[%s3520_s15 + $0x1c0] sm:$0xf]  ;;  %v2365_v54 = vor.u32 %v2819_v48, %v2364_v46  ;;  %v2801_v57 = vld [vmem:[%s3520_s15 + $0x34] sm:$0xf0] }
  0xdc   : > { %v2851_v52 = vld [vmem:[%s3520_s15 + $0x1c4] sm:$0xf0]  ;;  %1701 = vmatpush.bf16.msra.mxu0 %v2309_v38  ;;  %v2429_v55 = vor.u32 %v2835_v50, %v2428_v49  ;;  %v2356_v58 = vld [vmem:[%s3520_s15 + $0xb0] sm:$0xf]  ;;  %v2817_v60 = vld [vmem:[%s3520_s15 + $0xb4] sm:$0xf0]  ;;  %v2293_v1 = vor.u32 %v2801_v57, %v2292_v56 }
  0xdd   : > { %1715 = vmatpush.bf16.msra.mxu1 %v2373_v42  ;;  %v2493_v59 = vor.u32 %v2851_v52, %v2492_v51  ;;  %v2420_v61 = vld [vmem:[%s3520_s15 + $0x130] sm:$0xf]  ;;  %v2833_v62 = vld [vmem:[%s3520_s15 + $0x134] sm:$0xf0]  ;;  %v2357_v2 = vor.u32 %v2817_v60, %v2356_v58  ;;  %v2284_v4 = vld [vmem:[%s3520_s15 + $0x20] sm:$0xf] }
  0xde   : > { %1729 = vmatpush.bf16.msra.mxu2 %v2437_v43  ;;  %v2484_v63 = vld [vmem:[%s3520_s15 + $0x1b0] sm:$0xf]  ;;  %v2849_v0 = vld [vmem:[%s3520_s15 + $0x1b4] sm:$0xf0]  ;;  %v2421_v3 = vor.u32 %v2833_v62, %v2420_v61  ;;  %v2799_v5 = vld [vmem:[%s3520_s15 + $0x24] sm:$0xf0] }
  0xdf   : > { %1743 = vmatpush.bf16.msra.mxu3 %v2501_v47  ;;  %v2348_v6 = vld [vmem:[%s3520_s15 + $0xa0] sm:$0xf]  ;;  %v2485_v7 = vor.u32 %v2849_v0, %v2484_v63  ;;  %v2815_v8 = vld [vmem:[%s3520_s15 + $0xa4] sm:$0xf0]  ;;  %v2285_v13 = vor.u32 %v2799_v5, %v2284_v4  ;;  %v2276_v16 = vld [vmem:[%s3520_s15 + $0x10] sm:$0xf] }
  0xe0   : > { %1702 = vmatpush.bf16.msra.mxu0 %v2301_v53  ;;  %v2412_v9 = vld [vmem:[%s3520_s15 + $0x120] sm:$0xf]  ;;  %v2831_v10 = vld [vmem:[%s3520_s15 + $0x124] sm:$0xf0]  ;;  %v2349_v14 = vor.u32 %v2815_v8, %v2348_v6  ;;  %v2797_v17 = vld [vmem:[%s3520_s15 + $0x14] sm:$0xf0] }
  0xe1   : > { %1716 = vmatpush.bf16.msra.mxu1 %v2365_v54  ;;  %v2476_v11 = vld [vmem:[%s3520_s15 + $0x1a0] sm:$0xf]  ;;  %v2847_v12 = vld [vmem:[%s3520_s15 + $0x1a4] sm:$0xf0]  ;;  %v2413_v15 = vor.u32 %v2831_v10, %v2412_v9  ;;  %v2340_v18 = vld [vmem:[%s3520_s15 + $0x90] sm:$0xf]  ;;  %v2277_v25 = vor.u32 %v2797_v17, %v2276_v16 }
  0xe2   : > { %1730 = vmatpush.bf16.msra.mxu2 %v2429_v55  ;;  %v2477_v19 = vor.u32 %v2847_v12, %v2476_v11  ;;  %v2813_v20 = vld [vmem:[%s3520_s15 + $0x94] sm:$0xf0]  ;;  %v2404_v21 = vld [vmem:[%s3520_s15 + $0x110] sm:$0xf]  ;;  %v2268_v26 = vld [vmem:[%s3520_s15] sm:$0xf] }
  0xe3   : > { %1744 = vmatpush.bf16.msra.mxu3 %v2493_v59  ;;  %v2829_v22 = vld [vmem:[%s3520_s15 + $0x114] sm:$0xf0]  ;;  %v2468_v23 = vld [vmem:[%s3520_s15 + $0x190] sm:$0xf]  ;;  %v2795_v27 = vld [vmem:[%s3520_s15 + $0x4] sm:$0xf0]  ;;  %v2341_v28 = vor.u32 %v2813_v20, %v2340_v18 }
  0xe4   : > { %1703 = vmatpush.bf16.msra.mxu0 %v2293_v1  ;;  %v2845_v24 = vld [vmem:[%s3520_s15 + $0x194] sm:$0xf0]  ;;  %v2405_v29 = vor.u32 %v2829_v22, %v2404_v21  ;;  %v2332_v30 = vld [vmem:[%s3520_s15 + $0x80] sm:$0xf]  ;;  %v2811_v31 = vld [vmem:[%s3520_s15 + $0x84] sm:$0xf0]  ;;  %v2269_v40 = vor.u32 %v2795_v27, %v2268_v26 }
  0xe5   : > { %1717 = vmatpush.bf16.msra.mxu1 %v2357_v2  ;;  %v2396_v32 = vld [vmem:[%s3520_s15 + $0x100] sm:$0xf]  ;;  %v2469_v33 = vor.u32 %v2845_v24, %v2468_v23  ;;  %v2827_v34 = vld [vmem:[%s3520_s15 + $0x104] sm:$0xf0]  ;;  %v2580_v37 = vld [vmem:[%s3520_s15 + $0x270] sm:$0xf]  ;;  %v2333_v44 = vor.u32 %v2811_v31, %v2332_v30 }
  0xe6   : > { %1731 = vmatpush.bf16.msra.mxu2 %v2421_v3  ;;  %v2460_v35 = vld [vmem:[%s3520_s15 + $0x180] sm:$0xf]  ;;  %v2843_v36 = vld [vmem:[%s3520_s15 + $0x184] sm:$0xf0]  ;;  %v2873_v38 = vld [vmem:[%s3520_s15 + $0x274] sm:$0xf0]  ;;  %v2397_v45 = vor.u32 %v2827_v34, %v2396_v32 }
  0xe7   : > { %1745 = vmatpush.bf16.msra.mxu3 %v2485_v7  ;;  %v2644_v39 = vld [vmem:[%s3520_s15 + $0x2f0] sm:$0xf]  ;;  %v2889_v41 = vld [vmem:[%s3520_s15 + $0x2f4] sm:$0xf0]  ;;  %v2461_v48 = vor.u32 %v2843_v36, %v2460_v35  ;;  %v2581_v49 = vor.u32 %v2873_v38, %v2580_v37  ;;  %v2572_v50 = vld [vmem:[%s3520_s15 + $0x260] sm:$0xf] }
  0xe8   : > { %1704 = vmatpush.bf16.msra.mxu0 %v2285_v13  ;;  %v2708_v42 = vld [vmem:[%s3520_s15 + $0x370] sm:$0xf]  ;;  %v2905_v43 = vld [vmem:[%s3520_s15 + $0x374] sm:$0xf0]  ;;  %v2871_v51 = vld [vmem:[%s3520_s15 + $0x264] sm:$0xf0]  ;;  %v2645_v52 = vor.u32 %v2889_v41, %v2644_v39 }
  0xe9   : > { %1718 = vmatpush.bf16.msra.mxu1 %v2349_v14  ;;  %v2772_v46 = vld [vmem:[%s3520_s15 + $0x3f0] sm:$0xf]  ;;  %v2921_v47 = vld [vmem:[%s3520_s15 + $0x3f4] sm:$0xf0]  ;;  %v2709_v53 = vor.u32 %v2905_v43, %v2708_v42  ;;  %v2636_v54 = vld [vmem:[%s3520_s15 + $0x2e0] sm:$0xf]  ;;  %v2573_v0 = vor.u32 %v2871_v51, %v2572_v50 }
  0xea   : > { %1732 = vmatpush.bf16.msra.mxu2 %v2413_v15  ;;  %v2887_v55 = vld [vmem:[%s3520_s15 + $0x2e4] sm:$0xf0]  ;;  %v2700_v56 = vld [vmem:[%s3520_s15 + $0x360] sm:$0xf]  ;;  %v2773_v57 = vor.u32 %v2921_v47, %v2772_v46  ;;  %v2564_v1 = vld [vmem:[%s3520_s15 + $0x250] sm:$0xf] }
  0xeb   : > { %1746 = vmatpush.bf16.msra.mxu3 %v2477_v19  ;;  %v2903_v58 = vld [vmem:[%s3520_s15 + $0x364] sm:$0xf0]  ;;  %v2764_v59 = vld [vmem:[%s3520_s15 + $0x3e0] sm:$0xf]  ;;  %v2869_v2 = vld [vmem:[%s3520_s15 + $0x254] sm:$0xf0]  ;;  %v2637_v5 = vor.u32 %v2887_v55, %v2636_v54 }
  0xec   : > { %1705 = vmatpush.bf16.msra.mxu0 %v2277_v25  ;;  %v2919_v60 = vld [vmem:[%s3520_s15 + $0x3e4] sm:$0xf0]  ;;  %v2236_v61 = vld [vmem:[%s3518_s17] sm:$0xf]  ;;  %v2701_v6 = vor.u32 %v2903_v58, %v2700_v56  ;;  %v2628_v7 = vld [vmem:[%s3520_s15 + $0x2d0] sm:$0xf]  ;;  %v2565_v18 = vor.u32 %v2869_v2, %v2564_v1 }
  0xed   : > { %1719 = vmatpush.bf16.msra.mxu1 %v2341_v28  ;;  %v2790_v62 = vld [vmem:[%s3518_s17 + $0x1c] sm:$0xf0]  ;;  %v2244_v63 = vld [vmem:[%s3518_s17 + $0x8] sm:$0xf]  ;;  %v2885_v8 = vld [vmem:[%s3520_s15 + $0x2d4] sm:$0xf0]  ;;  %v2765_v11 = vor.u32 %v2919_v60, %v2764_v59 }
  0xee   : > { %1733 = vmatpush.bf16.msra.mxu2 %v2405_v29  ;;  %v3610_v3 = vor.u32 %v2790_v62, %v2236_v61  ;;  %v2791_v4 = vld [vmem:[%s3518_s17 + $0x24] sm:$0xf0]  ;;  %v2692_v9 = vld [vmem:[%s3520_s15 + $0x350] sm:$0xf]  ;;  %v2901_v12 = vld [vmem:[%s3520_s15 + $0x354] sm:$0xf0]  ;;  %v2629_v21 = vor.u32 %v2885_v8, %v2628_v7 }
  0xef   : > { %1747 = vmatpush.bf16.msra.mxu3 %v2469_v33  ;;  %v3616_v10 = vor.u32 %v2791_v4, %v2244_v63  ;;  %v2756_v13 = vld [vmem:[%s3520_s15 + $0x3d0] sm:$0xf]  ;;  %v2917_v14 = vld [vmem:[%s3520_s15 + $0x3d4] sm:$0xf0]  ;;  %v2786_v15 = vld [vmem:[%s3518_s17 + $0x4] sm:$0xf]  ;;  %v2693_v22 = vor.u32 %v2901_v12, %v2692_v9 }
  0xf0   : > { %1706 = vmatpush.bf16.msra.mxu0 %v2269_v40  ;;  %v2238_v16 = vld [vmem:[%s3518_s17 + $0x20] sm:$0xf0]  ;;  %v2787_v17 = vld [vmem:[%s3518_s17 + $0xc] sm:$0xf]  ;;  %v2556_v23 = vld [vmem:[%s3520_s15 + $0x240] sm:$0xf]  ;;  %v2757_v27 = vor.u32 %v2917_v14, %v2756_v13 }
  0xf1   : > { %1720 = vmatpush.bf16.msra.mxu1 %v2333_v44  ;;  %v3626_v19 = vor.u32 %v2786_v15, %v2238_v16  ;;  %v2246_v20 = vld [vmem:[%s3518_s17 + $0x28] sm:$0xf0]  ;;  %v2867_v24 = vld [vmem:[%s3520_s15 + $0x244] sm:$0xf0]  ;;  %v2620_v25 = vld [vmem:[%s3520_s15 + $0x2c0] sm:$0xf] }
  0xf2   : > { %1734 = vmatpush.bf16.msra.mxu2 %v2397_v45  ;;  %v3632_v26 = vor.u32 %v2787_v17, %v2246_v20  ;;  %v2883_v28 = vld [vmem:[%s3520_s15 + $0x2c4] sm:$0xf0]  ;;  %v2684_v29 = vld [vmem:[%s3520_s15 + $0x340] sm:$0xf]  ;;  %v2557_v33 = vor.u32 %v2867_v24, %v2556_v23  ;;  %v2548_v36 = vld [vmem:[%s3520_s15 + $0x230] sm:$0xf] }
  0xf3   : > { %1748 = vmatpush.bf16.msra.mxu3 %v2461_v48  ;;  %1707 = vmatmul.bf16.vlgmr.msra.gmra.mxu0 %v3610_v3  ;;  %v2899_v30 = vld [vmem:[%s3520_s15 + $0x344] sm:$0xf0]  ;;  %v2748_v31 = vld [vmem:[%s3520_s15 + $0x3c0] sm:$0xf]  ;;  %v2621_v34 = vor.u32 %v2883_v28, %v2620_v25  ;;  %v2865_v37 = vld [vmem:[%s3520_s15 + $0x234] sm:$0xf0] }
  0xf4   : > { %1755 = vmatpush.bf16.msrb.mxu0 %v2581_v49  ;;  %1721 = vmatmul.bf16.vlgmr.msra.gmra.mxu1 %v3626_v19  ;;  %v2915_v32 = vld [vmem:[%s3520_s15 + $0x3c4] sm:$0xf0]  ;;  %v2685_v35 = vor.u32 %v2899_v30, %v2684_v29  ;;  %v2612_v38 = vld [vmem:[%s3520_s15 + $0x2b0] sm:$0xf]  ;;  %v2881_v40 = vld [vmem:[%s3520_s15 + $0x2b4] sm:$0xf0]  ;;  %v2549_v45 = vor.u32 %v2865_v37, %v2548_v36 }
  0xf5   : > { %1769 = vmatpush.bf16.msrb.mxu1 %v2645_v52  ;;  %1735 = vmatmul.bf16.vlgmr.msra.gmra.mxu2 %v3616_v10  ;;  %v2749_v39 = vor.u32 %v2915_v32, %v2748_v31  ;;  %v2676_v41 = vld [vmem:[%s3520_s15 + $0x330] sm:$0xf]  ;;  %v2897_v42 = vld [vmem:[%s3520_s15 + $0x334] sm:$0xf0]  ;;  %v2613_v46 = vor.u32 %v2881_v40, %v2612_v38  ;;  %v2540_v48 = vld [vmem:[%s3520_s15 + $0x220] sm:$0xf] }
  0xf6   : > { %1783 = vmatpush.bf16.msrb.mxu2 %v2709_v53  ;;  %1749 = vmatmul.bf16.vlgmr.msra.gmra.mxu3 %v3632_v26  ;;  %v2740_v43 = vld [vmem:[%s3520_s15 + $0x3b0] sm:$0xf]  ;;  %v2913_v44 = vld [vmem:[%s3520_s15 + $0x3b4] sm:$0xf0]  ;;  %v2677_v47 = vor.u32 %v2897_v42, %v2676_v41  ;;  %v2863_v49 = vld [vmem:[%s3520_s15 + $0x224] sm:$0xf0] }
  0xf7   : > { %1797 = vmatpush.bf16.msrb.mxu3 %v2773_v57  ;;  %v2604_v50 = vld [vmem:[%s3520_s15 + $0x2a0] sm:$0xf]  ;;  %v2741_v51 = vor.u32 %v2913_v44, %v2740_v43  ;;  %v2879_v52 = vld [vmem:[%s3520_s15 + $0x2a4] sm:$0xf0]  ;;  %v2541_v57 = vor.u32 %v2863_v49, %v2540_v48  ;;  %v2532_v58 = vld [vmem:[%s3520_s15 + $0x210] sm:$0xf] }
  0xf8   : > { %1756 = vmatpush.bf16.msrb.mxu0 %v2573_v0  ;;  %v2668_v53 = vld [vmem:[%s3520_s15 + $0x320] sm:$0xf]  ;;  %v2895_v54 = vld [vmem:[%s3520_s15 + $0x324] sm:$0xf0]  ;;  %v2605_v59 = vor.u32 %v2879_v52, %v2604_v50  ;;  %v2861_v61 = vld [vmem:[%s3520_s15 + $0x214] sm:$0xf0] }
  0xf9   : > { %1770 = vmatpush.bf16.msrb.mxu1 %v2637_v5  ;;  %v2732_v55 = vld [vmem:[%s3520_s15 + $0x3a0] sm:$0xf]  ;;  %v2911_v56 = vld [vmem:[%s3520_s15 + $0x3a4] sm:$0xf0]  ;;  %v2669_v60 = vor.u32 %v2895_v54, %v2668_v53  ;;  %v2596_v62 = vld [vmem:[%s3520_s15 + $0x290] sm:$0xf]  ;;  %v2533_v8 = vor.u32 %v2861_v61, %v2532_v58 }
  0xfa   : > { %1784 = vmatpush.bf16.msrb.mxu2 %v2701_v6  ;;  %v2877_v63 = vld [vmem:[%s3520_s15 + $0x294] sm:$0xf0]  ;;  %v2733_v0 = vor.u32 %v2911_v56, %v2732_v55  ;;  %v2660_v1 = vld [vmem:[%s3520_s15 + $0x310] sm:$0xf]  ;;  %v2524_v6 = vld [vmem:[%s3520_s15 + $0x200] sm:$0xf] }
  0xfb   : > { %1798 = vmatpush.bf16.msrb.mxu3 %v2765_v11  ;;  %v2893_v2 = vld [vmem:[%s3520_s15 + $0x314] sm:$0xf0]  ;;  %v2724_v4 = vld [vmem:[%s3520_s15 + $0x390] sm:$0xf]  ;;  %v2859_v7 = vld [vmem:[%s3520_s15 + $0x204] sm:$0xf0]  ;;  %v2597_v14 = vor.u32 %v2877_v63, %v2596_v62 }
  0xfc   : > { %1757 = vmatpush.bf16.msrb.mxu0 %v2565_v18  ;;  %v2909_v5 = vld [vmem:[%s3520_s15 + $0x394] sm:$0xf0]  ;;  %v2588_v9 = vld [vmem:[%s3520_s15 + $0x280] sm:$0xf]  ;;  %v2875_v11 = vld [vmem:[%s3520_s15 + $0x284] sm:$0xf0]  ;;  %v2661_v15 = vor.u32 %v2893_v2, %v2660_v1  ;;  %v2525_v28 = vor.u32 %v2859_v7, %v2524_v6 }
  0xfd   : > { %1771 = vmatpush.bf16.msrb.mxu1 %v2629_v21  ;;  %v2652_v12 = vld [vmem:[%s3520_s15 + $0x300] sm:$0xf]  ;;  %v2891_v13 = vld [vmem:[%s3520_s15 + $0x304] sm:$0xf0]  ;;  %v2808_v18 = vld [vmem:[%s3520_s15 + $0x74] sm:$0xf]  ;;  %v2725_v20 = vor.u32 %v2909_v5, %v2724_v4  ;;  %v2589_v32 = vor.u32 %v2875_v11, %v2588_v9 }
  0xfe   : > { %1785 = vmatpush.bf16.msrb.mxu2 %v2693_v22  ;;  %v2716_v16 = vld [vmem:[%s3520_s15 + $0x380] sm:$0xf]  ;;  %v2907_v17 = vld [vmem:[%s3520_s15 + $0x384] sm:$0xf0]  ;;  %v2326_v21 = vld [vmem:[%s3520_s15 + $0x78] sm:$0xf0] }
  0xff   : > { %1799 = vmatpush.bf16.msrb.mxu3 %v2757_v27  ;;  %v2824_v22 = vld [vmem:[%s3520_s15 + $0xf4] sm:$0xf]  ;;  %v2390_v23 = vld [vmem:[%s3520_s15 + $0xf8] sm:$0xf0]  ;;  %v2252_v30 = vld [vmem:[%s3518_s17 + $0x10] sm:$0xf]  ;;  %v2717_v37 = vor.u32 %v2907_v17, %v2716_v16  ;;  %v2329_v38 = vor.u32 %v2808_v18, %v2326_v21 }
 0x100   : > { %1758 = vmatpush.bf16.msrb.mxu0 %v2557_v33  ;;  %v2840_v24 = vld [vmem:[%s3520_s15 + $0x174] sm:$0xf]  ;;  %v2454_v25 = vld [vmem:[%s3520_s15 + $0x178] sm:$0xf0]  ;;  %v2792_v31 = vld [vmem:[%s3518_s17 + $0x2c] sm:$0xf0]  ;;  %v2653_v33 = vor.u32 %v2891_v13, %v2652_v12  ;;  %v2393_v42 = vor.u32 %v2824_v22, %v2390_v23 }
 0x101   : > { %1772 = vmatpush.bf16.msrb.mxu1 %v2621_v34  ;;  %v2856_v27 = vld [vmem:[%s3520_s15 + $0x1f4] sm:$0xf]  ;;  %v2518_v29 = vld [vmem:[%s3520_s15 + $0x1f8] sm:$0xf0]  ;;  %v2260_v34 = vld [vmem:[%s3518_s17 + $0x18] sm:$0xf]  ;;  %v2457_v43 = vor.u32 %v2840_v24, %v2454_v25  ;;  %v3692_v48 = vor.u32 %v2792_v31, %v2252_v30 }
 0x102   : > { %1786 = vmatpush.bf16.msrb.mxu2 %v2685_v35  ;;  %v2793_v35 = vld [vmem:[%s3518_s17 + $0x34] sm:$0xf0]  ;;  %v2788_v36 = vld [vmem:[%s3518_s17 + $0x14] sm:$0xf]  ;;  %v2789_v40 = vld [vmem:[%s3518_s17 + $0x1c] sm:$0xf] }
 0x103   : > { %1800 = vmatpush.bf16.msrb.mxu3 %v2749_v39  ;;  %v2254_v39 = vld [vmem:[%s3518_s17 + $0x30] sm:$0xf0]  ;;  %v2262_v41 = vld [vmem:[%s3518_s17 + $0x38] sm:$0xf0]  ;;  %v2806_v44 = vld [vmem:[%s3520_s15 + $0x64] sm:$0xf]  ;;  %v3697_v52 = vor.u32 %v2793_v35, %v2260_v34 }
 0x104   : > { %1759 = vmatpush.bf16.msrb.mxu0 %v2549_v45  ;;  %v2318_v45 = vld [vmem:[%s3520_s15 + $0x68] sm:$0xf0]  ;;  %v2838_v50 = vld [vmem:[%s3520_s15 + $0x164] sm:$0xf]  ;;  %v3699_v53 = vor.u32 %v2788_v36, %v2254_v39  ;;  %v3703_v56 = vor.u32 %v2789_v40, %v2262_v41  ;;  %v2310_v61 = vld [vmem:[%s3520_s15 + $0x58] sm:$0xf0] }
 0x105   : > { %1773 = vmatpush.bf16.msrb.mxu1 %v2613_v46  ;;  %v2822_v46 = vld [vmem:[%s3520_s15 + $0xe4] sm:$0xf]  ;;  %v2382_v49 = vld [vmem:[%s3520_s15 + $0xe8] sm:$0xf0]  ;;  %v2820_v62 = vld [vmem:[%s3520_s15 + $0xd4] sm:$0xf] }
 0x106   : > { %1787 = vmatpush.bf16.msrb.mxu2 %v2677_v47  ;;  %v2521_v47 = vor.u32 %v2856_v27, %v2518_v29  ;;  %v2854_v54 = vld [vmem:[%s3520_s15 + $0x1e4] sm:$0xf]  ;;  %v2510_v55 = vld [vmem:[%s3520_s15 + $0x1e8] sm:$0xf0]  ;;  %v2385_v58 = vor.u32 %v2822_v46, %v2382_v49  ;;  %v2836_v1 = vld [vmem:[%s3520_s15 + $0x154] sm:$0xf] }
 0x107   : > { %1801 = vmatpush.bf16.msrb.mxu3 %v2741_v51  ;;  %v2446_v51 = vld [vmem:[%s3520_s15 + $0x168] sm:$0xf0]  ;;  %v2513_v63 = vor.u32 %v2854_v54, %v2510_v55  ;;  %v2438_v2 = vld [vmem:[%s3520_s15 + $0x158] sm:$0xf0]  ;;  %v2852_v4 = vld [vmem:[%s3520_s15 + $0x1d4] sm:$0xf] }
 0x108   : > { %1760 = vmatpush.bf16.msrb.mxu0 %v2541_v57  ;;  %v2321_v57 = vor.u32 %v2806_v44, %v2318_v45  ;;  %v2502_v5 = vld [vmem:[%s3520_s15 + $0x1d8] sm:$0xf0]  ;;  %v2802_v9 = vld [vmem:[%s3520_s15 + $0x44] sm:$0xf]  ;;  %v2302_v11 = vld [vmem:[%s3520_s15 + $0x48] sm:$0xf0] }
 0x109   : > { %1774 = vmatpush.bf16.msrb.mxu1 %v2605_v59  ;;  %v2449_v59 = vor.u32 %v2838_v50, %v2446_v51  ;;  %v2818_v12 = vld [vmem:[%s3520_s15 + $0xc4] sm:$0xf]  ;;  %v2505_v13 = vor.u32 %v2852_v4, %v2502_v5  ;;  %v2430_v16 = vld [vmem:[%s3520_s15 + $0x148] sm:$0xf0]  ;;  %v2800_v23 = vld [vmem:[%s3520_s15 + $0x34] sm:$0xf] }
 0x10a   : > { %1788 = vmatpush.bf16.msrb.mxu2 %v2669_v60  ;;  %v2804_v60 = vld [vmem:[%s3520_s15 + $0x54] sm:$0xf]  ;;  %v2850_v17 = vld [vmem:[%s3520_s15 + $0x1c4] sm:$0xf]  ;;  %v2494_v18 = vld [vmem:[%s3520_s15 + $0x1c8] sm:$0xf0] }
 0x10b   : > { %1802 = vmatpush.bf16.msrb.mxu3 %v2733_v0  ;;  %v2374_v0 = vld [vmem:[%s3520_s15 + $0xd8] sm:$0xf0]  ;;  %v2313_v6 = vor.u32 %v2804_v60, %v2310_v61  ;;  %v2816_v25 = vld [vmem:[%s3520_s15 + $0xb4] sm:$0xf]  ;;  %v2497_v27 = vor.u32 %v2850_v17, %v2494_v18  ;;  %v2798_v36 = vld [vmem:[%s3520_s15 + $0x24] sm:$0xf] }
 0x10c   : > { %1761 = vmatpush.bf16.msrb.mxu0 %v2533_v8  ;;  %v2377_v7 = vor.u32 %v2820_v62, %v2374_v0  ;;  %v2441_v8 = vor.u32 %v2836_v1, %v2438_v2  ;;  %v2294_v24 = vld [vmem:[%s3520_s15 + $0x38] sm:$0xf0]  ;;  %v2832_v29 = vld [vmem:[%s3520_s15 + $0x134] sm:$0xf]  ;;  %v2350_v40 = vld [vmem:[%s3520_s15 + $0xa8] sm:$0xf0] }
 0x10d   : > { %1775 = vmatpush.bf16.msrb.mxu1 %v2597_v14  ;;  %v2366_v14 = vld [vmem:[%s3520_s15 + $0xc8] sm:$0xf0]  ;;  %v2422_v30 = vld [vmem:[%s3520_s15 + $0x138] sm:$0xf0]  ;;  %v2848_v31 = vld [vmem:[%s3520_s15 + $0x1b4] sm:$0xf] }
 0x10e   : > { %1789 = vmatpush.bf16.msrb.mxu2 %v2661_v15  ;;  %v2834_v15 = vld [vmem:[%s3520_s15 + $0x144] sm:$0xf]  ;;  %v2369_v21 = vor.u32 %v2818_v12, %v2366_v14  ;;  %v2425_v35 = vor.u32 %v2832_v29, %v2422_v30  ;;  %v2478_v44 = vld [vmem:[%s3520_s15 + $0x1a8] sm:$0xf0]  ;;  %v2796_v49 = vld [vmem:[%s3520_s15 + $0x14] sm:$0xf] }
 0x10f   : > { %1803 = vmatpush.bf16.msrb.mxu3 %v2725_v20  ;;  %v2305_v20 = vor.u32 %v2802_v9, %v2302_v11  ;;  %v2433_v22 = vor.u32 %v2834_v15, %v2430_v16  ;;  %v2830_v41 = vld [vmem:[%s3520_s15 + $0x124] sm:$0xf]  ;;  %v2278_v50 = vld [vmem:[%s3520_s15 + $0x18] sm:$0xf0]  ;;  %v2812_v51 = vld [vmem:[%s3520_s15 + $0x94] sm:$0xf] }
 0x110   : > { %1762 = vmatpush.bf16.msrb.mxu0 %v2525_v28  ;;  %v2358_v28 = vld [vmem:[%s3520_s15 + $0xb8] sm:$0xf0]  ;;  %v2281_v61 = vor.u32 %v2796_v49, %v2278_v50  ;;  %v2794_v62 = vld [vmem:[%s3520_s15 + $0x4] sm:$0xf]  ;;  %v2334_v4 = vld [vmem:[%s3520_s15 + $0x88] sm:$0xf0] }
 0x111   : > { %1776 = vmatpush.bf16.msrb.mxu1 %v2589_v32  ;;  %v2486_v32 = vld [vmem:[%s3520_s15 + $0x1b8] sm:$0xf0]  ;;  %v2361_v34 = vor.u32 %v2816_v25, %v2358_v28  ;;  %v2810_v2 = vld [vmem:[%s3520_s15 + $0x84] sm:$0xf]  ;;  %v2462_v9 = vld [vmem:[%s3520_s15 + $0x188] sm:$0xf0] }
 0x112   : > { %1790 = vmatpush.bf16.msrb.mxu2 %v2653_v33  ;;  %v2297_v33 = vor.u32 %v2800_v23, %v2294_v24  ;;  %v2489_v39 = vor.u32 %v2848_v31, %v2486_v32  ;;  %v2342_v55 = vld [vmem:[%s3520_s15 + $0x98] sm:$0xf0]  ;;  %v2826_v5 = vld [vmem:[%s3520_s15 + $0x104] sm:$0xf]  ;;  %v2872_v11 = vld [vmem:[%s3520_s15 + $0x274] sm:$0xf]  ;;  %v2337_v18 = vor.u32 %v2810_v2, %v2334_v4 }
 0x113   : > { %1804 = vmatpush.bf16.msrb.mxu3 %v2717_v37  ;;  %1763 = vmatmul.bf16.vlgmr.msrb.gmra.mxu0 %v3692_v48  ;;  %v2286_v37 = vld [vmem:[%s3520_s15 + $0x28] sm:$0xf0]  ;;  %v2470_v60 = vld [vmem:[%s3520_s15 + $0x198] sm:$0xf0]  ;;  %v2345_v0 = vor.u32 %v2812_v51, %v2342_v55  ;;  %v2904_v16 = vld [vmem:[%s3520_s15 + $0x374] sm:$0xf] }
 0x114   : > { %1811 = vmatpush.bf16.msra.mxu0 %v2329_v38  ;;  %1777 = vmatmul.bf16.vlgmr.msrb.gmra.mxu1 %v3699_v53  ;;  %v2814_v38 = vld [vmem:[%s3520_s15 + $0xa4] sm:$0xf]  ;;  %v2289_v45 = vor.u32 %v2798_v36, %v2286_v37  ;;  %v2582_v12 = vld [vmem:[%s3520_s15 + $0x278] sm:$0xf0]  ;;  %v2574_v29 = vld [vmem:[%s3520_s15 + $0x268] sm:$0xf0] }
 0x115   : > { %1825 = vmatpush.bf16.msra.mxu1 %v2393_v42  ;;  %1791 = vmatmul.bf16.vlgmr.msrb.gmra.mxu2 %v3697_v52  ;;  %v2414_v42 = vld [vmem:[%s3520_s15 + $0x128] sm:$0xf0]  ;;  %v2353_v46 = vor.u32 %v2814_v38, %v2350_v40  ;;  %v2646_v15 = vld [vmem:[%s3520_s15 + $0x2f8] sm:$0xf0]  ;;  %v2585_v24 = vor.u32 %v2872_v11, %v2582_v12  ;;  %v2870_v28 = vld [vmem:[%s3520_s15 + $0x264] sm:$0xf] }
 0x116   : > { %1839 = vmatpush.bf16.msra.mxu2 %v2457_v43  ;;  %1805 = vmatmul.bf16.vlgmr.msrb.gmra.mxu3 %v3703_v56  ;;  %v2846_v43 = vld [vmem:[%s3520_s15 + $0x1a4] sm:$0xf]  ;;  %v2710_v17 = vld [vmem:[%s3520_s15 + $0x378] sm:$0xf0]  ;;  %v2638_v32 = vld [vmem:[%s3520_s15 + $0x2e8] sm:$0xf0]  ;;  %v2577_v37 = vor.u32 %v2870_v28, %v2574_v29 }
 0x117   : > { %1853 = vmatpush.bf16.msra.mxu3 %v2521_v47  ;;  %v2417_v47 = vor.u32 %v2830_v41, %v2414_v42  ;;  %v2481_v54 = vor.u32 %v2846_v43, %v2478_v44  ;;  %v2886_v30 = vld [vmem:[%s3520_s15 + $0x2e4] sm:$0xf]  ;;  %v2766_v36 = vld [vmem:[%s3520_s15 + $0x3e8] sm:$0xf0]  ;;  %v2868_v40 = vld [vmem:[%s3520_s15 + $0x254] sm:$0xf] }
 0x118   : > { %1812 = vmatpush.bf16.msra.mxu0 %v2321_v57  ;;  %v2828_v57 = vld [vmem:[%s3520_s15 + $0x114] sm:$0xf]  ;;  %v2641_v38 = vor.u32 %v2886_v30, %v2638_v32  ;;  %v2566_v41 = vld [vmem:[%s3520_s15 + $0x258] sm:$0xf0]  ;;  %v2882_v55 = vld [vmem:[%s3520_s15 + $0x2c4] sm:$0xf] }
 0x119   : > { %1826 = vmatpush.bf16.msra.mxu1 %v2385_v58  ;;  %v2406_v58 = vld [vmem:[%s3520_s15 + $0x118] sm:$0xf0]  ;;  %v2884_v42 = vld [vmem:[%s3520_s15 + $0x2d4] sm:$0xf]  ;;  %v2569_v50 = vor.u32 %v2868_v40, %v2566_v41  ;;  %v2858_v40 = vld [vmem:[%s3520_s15 + $0x204] sm:$0xf] }
 0x11a   : > { %1840 = vmatpush.bf16.msra.mxu2 %v2449_v59  ;;  %v2844_v59 = vld [vmem:[%s3520_s15 + $0x194] sm:$0xf]  ;;  %v2409_v1 = vor.u32 %v2828_v57, %v2406_v58  ;;  %v2630_v44 = vld [vmem:[%s3520_s15 + $0x2d8] sm:$0xf0]  ;;  %v2622_v58 = vld [vmem:[%s3520_s15 + $0x2c8] sm:$0xf0] }
 0x11b   : > { %1854 = vmatpush.bf16.msra.mxu3 %v2513_v63  ;;  %v2270_v63 = vld [vmem:[%s3520_s15 + $0x8] sm:$0xf0]  ;;  %v2758_v49 = vld [vmem:[%s3520_s15 + $0x3d8] sm:$0xf0]  ;;  %v2880_v2 = vld [vmem:[%s3520_s15 + $0x2b4] sm:$0xf] }
 0x11c   : > { %1813 = vmatpush.bf16.msra.mxu0 %v2313_v6  ;;  %v2473_v6 = vor.u32 %v2844_v59, %v2470_v60  ;;  %v2273_v14 = vor.u32 %v2794_v62, %v2270_v63  ;;  %v2686_v59 = vld [vmem:[%s3520_s15 + $0x348] sm:$0xf0]  ;;  %v2914_v60 = vld [vmem:[%s3520_s15 + $0x3c4] sm:$0xf]  ;;  %v2625_v62 = vor.u32 %v2882_v55, %v2622_v58  ;;  %v2860_v28 = vld [vmem:[%s3520_s15 + $0x214] sm:$0xf] }
 0x11d   : > { %1827 = vmatpush.bf16.msra.mxu1 %v2377_v7  ;;  %v2398_v7 = vld [vmem:[%s3520_s15 + $0x108] sm:$0xf0]  ;;  %v2534_v29 = vld [vmem:[%s3520_s15 + $0x218] sm:$0xf0]  ;;  %v2876_v30 = vld [vmem:[%s3520_s15 + $0x294] sm:$0xf] }
 0x11e   : > { %1841 = vmatpush.bf16.msra.mxu2 %v2441_v8  ;;  %v2842_v8 = vld [vmem:[%s3520_s15 + $0x184] sm:$0xf]  ;;  %v2598_v32 = vld [vmem:[%s3520_s15 + $0x298] sm:$0xf0]  ;;  %v2526_v41 = vld [vmem:[%s3520_s15 + $0x208] sm:$0xf0] }
 0x11f   : > { %1855 = vmatpush.bf16.msra.mxu3 %v2505_v13  ;;  %v2888_v13 = vld [vmem:[%s3520_s15 + $0x2f4] sm:$0xf]  ;;  %v2465_v23 = vor.u32 %v2842_v8, %v2462_v9  ;;  %v2742_v9 = vld [vmem:[%s3520_s15 + $0x3b8] sm:$0xf0]  ;;  %p2778_p5 = scmp.ne.s32.totalorder %s3082_s21, 3 }
 0x120   : > { %1814 = vmatpush.bf16.msra.mxu0 %v2305_v20  ;;  %v2401_v20 = vor.u32 %v2826_v5, %v2398_v7  ;;  %v2649_v25 = vor.u32 %v2888_v13, %v2646_v15  ;;  %v2614_v5 = vld [vmem:[%s3520_s15 + $0x2b8] sm:$0xf0]  ;;  %v2912_v8 = vld [vmem:[%s3520_s15 + $0x3b4] sm:$0xf]  ;;  %v2542_v15 = vld [vmem:[%s3520_s15 + $0x228] sm:$0xf0] }
 0x121   : > { %1828 = vmatpush.bf16.msra.mxu1 %v2369_v21  ;;  %v2920_v21 = vld [vmem:[%s3520_s15 + $0x3f4] sm:$0xf]  ;;  %v2678_v7 = vld [vmem:[%s3520_s15 + $0x338] sm:$0xf0]  ;;  %v2617_v12 = vor.u32 %v2880_v2, %v2614_v5 }
 0x122   : > { %1842 = vmatpush.bf16.msra.mxu2 %v2433_v22  ;;  %v2774_v22 = vld [vmem:[%s3520_s15 + $0x3f8] sm:$0xf0] }
 0x123   : > { %1856 = vmatpush.bf16.msra.mxu3 %v2497_v27  ;;  %v2713_v27 = vor.u32 %v2904_v16, %v2710_v17  ;;  %v2777_v31 = vor.u32 %v2920_v21, %v2774_v22  ;;  %v2878_v16 = vld [vmem:[%s3520_s15 + $0x2a4] sm:$0xf]  ;;  %v2745_v17 = vor.u32 %v2912_v8, %v2742_v9  ;;  %v2670_v21 = vld [vmem:[%s3520_s15 + $0x328] sm:$0xf0]  ;;  %v879_v8 = vld [vmem:[#allocation2 + $0x10] sm:$0xff] }
 0x124   : > { %1815 = vmatpush.bf16.msra.mxu0 %v2297_v33  ;;  %v2902_v33 = vld [vmem:[%s3520_s15 + $0x364] sm:$0xf] }
 0x125   : > { %1829 = vmatpush.bf16.msra.mxu1 %v2361_v34  ;;  %v2702_v34 = vld [vmem:[%s3520_s15 + $0x368] sm:$0xf0]  ;;  %v2910_v22 = vld [vmem:[%s3520_s15 + $0x3a4] sm:$0xf] }
 0x126   : > { %1843 = vmatpush.bf16.msra.mxu2 %v2425_v35  ;;  %v2918_v35 = vld [vmem:[%s3520_s15 + $0x3e4] sm:$0xf] }
 0x127   : > { %1857 = vmatpush.bf16.msra.mxu3 %v2489_v39  ;;  %v2705_v39 = vor.u32 %v2902_v33, %v2702_v34  ;;  %v2769_v43 = vor.u32 %v2918_v35, %v2766_v36  ;;  %v2892_v33 = vld [vmem:[%s3520_s15 + $0x314] sm:$0xf]  ;;  %v2662_v34 = vld [vmem:[%s3520_s15 + $0x318] sm:$0xf0] }
 0x128   : > { %1816 = vmatpush.bf16.msra.mxu0 %v2289_v45  ;;  %v2900_v45 = vld [vmem:[%s3520_s15 + $0x354] sm:$0xf]  ;;  %v2726_v36 = vld [vmem:[%s3520_s15 + $0x398] sm:$0xf0] }
 0x129   : > { %1830 = vmatpush.bf16.msra.mxu1 %v2353_v46  ;;  %v2694_v46 = vld [vmem:[%s3520_s15 + $0x358] sm:$0xf0]  ;;  %v2908_v35 = vld [vmem:[%s3520_s15 + $0x394] sm:$0xf] }
 0x12a   : > { %1844 = vmatpush.bf16.msra.mxu2 %v2417_v47  ;;  %v2916_v47 = vld [vmem:[%s3520_s15 + $0x3d4] sm:$0xf]  ;;  %v2697_v51 = vor.u32 %v2900_v45, %v2694_v46  ;;  %v2890_v45 = vld [vmem:[%s3520_s15 + $0x304] sm:$0xf]  ;;  %v2654_v46 = vld [vmem:[%s3520_s15 + $0x308] sm:$0xf0] }
 0x12b   : > { %1858 = vmatpush.bf16.msra.mxu3 %v2481_v54  ;;  %v2866_v54 = vld [vmem:[%s3520_s15 + $0x244] sm:$0xf]  ;;  %v2761_v57 = vor.u32 %v2916_v47, %v2758_v49  ;;  %v2718_v49 = vld [vmem:[%s3520_s15 + $0x388] sm:$0xf0] }
 0x12c   : > { %1817 = vmatpush.bf16.msra.mxu0 %v2281_v61  ;;  %v2906_v47 = vld [vmem:[%s3520_s15 + $0x384] sm:$0xf] }
 0x12d   : > { %1831 = vmatpush.bf16.msra.mxu1 %v2345_v0  ;;  %v2864_v0 = vld [vmem:[%s3520_s15 + $0x234] sm:$0xf] }
 0x12e   : > { %1845 = vmatpush.bf16.msra.mxu2 %v2409_v1  ;;  %v2550_v1 = vld [vmem:[%s3520_s15 + $0x238] sm:$0xf0] }
 0x12f   : > { %1859 = vmatpush.bf16.msra.mxu3 %v2473_v6  ;;  %v2896_v6 = vld [vmem:[%s3520_s15 + $0x334] sm:$0xf]  ;;  %v2553_v11 = vor.u32 %v2864_v0, %v2550_v1 }
 0x130   : > { %1818 = vmatpush.bf16.msra.mxu0 %v2273_v14  ;;  %v2681_v13 = vor.u32 %v2896_v6, %v2678_v7  ;;  %v2862_v14 = vld [vmem:[%s3520_s15 + $0x224] sm:$0xf] }
 0x131   : > { %1832 = vmatpush.bf16.msra.mxu1 %v2337_v18  ;;  %v2606_v18 = vld [vmem:[%s3520_s15 + $0x2a8] sm:$0xf0] }
 0x132   : > { %1846 = vmatpush.bf16.msra.mxu2 %v2401_v20  ;;  %v2894_v20 = vld [vmem:[%s3520_s15 + $0x324] sm:$0xf] }
 0x133   : > { %1860 = vmatpush.bf16.msra.mxu3 %v2465_v23  ;;  %1819 = vmatmul.bf16.vlgmr.msra.gmra.mxu0 %v3610_v3  ;;  %v2898_v3 = vld [vmem:[%s3520_s15 + $0x344] sm:$0xf]  ;;  %v2734_v23 = vld [vmem:[%s3520_s15 + $0x3a8] sm:$0xf0] }
 0x134   : > { %1867 = vmatpush.bf16.msrb.mxu0 %v2585_v24  ;;  %1833 = vmatmul.bf16.vlgmr.msra.gmra.mxu1 %v3626_v19  ;;  %v2750_v19 = vld [vmem:[%s3520_s15 + $0x3c8] sm:$0xf0]  ;;  %v2689_v63 = vor.u32 %v2898_v3, %v2686_v59  ;;  %v2545_v24 = vor.u32 %v2862_v14, %v2542_v15 }
 0x135   : > { %1881 = vmatpush.bf16.msrb.mxu1 %v2649_v25  ;;  %1847 = vmatmul.bf16.vlgmr.msra.gmra.mxu2 %v3616_v10  ;;  %v2633_v10 = vor.u32 %v2884_v42, %v2630_v44  ;;  %v2753_v4 = vor.u32 %v2914_v60, %v2750_v19  ;;  %v2609_v25 = vor.u32 %v2878_v16, %v2606_v18  ;;  %v2874_v42 = vld [vmem:[%s3520_s15 + $0x284] sm:$0xf]  ;;  %v2590_v44 = vld [vmem:[%s3520_s15 + $0x288] sm:$0xf0]  ;;  %v881_v18 = vld [vmem:[#allocation2 + $0x18] sm:$0xff] }
 0x136   : > { %1895 = vmatpush.bf16.msrb.mxu2 %v2713_v27  ;;  %1861 = vmatmul.bf16.vlgmr.msra.gmra.mxu3 %v3632_v26  ;;  %v2558_v26 = vld [vmem:[%s3520_s15 + $0x248] sm:$0xf0]  ;;  %v2673_v27 = vor.u32 %v2894_v20, %v2670_v21 }
 0x137   : > { %1909 = vmatpush.bf16.msrb.mxu3 %v2777_v31  ;;  %v2561_v61 = vor.u32 %v2866_v54, %v2558_v26  ;;  %v2737_v31 = vor.u32 %v2910_v22, %v2734_v23  ;;  %v2721_v54 = vor.u32 %v2906_v47, %v2718_v49 }
 0x138   : > { %1868 = vmatpush.bf16.msrb.mxu0 %v2577_v37  ;;  %v2537_v37 = vor.u32 %v2860_v28, %v2534_v29 }
 0x139   : > { %1882 = vmatpush.bf16.msrb.mxu1 %v2641_v38  ;;  %v2601_v38 = vor.u32 %v2876_v30, %v2598_v32 }
 0x13a   : > { %1896 = vmatpush.bf16.msrb.mxu2 %v2705_v39  ;;  %v2665_v39 = vor.u32 %v2892_v33, %v2662_v34 }
 0x13b   : > { %1910 = vmatpush.bf16.msrb.mxu3 %v2769_v43  ;;  %v2729_v43 = vor.u32 %v2908_v35, %v2726_v36 }
 0x13c   : > { %1869 = vmatpush.bf16.msrb.mxu0 %v2569_v50  ;;  %v2529_v50 = vor.u32 %v2858_v40, %v2526_v41 }
 0x13d   : > { %1883 = vmatpush.bf16.msrb.mxu1 %v2633_v10  ;;  %v2593_v10 = vor.u32 %v2874_v42, %v2590_v44 }
 0x13e   : > { %1897 = vmatpush.bf16.msrb.mxu2 %v2697_v51  ;;  %v2657_v51 = vor.u32 %v2890_v45, %v2654_v46  ;;  %v880_v45 = vld [vmem:[#allocation2] sm:$0xff] }
 0x13f   : > { %1911 = vmatpush.bf16.msrb.mxu3 %v2761_v57 }
 0x140   : > { %1870 = vmatpush.bf16.msrb.mxu0 %v2561_v61 }
 0x141   : > { %1884 = vmatpush.bf16.msrb.mxu1 %v2625_v62 }
 0x142   : > { %1898 = vmatpush.bf16.msrb.mxu2 %v2689_v63 }
 0x143   : > { %1912 = vmatpush.bf16.msrb.mxu3 %v2753_v4 }
 0x144   : > { %1871 = vmatpush.bf16.msrb.mxu0 %v2553_v11 }
 0x145   : > { %1885 = vmatpush.bf16.msrb.mxu1 %v2617_v12 }
 0x146   : > { %1899 = vmatpush.bf16.msrb.mxu2 %v2681_v13 }
 0x147   : > { %1913 = vmatpush.bf16.msrb.mxu3 %v2745_v17 }
 0x148   : > { %1872 = vmatpush.bf16.msrb.mxu0 %v2545_v24 }
 0x149   : > { %1886 = vmatpush.bf16.msrb.mxu1 %v2609_v25 }
 0x14a   : > { %1900 = vmatpush.bf16.msrb.mxu2 %v2673_v27 }
 0x14b   : > { %1914 = vmatpush.bf16.msrb.mxu3 %v2737_v31 }
 0x14c   : > { %1873 = vmatpush.bf16.msrb.mxu0 %v2537_v37 }
 0x14d   : > { %1887 = vmatpush.bf16.msrb.mxu1 %v2601_v38 }
 0x14e   : > { %1901 = vmatpush.bf16.msrb.mxu2 %v2665_v39 }
 0x14f   : > { %1915 = vmatpush.bf16.msrb.mxu3 %v2729_v43 }
 0x150   : > { %1874 = vmatpush.bf16.msrb.mxu0 %v2529_v50 }
 0x151   : > { %1888 = vmatpush.bf16.msrb.mxu1 %v2593_v10 }
 0x152   : > { %1902 = vmatpush.bf16.msrb.mxu2 %v2657_v51 }
 0x153   : > { %1916 = vmatpush.bf16.msrb.mxu3 %v2721_v54  ;;  %1875 = vmatmul.bf16.vlgmr.msrb.gmra.mxu0 %v3692_v48 }
 0x154   : > { %1889 = vmatmul.bf16.vlgmr.msrb.gmra.mxu1 %v3699_v53 }
 0x155   : > { %1903 = vmatmul.bf16.vlgmr.msrb.gmra.mxu2 %v3697_v52 }
 0x156   : > { %1917 = vmatmul.bf16.vlgmr.msrb.gmra.mxu3 %v3703_v56 }
 0x170   : > { %v1708_v26 = vpop.f32.mrf.mxu0 }
 0x171   : > { %v1722_v55 = vpop.f32.mrf.mxu1 }
 0x172   : > { %v1723_v3 = vadd.f32 %v1722_v55, %v1708_v26  ;;  %v882_v26 = vld [vmem:[#allocation2 + $0x8] sm:$0xff] }
 0x178   : > { %v1736_v57 = vpop.f32.mrf.mxu2  ;;  %v1710_v59 = vpop.f32.mrf.mxu0 }
 0x179   : > { %v1750_v58 = vpop.f32.mrf.mxu3  ;;  %v1724_v60 = vpop.f32.mrf.mxu1  ;;  %v1737_v19 = vadd.f32 %v1736_v57, %v1723_v3 }
 0x17a   : > { %v1725_v0 = vadd.f32 %v1724_v60, %v1710_v59 }
 0x17b   : > { %v1751_v61 = vadd.f32 %v1750_v58, %v1737_v19 }
 0x180   : > { %v1738_v62 = vpop.f32.mrf.mxu2 }
 0x181   : > { %v1752_v63 = vpop.f32.mrf.mxu3  ;;  %v1739_v53 = vadd.f32 %v1738_v62, %v1725_v0 }
 0x183   : > { %v1753_v5 = vadd.f32 %v1752_v63, %v1739_v53 }
 0x190   : > { %v1764_v1 = vpop.f32.mrf.mxu0 }
 0x191   : > { %v1765_v48 = vadd.f32 %v1764_v1, %v1751_v61  ;;  %v1778_v2 = vpop.f32.mrf.mxu1 }
 0x193   : > { %v1779_v4 = vadd.f32 %v1778_v2, %v1765_v48 }
 0x198   : > { %v1792_v52 = vpop.f32.mrf.mxu2  ;;  %v1766_v6 = vpop.f32.mrf.mxu0 }
 0x199   : > { %v1793_v56 = vadd.f32 %v1792_v52, %v1779_v4  ;;  %v1806_v7 = vpop.f32.mrf.mxu3  ;;  %v1767_v9 = vadd.f32 %v1766_v6, %v1753_v5  ;;  %v1780_v12 = vpop.f32.mrf.mxu1 }
 0x19b   : > { %v1807_v11 = vadd.f32 %v1806_v7, %v1793_v56  ;;  %v1781_v14 = vadd.f32 %v1780_v12, %v1767_v9 }
 0x19d   : > { %v1923_v13 = vadd.f32 %v1807_v11, %v879_v8 }
 0x19f   : > { %1927 = vst [vmem:[#allocation2 + $0x10] sm:$0xff] %v1923_v13 }
 0x1a0   : > { %v1794_v15 = vpop.f32.mrf.mxu2 }
 0x1a1   : > { %v1795_v16 = vadd.f32 %v1794_v15, %v1781_v14  ;;  %v1808_v17 = vpop.f32.mrf.mxu3 }
 0x1a3   : > { %v1809_v20 = vadd.f32 %v1808_v17, %v1795_v16 }
 0x1a5   : > { %v1925_v21 = vadd.f32 %v1809_v20, %v881_v18 }
 0x1a7   : > { %1929 = vst [vmem:[#allocation2 + $0x18] sm:$0xff] %v1925_v21 }
 0x1b0   : > { %v1820_v22 = vpop.f32.mrf.mxu0 }
 0x1b1   : > { %v1834_v23 = vpop.f32.mrf.mxu1 }
 0x1b2   : > { %v1835_v27 = vadd.f32 %v1834_v23, %v1820_v22 }
 0x1b8   : > { %v1848_v24 = vpop.f32.mrf.mxu2  ;;  %v1822_v28 = vpop.f32.mrf.mxu0 }
 0x1b9   : > { %v1862_v25 = vpop.f32.mrf.mxu3  ;;  %v1836_v29 = vpop.f32.mrf.mxu1  ;;  %v1849_v30 = vadd.f32 %v1848_v24, %v1835_v27 }
 0x1ba   : > { %v1837_v33 = vadd.f32 %v1836_v29, %v1822_v28 }
 0x1bb   : > { %v1863_v32 = vadd.f32 %v1862_v25, %v1849_v30 }
 0x1c0   : > { %v1850_v31 = vpop.f32.mrf.mxu2 }
 0x1c1   : > { %v1864_v34 = vpop.f32.mrf.mxu3  ;;  %v1851_v38 = vadd.f32 %v1850_v31, %v1837_v33 }
 0x1c3   : > { %v1865_v41 = vadd.f32 %v1864_v34, %v1851_v38 }
 0x1d0   : > { %v1876_v35 = vpop.f32.mrf.mxu0 }
 0x1d1   : > { %v1877_v36 = vadd.f32 %v1876_v35, %v1863_v32  ;;  %v1890_v37 = vpop.f32.mrf.mxu1 }
 0x1d3   : > { %v1891_v39 = vadd.f32 %v1890_v37, %v1877_v36 }
 0x1d8   : > { %v1904_v40 = vpop.f32.mrf.mxu2  ;;  %v1878_v44 = vpop.f32.mrf.mxu0 }
 0x1d9   : > { %v1905_v42 = vadd.f32 %v1904_v40, %v1891_v39  ;;  %v1918_v43 = vpop.f32.mrf.mxu3  ;;  %v1879_v47 = vadd.f32 %v1878_v44, %v1865_v41  ;;  %v1892_v50 = vpop.f32.mrf.mxu1 }
 0x1db   : > { %v1919_v46 = vadd.f32 %v1918_v43, %v1905_v42  ;;  %v1893_v10 = vadd.f32 %v1892_v50, %v1879_v47 }
 0x1dd   : > { %v1924_v49 = vadd.f32 %v1919_v46, %v880_v45 }
 0x1df   : > { %1928 = vst [vmem:[#allocation2] sm:$0xff] %v1924_v49 }
 0x1e0   : > { %v1906_v51 = vpop.f32.mrf.mxu2 }
 0x1e1   : > { %v1907_v54 = vadd.f32 %v1906_v51, %v1893_v10  ;;  %v1920_v55 = vpop.f32.mrf.mxu3 }
 0x1e3   : > { %v1921_v57 = vadd.f32 %v1920_v55, %v1907_v54  ;;  %1934 = sbr.rel (%p2778_p5) target bundleno = 512 (0x200), region = 101 }
 0x1e5   : > { %v1926_v58 = vadd.f32 %v1921_v57, %v882_v26 }
 0x1e7   : > { %1930 = vst [vmem:[#allocation2 + $0x8] sm:$0xff] %v1926_v58 }
 0x1e8   : > { %v1935_v3 = vld [vmem:[#allocation2 + $0x10] sm:$0xff]  ;;  %v1939_v59 = vld [vmem:[%s856_s11] sm:$0x3]  ;;  %v1937_v62 = vld [vmem:[#allocation2 + $0x18] sm:$0xff]  ;;  %v1949_v56 = vlaneseq }
 0x1e9   : > { %v1936_v60 = vld [vmem:[#allocation2] sm:$0xff]  ;;  %v1941_v19 = vperm.slane %v1939_v59, 0  ;;  %v1942_v61 = vperm.slane %v1939_v59, 1 }
 0x1ea   : > { %v1950_v17 = vshrl.u32 %v1949_v56, 7 }
 0x1eb   : > { %v1945_v0 = vadd.f32 %v1941_v19, %v1935_v3  ;;  %v1946_v1 = vadd.f32 %v1942_v61, %v1936_v60  ;;  %v1947_v48 = vadd.f32 %v1941_v19, %v1937_v62 }
 0x1ec   : > { %vm1993_vm0 = vcmp.eq.s32.totalorder %v1950_v17, 0  ;;  %vm1996_vm1 = vcmp.eq.s32.totalorder %v1950_v17, 1 }
 0x1ed   : > { %v1962_v53 = vrot.slane %v1945_v0, 4  ;;  %v1975_v4 = vmul.f32 %v1945_v0, %v1945_v0  ;;  %v1969_v52 = vrot.slane %v1946_v1, 4  ;;  %v1976_v5 = vmul.f32 %v1946_v1, %v1946_v1 }
 0x1ee   : > { %v1938_v63 = vld [vmem:[#allocation2 + $0x8] sm:$0xff]  ;;  %v2003_v6 = vpack.c.bf16 %v1946_v1, %v1945_v0 }
 0x1ef   : > { %v1948_v2 = vadd.f32 %v1942_v61, %v1938_v63  ;;  %v1963_v8 = vadd.f32 %v1962_v53, %v1945_v0  ;;  %v1980_v9 = vrot.slane %v1975_v4, 4  ;;  %v1970_v11 = vadd.f32 %v1969_v52, %v1946_v1 }
 0x1f0   : > { %v1987_v12 = vrot.slane %v1976_v5, 4  ;;  %2005 = vst [vmem:[%s3522_s0] sm:$0xff] %v2003_v6 }
 0x1f1   : > { %v2004_v7 = vpack.c.bf16 %v1948_v2, %v1947_v48  ;;  %v1964_v13 = vrot.slane %v1963_v8, 2  ;;  %v1981_v14 = vadd.f32 %v1980_v9, %v1975_v4  ;;  %v1971_v15 = vrot.slane %v1970_v11, 2 }
 0x1f2   : > { %v1988_v16 = vadd.f32 %v1987_v12, %v1976_v5 }
 0x1f3   : > { %2006 = vst [vmem:[%s3522_s0 + $0x8] sm:$0xff] %v2004_v7  ;;  %v1965_v18 = vadd.f32 %v1964_v13, %v1963_v8  ;;  %v1982_v20 = vrot.slane %v1981_v14, 2  ;;  %v1972_v21 = vadd.f32 %v1971_v15, %v1970_v11 }
 0x1f4   : > { %v1989_v22 = vrot.slane %v1988_v16, 2 }
 0x1f5   : > { %v1966_v23 = vrot.slane %v1965_v18, 1  ;;  %v1983_v24 = vadd.f32 %v1982_v20, %v1981_v14  ;;  %v1973_v25 = vrot.slane %v1972_v21, 1 }
 0x1f6   : > { %v1990_v27 = vadd.f32 %v1989_v22, %v1988_v16 }
 0x1f7   : > { %v1967_v28 = vadd.f32 %v1966_v23, %v1965_v18  ;;  %v1984_v29 = vrot.slane %v1983_v24, 1  ;;  %v1974_v30 = vadd.f32 %v1973_v25, %v1972_v21 }
 0x1f8   : > { %v1991_v31 = vrot.slane %v1990_v27, 1 }
 0x1f9   : > { %v1985_v32 = vadd.f32 %v1984_v29, %v1983_v24  ;;  %v1994_v33 = vsel %vm1993_vm0, %v1967_v28, 0.0  ;;  %v1995_v35 = vsel %vm1993_vm0, %v1974_v30, 0.0 }
 0x1fa   : > { %v1992_v34 = vadd.f32 %v1991_v31, %v1990_v27 }
 0x1fb   : > { %v1997_v36 = vsel %vm1996_vm1, %v1985_v32, 0.0 }
 0x1fc   : > { %v1998_v37 = vsel %vm1996_vm1, %v1992_v34, 0.0  ;;  %v1999_v38 = vadd.f32 %v1997_v36, %v1994_v33 }
 0x1fd   : > { %v2000_v39 = vadd.f32 %v1998_v37, %v1995_v35 }
 0x1fe   : > { %2001 = vst [vmem:[%s3516_s19] sm:$0xff] %v1999_v38 }
 0x1ff   : > { %2002 = vst [vmem:[%s3516_s19 + $0x8] sm:$0xff] %v2000_v39 }
 0x200 PF: > { %2022 = sbr.rel (!%p3220_p12) target bundleno = 517 (0x205), region = 105  ;;  %s2922_s21 = sshll.u32 (%p3220_p12), %s3086_s22, 3  ;;  %v2059_v40 = vld [vmem:[%s3522_s0] sm:$0xff] (%p3220_p12)  ;;  %v2061_v41 = vld [vmem:[%s3522_s0 + $0x8] sm:$0xff] (%p3220_p12) }
 0x201   : > { %s2028_s5 = scalar_lea.vmem (%p3220_p12), %s3883_s3, %s2922_s21 }
 0x202   : > { %2060 = vst [vmem:[%s2028_s5] sm:$0xff] (%p3220_p12), %v2059_v40 }
 0x203   : > { %2062 = vst [vmem:[%s2028_s5 + $0x10] sm:$0xff] (%p3220_p12), %v2061_v41 }
 0x205 PF: > { %s15_s25 = sadd.s32 1, %s3098_s25   ;;  %s3896_s14 = sld [smem:[#allocation6_spill]] }
 0x206   : > { %p12_p6 = scmp.ge.s32.totalorder %s15_s25, 10   ;;  %s3897_s29 = sld [smem:[#allocation7_spill]] }
 0x207   : > { %s3898_s15 = smov %s3062_s16  ;;  %s3899_s16 = smov %s3218_s13 }
 0x208   : > { %s3900_s17 = smov %s3070_s18  ;;  %s3901_s18 = smov %s3215_s12 }
 0x209   : > { %s3902_s19 = smov %s3078_s20  ;;  %s3903_s20 = smov %s3201_s7 }
 0x20a   : > { %s3904_s21 = smov %s3090_s23  ;;  %s3905_s22 = smov %s3094_s24 }
 0x20b   : > { %s3906_s23 = smov %s3896_s14  ;;  %14 = sbr.rel (!%p12_p6) target bundleno = 9 (0x9), region = 197 }
 0x20c   : > { %s3907_s24 = smov %s3897_s29 }

// kernel: discriminator_forward.15
= control target key start
LH: loop header
LB: loop body
LE: loop exit
PB: predicated region body
PF: predicated region fallthrough
CT: control target
= control target key end

     0   :  { %s1577_s12 = smov 0   ;;  %s1579_s13 = smov 0   ;;  %s1737_s0 = inlined_call_operand.vmem [shape: bf16[16,8192], index: 0, kind: input, shape index: {}]   ;;  %s1738_s1 = inlined_call_operand.vmem [shape: bf16[8192,128], index: 1, kind: input, shape index: {}]   ;;  %s1739_s2 = inlined_call_operand.vmem [shape: f32[1,128], index: 2, kind: input, shape index: {}]   ;;  %s1740_s3 = inlined_call_operand.vmem [shape: f32[16,128], index: 3, kind: output, shape index: {}]  }
   0x1   :  { %s1581_s14 = smov 0   ;;  %s1583_s15 = smov 0  }
   0x2   :  { %s1585_s16 = smov 0  }
   0x3 LB: > { %s25_s17 = sadd.s32 1, %s1550_s15  ;;  %p48_p1 = scmp.ne.s32.totalorder %s1542_s13, %s1538_s12  ;;  %s1554_s16 = sphi %s1585_s16, %s13_s16   ;;  %s1550_s15 = sphi %s1583_s15, %s1744_s15   ;;  %s1546_s14 = sphi %s1581_s14, %s1743_s14   ;;  %s1542_s13 = sphi %s1579_s13, %s1742_s13   ;;  %s1538_s12 = sphi %s1577_s12, %s1741_s12  }
   0x4   : > { %p26_p0 = scmp.ge.s32.totalorder %s25_s17, 8  ;;  %p49_p2 = scmp.eq.s32.totalorder %s1554_s16, 0 }
   0x5   : > { %s41_s19 = sadd.s32 1, %s1542_s13  ;;  %p1099_p5 = scmp.ge.s32.totalorder %s1554_s16, 8 }
   0x6   : > { %s1746_s17 = smov (%p26_p0, %s25_s17), 0  ;;  %p50_p3 = por %p49_p2, %p48_p1 }
   0x7   : > { %s37_s18 = ssub.s32 %s1550_s15, %s1746_s17  ;;  %162 = sbr.rel (%p1099_p5) target bundleno = 24 (0x18), region = 20 }
   0x8   : > { %p39_p4 = scmp.eq.s32.totalorder %s37_s18, 0 }
   0xa   : > { %s1612_s20 = scalar_select %p39_p4, %s1542_s13, %s41_s19  }
   0xc   : > { %165 = sbr.rel (!%p50_p3) target bundleno = 24 (0x18), region = 24  ;;  %s167_s21 = sand.u32 (%p50_p3), 1, %s1542_s13  }
   0xd   : > { %s1401_s22 = sshll.u32 (%p50_p3), %s1550_s15, 5  ;;  %s1100_s23 = sshll.u32 (%p50_p3), %s167_s21, 6 }
   0xe   : > { %s175_s26 = scalar_lea.vmem (%p50_p3), %s1737_s0, %s1401_s22  ;;  %s169_s27 = scalar_lea.vmem (%p50_p3), [#allocation3], %s1100_s23 }
   0xf   : > { %v188_v0 = vld [vmem:[%s175_s26] sm:$0xff] (%p50_p3)  ;;  %v190_v1 = vld [vmem:[%s175_s26 + $0x8] sm:$0xff] (%p50_p3)  ;;  %v192_v2 = vld [vmem:[%s175_s26 + $0x10] sm:$0xff] (%p50_p3) }
  0x10   : > { %189 = vst [vmem:[%s169_s27] sm:$0xff] (%p50_p3), %v188_v0  ;;  %v194_v3 = vld [vmem:[%s175_s26 + $0x18] sm:$0xff] (%p50_p3)  ;;  %v196_v4 = vld [vmem:[%s175_s26 + $0x100] sm:$0xff] (%p50_p3)  ;;  %v198_v5 = vld [vmem:[%s175_s26 + $0x108] sm:$0xff] (%p50_p3) }
  0x11   : > { %191 = vst [vmem:[%s169_s27 + $0x8] sm:$0xff] %v190_v1  ;;  %v200_v6 = vld [vmem:[%s175_s26 + $0x110] sm:$0xff]  ;;  %v202_v7 = vld [vmem:[%s175_s26 + $0x118] sm:$0xff] }
  0x12   : > { %193 = vst [vmem:[%s169_s27 + $0x10] sm:$0xff] %v192_v2 }
  0x13   : > { %195 = vst [vmem:[%s169_s27 + $0x18] sm:$0xff] %v194_v3 }
  0x14   : > { %197 = vst [vmem:[%s169_s27 + $0x20] sm:$0xff] %v196_v4 }
  0x15   : > { %199 = vst [vmem:[%s169_s27 + $0x28] sm:$0xff] %v198_v5 }
  0x16   : > { %201 = vst [vmem:[%s169_s27 + $0x30] sm:$0xff] %v200_v6 }
  0x17   : > { %203 = vst [vmem:[%s169_s27 + $0x38] sm:$0xff] %v202_v7 }
  0x18 PF: > { %p1103_p6 = scmp.ge.s32.totalorder %s1554_s16, 1  ;;  %p220_p7 = scmp.lt.s32.totalorder %s1554_s16, 9 }
  0x1a   : > { %p221_p8 = pnand %p1103_p6, %p220_p7 }
  0x1b   : > { %s227_s28 = sand.u32 (!%p221_p8), 1, %s1538_s12   ;;  %s1105_s29 = sshll.u32 (!%p221_p8), %s1546_s14, 7 }
  0x1c   : > { %224 = sbr.rel (%p221_p8) target bundleno = 264 (0x108), region = 51  ;;  %s1104_s30 = sshll.u32 (!%p221_p8), %s227_s28, 6 }
  0x1d   : > { %p267_p9 = scmp.lt.s32.totalorder (!%p221_p8), %s1105_s29, 1023  ;;  %s1629_s8 = scalar_lea.vmem (!%p221_p8), [#allocation3], %s1104_s30 }
  0x1e   : > { %p1107_p10 = scmp.ne.s32.totalorder (!%p221_p8), %s1546_s14, 0 }
  0x21   : > { %s1748_s29 = smov (!%p267_p9, %s1105_s29), 1023  ;;  %290 = sbr.rel (%p1107_p10) target bundleno = 41 (0x29), region = 59 }
  0x22   : > { %s1106_s4 = sshll.u32 %s1748_s29, 2 }
  0x23   : > { %s1627_s7 = scalar_lea.vmem %s1738_s1, %s1106_s4 }
  0x26   : > { %v1556_v8 = vmov 0.0  }
  0x27   : > { %291 = vst [vmem:[#allocation2] sm:$0xff] %v1556_v8 }
  0x28   : > { %292 = vst [vmem:[#allocation2 + $0x8] sm:$0xff] %v1556_v8 }
  0x29 PF: > { %v1417_v9 = vld [vmem:[%s1627_s7 + $0x38] sm:$0xff]  ;;  %v1416_v13 = vld [vmem:[%s1627_s7 + $0x30] sm:$0xff]  ;;  %v1415_v17 = vld [vmem:[%s1627_s7 + $0x28] sm:$0xff]  ;;  %p1396_p11 = scmp.ne.s32.totalorder %s1546_s14, 7 }
  0x2a   : > { %v1425_v10 = vld [vmem:[%s1627_s7 + $0x78] sm:$0xff]  ;;  %855 = vmatpush.bf16.msra.mxu0 %v1417_v9  ;;  %v1424_v14 = vld [vmem:[%s1627_s7 + $0x70] sm:$0xff]  ;;  %v1423_v18 = vld [vmem:[%s1627_s7 + $0x68] sm:$0xff] }
  0x2b   : > { %v1433_v11 = vld [vmem:[%s1627_s7 + $0xb8] sm:$0xff]  ;;  %869 = vmatpush.bf16.msra.mxu1 %v1425_v10  ;;  %v1432_v15 = vld [vmem:[%s1627_s7 + $0xb0] sm:$0xff]  ;;  %v1431_v19 = vld [vmem:[%s1627_s7 + $0xa8] sm:$0xff] }
  0x2c   : > { %v1441_v12 = vld [vmem:[%s1627_s7 + $0xf8] sm:$0xff]  ;;  %883 = vmatpush.bf16.msra.mxu2 %v1433_v11  ;;  %v1440_v16 = vld [vmem:[%s1627_s7 + $0xf0] sm:$0xff]  ;;  %v1439_v20 = vld [vmem:[%s1627_s7 + $0xe8] sm:$0xff] }
  0x2d   : > { %897 = vmatpush.bf16.msra.mxu3 %v1441_v12  ;;  %v1414_v21 = vld [vmem:[%s1627_s7 + $0x20] sm:$0xff]  ;;  %v1413_v25 = vld [vmem:[%s1627_s7 + $0x18] sm:$0xff]  ;;  %v1412_v29 = vld [vmem:[%s1627_s7 + $0x10] sm:$0xff] }
  0x2e   : > { %856 = vmatpush.bf16.msra.mxu0 %v1416_v13  ;;  %v1422_v22 = vld [vmem:[%s1627_s7 + $0x60] sm:$0xff]  ;;  %v1421_v26 = vld [vmem:[%s1627_s7 + $0x58] sm:$0xff]  ;;  %v1420_v30 = vld [vmem:[%s1627_s7 + $0x50] sm:$0xff] }
  0x2f   : > { %870 = vmatpush.bf16.msra.mxu1 %v1424_v14  ;;  %v1430_v23 = vld [vmem:[%s1627_s7 + $0xa0] sm:$0xff]  ;;  %v1429_v27 = vld [vmem:[%s1627_s7 + $0x98] sm:$0xff]  ;;  %v1428_v31 = vld [vmem:[%s1627_s7 + $0x90] sm:$0xff] }
  0x30   : > { %884 = vmatpush.bf16.msra.mxu2 %v1432_v15  ;;  %v1438_v24 = vld [vmem:[%s1627_s7 + $0xe0] sm:$0xff]  ;;  %v1437_v28 = vld [vmem:[%s1627_s7 + $0xd8] sm:$0xff]  ;;  %v1436_v32 = vld [vmem:[%s1627_s7 + $0xd0] sm:$0xff] }
  0x31   : > { %898 = vmatpush.bf16.msra.mxu3 %v1440_v16  ;;  %v1411_v33 = vld [vmem:[%s1627_s7 + $0x8] sm:$0xff]  ;;  %v1410_v37 = vld [vmem:[%s1627_s7] sm:$0xff]  ;;  %v1449_v41 = vld [vmem:[%s1627_s7 + $0x138] sm:$0xff] }
  0x32   : > { %857 = vmatpush.bf16.msra.mxu0 %v1415_v17  ;;  %v1419_v34 = vld [vmem:[%s1627_s7 + $0x48] sm:$0xff]  ;;  %v1418_v38 = vld [vmem:[%s1627_s7 + $0x40] sm:$0xff]  ;;  %v1457_v42 = vld [vmem:[%s1627_s7 + $0x178] sm:$0xff] }
  0x33   : > { %871 = vmatpush.bf16.msra.mxu1 %v1423_v18  ;;  %v1427_v35 = vld [vmem:[%s1627_s7 + $0x88] sm:$0xff]  ;;  %v1426_v39 = vld [vmem:[%s1627_s7 + $0x80] sm:$0xff]  ;;  %v1118_v43 = vld [vmem:[%s1629_s8 + $0x8] sm:$0xf] }
  0x34   : > { %885 = vmatpush.bf16.msra.mxu2 %v1431_v19  ;;  %v1435_v36 = vld [vmem:[%s1627_s7 + $0xc8] sm:$0xff]  ;;  %v1434_v40 = vld [vmem:[%s1627_s7 + $0xc0] sm:$0xff]  ;;  %v1407_v44 = vld [vmem:[%s1629_s8 + $0x24] sm:$0xf0] }
  0x35   : > { %899 = vmatpush.bf16.msra.mxu3 %v1439_v20  ;;  %v1403_v45 = vld [vmem:[%s1629_s8 + $0xc] sm:$0xf]  ;;  %v1110_v47 = vld [vmem:[%s1629_s8] sm:$0xf]  ;;  %v1402_v49 = vld [vmem:[%s1629_s8 + $0x4] sm:$0xf]  ;;  %v1119_v53 = vor.u32 %v1407_v44, %v1118_v43 }
  0x36   : > { %858 = vmatpush.bf16.msra.mxu0 %v1414_v21  ;;  %v1120_v46 = vld [vmem:[%s1629_s8 + $0x28] sm:$0xf0]  ;;  %v1406_v48 = vld [vmem:[%s1629_s8 + $0x1c] sm:$0xf0]  ;;  %v1112_v50 = vld [vmem:[%s1629_s8 + $0x20] sm:$0xf0] }
  0x37   : > { %872 = vmatpush.bf16.msra.mxu1 %v1422_v22  ;;  %v1465_v51 = vld [vmem:[%s1627_s7 + $0x1b8] sm:$0xff]  ;;  %v1123_v54 = vor.u32 %v1403_v45, %v1120_v46  ;;  %v1111_v55 = vor.u32 %v1406_v48, %v1110_v47  ;;  %v1115_v56 = vor.u32 %v1402_v49, %v1112_v50  ;;  %v1448_v57 = vld [vmem:[%s1627_s7 + $0x130] sm:$0xff]  ;;  %v1447_v61 = vld [vmem:[%s1627_s7 + $0x128] sm:$0xff] }
  0x38   : > { %886 = vmatpush.bf16.msra.mxu2 %v1430_v23  ;;  %v1473_v52 = vld [vmem:[%s1627_s7 + $0x1f8] sm:$0xff]  ;;  %v1456_v58 = vld [vmem:[%s1627_s7 + $0x170] sm:$0xff]  ;;  %v1455_v62 = vld [vmem:[%s1627_s7 + $0x168] sm:$0xff] }
  0x39   : > { %900 = vmatpush.bf16.msra.mxu3 %v1438_v24  ;;  %v1464_v59 = vld [vmem:[%s1627_s7 + $0x1b0] sm:$0xff]  ;;  %v1463_v63 = vld [vmem:[%s1627_s7 + $0x1a8] sm:$0xff]  ;;  %v1446_v1 = vld [vmem:[%s1627_s7 + $0x120] sm:$0xff] }
  0x3a   : > { %859 = vmatpush.bf16.msra.mxu0 %v1413_v25  ;;  %v1472_v60 = vld [vmem:[%s1627_s7 + $0x1f0] sm:$0xff]  ;;  %v1471_v0 = vld [vmem:[%s1627_s7 + $0x1e8] sm:$0xff]  ;;  %v1454_v2 = vld [vmem:[%s1627_s7 + $0x160] sm:$0xff] }
  0x3b   : > { %873 = vmatpush.bf16.msra.mxu1 %v1421_v26  ;;  %v1462_v3 = vld [vmem:[%s1627_s7 + $0x1a0] sm:$0xff]  ;;  %v1445_v5 = vld [vmem:[%s1627_s7 + $0x118] sm:$0xff]  ;;  %v1444_v9 = vld [vmem:[%s1627_s7 + $0x110] sm:$0xff] }
  0x3c   : > { %887 = vmatpush.bf16.msra.mxu2 %v1429_v27  ;;  %v1470_v4 = vld [vmem:[%s1627_s7 + $0x1e0] sm:$0xff]  ;;  %v1453_v6 = vld [vmem:[%s1627_s7 + $0x158] sm:$0xff]  ;;  %v1452_v10 = vld [vmem:[%s1627_s7 + $0x150] sm:$0xff] }
  0x3d   : > { %901 = vmatpush.bf16.msra.mxu3 %v1437_v28  ;;  %v1461_v7 = vld [vmem:[%s1627_s7 + $0x198] sm:$0xff]  ;;  %v1460_v11 = vld [vmem:[%s1627_s7 + $0x190] sm:$0xff]  ;;  %v1443_v13 = vld [vmem:[%s1627_s7 + $0x108] sm:$0xff] }
  0x3e   : > { %860 = vmatpush.bf16.msra.mxu0 %v1412_v29  ;;  %v1469_v8 = vld [vmem:[%s1627_s7 + $0x1d8] sm:$0xff]  ;;  %v1468_v12 = vld [vmem:[%s1627_s7 + $0x1d0] sm:$0xff]  ;;  %v1451_v14 = vld [vmem:[%s1627_s7 + $0x148] sm:$0xff] }
  0x3f   : > { %874 = vmatpush.bf16.msra.mxu1 %v1420_v30  ;;  %v1459_v15 = vld [vmem:[%s1627_s7 + $0x188] sm:$0xff]  ;;  %v1442_v17 = vld [vmem:[%s1627_s7 + $0x100] sm:$0xff] }
  0x40   : > { %888 = vmatpush.bf16.msra.mxu2 %v1428_v31  ;;  %v1467_v16 = vld [vmem:[%s1627_s7 + $0x1c8] sm:$0xff]  ;;  %v1450_v18 = vld [vmem:[%s1627_s7 + $0x140] sm:$0xff] }
  0x41   : > { %902 = vmatpush.bf16.msra.mxu3 %v1436_v32  ;;  %v1458_v19 = vld [vmem:[%s1627_s7 + $0x180] sm:$0xff]  ;;  %v1134_v25 = vld [vmem:[%s1629_s8 + $0x18] sm:$0xf]  ;;  %v1405_v27 = vld [vmem:[%s1629_s8 + $0x1c] sm:$0xf] }
  0x42   : > { %861 = vmatpush.bf16.msra.mxu0 %v1411_v33  ;;  %v1466_v20 = vld [vmem:[%s1627_s7 + $0x1c0] sm:$0xff]  ;;  %v1409_v26 = vld [vmem:[%s1629_s8 + $0x34] sm:$0xf0]  ;;  %v1136_v28 = vld [vmem:[%s1629_s8 + $0x38] sm:$0xf0] }
  0x43   : > { %875 = vmatpush.bf16.msra.mxu1 %v1419_v34  ;;  %v1126_v21 = vld [vmem:[%s1629_s8 + $0x10] sm:$0xf]  ;;  %v1404_v23 = vld [vmem:[%s1629_s8 + $0x14] sm:$0xf]  ;;  %v1135_v31 = vor.u32 %v1409_v26, %v1134_v25  ;;  %v1139_v32 = vor.u32 %v1405_v27, %v1136_v28 }
  0x44   : > { %889 = vmatpush.bf16.msra.mxu2 %v1427_v35  ;;  %v1408_v22 = vld [vmem:[%s1629_s8 + $0x2c] sm:$0xf0]  ;;  %v1128_v24 = vld [vmem:[%s1629_s8 + $0x30] sm:$0xf0] }
  0x45   : > { %903 = vmatpush.bf16.msra.mxu3 %v1435_v36  ;;  %v1127_v29 = vor.u32 %v1408_v22, %v1126_v21  ;;  %v1131_v30 = vor.u32 %v1404_v23, %v1128_v24 }
  0x46   : > { %862 = vmatpush.bf16.msra.mxu0 %v1410_v37 }
  0x47   : > { %876 = vmatpush.bf16.msra.mxu1 %v1418_v38 }
  0x48   : > { %890 = vmatpush.bf16.msra.mxu2 %v1426_v39 }
  0x49   : > { %904 = vmatpush.bf16.msra.mxu3 %v1434_v40  ;;  %863 = vmatmul.bf16.vlgmr.msra.gmra.mxu0 %v1111_v55  ;;  %v293_v55 = vld [vmem:[#allocation2] sm:$0xff] }
  0x4a   : > { %911 = vmatpush.bf16.msrb.mxu0 %v1449_v41  ;;  %877 = vmatmul.bf16.vlgmr.msra.gmra.mxu1 %v1115_v56 }
  0x4b   : > { %925 = vmatpush.bf16.msrb.mxu1 %v1457_v42  ;;  %891 = vmatmul.bf16.vlgmr.msra.gmra.mxu2 %v1119_v53 }
  0x4c   : > { %939 = vmatpush.bf16.msrb.mxu2 %v1465_v51  ;;  %905 = vmatmul.bf16.vlgmr.msra.gmra.mxu3 %v1123_v54 }
  0x4d   : > { %953 = vmatpush.bf16.msrb.mxu3 %v1473_v52 }
  0x4e   : > { %912 = vmatpush.bf16.msrb.mxu0 %v1448_v57 }
  0x4f   : > { %926 = vmatpush.bf16.msrb.mxu1 %v1456_v58 }
  0x50   : > { %940 = vmatpush.bf16.msrb.mxu2 %v1464_v59 }
  0x51   : > { %954 = vmatpush.bf16.msrb.mxu3 %v1472_v60 }
  0x52   : > { %913 = vmatpush.bf16.msrb.mxu0 %v1447_v61 }
  0x53   : > { %927 = vmatpush.bf16.msrb.mxu1 %v1455_v62 }
  0x54   : > { %941 = vmatpush.bf16.msrb.mxu2 %v1463_v63  ;;  %v294_v63 = vld [vmem:[#allocation2 + $0x8] sm:$0xff] }
  0x55   : > { %955 = vmatpush.bf16.msrb.mxu3 %v1471_v0 }
  0x56   : > { %914 = vmatpush.bf16.msrb.mxu0 %v1446_v1 }
  0x57   : > { %928 = vmatpush.bf16.msrb.mxu1 %v1454_v2 }
  0x58   : > { %942 = vmatpush.bf16.msrb.mxu2 %v1462_v3 }
  0x59   : > { %956 = vmatpush.bf16.msrb.mxu3 %v1470_v4 }
  0x5a   : > { %915 = vmatpush.bf16.msrb.mxu0 %v1445_v5 }
  0x5b   : > { %929 = vmatpush.bf16.msrb.mxu1 %v1453_v6 }
  0x5c   : > { %943 = vmatpush.bf16.msrb.mxu2 %v1461_v7 }
  0x5d   : > { %957 = vmatpush.bf16.msrb.mxu3 %v1469_v8 }
  0x5e   : > { %916 = vmatpush.bf16.msrb.mxu0 %v1444_v9 }
  0x5f   : > { %930 = vmatpush.bf16.msrb.mxu1 %v1452_v10 }
  0x60   : > { %944 = vmatpush.bf16.msrb.mxu2 %v1460_v11 }
  0x61   : > { %958 = vmatpush.bf16.msrb.mxu3 %v1468_v12 }
  0x62   : > { %917 = vmatpush.bf16.msrb.mxu0 %v1443_v13 }
  0x63   : > { %931 = vmatpush.bf16.msrb.mxu1 %v1451_v14 }
  0x64   : > { %945 = vmatpush.bf16.msrb.mxu2 %v1459_v15 }
  0x65   : > { %959 = vmatpush.bf16.msrb.mxu3 %v1467_v16 }
  0x66   : > { %918 = vmatpush.bf16.msrb.mxu0 %v1442_v17 }
  0x67   : > { %932 = vmatpush.bf16.msrb.mxu1 %v1450_v18 }
  0x68   : > { %946 = vmatpush.bf16.msrb.mxu2 %v1458_v19 }
  0x69   : > { %960 = vmatpush.bf16.msrb.mxu3 %v1466_v20  ;;  %919 = vmatmul.bf16.vlgmr.msrb.gmra.mxu0 %v1127_v29 }
  0x6a   : > { %933 = vmatmul.bf16.vlgmr.msrb.gmra.mxu1 %v1131_v30 }
  0x6b   : > { %947 = vmatmul.bf16.vlgmr.msrb.gmra.mxu2 %v1135_v31 }
  0x6c   : > { %961 = vmatmul.bf16.vlgmr.msrb.gmra.mxu3 %v1139_v32 }
  0xc6   : > { %v864_v33 = vpop.f32.mrf.mxu0 }
  0xc7   : > { %v878_v34 = vpop.f32.mrf.mxu1 }
  0xc8   : > { %v879_v37 = vadd.f32 %v878_v34, %v864_v33 }
  0xce   : > { %v892_v35 = vpop.f32.mrf.mxu2  ;;  %v866_v38 = vpop.f32.mrf.mxu0 }
  0xcf   : > { %v906_v36 = vpop.f32.mrf.mxu3  ;;  %v880_v39 = vpop.f32.mrf.mxu1  ;;  %v893_v40 = vadd.f32 %v892_v35, %v879_v37 }
  0xd0   : > { %v881_v44 = vadd.f32 %v880_v39, %v866_v38 }
  0xd1   : > { %v907_v43 = vadd.f32 %v906_v36, %v893_v40 }
  0xd6   : > { %v894_v41 = vpop.f32.mrf.mxu2 }
  0xd7   : > { %v908_v42 = vpop.f32.mrf.mxu3  ;;  %v895_v48 = vadd.f32 %v894_v41, %v881_v44 }
  0xd9   : > { %v909_v52 = vadd.f32 %v908_v42, %v895_v48 }
  0xe6   : > { %v920_v45 = vpop.f32.mrf.mxu0 }
  0xe7   : > { %v921_v46 = vadd.f32 %v920_v45, %v907_v43  ;;  %v934_v47 = vpop.f32.mrf.mxu1 }
  0xe9   : > { %v935_v49 = vadd.f32 %v934_v47, %v921_v46 }
  0xee   : > { %v948_v50 = vpop.f32.mrf.mxu2  ;;  %v922_v54 = vpop.f32.mrf.mxu0 }
  0xef   : > { %v962_v51 = vpop.f32.mrf.mxu3  ;;  %v949_v53 = vadd.f32 %v948_v50, %v935_v49  ;;  %v923_v57 = vadd.f32 %v922_v54, %v909_v52  ;;  %v936_v59 = vpop.f32.mrf.mxu1 }
  0xf1   : > { %v963_v56 = vadd.f32 %v962_v51, %v949_v53  ;;  %v937_v60 = vadd.f32 %v936_v59, %v923_v57 }
  0xf3   : > { %v967_v58 = vadd.f32 %v963_v56, %v293_v55 }
  0xf5   : > { %969 = vst [vmem:[#allocation2] sm:$0xff] %v967_v58 }
  0xf6   : > { %v950_v61 = vpop.f32.mrf.mxu2 }
  0xf7   : > { %v951_v62 = vadd.f32 %v950_v61, %v937_v60  ;;  %v964_v0 = vpop.f32.mrf.mxu3 }
  0xf9   : > { %v965_v1 = vadd.f32 %v964_v0, %v951_v62  ;;  %974 = sbr.rel (%p1396_p11) target bundleno = 264 (0x108), region = 63 }
  0xfb   : > { %v968_v2 = vadd.f32 %v965_v1, %v294_v63 }
  0xfd   : > { %970 = vst [vmem:[#allocation2 + $0x8] sm:$0xff] %v968_v2 }
  0xfe   : > { %v975_v3 = vld [vmem:[#allocation2] sm:$0xff] }
  0xff   : > { %v1515_v4 = vld [vmem:[%s1739_s2] ss:$0 sm:$0xff] }
 0x100   : > { %v981_v6 = vadd.f32 %v1515_v4, %v975_v3 }
 0x102   : > { %983 = vst [vmem:[%s1740_s3] sm:$0xff] %v981_v6 }
 0x104   : > { %v976_v5 = vld [vmem:[#allocation2 + $0x8] sm:$0xff] }
 0x105   : > { %v982_v7 = vadd.f32 %v1515_v4, %v976_v5 }
 0x107   : > { %984 = vst [vmem:[%s1740_s3 + $0x8] sm:$0xff] %v982_v7 }
 0x108 PF: > { %s13_s16 = sadd.s32 1, %s1554_s16   ;;  %s1741_s12 = smov %s1542_s13 }
 0x109   : > { %p10_p12 = scmp.ge.s32.totalorder %s13_s16, 10   ;;  %s1742_s13 = smov %s1612_s20 }
 0x10a   : > { %s1743_s14 = smov %s1550_s15  ;;  %s1744_s15 = smov %s1746_s17 }
 0x10b   :  { %12 = sbr.rel (!%p10_p12) target bundleno = 3 (0x3), region = 104 }

</bundles_post_ra>
